<compile_context>
chip_gen: v6e
topology: v6e:2x2x1
jax: 0.10.0
libtpu: 0.0.40
codegen_flags: <defaults>
</compile_context>

<pallas_src>
import jax
import jax.numpy as jnp
from jax.experimental import pallas as pl
from jax.experimental.pallas import tpu as pltpu


# --------------------------------- fused Model4 kernel ---------------------------------
def _model4_kernel(x_ref,
                   cw0, cb0, cw1, cb1, cw2, cb2, cw3, cb3,
                   fc1w_ref, fc1b_ref, fc2w_ref, fc2b_ref,
                   o_ref):
    """Whole Model4 forward in one kernel invocation (grid=(1,)).

    x_ref   : (B, Nframe, F)   activations, channels-last
    cwK     : (3, Cin, Cout)   conv tap weights (eval BatchNorm folded in)
    cbK     : (1, Cout)        conv bias (BatchNorm folded in)
    fc1w_ref: (L4, F, D1)      fc1 weight, factored over the (l, c) flatten
    fc1b_ref: (1, D1)
    fc2w_ref: (D1, Opad)       fc2 weight, zero-padded to a multiple of 128 lanes
    fc2b_ref: (1, Opad)
    o_ref   : (B, Opad)
    """
    B = x_ref.shape[0]
    L4 = fc1w_ref.shape[0]

    def conv_block(x, w_ref, b_ref):
        # Conv1d(k=3, padding='same', padding_mode='circular')  [BN folded]
        #   -> ReLU -> AvgPool1d(kernel_size=3, stride=1)        : (L, Cin) -> (L-2, Cout)
        L = x.shape[0]
        # Circular conv == matmuls against circularly shifted copies (no explicit pad).
        y = jnp.dot(jnp.roll(x, 1, axis=0), w_ref[0], preferred_element_type=jnp.float32)
        y = y + jnp.dot(x, w_ref[1], preferred_element_type=jnp.float32)
        y = y + jnp.dot(jnp.roll(x, -1, axis=0), w_ref[2], preferred_element_type=jnp.float32)
        y = jnp.maximum(y + b_ref[...], 0.0)
        return (y[0:L - 2, :] + y[1:L - 1, :] + y[2:L, :]) * (1.0 / 3.0)

    layers = ((cw0, cb0), (cw1, cb1), (cw2, cb2), (cw3, cb3))

    rows = []
    for bi in range(B):                                    # B is tiny -> fully unrolled
        xb = x_ref[bi]                                     # (Nframe, F)
        for wr, br in layers:
            xb = conv_block(xb, wr, br)                    # ends at (Nframe-8, F)
        # fc1 over the flattened (L4, F) activation; the weight is stored factored as
        # (L4, F, D1) so no in-kernel reshape of the activation is needed.
        acc = fc1b_ref[...]                                # (1, D1)
        for l in range(L4):
            acc = acc + jnp.dot(xb[l:l + 1, :], fc1w_ref[l],
                                preferred_element_type=jnp.float32)
        h = jnp.maximum(acc, 0.0)                          # ReLU (dropout = identity, eval)
        rows.append(jnp.dot(h, fc2w_ref[...], preferred_element_type=jnp.float32)
                    + fc2b_ref[...])                       # (1, Opad)
    o_ref[...] = jnp.concatenate(rows, axis=0)             # lane-dense (B, Opad) store


# ----------------------- host-side parameter prep (layout + BN fold) -------------------
def prepare_params(params, eps=1e-5):
    """Fold eval-mode BatchNorm into conv weights, convert PyTorch layouts to the
    channels-last kernel layouts, and pad fc2 to a lane-dense (multiple-of-128) width."""
    conv_w, conv_b = [], []
    for layer in params["conv"]:
        w = jnp.transpose(layer["w"], (2, 1, 0))            # (Cout,Cin,3) -> (3,Cin,Cout)
        s = layer["bn_gamma"] / jnp.sqrt(layer["bn_var"] + eps)
        t = layer["bn_beta"] - layer["bn_mean"] * s
        conv_w.append(w * s[None, None, :])
        conv_b.append((layer["b"] * s + t).reshape(1, -1))

    d1, fin = params["fc1_w"].shape                          # (D1, (Nframe-8)*F)
    fdim = params["conv"][-1]["w"].shape[0]                  # last conv out_channel == F
    l4 = fin // fdim
    # PyTorch flattens (B, C, L4) row-major (index = c*L4 + l); re-factor to (L4, F, D1).
    fc1w = params["fc1_w"].reshape(d1, fdim, l4).transpose(2, 1, 0)
    fc1b = params["fc1_b"].reshape(1, d1)

    out_dim = params["fc2_w"].shape[0]
    opad = ((out_dim + 127) // 128) * 128
    fc2w = jnp.pad(params["fc2_w"].T, ((0, 0), (0, opad - out_dim)))
    fc2b = jnp.pad(params["fc2_b"], (0, opad - out_dim)).reshape(1, opad)
    return conv_w, conv_b, fc1w, fc1b, fc2w, fc2b


# ------------------------------------ fused forward ------------------------------------
@jax.jit
def model4_forward(params, feature):
    """feature: (B, Nframe, feature_dim) float32 -> (B, out_dim) float32."""
    B, nframe, fdim = feature.shape
    out_dim = params["fc2_b"].shape[0]
    conv_w, conv_b, fc1w, fc1b, fc2w, fc2b = prepare_params(params)
    opad = fc2w.shape[1]

    in_specs = [pl.BlockSpec(feature.shape, lambda i: (0, 0, 0))]
    operands = [feature]
    for w, bb in zip(conv_w, conv_b):
        in_specs.append(pl.BlockSpec(w.shape, lambda i: (0, 0, 0)))
        in_specs.append(pl.BlockSpec(bb.shape, lambda i: (0, 0)))
        operands += [w, bb]
    in_specs += [
        pl.BlockSpec(fc1w.shape, lambda i: (0, 0, 0)),
        pl.BlockSpec(fc1b.shape, lambda i: (0, 0)),
        pl.BlockSpec(fc2w.shape, lambda i: (0, 0)),
        pl.BlockSpec(fc2b.shape, lambda i: (0, 0)),
    ]
    operands += [fc1w, fc1b, fc2w, fc2b]

    out_padded = pl.pallas_call(
        _model4_kernel,
        out_shape=jax.ShapeDtypeStruct((B, opad), jnp.float32),
        grid=(1,),
        in_specs=in_specs,
        out_specs=pl.BlockSpec((B, opad), lambda i: (0, 0)),
        compiler_params=pltpu.CompilerParams(dimension_semantics=("arbitrary",)),
    )(*operands)
    return out_padded[:, :out_dim]


# ------------------------------------ param init ---------------------------------------
def init_params(key, nframe, feature_dim, conv_hidden_dim, out_dim):
    """Raw parameters in PyTorch layouts (conv: (Cout,Cin,3); linear: (out,in))."""
    channels = [(feature_dim, feature_dim), (feature_dim, conv_hidden_dim),
                (conv_hidden_dim, conv_hidden_dim), (conv_hidden_dim, feature_dim)]
    keys = iter(jax.random.split(key, 6 * len(channels) + 4))
    conv = []
    for cin, cout in channels:
        scale = 1.0 / jnp.sqrt(3.0 * cin)
        conv.append(dict(
            w=scale * jax.random.normal(next(keys), (cout, cin, 3), jnp.float32),
            b=scale * jax.random.normal(next(keys), (cout,), jnp.float32),
            bn_gamma=1.0 + 0.1 * jax.random.normal(next(keys), (cout,), jnp.float32),
            bn_beta=0.1 * jax.random.normal(next(keys), (cout,), jnp.float32),
            bn_mean=0.1 * jax.random.normal(next(keys), (cout,), jnp.float32),
            bn_var=jnp.abs(1.0 + 0.1 * jax.random.normal(next(keys), (cout,), jnp.float32)),
        ))
    d_in = (nframe - 8) * feature_dim
    d1 = conv_hidden_dim * 10
    s1 = 1.0 / jnp.sqrt(float(d_in))
    s2 = 1.0 / jnp.sqrt(float(d1))
    return dict(
        conv=conv,
        fc1_w=s1 * jax.random.normal(next(keys), (d1, d_in), jnp.float32),
        fc1_b=s1 * jax.random.normal(next(keys), (d1,), jnp.float32),
        fc2_w=s2 * jax.random.normal(next(keys), (out_dim, d1), jnp.float32),
        fc2_b=s2 * jax.random.normal(next(keys), (out_dim,), jnp.float32),
    )


# -------------------------------- pure-JAX reference ------------------------------------
def model4_reference(params, feature, eps=1e-5):
    """Direct JAX re-implementation of Model4.forward (channels-first, unfused BN)."""
    x = jnp.transpose(feature, (0, 2, 1))                  # (B, C, L), like feature.transpose(-1,-2)
    for layer in params["conv"]:
        w, b = layer["w"], layer["b"]                      # (Cout, Cin, 3), (Cout,)
        L = x.shape[2]
        xp = jnp.concatenate([x[:, :, L - 1:L], x, x[:, :, 0:1]], axis=2)   # circular pad 1
        y = (jnp.einsum("bci,oc->boi", xp[:, :, 0:L], w[:, :, 0])
             + jnp.einsum("bci,oc->boi", xp[:, :, 1:L + 1], w[:, :, 1])
             + jnp.einsum("bci,oc->boi", xp[:, :, 2:L + 2], w[:, :, 2])
             + b[None, :, None])
        s = layer["bn_gamma"] / jnp.sqrt(layer["bn_var"] + eps)             # BatchNorm1d (eval)
        y = (y - layer["bn_mean"][None, :, None]) * s[None, :, None] + layer["bn_beta"][None, :, None]
        y = jnp.maximum(y, 0.0)                                             # ReLU
        x = (y[:, :, 0:L - 2] + y[:, :, 1:L - 1] + y[:, :, 2:L]) / 3.0      # AvgPool1d(3, stride=1)
    flat = x.reshape(x.shape[0], -1)                       # .view(-1, (Nframe-8)*feature_dim)
    h = jnp.maximum(flat @ params["fc1_w"].T + params["fc1_b"], 0.0)        # fc1 + ReLU
    return h @ params["fc2_w"].T + params["fc2_b"]         # dropout == identity (eval)


if __name__ == "__main__":
    B = 2
    nframe = 24            # must be > 8: four blocks each shrink L by 2
    feature_dim = 32
    conv_hidden_dim = 64
    out_dim = 115

    key = jax.random.PRNGKey(0)
    pkey, xkey = jax.random.split(key)
    params = init_params(pkey, nframe, feature_dim, conv_hidden_dim, out_dim)
    feature = jax.random.normal(xkey, (B, nframe, feature_dim), jnp.float32)

    out = model4_forward(params, feature)
    out = jax.block_until_ready(out)

    ref = model4_reference(params, feature)
    assert out.shape == (B, out_dim), out.shape
    max_err = float(jnp.max(jnp.abs(out - ref)))
    assert jnp.allclose(out, ref, atol=2e-4, rtol=2e-4), f"mismatch vs reference (max err {max_err})"

    print("KERNEL_OK")
</pallas_src>

<mosaic_0001>
module attributes {stable_mosaic.version = 11 : i64} {
  func.func @_model4_kernel(%arg0: i32, %arg1: memref<2x24x32xf32, #tpu.memory_space<vmem>>, %arg2: memref<3x32x32xf32, #tpu.memory_space<vmem>>, %arg3: memref<1x32xf32, #tpu.memory_space<vmem>>, %arg4: memref<3x32x64xf32, #tpu.memory_space<vmem>>, %arg5: memref<1x64xf32, #tpu.memory_space<vmem>>, %arg6: memref<3x64x64xf32, #tpu.memory_space<vmem>>, %arg7: memref<1x64xf32, #tpu.memory_space<vmem>>, %arg8: memref<3x64x32xf32, #tpu.memory_space<vmem>>, %arg9: memref<1x32xf32, #tpu.memory_space<vmem>>, %arg10: memref<16x32x640xf32, #tpu.memory_space<vmem>>, %arg11: memref<1x640xf32, #tpu.memory_space<vmem>>, %arg12: memref<640x128xf32, #tpu.memory_space<vmem>>, %arg13: memref<1x128xf32, #tpu.memory_space<vmem>>, %arg14: memref<2x128xf32, #tpu.memory_space<vmem>>) attributes {dimension_semantics = [#tpu.dimension_semantics<arbitrary>], iteration_bounds = array<i64: 1>, scalar_prefetch = 0 : i64, scratch_operands = 0 : i64, tpu.core_type = #tpu.core_type<tc>, window_params = [{pipeline_mode = #tpu.pipeline_mode<synchronous>, transform_indices = @transform_0, window_bounds = array<i64: 2, 24, 32>}, {pipeline_mode = #tpu.pipeline_mode<synchronous>, transform_indices = @transform_1, window_bounds = array<i64: 3, 32, 32>}, {pipeline_mode = #tpu.pipeline_mode<synchronous>, transform_indices = @transform_2, window_bounds = array<i64: 1, 32>}, {pipeline_mode = #tpu.pipeline_mode<synchronous>, transform_indices = @transform_3, window_bounds = array<i64: 3, 32, 64>}, {pipeline_mode = #tpu.pipeline_mode<synchronous>, transform_indices = @transform_4, window_bounds = array<i64: 1, 64>}, {pipeline_mode = #tpu.pipeline_mode<synchronous>, transform_indices = @transform_5, window_bounds = array<i64: 3, 64, 64>}, {pipeline_mode = #tpu.pipeline_mode<synchronous>, transform_indices = @transform_6, window_bounds = array<i64: 1, 64>}, {pipeline_mode = #tpu.pipeline_mode<synchronous>, transform_indices = @transform_7, window_bounds = array<i64: 3, 64, 32>}, {pipeline_mode = #tpu.pipeline_mode<synchronous>, transform_indices = @transform_8, window_bounds = array<i64: 1, 32>}, {pipeline_mode = #tpu.pipeline_mode<synchronous>, transform_indices = @transform_9, window_bounds = array<i64: 16, 32, 640>}, {pipeline_mode = #tpu.pipeline_mode<synchronous>, transform_indices = @transform_10, window_bounds = array<i64: 1, 640>}, {pipeline_mode = #tpu.pipeline_mode<synchronous>, transform_indices = @transform_11, window_bounds = array<i64: 640, 128>}, {pipeline_mode = #tpu.pipeline_mode<synchronous>, transform_indices = @transform_12, window_bounds = array<i64: 1, 128>}, {pipeline_mode = #tpu.pipeline_mode<synchronous>, transform_indices = @transform_13, window_bounds = array<i64: 2, 128>}]} {
    %c0 = arith.constant 0 : index
    %c0_0 = arith.constant 0 : index
    %c0_1 = arith.constant 0 : index
    %0 = vector.load %arg1[%c0, %c0_0, %c0_1] : memref<2x24x32xf32, #tpu.memory_space<vmem>>, vector<1x24x32xf32>
    %1 = vector.shape_cast %0 : vector<1x24x32xf32> to vector<24x32xf32>
    %2 = vector.extract_strided_slice %1 {offsets = [23, 0], sizes = [1, 32], strides = [1, 1]} : vector<24x32xf32> to vector<1x32xf32>
    %3 = vector.extract_strided_slice %1 {offsets = [0, 0], sizes = [23, 32], strides = [1, 1]} : vector<24x32xf32> to vector<23x32xf32>
    %4 = tpu.concatenate %2, %3 in 0 : vector<1x32xf32>, vector<23x32xf32> -> vector<24x32xf32>
    %c0_2 = arith.constant 0 : index
    %c0_3 = arith.constant 0 : index
    %c0_4 = arith.constant 0 : index
    %5 = vector.load %arg2[%c0_2, %c0_3, %c0_4] : memref<3x32x32xf32, #tpu.memory_space<vmem>>, vector<1x32x32xf32>
    %6 = vector.shape_cast %5 : vector<1x32x32xf32> to vector<32x32xf32>
    %cst = arith.constant dense<0.000000e+00> : vector<24x32xf32>
    %7 = tpu.matmul %4, %6, %cst {dimension_numbers = #tpu.dot_dimension_numbers<[1], [0], [0], [1], [0, 0, 1, 1], [], []>} : vector<24x32xf32>, vector<32x32xf32>, vector<24x32xf32> -> vector<24x32xf32>
    %c1 = arith.constant 1 : index
    %c0_5 = arith.constant 0 : index
    %c0_6 = arith.constant 0 : index
    %8 = vector.load %arg2[%c1, %c0_5, %c0_6] : memref<3x32x32xf32, #tpu.memory_space<vmem>>, vector<1x32x32xf32>
    %9 = vector.shape_cast %8 : vector<1x32x32xf32> to vector<32x32xf32>
    %cst_7 = arith.constant dense<0.000000e+00> : vector<24x32xf32>
    %10 = tpu.matmul %1, %9, %cst_7 {dimension_numbers = #tpu.dot_dimension_numbers<[1], [0], [0], [1], [0, 0, 1, 1], [], []>} : vector<24x32xf32>, vector<32x32xf32>, vector<24x32xf32> -> vector<24x32xf32>
    %11 = arith.addf %7, %10 : vector<24x32xf32>
    %12 = vector.extract_strided_slice %1 {offsets = [1, 0], sizes = [23, 32], strides = [1, 1]} : vector<24x32xf32> to vector<23x32xf32>
    %13 = vector.extract_strided_slice %1 {offsets = [0, 0], sizes = [1, 32], strides = [1, 1]} : vector<24x32xf32> to vector<1x32xf32>
    %14 = tpu.concatenate %12, %13 in 0 : vector<23x32xf32>, vector<1x32xf32> -> vector<24x32xf32>
    %c2 = arith.constant 2 : index
    %c0_8 = arith.constant 0 : index
    %c0_9 = arith.constant 0 : index
    %15 = vector.load %arg2[%c2, %c0_8, %c0_9] : memref<3x32x32xf32, #tpu.memory_space<vmem>>, vector<1x32x32xf32>
    %16 = vector.shape_cast %15 : vector<1x32x32xf32> to vector<32x32xf32>
    %cst_10 = arith.constant dense<0.000000e+00> : vector<24x32xf32>
    %17 = tpu.matmul %14, %16, %cst_10 {dimension_numbers = #tpu.dot_dimension_numbers<[1], [0], [0], [1], [0, 0, 1, 1], [], []>} : vector<24x32xf32>, vector<32x32xf32>, vector<24x32xf32> -> vector<24x32xf32>
    %18 = arith.addf %11, %17 : vector<24x32xf32>
    %c0_11 = arith.constant 0 : index
    %c0_12 = arith.constant 0 : index
    %19 = vector.load %arg3[%c0_11, %c0_12] : memref<1x32xf32, #tpu.memory_space<vmem>>, vector<1x32xf32>
    %20 = vector.broadcast %19 : vector<1x32xf32> to vector<24x32xf32>
    %21 = arith.addf %18, %20 : vector<24x32xf32>
    %cst_13 = arith.constant 0.000000e+00 : f32
    %22 = vector.broadcast %cst_13 : f32 to vector<24x32xf32>
    %23 = arith.maximumf %21, %22 : vector<24x32xf32>
    %24 = vector.extract_strided_slice %23 {offsets = [0, 0], sizes = [22, 32], strides = [1, 1]} : vector<24x32xf32> to vector<22x32xf32>
    %25 = vector.extract_strided_slice %23 {offsets = [1, 0], sizes = [22, 32], strides = [1, 1]} : vector<24x32xf32> to vector<22x32xf32>
    %26 = arith.addf %24, %25 : vector<22x32xf32>
    %27 = vector.extract_strided_slice %23 {offsets = [2, 0], sizes = [22, 32], strides = [1, 1]} : vector<24x32xf32> to vector<22x32xf32>
    %28 = arith.addf %26, %27 : vector<22x32xf32>
    %cst_14 = arith.constant 0.333333343 : f32
    %29 = vector.broadcast %cst_14 : f32 to vector<22x32xf32>
    %30 = arith.mulf %28, %29 : vector<22x32xf32>
    %31 = vector.extract_strided_slice %30 {offsets = [21, 0], sizes = [1, 32], strides = [1, 1]} : vector<22x32xf32> to vector<1x32xf32>
    %32 = vector.extract_strided_slice %30 {offsets = [0, 0], sizes = [21, 32], strides = [1, 1]} : vector<22x32xf32> to vector<21x32xf32>
    %33 = tpu.concatenate %31, %32 in 0 : vector<1x32xf32>, vector<21x32xf32> -> vector<22x32xf32>
    %c0_15 = arith.constant 0 : index
    %c0_16 = arith.constant 0 : index
    %c0_17 = arith.constant 0 : index
    %34 = vector.load %arg4[%c0_15, %c0_16, %c0_17] : memref<3x32x64xf32, #tpu.memory_space<vmem>>, vector<1x32x64xf32>
    %35 = vector.shape_cast %34 : vector<1x32x64xf32> to vector<32x64xf32>
    %cst_18 = arith.constant dense<0.000000e+00> : vector<22x64xf32>
    %36 = tpu.matmul %33, %35, %cst_18 {dimension_numbers = #tpu.dot_dimension_numbers<[1], [0], [0], [1], [0, 0, 1, 1], [], []>} : vector<22x32xf32>, vector<32x64xf32>, vector<22x64xf32> -> vector<22x64xf32>
    %c1_19 = arith.constant 1 : index
    %c0_20 = arith.constant 0 : index
    %c0_21 = arith.constant 0 : index
    %37 = vector.load %arg4[%c1_19, %c0_20, %c0_21] : memref<3x32x64xf32, #tpu.memory_space<vmem>>, vector<1x32x64xf32>
    %38 = vector.shape_cast %37 : vector<1x32x64xf32> to vector<32x64xf32>
    %cst_22 = arith.constant dense<0.000000e+00> : vector<22x64xf32>
    %39 = tpu.matmul %30, %38, %cst_22 {dimension_numbers = #tpu.dot_dimension_numbers<[1], [0], [0], [1], [0, 0, 1, 1], [], []>} : vector<22x32xf32>, vector<32x64xf32>, vector<22x64xf32> -> vector<22x64xf32>
    %40 = arith.addf %36, %39 : vector<22x64xf32>
    %41 = vector.extract_strided_slice %30 {offsets = [1, 0], sizes = [21, 32], strides = [1, 1]} : vector<22x32xf32> to vector<21x32xf32>
    %42 = vector.extract_strided_slice %30 {offsets = [0, 0], sizes = [1, 32], strides = [1, 1]} : vector<22x32xf32> to vector<1x32xf32>
    %43 = tpu.concatenate %41, %42 in 0 : vector<21x32xf32>, vector<1x32xf32> -> vector<22x32xf32>
    %c2_23 = arith.constant 2 : index
    %c0_24 = arith.constant 0 : index
    %c0_25 = arith.constant 0 : index
    %44 = vector.load %arg4[%c2_23, %c0_24, %c0_25] : memref<3x32x64xf32, #tpu.memory_space<vmem>>, vector<1x32x64xf32>
    %45 = vector.shape_cast %44 : vector<1x32x64xf32> to vector<32x64xf32>
    %cst_26 = arith.constant dense<0.000000e+00> : vector<22x64xf32>
    %46 = tpu.matmul %43, %45, %cst_26 {dimension_numbers = #tpu.dot_dimension_numbers<[1], [0], [0], [1], [0, 0, 1, 1], [], []>} : vector<22x32xf32>, vector<32x64xf32>, vector<22x64xf32> -> vector<22x64xf32>
    %47 = arith.addf %40, %46 : vector<22x64xf32>
    %c0_27 = arith.constant 0 : index
    %c0_28 = arith.constant 0 : index
    %48 = vector.load %arg5[%c0_27, %c0_28] : memref<1x64xf32, #tpu.memory_space<vmem>>, vector<1x64xf32>
    %49 = vector.broadcast %48 : vector<1x64xf32> to vector<22x64xf32>
    %50 = arith.addf %47, %49 : vector<22x64xf32>
    %cst_29 = arith.constant 0.000000e+00 : f32
    %51 = vector.broadcast %cst_29 : f32 to vector<22x64xf32>
    %52 = arith.maximumf %50, %51 : vector<22x64xf32>
    %53 = vector.extract_strided_slice %52 {offsets = [0, 0], sizes = [20, 64], strides = [1, 1]} : vector<22x64xf32> to vector<20x64xf32>
    %54 = vector.extract_strided_slice %52 {offsets = [1, 0], sizes = [20, 64], strides = [1, 1]} : vector<22x64xf32> to vector<20x64xf32>
    %55 = arith.addf %53, %54 : vector<20x64xf32>
    %56 = vector.extract_strided_slice %52 {offsets = [2, 0], sizes = [20, 64], strides = [1, 1]} : vector<22x64xf32> to vector<20x64xf32>
    %57 = arith.addf %55, %56 : vector<20x64xf32>
    %cst_30 = arith.constant 0.333333343 : f32
    %58 = vector.broadcast %cst_30 : f32 to vector<20x64xf32>
    %59 = arith.mulf %57, %58 : vector<20x64xf32>
    %60 = vector.extract_strided_slice %59 {offsets = [19, 0], sizes = [1, 64], strides = [1, 1]} : vector<20x64xf32> to vector<1x64xf32>
    %61 = vector.extract_strided_slice %59 {offsets = [0, 0], sizes = [19, 64], strides = [1, 1]} : vector<20x64xf32> to vector<19x64xf32>
    %62 = tpu.concatenate %60, %61 in 0 : vector<1x64xf32>, vector<19x64xf32> -> vector<20x64xf32>
    %c0_31 = arith.constant 0 : index
    %c0_32 = arith.constant 0 : index
    %c0_33 = arith.constant 0 : index
    %63 = vector.load %arg6[%c0_31, %c0_32, %c0_33] : memref<3x64x64xf32, #tpu.memory_space<vmem>>, vector<1x64x64xf32>
    %64 = vector.shape_cast %63 : vector<1x64x64xf32> to vector<64x64xf32>
    %cst_34 = arith.constant dense<0.000000e+00> : vector<20x64xf32>
    %65 = tpu.matmul %62, %64, %cst_34 {dimension_numbers = #tpu.dot_dimension_numbers<[1], [0], [0], [1], [0, 0, 1, 1], [], []>} : vector<20x64xf32>, vector<64x64xf32>, vector<20x64xf32> -> vector<20x64xf32>
    %c1_35 = arith.constant 1 : index
    %c0_36 = arith.constant 0 : index
    %c0_37 = arith.constant 0 : index
    %66 = vector.load %arg6[%c1_35, %c0_36, %c0_37] : memref<3x64x64xf32, #tpu.memory_space<vmem>>, vector<1x64x64xf32>
    %67 = vector.shape_cast %66 : vector<1x64x64xf32> to vector<64x64xf32>
    %cst_38 = arith.constant dense<0.000000e+00> : vector<20x64xf32>
    %68 = tpu.matmul %59, %67, %cst_38 {dimension_numbers = #tpu.dot_dimension_numbers<[1], [0], [0], [1], [0, 0, 1, 1], [], []>} : vector<20x64xf32>, vector<64x64xf32>, vector<20x64xf32> -> vector<20x64xf32>
    %69 = arith.addf %65, %68 : vector<20x64xf32>
    %70 = vector.extract_strided_slice %59 {offsets = [1, 0], sizes = [19, 64], strides = [1, 1]} : vector<20x64xf32> to vector<19x64xf32>
    %71 = vector.extract_strided_slice %59 {offsets = [0, 0], sizes = [1, 64], strides = [1, 1]} : vector<20x64xf32> to vector<1x64xf32>
    %72 = tpu.concatenate %70, %71 in 0 : vector<19x64xf32>, vector<1x64xf32> -> vector<20x64xf32>
    %c2_39 = arith.constant 2 : index
    %c0_40 = arith.constant 0 : index
    %c0_41 = arith.constant 0 : index
    %73 = vector.load %arg6[%c2_39, %c0_40, %c0_41] : memref<3x64x64xf32, #tpu.memory_space<vmem>>, vector<1x64x64xf32>
    %74 = vector.shape_cast %73 : vector<1x64x64xf32> to vector<64x64xf32>
    %cst_42 = arith.constant dense<0.000000e+00> : vector<20x64xf32>
    %75 = tpu.matmul %72, %74, %cst_42 {dimension_numbers = #tpu.dot_dimension_numbers<[1], [0], [0], [1], [0, 0, 1, 1], [], []>} : vector<20x64xf32>, vector<64x64xf32>, vector<20x64xf32> -> vector<20x64xf32>
    %76 = arith.addf %69, %75 : vector<20x64xf32>
    %c0_43 = arith.constant 0 : index
    %c0_44 = arith.constant 0 : index
    %77 = vector.load %arg7[%c0_43, %c0_44] : memref<1x64xf32, #tpu.memory_space<vmem>>, vector<1x64xf32>
    %78 = vector.broadcast %77 : vector<1x64xf32> to vector<20x64xf32>
    %79 = arith.addf %76, %78 : vector<20x64xf32>
    %cst_45 = arith.constant 0.000000e+00 : f32
    %80 = vector.broadcast %cst_45 : f32 to vector<20x64xf32>
    %81 = arith.maximumf %79, %80 : vector<20x64xf32>
    %82 = vector.extract_strided_slice %81 {offsets = [0, 0], sizes = [18, 64], strides = [1, 1]} : vector<20x64xf32> to vector<18x64xf32>
    %83 = vector.extract_strided_slice %81 {offsets = [1, 0], sizes = [18, 64], strides = [1, 1]} : vector<20x64xf32> to vector<18x64xf32>
    %84 = arith.addf %82, %83 : vector<18x64xf32>
    %85 = vector.extract_strided_slice %81 {offsets = [2, 0], sizes = [18, 64], strides = [1, 1]} : vector<20x64xf32> to vector<18x64xf32>
    %86 = arith.addf %84, %85 : vector<18x64xf32>
    %cst_46 = arith.constant 0.333333343 : f32
    %87 = vector.broadcast %cst_46 : f32 to vector<18x64xf32>
    %88 = arith.mulf %86, %87 : vector<18x64xf32>
    %89 = vector.extract_strided_slice %88 {offsets = [17, 0], sizes = [1, 64], strides = [1, 1]} : vector<18x64xf32> to vector<1x64xf32>
    %90 = vector.extract_strided_slice %88 {offsets = [0, 0], sizes = [17, 64], strides = [1, 1]} : vector<18x64xf32> to vector<17x64xf32>
    %91 = tpu.concatenate %89, %90 in 0 : vector<1x64xf32>, vector<17x64xf32> -> vector<18x64xf32>
    %c0_47 = arith.constant 0 : index
    %c0_48 = arith.constant 0 : index
    %c0_49 = arith.constant 0 : index
    %92 = vector.load %arg8[%c0_47, %c0_48, %c0_49] : memref<3x64x32xf32, #tpu.memory_space<vmem>>, vector<1x64x32xf32>
    %93 = vector.shape_cast %92 : vector<1x64x32xf32> to vector<64x32xf32>
    %cst_50 = arith.constant dense<0.000000e+00> : vector<18x32xf32>
    %94 = tpu.matmul %91, %93, %cst_50 {dimension_numbers = #tpu.dot_dimension_numbers<[1], [0], [0], [1], [0, 0, 1, 1], [], []>} : vector<18x64xf32>, vector<64x32xf32>, vector<18x32xf32> -> vector<18x32xf32>
    %c1_51 = arith.constant 1 : index
    %c0_52 = arith.constant 0 : index
    %c0_53 = arith.constant 0 : index
    %95 = vector.load %arg8[%c1_51, %c0_52, %c0_53] : memref<3x64x32xf32, #tpu.memory_space<vmem>>, vector<1x64x32xf32>
    %96 = vector.shape_cast %95 : vector<1x64x32xf32> to vector<64x32xf32>
    %cst_54 = arith.constant dense<0.000000e+00> : vector<18x32xf32>
    %97 = tpu.matmul %88, %96, %cst_54 {dimension_numbers = #tpu.dot_dimension_numbers<[1], [0], [0], [1], [0, 0, 1, 1], [], []>} : vector<18x64xf32>, vector<64x32xf32>, vector<18x32xf32> -> vector<18x32xf32>
    %98 = arith.addf %94, %97 : vector<18x32xf32>
    %99 = vector.extract_strided_slice %88 {offsets = [1, 0], sizes = [17, 64], strides = [1, 1]} : vector<18x64xf32> to vector<17x64xf32>
    %100 = vector.extract_strided_slice %88 {offsets = [0, 0], sizes = [1, 64], strides = [1, 1]} : vector<18x64xf32> to vector<1x64xf32>
    %101 = tpu.concatenate %99, %100 in 0 : vector<17x64xf32>, vector<1x64xf32> -> vector<18x64xf32>
    %c2_55 = arith.constant 2 : index
    %c0_56 = arith.constant 0 : index
    %c0_57 = arith.constant 0 : index
    %102 = vector.load %arg8[%c2_55, %c0_56, %c0_57] : memref<3x64x32xf32, #tpu.memory_space<vmem>>, vector<1x64x32xf32>
    %103 = vector.shape_cast %102 : vector<1x64x32xf32> to vector<64x32xf32>
    %cst_58 = arith.constant dense<0.000000e+00> : vector<18x32xf32>
    %104 = tpu.matmul %101, %103, %cst_58 {dimension_numbers = #tpu.dot_dimension_numbers<[1], [0], [0], [1], [0, 0, 1, 1], [], []>} : vector<18x64xf32>, vector<64x32xf32>, vector<18x32xf32> -> vector<18x32xf32>
    %105 = arith.addf %98, %104 : vector<18x32xf32>
    %c0_59 = arith.constant 0 : index
    %c0_60 = arith.constant 0 : index
    %106 = vector.load %arg9[%c0_59, %c0_60] : memref<1x32xf32, #tpu.memory_space<vmem>>, vector<1x32xf32>
    %107 = vector.broadcast %106 : vector<1x32xf32> to vector<18x32xf32>
    %108 = arith.addf %105, %107 : vector<18x32xf32>
    %cst_61 = arith.constant 0.000000e+00 : f32
    %109 = vector.broadcast %cst_61 : f32 to vector<18x32xf32>
    %110 = arith.maximumf %108, %109 : vector<18x32xf32>
    %111 = vector.extract_strided_slice %110 {offsets = [0, 0], sizes = [16, 32], strides = [1, 1]} : vector<18x32xf32> to vector<16x32xf32>
    %112 = vector.extract_strided_slice %110 {offsets = [1, 0], sizes = [16, 32], strides = [1, 1]} : vector<18x32xf32> to vector<16x32xf32>
    %113 = arith.addf %111, %112 : vector<16x32xf32>
    %114 = vector.extract_strided_slice %110 {offsets = [2, 0], sizes = [16, 32], strides = [1, 1]} : vector<18x32xf32> to vector<16x32xf32>
    %115 = arith.addf %113, %114 : vector<16x32xf32>
    %cst_62 = arith.constant 0.333333343 : f32
    %116 = vector.broadcast %cst_62 : f32 to vector<16x32xf32>
    %117 = arith.mulf %115, %116 : vector<16x32xf32>
    %c0_63 = arith.constant 0 : index
    %c0_64 = arith.constant 0 : index
    %118 = vector.load %arg11[%c0_63, %c0_64] : memref<1x640xf32, #tpu.memory_space<vmem>>, vector<1x640xf32>
    %119 = vector.extract_strided_slice %117 {offsets = [0, 0], sizes = [1, 32], strides = [1, 1]} : vector<16x32xf32> to vector<1x32xf32>
    %c0_65 = arith.constant 0 : index
    %c0_66 = arith.constant 0 : index
    %c0_67 = arith.constant 0 : index
    %120 = vector.load %arg10[%c0_65, %c0_66, %c0_67] : memref<16x32x640xf32, #tpu.memory_space<vmem>>, vector<1x32x640xf32>
    %121 = vector.shape_cast %120 : vector<1x32x640xf32> to vector<32x640xf32>
    %cst_68 = arith.constant dense<0.000000e+00> : vector<1x640xf32>
    %122 = tpu.matmul %119, %121, %cst_68 {dimension_numbers = #tpu.dot_dimension_numbers<[1], [0], [0], [1], [0, 0, 1, 1], [], []>} : vector<1x32xf32>, vector<32x640xf32>, vector<1x640xf32> -> vector<1x640xf32>
    %123 = arith.addf %118, %122 : vector<1x640xf32>
    %124 = vector.extract_strided_slice %117 {offsets = [1, 0], sizes = [1, 32], strides = [1, 1]} : vector<16x32xf32> to vector<1x32xf32>
    %c1_69 = arith.constant 1 : index
    %c0_70 = arith.constant 0 : index
    %c0_71 = arith.constant 0 : index
    %125 = vector.load %arg10[%c1_69, %c0_70, %c0_71] : memref<16x32x640xf32, #tpu.memory_space<vmem>>, vector<1x32x640xf32>
    %126 = vector.shape_cast %125 : vector<1x32x640xf32> to vector<32x640xf32>
    %cst_72 = arith.constant dense<0.000000e+00> : vector<1x640xf32>
    %127 = tpu.matmul %124, %126, %cst_72 {dimension_numbers = #tpu.dot_dimension_numbers<[1], [0], [0], [1], [0, 0, 1, 1], [], []>} : vector<1x32xf32>, vector<32x640xf32>, vector<1x640xf32> -> vector<1x640xf32>
    %128 = arith.addf %123, %127 : vector<1x640xf32>
    %129 = vector.extract_strided_slice %117 {offsets = [2, 0], sizes = [1, 32], strides = [1, 1]} : vector<16x32xf32> to vector<1x32xf32>
    %c2_73 = arith.constant 2 : index
    %c0_74 = arith.constant 0 : index
    %c0_75 = arith.constant 0 : index
    %130 = vector.load %arg10[%c2_73, %c0_74, %c0_75] : memref<16x32x640xf32, #tpu.memory_space<vmem>>, vector<1x32x640xf32>
    %131 = vector.shape_cast %130 : vector<1x32x640xf32> to vector<32x640xf32>
    %cst_76 = arith.constant dense<0.000000e+00> : vector<1x640xf32>
    %132 = tpu.matmul %129, %131, %cst_76 {dimension_numbers = #tpu.dot_dimension_numbers<[1], [0], [0], [1], [0, 0, 1, 1], [], []>} : vector<1x32xf32>, vector<32x640xf32>, vector<1x640xf32> -> vector<1x640xf32>
    %133 = arith.addf %128, %132 : vector<1x640xf32>
    %134 = vector.extract_strided_slice %117 {offsets = [3, 0], sizes = [1, 32], strides = [1, 1]} : vector<16x32xf32> to vector<1x32xf32>
    %c3 = arith.constant 3 : index
    %c0_77 = arith.constant 0 : index
    %c0_78 = arith.constant 0 : index
    %135 = vector.load %arg10[%c3, %c0_77, %c0_78] : memref<16x32x640xf32, #tpu.memory_space<vmem>>, vector<1x32x640xf32>
    %136 = vector.shape_cast %135 : vector<1x32x640xf32> to vector<32x640xf32>
    %cst_79 = arith.constant dense<0.000000e+00> : vector<1x640xf32>
    %137 = tpu.matmul %134, %136, %cst_79 {dimension_numbers = #tpu.dot_dimension_numbers<[1], [0], [0], [1], [0, 0, 1, 1], [], []>} : vector<1x32xf32>, vector<32x640xf32>, vector<1x640xf32> -> vector<1x640xf32>
    %138 = arith.addf %133, %137 : vector<1x640xf32>
    %139 = vector.extract_strided_slice %117 {offsets = [4, 0], sizes = [1, 32], strides = [1, 1]} : vector<16x32xf32> to vector<1x32xf32>
    %c4 = arith.constant 4 : index
    %c0_80 = arith.constant 0 : index
    %c0_81 = arith.constant 0 : index
    %140 = vector.load %arg10[%c4, %c0_80, %c0_81] : memref<16x32x640xf32, #tpu.memory_space<vmem>>, vector<1x32x640xf32>
    %141 = vector.shape_cast %140 : vector<1x32x640xf32> to vector<32x640xf32>
    %cst_82 = arith.constant dense<0.000000e+00> : vector<1x640xf32>
    %142 = tpu.matmul %139, %141, %cst_82 {dimension_numbers = #tpu.dot_dimension_numbers<[1], [0], [0], [1], [0, 0, 1, 1], [], []>} : vector<1x32xf32>, vector<32x640xf32>, vector<1x640xf32> -> vector<1x640xf32>
    %143 = arith.addf %138, %142 : vector<1x640xf32>
    %144 = vector.extract_strided_slice %117 {offsets = [5, 0], sizes = [1, 32], strides = [1, 1]} : vector<16x32xf32> to vector<1x32xf32>
    %c5 = arith.constant 5 : index
    %c0_83 = arith.constant 0 : index
    %c0_84 = arith.constant 0 : index
    %145 = vector.load %arg10[%c5, %c0_83, %c0_84] : memref<16x32x640xf32, #tpu.memory_space<vmem>>, vector<1x32x640xf32>
    %146 = vector.shape_cast %145 : vector<1x32x640xf32> to vector<32x640xf32>
    %cst_85 = arith.constant dense<0.000000e+00> : vector<1x640xf32>
    %147 = tpu.matmul %144, %146, %cst_85 {dimension_numbers = #tpu.dot_dimension_numbers<[1], [0], [0], [1], [0, 0, 1, 1], [], []>} : vector<1x32xf32>, vector<32x640xf32>, vector<1x640xf32> -> vector<1x640xf32>
    %148 = arith.addf %143, %147 : vector<1x640xf32>
    %149 = vector.extract_strided_slice %117 {offsets = [6, 0], sizes = [1, 32], strides = [1, 1]} : vector<16x32xf32> to vector<1x32xf32>
    %c6 = arith.constant 6 : index
    %c0_86 = arith.constant 0 : index
    %c0_87 = arith.constant 0 : index
    %150 = vector.load %arg10[%c6, %c0_86, %c0_87] : memref<16x32x640xf32, #tpu.memory_space<vmem>>, vector<1x32x640xf32>
    %151 = vector.shape_cast %150 : vector<1x32x640xf32> to vector<32x640xf32>
    %cst_88 = arith.constant dense<0.000000e+00> : vector<1x640xf32>
    %152 = tpu.matmul %149, %151, %cst_88 {dimension_numbers = #tpu.dot_dimension_numbers<[1], [0], [0], [1], [0, 0, 1, 1], [], []>} : vector<1x32xf32>, vector<32x640xf32>, vector<1x640xf32> -> vector<1x640xf32>
    %153 = arith.addf %148, %152 : vector<1x640xf32>
    %154 = vector.extract_strided_slice %117 {offsets = [7, 0], sizes = [1, 32], strides = [1, 1]} : vector<16x32xf32> to vector<1x32xf32>
    %c7 = arith.constant 7 : index
    %c0_89 = arith.constant 0 : index
    %c0_90 = arith.constant 0 : index
    %155 = vector.load %arg10[%c7, %c0_89, %c0_90] : memref<16x32x640xf32, #tpu.memory_space<vmem>>, vector<1x32x640xf32>
    %156 = vector.shape_cast %155 : vector<1x32x640xf32> to vector<32x640xf32>
    %cst_91 = arith.constant dense<0.000000e+00> : vector<1x640xf32>
    %157 = tpu.matmul %154, %156, %cst_91 {dimension_numbers = #tpu.dot_dimension_numbers<[1], [0], [0], [1], [0, 0, 1, 1], [], []>} : vector<1x32xf32>, vector<32x640xf32>, vector<1x640xf32> -> vector<1x640xf32>
    %158 = arith.addf %153, %157 : vector<1x640xf32>
    %159 = vector.extract_strided_slice %117 {offsets = [8, 0], sizes = [1, 32], strides = [1, 1]} : vector<16x32xf32> to vector<1x32xf32>
    %c8 = arith.constant 8 : index
    %c0_92 = arith.constant 0 : index
    %c0_93 = arith.constant 0 : index
    %160 = vector.load %arg10[%c8, %c0_92, %c0_93] : memref<16x32x640xf32, #tpu.memory_space<vmem>>, vector<1x32x640xf32>
    %161 = vector.shape_cast %160 : vector<1x32x640xf32> to vector<32x640xf32>
    %cst_94 = arith.constant dense<0.000000e+00> : vector<1x640xf32>
    %162 = tpu.matmul %159, %161, %cst_94 {dimension_numbers = #tpu.dot_dimension_numbers<[1], [0], [0], [1], [0, 0, 1, 1], [], []>} : vector<1x32xf32>, vector<32x640xf32>, vector<1x640xf32> -> vector<1x640xf32>
    %163 = arith.addf %158, %162 : vector<1x640xf32>
    %164 = vector.extract_strided_slice %117 {offsets = [9, 0], sizes = [1, 32], strides = [1, 1]} : vector<16x32xf32> to vector<1x32xf32>
    %c9 = arith.constant 9 : index
    %c0_95 = arith.constant 0 : index
    %c0_96 = arith.constant 0 : index
    %165 = vector.load %arg10[%c9, %c0_95, %c0_96] : memref<16x32x640xf32, #tpu.memory_space<vmem>>, vector<1x32x640xf32>
    %166 = vector.shape_cast %165 : vector<1x32x640xf32> to vector<32x640xf32>
    %cst_97 = arith.constant dense<0.000000e+00> : vector<1x640xf32>
    %167 = tpu.matmul %164, %166, %cst_97 {dimension_numbers = #tpu.dot_dimension_numbers<[1], [0], [0], [1], [0, 0, 1, 1], [], []>} : vector<1x32xf32>, vector<32x640xf32>, vector<1x640xf32> -> vector<1x640xf32>
    %168 = arith.addf %163, %167 : vector<1x640xf32>
    %169 = vector.extract_strided_slice %117 {offsets = [10, 0], sizes = [1, 32], strides = [1, 1]} : vector<16x32xf32> to vector<1x32xf32>
    %c10 = arith.constant 10 : index
    %c0_98 = arith.constant 0 : index
    %c0_99 = arith.constant 0 : index
    %170 = vector.load %arg10[%c10, %c0_98, %c0_99] : memref<16x32x640xf32, #tpu.memory_space<vmem>>, vector<1x32x640xf32>
    %171 = vector.shape_cast %170 : vector<1x32x640xf32> to vector<32x640xf32>
    %cst_100 = arith.constant dense<0.000000e+00> : vector<1x640xf32>
    %172 = tpu.matmul %169, %171, %cst_100 {dimension_numbers = #tpu.dot_dimension_numbers<[1], [0], [0], [1], [0, 0, 1, 1], [], []>} : vector<1x32xf32>, vector<32x640xf32>, vector<1x640xf32> -> vector<1x640xf32>
    %173 = arith.addf %168, %172 : vector<1x640xf32>
    %174 = vector.extract_strided_slice %117 {offsets = [11, 0], sizes = [1, 32], strides = [1, 1]} : vector<16x32xf32> to vector<1x32xf32>
    %c11 = arith.constant 11 : index
    %c0_101 = arith.constant 0 : index
    %c0_102 = arith.constant 0 : index
    %175 = vector.load %arg10[%c11, %c0_101, %c0_102] : memref<16x32x640xf32, #tpu.memory_space<vmem>>, vector<1x32x640xf32>
    %176 = vector.shape_cast %175 : vector<1x32x640xf32> to vector<32x640xf32>
    %cst_103 = arith.constant dense<0.000000e+00> : vector<1x640xf32>
    %177 = tpu.matmul %174, %176, %cst_103 {dimension_numbers = #tpu.dot_dimension_numbers<[1], [0], [0], [1], [0, 0, 1, 1], [], []>} : vector<1x32xf32>, vector<32x640xf32>, vector<1x640xf32> -> vector<1x640xf32>
    %178 = arith.addf %173, %177 : vector<1x640xf32>
    %179 = vector.extract_strided_slice %117 {offsets = [12, 0], sizes = [1, 32], strides = [1, 1]} : vector<16x32xf32> to vector<1x32xf32>
    %c12 = arith.constant 12 : index
    %c0_104 = arith.constant 0 : index
    %c0_105 = arith.constant 0 : index
    %180 = vector.load %arg10[%c12, %c0_104, %c0_105] : memref<16x32x640xf32, #tpu.memory_space<vmem>>, vector<1x32x640xf32>
    %181 = vector.shape_cast %180 : vector<1x32x640xf32> to vector<32x640xf32>
    %cst_106 = arith.constant dense<0.000000e+00> : vector<1x640xf32>
    %182 = tpu.matmul %179, %181, %cst_106 {dimension_numbers = #tpu.dot_dimension_numbers<[1], [0], [0], [1], [0, 0, 1, 1], [], []>} : vector<1x32xf32>, vector<32x640xf32>, vector<1x640xf32> -> vector<1x640xf32>
    %183 = arith.addf %178, %182 : vector<1x640xf32>
    %184 = vector.extract_strided_slice %117 {offsets = [13, 0], sizes = [1, 32], strides = [1, 1]} : vector<16x32xf32> to vector<1x32xf32>
    %c13 = arith.constant 13 : index
    %c0_107 = arith.constant 0 : index
    %c0_108 = arith.constant 0 : index
    %185 = vector.load %arg10[%c13, %c0_107, %c0_108] : memref<16x32x640xf32, #tpu.memory_space<vmem>>, vector<1x32x640xf32>
    %186 = vector.shape_cast %185 : vector<1x32x640xf32> to vector<32x640xf32>
    %cst_109 = arith.constant dense<0.000000e+00> : vector<1x640xf32>
    %187 = tpu.matmul %184, %186, %cst_109 {dimension_numbers = #tpu.dot_dimension_numbers<[1], [0], [0], [1], [0, 0, 1, 1], [], []>} : vector<1x32xf32>, vector<32x640xf32>, vector<1x640xf32> -> vector<1x640xf32>
    %188 = arith.addf %183, %187 : vector<1x640xf32>
    %189 = vector.extract_strided_slice %117 {offsets = [14, 0], sizes = [1, 32], strides = [1, 1]} : vector<16x32xf32> to vector<1x32xf32>
    %c14 = arith.constant 14 : index
    %c0_110 = arith.constant 0 : index
    %c0_111 = arith.constant 0 : index
    %190 = vector.load %arg10[%c14, %c0_110, %c0_111] : memref<16x32x640xf32, #tpu.memory_space<vmem>>, vector<1x32x640xf32>
    %191 = vector.shape_cast %190 : vector<1x32x640xf32> to vector<32x640xf32>
    %cst_112 = arith.constant dense<0.000000e+00> : vector<1x640xf32>
    %192 = tpu.matmul %189, %191, %cst_112 {dimension_numbers = #tpu.dot_dimension_numbers<[1], [0], [0], [1], [0, 0, 1, 1], [], []>} : vector<1x32xf32>, vector<32x640xf32>, vector<1x640xf32> -> vector<1x640xf32>
    %193 = arith.addf %188, %192 : vector<1x640xf32>
    %194 = vector.extract_strided_slice %117 {offsets = [15, 0], sizes = [1, 32], strides = [1, 1]} : vector<16x32xf32> to vector<1x32xf32>
    %c15 = arith.constant 15 : index
    %c0_113 = arith.constant 0 : index
    %c0_114 = arith.constant 0 : index
    %195 = vector.load %arg10[%c15, %c0_113, %c0_114] : memref<16x32x640xf32, #tpu.memory_space<vmem>>, vector<1x32x640xf32>
    %196 = vector.shape_cast %195 : vector<1x32x640xf32> to vector<32x640xf32>
    %cst_115 = arith.constant dense<0.000000e+00> : vector<1x640xf32>
    %197 = tpu.matmul %194, %196, %cst_115 {dimension_numbers = #tpu.dot_dimension_numbers<[1], [0], [0], [1], [0, 0, 1, 1], [], []>} : vector<1x32xf32>, vector<32x640xf32>, vector<1x640xf32> -> vector<1x640xf32>
    %198 = arith.addf %193, %197 : vector<1x640xf32>
    %cst_116 = arith.constant 0.000000e+00 : f32
    %199 = vector.broadcast %cst_116 : f32 to vector<1x640xf32>
    %200 = arith.maximumf %198, %199 : vector<1x640xf32>
    %c0_117 = arith.constant 0 : index
    %c0_118 = arith.constant 0 : index
    %201 = vector.load %arg12[%c0_117, %c0_118] : memref<640x128xf32, #tpu.memory_space<vmem>>, vector<640x128xf32>
    %cst_119 = arith.constant dense<0.000000e+00> : vector<1x128xf32>
    %202 = tpu.matmul %200, %201, %cst_119 {dimension_numbers = #tpu.dot_dimension_numbers<[1], [0], [0], [1], [0, 0, 1, 1], [], []>} : vector<1x640xf32>, vector<640x128xf32>, vector<1x128xf32> -> vector<1x128xf32>
    %c0_120 = arith.constant 0 : index
    %c0_121 = arith.constant 0 : index
    %203 = vector.load %arg13[%c0_120, %c0_121] : memref<1x128xf32, #tpu.memory_space<vmem>>, vector<1x128xf32>
    %204 = arith.addf %202, %203 : vector<1x128xf32>
    %c1_122 = arith.constant 1 : index
    %c0_123 = arith.constant 0 : index
    %c0_124 = arith.constant 0 : index
    %205 = vector.load %arg1[%c1_122, %c0_123, %c0_124] : memref<2x24x32xf32, #tpu.memory_space<vmem>>, vector<1x24x32xf32>
    %206 = vector.shape_cast %205 : vector<1x24x32xf32> to vector<24x32xf32>
    %207 = vector.extract_strided_slice %206 {offsets = [23, 0], sizes = [1, 32], strides = [1, 1]} : vector<24x32xf32> to vector<1x32xf32>
    %208 = vector.extract_strided_slice %206 {offsets = [0, 0], sizes = [23, 32], strides = [1, 1]} : vector<24x32xf32> to vector<23x32xf32>
    %209 = tpu.concatenate %207, %208 in 0 : vector<1x32xf32>, vector<23x32xf32> -> vector<24x32xf32>
    %c0_125 = arith.constant 0 : index
    %c0_126 = arith.constant 0 : index
    %c0_127 = arith.constant 0 : index
    %210 = vector.load %arg2[%c0_125, %c0_126, %c0_127] : memref<3x32x32xf32, #tpu.memory_space<vmem>>, vector<1x32x32xf32>
    %211 = vector.shape_cast %210 : vector<1x32x32xf32> to vector<32x32xf32>
    %cst_128 = arith.constant dense<0.000000e+00> : vector<24x32xf32>
    %212 = tpu.matmul %209, %211, %cst_128 {dimension_numbers = #tpu.dot_dimension_numbers<[1], [0], [0], [1], [0, 0, 1, 1], [], []>} : vector<24x32xf32>, vector<32x32xf32>, vector<24x32xf32> -> vector<24x32xf32>
    %c1_129 = arith.constant 1 : index
    %c0_130 = arith.constant 0 : index
    %c0_131 = arith.constant 0 : index
    %213 = vector.load %arg2[%c1_129, %c0_130, %c0_131] : memref<3x32x32xf32, #tpu.memory_space<vmem>>, vector<1x32x32xf32>
    %214 = vector.shape_cast %213 : vector<1x32x32xf32> to vector<32x32xf32>
    %cst_132 = arith.constant dense<0.000000e+00> : vector<24x32xf32>
    %215 = tpu.matmul %206, %214, %cst_132 {dimension_numbers = #tpu.dot_dimension_numbers<[1], [0], [0], [1], [0, 0, 1, 1], [], []>} : vector<24x32xf32>, vector<32x32xf32>, vector<24x32xf32> -> vector<24x32xf32>
    %216 = arith.addf %212, %215 : vector<24x32xf32>
    %217 = vector.extract_strided_slice %206 {offsets = [1, 0], sizes = [23, 32], strides = [1, 1]} : vector<24x32xf32> to vector<23x32xf32>
    %218 = vector.extract_strided_slice %206 {offsets = [0, 0], sizes = [1, 32], strides = [1, 1]} : vector<24x32xf32> to vector<1x32xf32>
    %219 = tpu.concatenate %217, %218 in 0 : vector<23x32xf32>, vector<1x32xf32> -> vector<24x32xf32>
    %c2_133 = arith.constant 2 : index
    %c0_134 = arith.constant 0 : index
    %c0_135 = arith.constant 0 : index
    %220 = vector.load %arg2[%c2_133, %c0_134, %c0_135] : memref<3x32x32xf32, #tpu.memory_space<vmem>>, vector<1x32x32xf32>
    %221 = vector.shape_cast %220 : vector<1x32x32xf32> to vector<32x32xf32>
    %cst_136 = arith.constant dense<0.000000e+00> : vector<24x32xf32>
    %222 = tpu.matmul %219, %221, %cst_136 {dimension_numbers = #tpu.dot_dimension_numbers<[1], [0], [0], [1], [0, 0, 1, 1], [], []>} : vector<24x32xf32>, vector<32x32xf32>, vector<24x32xf32> -> vector<24x32xf32>
    %223 = arith.addf %216, %222 : vector<24x32xf32>
    %c0_137 = arith.constant 0 : index
    %c0_138 = arith.constant 0 : index
    %224 = vector.load %arg3[%c0_137, %c0_138] : memref<1x32xf32, #tpu.memory_space<vmem>>, vector<1x32xf32>
    %225 = vector.broadcast %224 : vector<1x32xf32> to vector<24x32xf32>
    %226 = arith.addf %223, %225 : vector<24x32xf32>
    %cst_139 = arith.constant 0.000000e+00 : f32
    %227 = vector.broadcast %cst_139 : f32 to vector<24x32xf32>
    %228 = arith.maximumf %226, %227 : vector<24x32xf32>
    %229 = vector.extract_strided_slice %228 {offsets = [0, 0], sizes = [22, 32], strides = [1, 1]} : vector<24x32xf32> to vector<22x32xf32>
    %230 = vector.extract_strided_slice %228 {offsets = [1, 0], sizes = [22, 32], strides = [1, 1]} : vector<24x32xf32> to vector<22x32xf32>
    %231 = arith.addf %229, %230 : vector<22x32xf32>
    %232 = vector.extract_strided_slice %228 {offsets = [2, 0], sizes = [22, 32], strides = [1, 1]} : vector<24x32xf32> to vector<22x32xf32>
    %233 = arith.addf %231, %232 : vector<22x32xf32>
    %cst_140 = arith.constant 0.333333343 : f32
    %234 = vector.broadcast %cst_140 : f32 to vector<22x32xf32>
    %235 = arith.mulf %233, %234 : vector<22x32xf32>
    %236 = vector.extract_strided_slice %235 {offsets = [21, 0], sizes = [1, 32], strides = [1, 1]} : vector<22x32xf32> to vector<1x32xf32>
    %237 = vector.extract_strided_slice %235 {offsets = [0, 0], sizes = [21, 32], strides = [1, 1]} : vector<22x32xf32> to vector<21x32xf32>
    %238 = tpu.concatenate %236, %237 in 0 : vector<1x32xf32>, vector<21x32xf32> -> vector<22x32xf32>
    %c0_141 = arith.constant 0 : index
    %c0_142 = arith.constant 0 : index
    %c0_143 = arith.constant 0 : index
    %239 = vector.load %arg4[%c0_141, %c0_142, %c0_143] : memref<3x32x64xf32, #tpu.memory_space<vmem>>, vector<1x32x64xf32>
    %240 = vector.shape_cast %239 : vector<1x32x64xf32> to vector<32x64xf32>
    %cst_144 = arith.constant dense<0.000000e+00> : vector<22x64xf32>
    %241 = tpu.matmul %238, %240, %cst_144 {dimension_numbers = #tpu.dot_dimension_numbers<[1], [0], [0], [1], [0, 0, 1, 1], [], []>} : vector<22x32xf32>, vector<32x64xf32>, vector<22x64xf32> -> vector<22x64xf32>
    %c1_145 = arith.constant 1 : index
    %c0_146 = arith.constant 0 : index
    %c0_147 = arith.constant 0 : index
    %242 = vector.load %arg4[%c1_145, %c0_146, %c0_147] : memref<3x32x64xf32, #tpu.memory_space<vmem>>, vector<1x32x64xf32>
    %243 = vector.shape_cast %242 : vector<1x32x64xf32> to vector<32x64xf32>
    %cst_148 = arith.constant dense<0.000000e+00> : vector<22x64xf32>
    %244 = tpu.matmul %235, %243, %cst_148 {dimension_numbers = #tpu.dot_dimension_numbers<[1], [0], [0], [1], [0, 0, 1, 1], [], []>} : vector<22x32xf32>, vector<32x64xf32>, vector<22x64xf32> -> vector<22x64xf32>
    %245 = arith.addf %241, %244 : vector<22x64xf32>
    %246 = vector.extract_strided_slice %235 {offsets = [1, 0], sizes = [21, 32], strides = [1, 1]} : vector<22x32xf32> to vector<21x32xf32>
    %247 = vector.extract_strided_slice %235 {offsets = [0, 0], sizes = [1, 32], strides = [1, 1]} : vector<22x32xf32> to vector<1x32xf32>
    %248 = tpu.concatenate %246, %247 in 0 : vector<21x32xf32>, vector<1x32xf32> -> vector<22x32xf32>
    %c2_149 = arith.constant 2 : index
    %c0_150 = arith.constant 0 : index
    %c0_151 = arith.constant 0 : index
    %249 = vector.load %arg4[%c2_149, %c0_150, %c0_151] : memref<3x32x64xf32, #tpu.memory_space<vmem>>, vector<1x32x64xf32>
    %250 = vector.shape_cast %249 : vector<1x32x64xf32> to vector<32x64xf32>
    %cst_152 = arith.constant dense<0.000000e+00> : vector<22x64xf32>
    %251 = tpu.matmul %248, %250, %cst_152 {dimension_numbers = #tpu.dot_dimension_numbers<[1], [0], [0], [1], [0, 0, 1, 1], [], []>} : vector<22x32xf32>, vector<32x64xf32>, vector<22x64xf32> -> vector<22x64xf32>
    %252 = arith.addf %245, %251 : vector<22x64xf32>
    %c0_153 = arith.constant 0 : index
    %c0_154 = arith.constant 0 : index
    %253 = vector.load %arg5[%c0_153, %c0_154] : memref<1x64xf32, #tpu.memory_space<vmem>>, vector<1x64xf32>
    %254 = vector.broadcast %253 : vector<1x64xf32> to vector<22x64xf32>
    %255 = arith.addf %252, %254 : vector<22x64xf32>
    %cst_155 = arith.constant 0.000000e+00 : f32
    %256 = vector.broadcast %cst_155 : f32 to vector<22x64xf32>
    %257 = arith.maximumf %255, %256 : vector<22x64xf32>
    %258 = vector.extract_strided_slice %257 {offsets = [0, 0], sizes = [20, 64], strides = [1, 1]} : vector<22x64xf32> to vector<20x64xf32>
    %259 = vector.extract_strided_slice %257 {offsets = [1, 0], sizes = [20, 64], strides = [1, 1]} : vector<22x64xf32> to vector<20x64xf32>
    %260 = arith.addf %258, %259 : vector<20x64xf32>
    %261 = vector.extract_strided_slice %257 {offsets = [2, 0], sizes = [20, 64], strides = [1, 1]} : vector<22x64xf32> to vector<20x64xf32>
    %262 = arith.addf %260, %261 : vector<20x64xf32>
    %cst_156 = arith.constant 0.333333343 : f32
    %263 = vector.broadcast %cst_156 : f32 to vector<20x64xf32>
    %264 = arith.mulf %262, %263 : vector<20x64xf32>
    %265 = vector.extract_strided_slice %264 {offsets = [19, 0], sizes = [1, 64], strides = [1, 1]} : vector<20x64xf32> to vector<1x64xf32>
    %266 = vector.extract_strided_slice %264 {offsets = [0, 0], sizes = [19, 64], strides = [1, 1]} : vector<20x64xf32> to vector<19x64xf32>
    %267 = tpu.concatenate %265, %266 in 0 : vector<1x64xf32>, vector<19x64xf32> -> vector<20x64xf32>
    %c0_157 = arith.constant 0 : index
    %c0_158 = arith.constant 0 : index
    %c0_159 = arith.constant 0 : index
    %268 = vector.load %arg6[%c0_157, %c0_158, %c0_159] : memref<3x64x64xf32, #tpu.memory_space<vmem>>, vector<1x64x64xf32>
    %269 = vector.shape_cast %268 : vector<1x64x64xf32> to vector<64x64xf32>
    %cst_160 = arith.constant dense<0.000000e+00> : vector<20x64xf32>
    %270 = tpu.matmul %267, %269, %cst_160 {dimension_numbers = #tpu.dot_dimension_numbers<[1], [0], [0], [1], [0, 0, 1, 1], [], []>} : vector<20x64xf32>, vector<64x64xf32>, vector<20x64xf32> -> vector<20x64xf32>
    %c1_161 = arith.constant 1 : index
    %c0_162 = arith.constant 0 : index
    %c0_163 = arith.constant 0 : index
    %271 = vector.load %arg6[%c1_161, %c0_162, %c0_163] : memref<3x64x64xf32, #tpu.memory_space<vmem>>, vector<1x64x64xf32>
    %272 = vector.shape_cast %271 : vector<1x64x64xf32> to vector<64x64xf32>
    %cst_164 = arith.constant dense<0.000000e+00> : vector<20x64xf32>
    %273 = tpu.matmul %264, %272, %cst_164 {dimension_numbers = #tpu.dot_dimension_numbers<[1], [0], [0], [1], [0, 0, 1, 1], [], []>} : vector<20x64xf32>, vector<64x64xf32>, vector<20x64xf32> -> vector<20x64xf32>
    %274 = arith.addf %270, %273 : vector<20x64xf32>
    %275 = vector.extract_strided_slice %264 {offsets = [1, 0], sizes = [19, 64], strides = [1, 1]} : vector<20x64xf32> to vector<19x64xf32>
    %276 = vector.extract_strided_slice %264 {offsets = [0, 0], sizes = [1, 64], strides = [1, 1]} : vector<20x64xf32> to vector<1x64xf32>
    %277 = tpu.concatenate %275, %276 in 0 : vector<19x64xf32>, vector<1x64xf32> -> vector<20x64xf32>
    %c2_165 = arith.constant 2 : index
    %c0_166 = arith.constant 0 : index
    %c0_167 = arith.constant 0 : index
    %278 = vector.load %arg6[%c2_165, %c0_166, %c0_167] : memref<3x64x64xf32, #tpu.memory_space<vmem>>, vector<1x64x64xf32>
    %279 = vector.shape_cast %278 : vector<1x64x64xf32> to vector<64x64xf32>
    %cst_168 = arith.constant dense<0.000000e+00> : vector<20x64xf32>
    %280 = tpu.matmul %277, %279, %cst_168 {dimension_numbers = #tpu.dot_dimension_numbers<[1], [0], [0], [1], [0, 0, 1, 1], [], []>} : vector<20x64xf32>, vector<64x64xf32>, vector<20x64xf32> -> vector<20x64xf32>
    %281 = arith.addf %274, %280 : vector<20x64xf32>
    %c0_169 = arith.constant 0 : index
    %c0_170 = arith.constant 0 : index
    %282 = vector.load %arg7[%c0_169, %c0_170] : memref<1x64xf32, #tpu.memory_space<vmem>>, vector<1x64xf32>
    %283 = vector.broadcast %282 : vector<1x64xf32> to vector<20x64xf32>
    %284 = arith.addf %281, %283 : vector<20x64xf32>
    %cst_171 = arith.constant 0.000000e+00 : f32
    %285 = vector.broadcast %cst_171 : f32 to vector<20x64xf32>
    %286 = arith.maximumf %284, %285 : vector<20x64xf32>
    %287 = vector.extract_strided_slice %286 {offsets = [0, 0], sizes = [18, 64], strides = [1, 1]} : vector<20x64xf32> to vector<18x64xf32>
    %288 = vector.extract_strided_slice %286 {offsets = [1, 0], sizes = [18, 64], strides = [1, 1]} : vector<20x64xf32> to vector<18x64xf32>
    %289 = arith.addf %287, %288 : vector<18x64xf32>
    %290 = vector.extract_strided_slice %286 {offsets = [2, 0], sizes = [18, 64], strides = [1, 1]} : vector<20x64xf32> to vector<18x64xf32>
    %291 = arith.addf %289, %290 : vector<18x64xf32>
    %cst_172 = arith.constant 0.333333343 : f32
    %292 = vector.broadcast %cst_172 : f32 to vector<18x64xf32>
    %293 = arith.mulf %291, %292 : vector<18x64xf32>
    %294 = vector.extract_strided_slice %293 {offsets = [17, 0], sizes = [1, 64], strides = [1, 1]} : vector<18x64xf32> to vector<1x64xf32>
    %295 = vector.extract_strided_slice %293 {offsets = [0, 0], sizes = [17, 64], strides = [1, 1]} : vector<18x64xf32> to vector<17x64xf32>
    %296 = tpu.concatenate %294, %295 in 0 : vector<1x64xf32>, vector<17x64xf32> -> vector<18x64xf32>
    %c0_173 = arith.constant 0 : index
    %c0_174 = arith.constant 0 : index
    %c0_175 = arith.constant 0 : index
    %297 = vector.load %arg8[%c0_173, %c0_174, %c0_175] : memref<3x64x32xf32, #tpu.memory_space<vmem>>, vector<1x64x32xf32>
    %298 = vector.shape_cast %297 : vector<1x64x32xf32> to vector<64x32xf32>
    %cst_176 = arith.constant dense<0.000000e+00> : vector<18x32xf32>
    %299 = tpu.matmul %296, %298, %cst_176 {dimension_numbers = #tpu.dot_dimension_numbers<[1], [0], [0], [1], [0, 0, 1, 1], [], []>} : vector<18x64xf32>, vector<64x32xf32>, vector<18x32xf32> -> vector<18x32xf32>
    %c1_177 = arith.constant 1 : index
    %c0_178 = arith.constant 0 : index
    %c0_179 = arith.constant 0 : index
    %300 = vector.load %arg8[%c1_177, %c0_178, %c0_179] : memref<3x64x32xf32, #tpu.memory_space<vmem>>, vector<1x64x32xf32>
    %301 = vector.shape_cast %300 : vector<1x64x32xf32> to vector<64x32xf32>
    %cst_180 = arith.constant dense<0.000000e+00> : vector<18x32xf32>
    %302 = tpu.matmul %293, %301, %cst_180 {dimension_numbers = #tpu.dot_dimension_numbers<[1], [0], [0], [1], [0, 0, 1, 1], [], []>} : vector<18x64xf32>, vector<64x32xf32>, vector<18x32xf32> -> vector<18x32xf32>
    %303 = arith.addf %299, %302 : vector<18x32xf32>
    %304 = vector.extract_strided_slice %293 {offsets = [1, 0], sizes = [17, 64], strides = [1, 1]} : vector<18x64xf32> to vector<17x64xf32>
    %305 = vector.extract_strided_slice %293 {offsets = [0, 0], sizes = [1, 64], strides = [1, 1]} : vector<18x64xf32> to vector<1x64xf32>
    %306 = tpu.concatenate %304, %305 in 0 : vector<17x64xf32>, vector<1x64xf32> -> vector<18x64xf32>
    %c2_181 = arith.constant 2 : index
    %c0_182 = arith.constant 0 : index
    %c0_183 = arith.constant 0 : index
    %307 = vector.load %arg8[%c2_181, %c0_182, %c0_183] : memref<3x64x32xf32, #tpu.memory_space<vmem>>, vector<1x64x32xf32>
    %308 = vector.shape_cast %307 : vector<1x64x32xf32> to vector<64x32xf32>
    %cst_184 = arith.constant dense<0.000000e+00> : vector<18x32xf32>
    %309 = tpu.matmul %306, %308, %cst_184 {dimension_numbers = #tpu.dot_dimension_numbers<[1], [0], [0], [1], [0, 0, 1, 1], [], []>} : vector<18x64xf32>, vector<64x32xf32>, vector<18x32xf32> -> vector<18x32xf32>
    %310 = arith.addf %303, %309 : vector<18x32xf32>
    %c0_185 = arith.constant 0 : index
    %c0_186 = arith.constant 0 : index
    %311 = vector.load %arg9[%c0_185, %c0_186] : memref<1x32xf32, #tpu.memory_space<vmem>>, vector<1x32xf32>
    %312 = vector.broadcast %311 : vector<1x32xf32> to vector<18x32xf32>
    %313 = arith.addf %310, %312 : vector<18x32xf32>
    %cst_187 = arith.constant 0.000000e+00 : f32
    %314 = vector.broadcast %cst_187 : f32 to vector<18x32xf32>
    %315 = arith.maximumf %313, %314 : vector<18x32xf32>
    %316 = vector.extract_strided_slice %315 {offsets = [0, 0], sizes = [16, 32], strides = [1, 1]} : vector<18x32xf32> to vector<16x32xf32>
    %317 = vector.extract_strided_slice %315 {offsets = [1, 0], sizes = [16, 32], strides = [1, 1]} : vector<18x32xf32> to vector<16x32xf32>
    %318 = arith.addf %316, %317 : vector<16x32xf32>
    %319 = vector.extract_strided_slice %315 {offsets = [2, 0], sizes = [16, 32], strides = [1, 1]} : vector<18x32xf32> to vector<16x32xf32>
    %320 = arith.addf %318, %319 : vector<16x32xf32>
    %cst_188 = arith.constant 0.333333343 : f32
    %321 = vector.broadcast %cst_188 : f32 to vector<16x32xf32>
    %322 = arith.mulf %320, %321 : vector<16x32xf32>
    %c0_189 = arith.constant 0 : index
    %c0_190 = arith.constant 0 : index
    %323 = vector.load %arg11[%c0_189, %c0_190] : memref<1x640xf32, #tpu.memory_space<vmem>>, vector<1x640xf32>
    %324 = vector.extract_strided_slice %322 {offsets = [0, 0], sizes = [1, 32], strides = [1, 1]} : vector<16x32xf32> to vector<1x32xf32>
    %c0_191 = arith.constant 0 : index
    %c0_192 = arith.constant 0 : index
    %c0_193 = arith.constant 0 : index
    %325 = vector.load %arg10[%c0_191, %c0_192, %c0_193] : memref<16x32x640xf32, #tpu.memory_space<vmem>>, vector<1x32x640xf32>
    %326 = vector.shape_cast %325 : vector<1x32x640xf32> to vector<32x640xf32>
    %cst_194 = arith.constant dense<0.000000e+00> : vector<1x640xf32>
    %327 = tpu.matmul %324, %326, %cst_194 {dimension_numbers = #tpu.dot_dimension_numbers<[1], [0], [0], [1], [0, 0, 1, 1], [], []>} : vector<1x32xf32>, vector<32x640xf32>, vector<1x640xf32> -> vector<1x640xf32>
    %328 = arith.addf %323, %327 : vector<1x640xf32>
    %329 = vector.extract_strided_slice %322 {offsets = [1, 0], sizes = [1, 32], strides = [1, 1]} : vector<16x32xf32> to vector<1x32xf32>
    %c1_195 = arith.constant 1 : index
    %c0_196 = arith.constant 0 : index
    %c0_197 = arith.constant 0 : index
    %330 = vector.load %arg10[%c1_195, %c0_196, %c0_197] : memref<16x32x640xf32, #tpu.memory_space<vmem>>, vector<1x32x640xf32>
    %331 = vector.shape_cast %330 : vector<1x32x640xf32> to vector<32x640xf32>
    %cst_198 = arith.constant dense<0.000000e+00> : vector<1x640xf32>
    %332 = tpu.matmul %329, %331, %cst_198 {dimension_numbers = #tpu.dot_dimension_numbers<[1], [0], [0], [1], [0, 0, 1, 1], [], []>} : vector<1x32xf32>, vector<32x640xf32>, vector<1x640xf32> -> vector<1x640xf32>
    %333 = arith.addf %328, %332 : vector<1x640xf32>
    %334 = vector.extract_strided_slice %322 {offsets = [2, 0], sizes = [1, 32], strides = [1, 1]} : vector<16x32xf32> to vector<1x32xf32>
    %c2_199 = arith.constant 2 : index
    %c0_200 = arith.constant 0 : index
    %c0_201 = arith.constant 0 : index
    %335 = vector.load %arg10[%c2_199, %c0_200, %c0_201] : memref<16x32x640xf32, #tpu.memory_space<vmem>>, vector<1x32x640xf32>
    %336 = vector.shape_cast %335 : vector<1x32x640xf32> to vector<32x640xf32>
    %cst_202 = arith.constant dense<0.000000e+00> : vector<1x640xf32>
    %337 = tpu.matmul %334, %336, %cst_202 {dimension_numbers = #tpu.dot_dimension_numbers<[1], [0], [0], [1], [0, 0, 1, 1], [], []>} : vector<1x32xf32>, vector<32x640xf32>, vector<1x640xf32> -> vector<1x640xf32>
    %338 = arith.addf %333, %337 : vector<1x640xf32>
    %339 = vector.extract_strided_slice %322 {offsets = [3, 0], sizes = [1, 32], strides = [1, 1]} : vector<16x32xf32> to vector<1x32xf32>
    %c3_203 = arith.constant 3 : index
    %c0_204 = arith.constant 0 : index
    %c0_205 = arith.constant 0 : index
    %340 = vector.load %arg10[%c3_203, %c0_204, %c0_205] : memref<16x32x640xf32, #tpu.memory_space<vmem>>, vector<1x32x640xf32>
    %341 = vector.shape_cast %340 : vector<1x32x640xf32> to vector<32x640xf32>
    %cst_206 = arith.constant dense<0.000000e+00> : vector<1x640xf32>
    %342 = tpu.matmul %339, %341, %cst_206 {dimension_numbers = #tpu.dot_dimension_numbers<[1], [0], [0], [1], [0, 0, 1, 1], [], []>} : vector<1x32xf32>, vector<32x640xf32>, vector<1x640xf32> -> vector<1x640xf32>
    %343 = arith.addf %338, %342 : vector<1x640xf32>
    %344 = vector.extract_strided_slice %322 {offsets = [4, 0], sizes = [1, 32], strides = [1, 1]} : vector<16x32xf32> to vector<1x32xf32>
    %c4_207 = arith.constant 4 : index
    %c0_208 = arith.constant 0 : index
    %c0_209 = arith.constant 0 : index
    %345 = vector.load %arg10[%c4_207, %c0_208, %c0_209] : memref<16x32x640xf32, #tpu.memory_space<vmem>>, vector<1x32x640xf32>
    %346 = vector.shape_cast %345 : vector<1x32x640xf32> to vector<32x640xf32>
    %cst_210 = arith.constant dense<0.000000e+00> : vector<1x640xf32>
    %347 = tpu.matmul %344, %346, %cst_210 {dimension_numbers = #tpu.dot_dimension_numbers<[1], [0], [0], [1], [0, 0, 1, 1], [], []>} : vector<1x32xf32>, vector<32x640xf32>, vector<1x640xf32> -> vector<1x640xf32>
    %348 = arith.addf %343, %347 : vector<1x640xf32>
    %349 = vector.extract_strided_slice %322 {offsets = [5, 0], sizes = [1, 32], strides = [1, 1]} : vector<16x32xf32> to vector<1x32xf32>
    %c5_211 = arith.constant 5 : index
    %c0_212 = arith.constant 0 : index
    %c0_213 = arith.constant 0 : index
    %350 = vector.load %arg10[%c5_211, %c0_212, %c0_213] : memref<16x32x640xf32, #tpu.memory_space<vmem>>, vector<1x32x640xf32>
    %351 = vector.shape_cast %350 : vector<1x32x640xf32> to vector<32x640xf32>
    %cst_214 = arith.constant dense<0.000000e+00> : vector<1x640xf32>
    %352 = tpu.matmul %349, %351, %cst_214 {dimension_numbers = #tpu.dot_dimension_numbers<[1], [0], [0], [1], [0, 0, 1, 1], [], []>} : vector<1x32xf32>, vector<32x640xf32>, vector<1x640xf32> -> vector<1x640xf32>
    %353 = arith.addf %348, %352 : vector<1x640xf32>
    %354 = vector.extract_strided_slice %322 {offsets = [6, 0], sizes = [1, 32], strides = [1, 1]} : vector<16x32xf32> to vector<1x32xf32>
    %c6_215 = arith.constant 6 : index
    %c0_216 = arith.constant 0 : index
    %c0_217 = arith.constant 0 : index
    %355 = vector.load %arg10[%c6_215, %c0_216, %c0_217] : memref<16x32x640xf32, #tpu.memory_space<vmem>>, vector<1x32x640xf32>
    %356 = vector.shape_cast %355 : vector<1x32x640xf32> to vector<32x640xf32>
    %cst_218 = arith.constant dense<0.000000e+00> : vector<1x640xf32>
    %357 = tpu.matmul %354, %356, %cst_218 {dimension_numbers = #tpu.dot_dimension_numbers<[1], [0], [0], [1], [0, 0, 1, 1], [], []>} : vector<1x32xf32>, vector<32x640xf32>, vector<1x640xf32> -> vector<1x640xf32>
    %358 = arith.addf %353, %357 : vector<1x640xf32>
    %359 = vector.extract_strided_slice %322 {offsets = [7, 0], sizes = [1, 32], strides = [1, 1]} : vector<16x32xf32> to vector<1x32xf32>
    %c7_219 = arith.constant 7 : index
    %c0_220 = arith.constant 0 : index
    %c0_221 = arith.constant 0 : index
    %360 = vector.load %arg10[%c7_219, %c0_220, %c0_221] : memref<16x32x640xf32, #tpu.memory_space<vmem>>, vector<1x32x640xf32>
    %361 = vector.shape_cast %360 : vector<1x32x640xf32> to vector<32x640xf32>
    %cst_222 = arith.constant dense<0.000000e+00> : vector<1x640xf32>
    %362 = tpu.matmul %359, %361, %cst_222 {dimension_numbers = #tpu.dot_dimension_numbers<[1], [0], [0], [1], [0, 0, 1, 1], [], []>} : vector<1x32xf32>, vector<32x640xf32>, vector<1x640xf32> -> vector<1x640xf32>
    %363 = arith.addf %358, %362 : vector<1x640xf32>
    %364 = vector.extract_strided_slice %322 {offsets = [8, 0], sizes = [1, 32], strides = [1, 1]} : vector<16x32xf32> to vector<1x32xf32>
    %c8_223 = arith.constant 8 : index
    %c0_224 = arith.constant 0 : index
    %c0_225 = arith.constant 0 : index
    %365 = vector.load %arg10[%c8_223, %c0_224, %c0_225] : memref<16x32x640xf32, #tpu.memory_space<vmem>>, vector<1x32x640xf32>
    %366 = vector.shape_cast %365 : vector<1x32x640xf32> to vector<32x640xf32>
    %cst_226 = arith.constant dense<0.000000e+00> : vector<1x640xf32>
    %367 = tpu.matmul %364, %366, %cst_226 {dimension_numbers = #tpu.dot_dimension_numbers<[1], [0], [0], [1], [0, 0, 1, 1], [], []>} : vector<1x32xf32>, vector<32x640xf32>, vector<1x640xf32> -> vector<1x640xf32>
    %368 = arith.addf %363, %367 : vector<1x640xf32>
    %369 = vector.extract_strided_slice %322 {offsets = [9, 0], sizes = [1, 32], strides = [1, 1]} : vector<16x32xf32> to vector<1x32xf32>
    %c9_227 = arith.constant 9 : index
    %c0_228 = arith.constant 0 : index
    %c0_229 = arith.constant 0 : index
    %370 = vector.load %arg10[%c9_227, %c0_228, %c0_229] : memref<16x32x640xf32, #tpu.memory_space<vmem>>, vector<1x32x640xf32>
    %371 = vector.shape_cast %370 : vector<1x32x640xf32> to vector<32x640xf32>
    %cst_230 = arith.constant dense<0.000000e+00> : vector<1x640xf32>
    %372 = tpu.matmul %369, %371, %cst_230 {dimension_numbers = #tpu.dot_dimension_numbers<[1], [0], [0], [1], [0, 0, 1, 1], [], []>} : vector<1x32xf32>, vector<32x640xf32>, vector<1x640xf32> -> vector<1x640xf32>
    %373 = arith.addf %368, %372 : vector<1x640xf32>
    %374 = vector.extract_strided_slice %322 {offsets = [10, 0], sizes = [1, 32], strides = [1, 1]} : vector<16x32xf32> to vector<1x32xf32>
    %c10_231 = arith.constant 10 : index
    %c0_232 = arith.constant 0 : index
    %c0_233 = arith.constant 0 : index
    %375 = vector.load %arg10[%c10_231, %c0_232, %c0_233] : memref<16x32x640xf32, #tpu.memory_space<vmem>>, vector<1x32x640xf32>
    %376 = vector.shape_cast %375 : vector<1x32x640xf32> to vector<32x640xf32>
    %cst_234 = arith.constant dense<0.000000e+00> : vector<1x640xf32>
    %377 = tpu.matmul %374, %376, %cst_234 {dimension_numbers = #tpu.dot_dimension_numbers<[1], [0], [0], [1], [0, 0, 1, 1], [], []>} : vector<1x32xf32>, vector<32x640xf32>, vector<1x640xf32> -> vector<1x640xf32>
    %378 = arith.addf %373, %377 : vector<1x640xf32>
    %379 = vector.extract_strided_slice %322 {offsets = [11, 0], sizes = [1, 32], strides = [1, 1]} : vector<16x32xf32> to vector<1x32xf32>
    %c11_235 = arith.constant 11 : index
    %c0_236 = arith.constant 0 : index
    %c0_237 = arith.constant 0 : index
    %380 = vector.load %arg10[%c11_235, %c0_236, %c0_237] : memref<16x32x640xf32, #tpu.memory_space<vmem>>, vector<1x32x640xf32>
    %381 = vector.shape_cast %380 : vector<1x32x640xf32> to vector<32x640xf32>
    %cst_238 = arith.constant dense<0.000000e+00> : vector<1x640xf32>
    %382 = tpu.matmul %379, %381, %cst_238 {dimension_numbers = #tpu.dot_dimension_numbers<[1], [0], [0], [1], [0, 0, 1, 1], [], []>} : vector<1x32xf32>, vector<32x640xf32>, vector<1x640xf32> -> vector<1x640xf32>
    %383 = arith.addf %378, %382 : vector<1x640xf32>
    %384 = vector.extract_strided_slice %322 {offsets = [12, 0], sizes = [1, 32], strides = [1, 1]} : vector<16x32xf32> to vector<1x32xf32>
    %c12_239 = arith.constant 12 : index
    %c0_240 = arith.constant 0 : index
    %c0_241 = arith.constant 0 : index
    %385 = vector.load %arg10[%c12_239, %c0_240, %c0_241] : memref<16x32x640xf32, #tpu.memory_space<vmem>>, vector<1x32x640xf32>
    %386 = vector.shape_cast %385 : vector<1x32x640xf32> to vector<32x640xf32>
    %cst_242 = arith.constant dense<0.000000e+00> : vector<1x640xf32>
    %387 = tpu.matmul %384, %386, %cst_242 {dimension_numbers = #tpu.dot_dimension_numbers<[1], [0], [0], [1], [0, 0, 1, 1], [], []>} : vector<1x32xf32>, vector<32x640xf32>, vector<1x640xf32> -> vector<1x640xf32>
    %388 = arith.addf %383, %387 : vector<1x640xf32>
    %389 = vector.extract_strided_slice %322 {offsets = [13, 0], sizes = [1, 32], strides = [1, 1]} : vector<16x32xf32> to vector<1x32xf32>
    %c13_243 = arith.constant 13 : index
    %c0_244 = arith.constant 0 : index
    %c0_245 = arith.constant 0 : index
    %390 = vector.load %arg10[%c13_243, %c0_244, %c0_245] : memref<16x32x640xf32, #tpu.memory_space<vmem>>, vector<1x32x640xf32>
    %391 = vector.shape_cast %390 : vector<1x32x640xf32> to vector<32x640xf32>
    %cst_246 = arith.constant dense<0.000000e+00> : vector<1x640xf32>
    %392 = tpu.matmul %389, %391, %cst_246 {dimension_numbers = #tpu.dot_dimension_numbers<[1], [0], [0], [1], [0, 0, 1, 1], [], []>} : vector<1x32xf32>, vector<32x640xf32>, vector<1x640xf32> -> vector<1x640xf32>
    %393 = arith.addf %388, %392 : vector<1x640xf32>
    %394 = vector.extract_strided_slice %322 {offsets = [14, 0], sizes = [1, 32], strides = [1, 1]} : vector<16x32xf32> to vector<1x32xf32>
    %c14_247 = arith.constant 14 : index
    %c0_248 = arith.constant 0 : index
    %c0_249 = arith.constant 0 : index
    %395 = vector.load %arg10[%c14_247, %c0_248, %c0_249] : memref<16x32x640xf32, #tpu.memory_space<vmem>>, vector<1x32x640xf32>
    %396 = vector.shape_cast %395 : vector<1x32x640xf32> to vector<32x640xf32>
    %cst_250 = arith.constant dense<0.000000e+00> : vector<1x640xf32>
    %397 = tpu.matmul %394, %396, %cst_250 {dimension_numbers = #tpu.dot_dimension_numbers<[1], [0], [0], [1], [0, 0, 1, 1], [], []>} : vector<1x32xf32>, vector<32x640xf32>, vector<1x640xf32> -> vector<1x640xf32>
    %398 = arith.addf %393, %397 : vector<1x640xf32>
    %399 = vector.extract_strided_slice %322 {offsets = [15, 0], sizes = [1, 32], strides = [1, 1]} : vector<16x32xf32> to vector<1x32xf32>
    %c15_251 = arith.constant 15 : index
    %c0_252 = arith.constant 0 : index
    %c0_253 = arith.constant 0 : index
    %400 = vector.load %arg10[%c15_251, %c0_252, %c0_253] : memref<16x32x640xf32, #tpu.memory_space<vmem>>, vector<1x32x640xf32>
    %401 = vector.shape_cast %400 : vector<1x32x640xf32> to vector<32x640xf32>
    %cst_254 = arith.constant dense<0.000000e+00> : vector<1x640xf32>
    %402 = tpu.matmul %399, %401, %cst_254 {dimension_numbers = #tpu.dot_dimension_numbers<[1], [0], [0], [1], [0, 0, 1, 1], [], []>} : vector<1x32xf32>, vector<32x640xf32>, vector<1x640xf32> -> vector<1x640xf32>
    %403 = arith.addf %398, %402 : vector<1x640xf32>
    %cst_255 = arith.constant 0.000000e+00 : f32
    %404 = vector.broadcast %cst_255 : f32 to vector<1x640xf32>
    %405 = arith.maximumf %403, %404 : vector<1x640xf32>
    %c0_256 = arith.constant 0 : index
    %c0_257 = arith.constant 0 : index
    %406 = vector.load %arg12[%c0_256, %c0_257] : memref<640x128xf32, #tpu.memory_space<vmem>>, vector<640x128xf32>
    %cst_258 = arith.constant dense<0.000000e+00> : vector<1x128xf32>
    %407 = tpu.matmul %405, %406, %cst_258 {dimension_numbers = #tpu.dot_dimension_numbers<[1], [0], [0], [1], [0, 0, 1, 1], [], []>} : vector<1x640xf32>, vector<640x128xf32>, vector<1x128xf32> -> vector<1x128xf32>
    %c0_259 = arith.constant 0 : index
    %c0_260 = arith.constant 0 : index
    %408 = vector.load %arg13[%c0_259, %c0_260] : memref<1x128xf32, #tpu.memory_space<vmem>>, vector<1x128xf32>
    %409 = arith.addf %407, %408 : vector<1x128xf32>
    %410 = tpu.concatenate %204, %409 in 0 : vector<1x128xf32>, vector<1x128xf32> -> vector<2x128xf32>
    %c0_261 = arith.constant 0 : index
    %c0_262 = arith.constant 0 : index
    %411 = vector.load %arg14[%c0_261, %c0_262] : memref<2x128xf32, #tpu.memory_space<vmem>>, vector<2x128xf32>
    tpu.vector_store %arg14[%c0_261, %c0_262], %410 {strides = array<i32>} : memref<2x128xf32, #tpu.memory_space<vmem>>, vector<2x128xf32>,
    return
  }
  func.func @transform_0(%arg0: i32) -> (i32, i32, i32) {
    %c0_i32 = arith.constant 0 : i32
    %c0_i32_0 = arith.constant 0 : i32
    %c0_i32_1 = arith.constant 0 : i32
    %c0_i32_2 = arith.constant 0 : i32
    return %c0_i32, %c0_i32_0, %c0_i32_1 : i32, i32, i32
  }
  func.func @transform_1(%arg0: i32) -> (i32, i32, i32) {
    %c0_i32 = arith.constant 0 : i32
    %c0_i32_0 = arith.constant 0 : i32
    %c0_i32_1 = arith.constant 0 : i32
    %c0_i32_2 = arith.constant 0 : i32
    return %c0_i32, %c0_i32_0, %c0_i32_1 : i32, i32, i32
  }
  func.func @transform_2(%arg0: i32) -> (i32, i32) {
    %c0_i32 = arith.constant 0 : i32
    %c0_i32_0 = arith.constant 0 : i32
    %c0_i32_1 = arith.constant 0 : i32
    return %c0_i32, %c0_i32_0 : i32, i32
  }
  func.func @transform_3(%arg0: i32) -> (i32, i32, i32) {
    %c0_i32 = arith.constant 0 : i32
    %c0_i32_0 = arith.constant 0 : i32
    %c0_i32_1 = arith.constant 0 : i32
    %c0_i32_2 = arith.constant 0 : i32
    return %c0_i32, %c0_i32_0, %c0_i32_1 : i32, i32, i32
  }
  func.func @transform_4(%arg0: i32) -> (i32, i32) {
    %c0_i32 = arith.constant 0 : i32
    %c0_i32_0 = arith.constant 0 : i32
    %c0_i32_1 = arith.constant 0 : i32
    return %c0_i32, %c0_i32_0 : i32, i32
  }
  func.func @transform_5(%arg0: i32) -> (i32, i32, i32) {
    %c0_i32 = arith.constant 0 : i32
    %c0_i32_0 = arith.constant 0 : i32
    %c0_i32_1 = arith.constant 0 : i32
    %c0_i32_2 = arith.constant 0 : i32
    return %c0_i32, %c0_i32_0, %c0_i32_1 : i32, i32, i32
  }
  func.func @transform_6(%arg0: i32) -> (i32, i32) {
    %c0_i32 = arith.constant 0 : i32
    %c0_i32_0 = arith.constant 0 : i32
    %c0_i32_1 = arith.constant 0 : i32
    return %c0_i32, %c0_i32_0 : i32, i32
  }
  func.func @transform_7(%arg0: i32) -> (i32, i32, i32) {
    %c0_i32 = arith.constant 0 : i32
    %c0_i32_0 = arith.constant 0 : i32
    %c0_i32_1 = arith.constant 0 : i32
    %c0_i32_2 = arith.constant 0 : i32
    return %c0_i32, %c0_i32_0, %c0_i32_1 : i32, i32, i32
  }
  func.func @transform_8(%arg0: i32) -> (i32, i32) {
    %c0_i32 = arith.constant 0 : i32
    %c0_i32_0 = arith.constant 0 : i32
    %c0_i32_1 = arith.constant 0 : i32
    return %c0_i32, %c0_i32_0 : i32, i32
  }
  func.func @transform_9(%arg0: i32) -> (i32, i32, i32) {
    %c0_i32 = arith.constant 0 : i32
    %c0_i32_0 = arith.constant 0 : i32
    %c0_i32_1 = arith.constant 0 : i32
    %c0_i32_2 = arith.constant 0 : i32
    return %c0_i32, %c0_i32_0, %c0_i32_1 : i32, i32, i32
  }
  func.func @transform_10(%arg0: i32) -> (i32, i32) {
    %c0_i32 = arith.constant 0 : i32
    %c0_i32_0 = arith.constant 0 : i32
    %c0_i32_1 = arith.constant 0 : i32
    return %c0_i32, %c0_i32_0 : i32, i32
  }
  func.func @transform_11(%arg0: i32) -> (i32, i32) {
    %c0_i32 = arith.constant 0 : i32
    %c0_i32_0 = arith.constant 0 : i32
    %c0_i32_1 = arith.constant 0 : i32
    return %c0_i32, %c0_i32_0 : i32, i32
  }
  func.func @transform_12(%arg0: i32) -> (i32, i32) {
    %c0_i32 = arith.constant 0 : i32
    %c0_i32_0 = arith.constant 0 : i32
    %c0_i32_1 = arith.constant 0 : i32
    return %c0_i32, %c0_i32_0 : i32, i32
  }
  func.func @transform_13(%arg0: i32) -> (i32, i32) {
    %c0_i32 = arith.constant 0 : i32
    %c0_i32_0 = arith.constant 0 : i32
    %c0_i32_1 = arith.constant 0 : i32
    return %c0_i32, %c0_i32_0 : i32, i32
  }
}

</mosaic_0001>

<bundles_post_ra>
// kernel: model4_forward.1
= control target key start
LH: loop header
LB: loop body
LE: loop exit
PB: predicated region body
PF: predicated region fallthrough
CT: control target
= control target key end

     0   :  { %v14446_v1 = vmov 0.0   ;;  %vm14447_vm0 = vmmov 0   ;;  %s18580_s0 = inlined_call_operand.vmem [shape: f32[2,24,32], index: 0, kind: input, shape index: {}]   ;;  %s18581_s1 = inlined_call_operand.vmem [shape: f32[3,32,32], index: 1, kind: input, shape index: {}]   ;;  %s18582_s2 = inlined_call_operand.vmem [shape: f32[1,32], index: 2, kind: input, shape index: {}]   ;;  %s18583_s3 = inlined_call_operand.vmem [shape: f32[3,32,64], index: 3, kind: input, shape index: {}]   ;;  %s18584_s4 = inlined_call_operand.vmem [shape: f32[1,64], index: 4, kind: input, shape index: {}]   ;;  %s18585_s5 = inlined_call_operand.vmem [shape: f32[3,64,64], index: 5, kind: input, shape index: {}]   ;;  %s18586_s6 = inlined_call_operand.vmem [shape: f32[1,64], index: 6, kind: input, shape index: {}]   ;;  %s18587_s7 = inlined_call_operand.vmem [shape: f32[3,64,32], index: 7, kind: input, shape index: {}]   ;;  %s18588_s8 = inlined_call_operand.vmem [shape: f32[1,32], index: 8, kind: input, shape index: {}]   ;;  %s18589_s9 = inlined_call_operand.vmem [shape: f32[16,32,640], index: 9, kind: input, shape index: {}]   ;;  %s18590_s10 = inlined_call_operand.vmem [shape: f32[1,640], index: 10, kind: input, shape index: {}]   ;;  %s18591_s11 = inlined_call_operand.vmem [shape: f32[640,128], index: 11, kind: input, shape index: {}]   ;;  %s18592_s12 = inlined_call_operand.vmem [shape: f32[1,128], index: 12, kind: input, shape index: {}]   ;;  %s18593_s13 = inlined_call_operand.hbm [shape: f32[2,128], index: 13, kind: output, shape index: {}]  }
   0x1   :  { %v11946_v0 = vld [vmem:[%s18581_s1 + $0x38] sm:$0xff]  ;;  %13016 = vmatprep.subr.mxu0 %v14446_v1  ;;  %v11945_v2 = vld [vmem:[%s18581_s1 + $0x30] sm:$0xff]  ;;  %13024 = vmatprep.mubr.msk.f32.mxu0 %vm14447_vm0, %v14446_v1  ;;  %v11944_v3 = vld [vmem:[%s18581_s1 + $0x28] sm:$0xff] }
   0x2   :  { %13017 = vmatpush3.msra.mxu0 %v11946_v0  ;;  %13067 = vmatprep.subr.mxu1 %v14446_v1  ;;  %v11943_v4 = vld [vmem:[%s18581_s1 + $0x20] sm:$0xff] }
   0x3   :  { %13018 = vmatprep.subr.mxu0 %v14446_v1  ;;  %13075 = vmatprep.mubr.msk.f32.mxu1 %vm14447_vm0, %v14446_v1 }
   0x4   :  { %13019 = vmatpush3.msra.mxu0 %v11945_v2 }
   0x5   :  { %13020 = vmatprep.subr.mxu0 %v14446_v1 }
   0x6   :  { %18 = vsyncpa [#allocation3], 0  ;;  %13021 = vmatpush3.msra.mxu0 %v11944_v3  ;;  %v45_v5 = vld [vmem:[%s18580_s0] sm:$0xff]  ;;  %vm69_vm1 = vcmask 261120   ;;  %v63_v6 = vld [vmem:[%s18581_s1 + $0x18] sm:$0xff]  ;;  %vm53_vm2 = vcmask 1040384  }
   0x7   :  { %13022 = vmatprep.subr.mxu0 %v14446_v1  ;;  %v62_v7 = vld [vmem:[%s18581_s1 + $0x10] sm:$0xff]  ;;  %v46_v8 = vld [vmem:[%s18580_s0 + $0x8] sm:$0xff]  ;;  %v60_v11 = vld [vmem:[%s18581_s1] sm:$0xff]  ;;  %v54_v12 = vrot.slane %v45_v5, 7  ;;  %v244_v21 = vrot.slane %v45_v5, 1  ;;  %vm243_vm3 = vcmask 1046528  }
   0x8   :  { %13023 = vmatpush3.msra.mxu0 %v11943_v4  ;;  %v61_v9 = vld [vmem:[%s18581_s1 + $0x8] sm:$0xff]  ;;  %v47_v10 = vld [vmem:[%s18580_s0 + $0x10] sm:$0xff]  ;;  %v55_v14 = vrot.slane %v46_v8, 7  ;;  %v11956_v16 = vld [vmem:[%s18581_s1 + $0x58] sm:$0xff]  ;;  %v245_v22 = vrot.slane %v46_v8, 1  ;;  %vm374_vm4 = vcmask 1045504  }
   0x9   :  { %13025 = vmatmul.mubr.msk.f32.vlgmr.msra.gmra.mxu0 %vm69_vm1, %v45_v5  ;;  %13033 = vmatprep.subr.mxu0 %v14446_v1  ;;  %v49_v13 = vrot.slane %v47_v10, 7  ;;  %v11955_v17 = vld [vmem:[%s18581_s1 + $0x50] sm:$0xff]  ;;  %v11954_v19 = vld [vmem:[%s18581_s1 + $0x48] sm:$0xff]  ;;  %v11953_v20 = vld [vmem:[%s18581_s1 + $0x40] sm:$0xff]  ;;  %v247_v24 = vrot.slane %v47_v10, 1  ;;  %vm591_vm5 = vcmask 1044480  }
   0xa   :  { %13034 = vmatpush3.msra.mxu0 %v63_v6  ;;  %13027 = vmatprep.mubr.msk.f32.mxu0 %vm14447_vm0, %v14446_v1  ;;  %v56_v18 = vsel %vm53_vm2, %v54_v12, %v55_v14  ;;  %v246_v25 = vsel %vm243_vm3, %v244_v21, %v245_v22  ;;  %v11964_v28 = vld [vmem:[%s18583_s3 + $0x38] sm:$0xff]  ;;  %v11963_v29 = vld [vmem:[%s18583_s3 + $0x30] sm:$0xff]  ;;  %v11962_v30 = vld [vmem:[%s18583_s3 + $0x28] sm:$0xff]  ;;  %vm758_vm6 = vcmask 523264   ;;  %vm940_vm7 = vcmask 1042432   ;;  %s14449_s15 = smov [#allocation2]  }
   0xb   :  { %13035 = vmatprep.subr.mxu0 %v14446_v1  ;;  %v59_v15 = vsel %vm53_vm2, %v49_v13, %v54_v12  ;;  %v57_v23 = vsel %vm53_vm2, %v55_v14, %v49_v13  ;;  %v248_v26 = vsel %vm243_vm3, %v245_v22, %v247_v24  ;;  %v251_v27 = vsel %vm243_vm3, %v247_v24, %v244_v21  ;;  %v11961_v31 = vld [vmem:[%s18583_s3 + $0x20] sm:$0xff]  ;;  %v404_v32 = vld [vmem:[%s18583_s3 + $0x18] sm:$0xff]  ;;  %v403_v33 = vld [vmem:[%s18583_s3 + $0x10] sm:$0xff]  ;;  %s11935_s16 = sshll.u32 %s14449_s15, 4  ;;  %s11936_s16 = int_to_ptr.vmem [resolvable:$true] %s11935_s16 }
   0xc   :  { %13036 = vmatpush3.msra.mxu0 %v62_v7  ;;  %13068 = vmatpush3.msra.mxu1 %v11964_v28  ;;  %v402_v34 = vld [vmem:[%s18583_s3 + $0x8] sm:$0xff]  ;;  %v401_v35 = vld [vmem:[%s18583_s3] sm:$0xff]  ;;  %v11973_v22 = vld [vmem:[%s18583_s3 + $0x50] sm:$0xff]  ;;  %p14429_p1 = scmp.lt.s32.totalorder %s11936_s16, %s11936_s16 }
   0xd   :  { %13028 = vmatmul.mubr.msk.f32.gmra.mxu0 %vm69_vm1, %v46_v8  ;;  %13037 = vmatprep.subr.mxu0 %v14446_v1  ;;  %v11960_v50 = vld [vmem:[%s18582_s2] ss:$0 sm:$0xff] }
   0xe   :  { %13030 = vmatprep.mubr.msk.f32.mxu0 %vm14447_vm0, %v14446_v1  ;;  %13038 = vmatpush3.msra.mxu0 %v61_v9  ;;  %v11971_v28 = vld [vmem:[%s18583_s3 + $0x40] sm:$0xff] }
   0xf   :  { %13039 = vmatprep.subr.mxu0 %v14446_v1  ;;  %13069 = vmatprep.subr.mxu1 %v14446_v1 }
  0x10   :  { %13040 = vmatpush3.msra.mxu0 %v60_v11  ;;  %13070 = vmatpush3.msra.mxu1 %v11963_v29 }
  0x11   :  { %13031 = vmatmul.mubr.msk.f32.gmra.mxu0 %vm69_vm1, %v47_v10  ;;  %13050 = vmatprep.subr.mxu0 %v14446_v1 }
  0x12   :  { %13041 = vmatprep.mubr.msk.f32.mxu0 %vm14447_vm0, %v14446_v1  ;;  %13071 = vmatprep.subr.mxu1 %v14446_v1 }
  0x13   :  { %13072 = vmatpush3.msra.mxu1 %v11962_v30 }
  0x14   :  { %13073 = vmatprep.subr.mxu1 %v14446_v1 }
  0x15   :  { %13042 = vmatmul.mubr.msk.f32.vlgmr.msra.gmra.mxu0 %vm69_vm1, %v59_v15  ;;  %13074 = vmatpush3.msra.mxu1 %v11961_v31 }
  0x16   :  { %13051 = vmatpush3.msra.mxu0 %v11956_v16  ;;  %13044 = vmatprep.mubr.msk.f32.mxu0 %vm14447_vm0, %v14446_v1 }
  0x17   :  { %13052 = vmatprep.subr.mxu0 %v14446_v1  ;;  %13101 = vmatprep.subr.mxu1 %v14446_v1 }
  0x18   :  { %13053 = vmatpush3.msra.mxu0 %v11955_v17  ;;  %v11974_v17 = vld [vmem:[%s18583_s3 + $0x58] sm:$0xff] }
  0x19   :  { %13045 = vmatmul.mubr.msk.f32.gmra.mxu0 %vm69_vm1, %v56_v18  ;;  %13054 = vmatprep.subr.mxu0 %v14446_v1 }
  0x1a   :  { %13047 = vmatprep.mubr.msk.f32.mxu0 %vm14447_vm0, %v14446_v1  ;;  %13055 = vmatpush3.msra.mxu0 %v11954_v19 }
  0x1b   :  { %13056 = vmatprep.subr.mxu0 %v14446_v1 }
  0x1c   :  { %13057 = vmatpush3.msra.mxu0 %v11953_v20 }
  0x1d   :  { %13048 = vmatmul.mubr.msk.f32.gmra.mxu0 %vm69_vm1, %v57_v23  ;;  %13084 = vmatprep.subr.mxu0 %v14446_v1 }
  0x1e   :  { %13058 = vmatprep.mubr.msk.f32.mxu0 %vm14447_vm0, %v14446_v1 }
  0x21   :  { %13059 = vmatmul.mubr.msk.f32.vlgmr.msra.gmra.mxu0 %vm69_vm1, %v246_v25  ;;  %v11972_v25 = vld [vmem:[%s18583_s3 + $0x48] sm:$0xff] }
  0x22   :  { %13061 = vmatprep.mubr.msk.f32.mxu0 %vm14447_vm0, %v14446_v1  ;;  %13085 = vmatpush3.msra.mxu0 %v404_v32 }
  0x23   :  { %13086 = vmatprep.subr.mxu0 %v14446_v1 }
  0x24   :  { %13087 = vmatpush3.msra.mxu0 %v403_v33 }
  0x25   :  { %13062 = vmatmul.mubr.msk.f32.gmra.mxu0 %vm69_vm1, %v248_v26  ;;  %13088 = vmatprep.subr.mxu0 %v14446_v1 }
  0x26   :  { %13064 = vmatprep.mubr.msk.f32.mxu0 %vm14447_vm0, %v14446_v1  ;;  %13089 = vmatpush3.msra.mxu0 %v402_v34 }
  0x27   :  { %13090 = vmatprep.subr.mxu0 %v14446_v1 }
  0x28   :  { %13091 = vmatpush3.msra.mxu0 %v401_v35 }
  0x29   :  { %13065 = vmatmul.mubr.msk.f32.gmra.mxu0 %vm69_vm1, %v251_v27  ;;  %13118 = vmatprep.subr.mxu0 %v14446_v1 }
  0x2a   :  { %13092 = vmatprep.mubr.msk.f32.mxu0 %vm14447_vm0, %v14446_v1 }
  0xc9   :  { %v142_v36 = vpop.f32.mrf.mxu0 }
  0xcb   :  { %v13026_v37 = vpop.f32.mrf.mxu0 }
  0xcd   :  { %v147_v38 = vpop.f32.mrf.mxu0 }
  0xcf   :  { %v13029_v39 = vpop.f32.mrf.mxu0 }
  0xd1   :  { %v152_v40 = vpop.f32.mrf.mxu0 }
  0xd3   :  { %v13032_v41 = vpop.f32.mrf.mxu0 }
  0xd4   :  { %v11986_v41 = vld [vmem:[%s18585_s5 + $0x78] sm:$0xff] }
  0xd5   :  { %v229_v42 = vpop.f32.mrf.mxu0 }
  0xd6   :  { %v230_v48 = vadd.f32 %v229_v42, %v142_v36  ;;  %v11985_v42 = vld [vmem:[%s18585_s5 + $0x70] sm:$0xff] }
  0xd7   :  { %v13043_v43 = vpop.f32.mrf.mxu0 }
  0xd8   :  { %v11984_v43 = vld [vmem:[%s18585_s5 + $0x68] sm:$0xff] }
  0xd9   :  { %v234_v44 = vpop.f32.mrf.mxu0 }
  0xda   :  { %v235_v53 = vadd.f32 %v234_v44, %v147_v38  ;;  %v11983_v44 = vld [vmem:[%s18585_s5 + $0x60] sm:$0xff] }
  0xdb   :  { %v13046_v45 = vpop.f32.mrf.mxu0 }
  0xdc   :  { %v748_v45 = vld [vmem:[%s18585_s5 + $0x38] sm:$0xff] }
  0xdd   :  { %v239_v46 = vpop.f32.mrf.mxu0 }
  0xde   :  { %v240_v58 = vadd.f32 %v239_v46, %v152_v40  ;;  %v11982_v46 = vld [vmem:[%s18585_s5 + $0x58] sm:$0xff] }
  0xdf   :  { %v13049_v47 = vpop.f32.mrf.mxu0 }
  0xe0   :  { %v747_v47 = vld [vmem:[%s18585_s5 + $0x30] sm:$0xff] }
  0xe1   :  { %v330_v49 = vpop.f32.mrf.mxu0 }
  0xe2   :  { %v344_v51 = vadd.f32 %v330_v49, %v230_v48  ;;  %v11981_v48 = vld [vmem:[%s18585_s5 + $0x50] sm:$0xff]  ;;  %v746_v49 = vld [vmem:[%s18585_s5 + $0x28] sm:$0xff] }
  0xe3   :  { %v13060_v52 = vpop.f32.mrf.mxu0 }
  0xe4   :  { %v354_v54 = vadd.f32 %v11960_v50, %v344_v51  ;;  %v745_v51 = vld [vmem:[%s18585_s5 + $0x20] sm:$0xff] }
  0xe5   :  { %v335_v55 = vpop.f32.mrf.mxu0  ;;  %v11979_v52 = vld [vmem:[%s18585_s5 + $0x40] sm:$0xff] }
  0xe6   :  { %v345_v56 = vadd.f32 %v335_v55, %v235_v53  ;;  %v357_v59 = vmax.f32 %v354_v54, 0.0  ;;  %v744_v53 = vld [vmem:[%s18585_s5 + $0x18] sm:$0xff]  ;;  %v743_v54 = vld [vmem:[%s18585_s5 + $0x10] sm:$0xff]  ;;  %v742_v55 = vld [vmem:[%s18585_s5 + $0x8] sm:$0xff] }
  0xe7   :  { %v13063_v57 = vpop.f32.mrf.mxu0 }
  0xe8   :  { %v355_v60 = vadd.f32 %v11960_v50, %v345_v56  ;;  %v363_v2 = vrot.slane %v357_v59, 1  ;;  %v375_v6 = vrot.slane %v357_v59, 2  ;;  %v741_v56 = vld [vmem:[%s18585_s5] sm:$0xff] }
  0xe9   :  { %v340_v61 = vpop.f32.mrf.mxu0 }
  0xea   :  { %v358_v62 = vmax.f32 %v355_v60, 0.0  ;;  %v346_v63 = vadd.f32 %v340_v61, %v240_v58 }
  0xeb   :  { %v13066_v0 = vpop.f32.mrf.mxu0 }
  0xec   :  { %v364_v3 = vrot.slane %v358_v62, 1  ;;  %v376_v4 = vrot.slane %v358_v62, 2  ;;  %v356_v5 = vadd.f32 %v11960_v50, %v346_v63  ;;  %v11980_v50 = vld [vmem:[%s18585_s5 + $0x48] sm:$0xff] }
  0xee   :  { %v359_v7 = vmax.f32 %v356_v5, 0.0  ;;  %v365_v8 = vsel %vm243_vm3, %v363_v2, %v364_v3  ;;  %v377_v12 = vsel %vm374_vm4, %v375_v6, %v376_v4  ;;  %v11978_v6 = vld [vmem:[%s18584_s4] ss:$0 sm:$0xff] }
  0xef   :  { %v371_v9 = vadd.f32 %v365_v8, %v357_v59 }
  0xf0   :  { %v366_v10 = vrot.slane %v359_v7, 1  ;;  %v378_v11 = vrot.slane %v359_v7, 2 }
  0xf1   :  { %v383_v13 = vadd.f32 %v377_v12, %v371_v9 }
  0xf2   :  { %v373_v14 = vadd.f32 %v366_v10, %v359_v7  ;;  %v367_v15 = vsel %vm243_vm3, %v364_v3, %v366_v10  ;;  %v379_v20 = vsel %vm374_vm4, %v376_v4, %v378_v11 }
  0xf3   :  { %v386_v16 = vmul.f32 0.33333334, %v383_v13  ;;  %v372_v18 = vadd.f32 %v367_v15, %v358_v62 }
  0xf4   :  { %v385_v19 = vadd.f32 %v378_v11, %v373_v14 }
  0xf5   :  { %13076 = vmatmul.mubr.msk.f32.vlgmr.msra.gmra.mxu1 %vm69_vm1, %v386_v16  ;;  %v384_v21 = vadd.f32 %v379_v20, %v372_v18  ;;  %v394_v27 = vrot.slane %v386_v16, 7  ;;  %v583_v33 = vrot.slane %v386_v16, 1  ;;  %v589_v39 = vrot.slane %v386_v16, 3 }
  0xf6   :  { %v388_v23 = vmul.f32 0.33333334, %v385_v19  ;;  %13102 = vmatpush3.msra.mxu1 %v11974_v17  ;;  %13078 = vmatprep.mubr.msk.f32.mxu1 %vm14447_vm0, %v14446_v1 }
  0xf7   :  { %13103 = vmatprep.subr.mxu1 %v14446_v1  ;;  %v387_v24 = vmul.f32 0.33333334, %v384_v21 }
  0xf8   :  { %13104 = vmatpush3.msra.mxu1 %v11973_v22  ;;  %v390_v26 = vrot.slane %v388_v23, 5  ;;  %v397_v34 = vrot.slane %v388_v23, 7  ;;  %v586_v36 = vrot.slane %v388_v23, 1 }
  0xf9   :  { %13079 = vmatmul.mubr.msk.f32.gmra.mxu1 %vm69_vm1, %v387_v24  ;;  %13105 = vmatprep.subr.mxu1 %v14446_v1  ;;  %v395_v30 = vrot.slane %v387_v24, 7  ;;  %v584_v31 = vrot.slane %v387_v24, 1 }
  0xfa   :  { %v400_v29 = vsel %vm53_vm2, %v390_v26, %v394_v27  ;;  %13081 = vmatprep.mubr.msk.f32.mxu1 %vm14447_vm0, %v14446_v1  ;;  %13106 = vmatpush3.msra.mxu1 %v11972_v25  ;;  %v592_v40 = vsel %vm591_vm5, %v586_v36, %v589_v39 }
  0xfb   :  { %13093 = vmatmul.mubr.msk.f32.vlgmr.msra.gmra.mxu0 %vm69_vm1, %v400_v29  ;;  %13107 = vmatprep.subr.mxu1 %v14446_v1  ;;  %v396_v32 = vsel %vm53_vm2, %v394_v27, %v395_v30  ;;  %v585_v35 = vsel %vm243_vm3, %v583_v33, %v584_v31  ;;  %v398_v37 = vsel %vm53_vm2, %v395_v30, %v397_v34 }
  0xfc   :  { %13095 = vmatprep.mubr.msk.f32.mxu0 %vm14447_vm0, %v14446_v1  ;;  %13108 = vmatpush3.msra.mxu1 %v11971_v28  ;;  %v587_v38 = vsel %vm243_vm3, %v584_v31, %v586_v36 }
  0xfd   :  { %13082 = vmatmul.mubr.msk.f32.gmra.mxu1 %vm69_vm1, %v388_v23  ;;  %13143 = vmatprep.subr.mxu1 %v14446_v1 }
  0xfe   :  { %13109 = vmatprep.mubr.msk.f32.mxu1 %vm14447_vm0, %v14446_v1  ;;  %13119 = vmatpush3.msra.mxu0 %v11986_v41 }
  0xff   :  { %13096 = vmatmul.mubr.msk.f32.gmra.mxu0 %vm69_vm1, %v396_v32  ;;  %13120 = vmatprep.subr.mxu0 %v14446_v1 }
 0x100   :  { %13098 = vmatprep.mubr.msk.f32.mxu0 %vm14447_vm0, %v14446_v1  ;;  %13121 = vmatpush3.msra.mxu0 %v11985_v42  ;;  %v11999_v42 = vld [vmem:[%s18585_s5 + $0xb0] sm:$0xff] }
 0x101   :  { %13110 = vmatmul.mubr.msk.f32.vlgmr.msra.gmra.mxu1 %vm69_vm1, %v585_v35  ;;  %13122 = vmatprep.subr.mxu0 %v14446_v1 }
 0x102   :  { %13112 = vmatprep.mubr.msk.f32.mxu1 %vm14447_vm0, %v14446_v1  ;;  %13123 = vmatpush3.msra.mxu0 %v11984_v43 }
 0x103   :  { %13099 = vmatmul.mubr.msk.f32.gmra.mxu0 %vm69_vm1, %v398_v37  ;;  %13124 = vmatprep.subr.mxu0 %v14446_v1 }
 0x104   :  { %13134 = vmatprep.mubr.msk.f32.mxu0 %vm14447_vm0, %v14446_v1  ;;  %13125 = vmatpush3.msra.mxu0 %v11983_v44 }
 0x105   :  { %13113 = vmatmul.mubr.msk.f32.gmra.mxu1 %vm69_vm1, %v587_v38  ;;  %13126 = vmatprep.subr.mxu0 %v14446_v1  ;;  %v12000_v38 = vld [vmem:[%s18585_s5 + $0xb8] sm:$0xff] }
 0x106   :  { %13115 = vmatprep.mubr.msk.f32.mxu1 %vm14447_vm0, %v14446_v1  ;;  %13144 = vmatpush3.msra.mxu1 %v748_v45 }
 0x107   :  { %13127 = vmatpush3.msra.mxu0 %v11982_v46  ;;  %13145 = vmatprep.subr.mxu1 %v14446_v1  ;;  %v11998_v46 = vld [vmem:[%s18585_s5 + $0xa8] sm:$0xff] }
 0x108   :  { %13128 = vmatprep.subr.mxu0 %v14446_v1  ;;  %13146 = vmatpush3.msra.mxu1 %v747_v47 }
 0x109   :  { %13116 = vmatmul.mubr.msk.f32.gmra.mxu1 %vm69_vm1, %v592_v40  ;;  %13129 = vmatpush3.msra.mxu0 %v11981_v48 }
 0x10a   :  { %13159 = vmatprep.mubr.msk.f32.mxu1 %vm14447_vm0, %v14446_v1  ;;  %13147 = vmatprep.subr.mxu1 %v14446_v1 }
 0x10b   :  { %13130 = vmatprep.subr.mxu0 %v14446_v1  ;;  %13148 = vmatpush3.msra.mxu1 %v746_v49  ;;  %v11997_v49 = vld [vmem:[%s18585_s5 + $0xa0] sm:$0xff] }
 0x10c   :  { %13131 = vmatpush3.msra.mxu0 %v11980_v50  ;;  %13149 = vmatprep.subr.mxu1 %v14446_v1 }
 0x10d   :  { %13132 = vmatprep.subr.mxu0 %v14446_v1  ;;  %13150 = vmatpush3.msra.mxu1 %v745_v51 }
 0x10e   :  { %13133 = vmatpush3.msra.mxu0 %v11979_v52  ;;  %13151 = vmatprep.subr.mxu1 %v14446_v1  ;;  %v11996_v52 = vld [vmem:[%s18585_s5 + $0x98] sm:$0xff] }
 0x10f   :  { %13152 = vmatpush3.msra.mxu1 %v744_v53  ;;  %13168 = vmatprep.subr.mxu0 %v14446_v1  ;;  %v11995_v53 = vld [vmem:[%s18585_s5 + $0x90] sm:$0xff] }
 0x110   :  { %13153 = vmatprep.subr.mxu1 %v14446_v1 }
 0x111   :  { %13154 = vmatpush3.msra.mxu1 %v743_v54 }
 0x112   :  { %13155 = vmatprep.subr.mxu1 %v14446_v1 }
 0x113   :  { %13156 = vmatpush3.msra.mxu1 %v742_v55 }
 0x114   :  { %13157 = vmatprep.subr.mxu1 %v14446_v1 }
 0x115   :  { %13158 = vmatpush3.msra.mxu1 %v741_v56  ;;  %v11994_v56 = vld [vmem:[%s18585_s5 + $0x88] sm:$0xff] }
 0x116   :  { %13193 = vmatprep.subr.mxu1 %v14446_v1 }
 0x1b5   :  { %v482_v57 = vpop.f32.mrf.mxu1 }
 0x1b7   :  { %v13077_v58 = vpop.f32.mrf.mxu1 }
 0x1b8   :  { %v11993_v58 = vld [vmem:[%s18585_s5 + $0x80] sm:$0xff] }
 0x1b9   :  { %v487_v59 = vpop.f32.mrf.mxu1 }
 0x1bb   :  { %v13080_v60 = vpop.f32.mrf.mxu1  ;;  %v569_v61 = vpop.f32.mrf.mxu0 }
 0x1bc   :  { %v570_v3 = vadd.f32 %v569_v61, %v482_v57 }
 0x1bd   :  { %v492_v62 = vpop.f32.mrf.mxu1  ;;  %v13094_v63 = vpop.f32.mrf.mxu0 }
 0x1bf   :  { %v13083_v0 = vpop.f32.mrf.mxu1  ;;  %v574_v2 = vpop.f32.mrf.mxu0 }
 0x1c0   :  { %v575_v10 = vadd.f32 %v574_v2, %v487_v59 }
 0x1c1   :  { %v13097_v4 = vpop.f32.mrf.mxu0  ;;  %v671_v5 = vpop.f32.mrf.mxu1 }
 0x1c2   :  { %v685_v7 = vadd.f32 %v671_v5, %v570_v3  ;;  %v12012_v3 = vld [vmem:[%s18587_s7 + $0x78] sm:$0xff]  ;;  %v12011_v4 = vld [vmem:[%s18587_s7 + $0x70] sm:$0xff]  ;;  %v12010_v5 = vld [vmem:[%s18587_s7 + $0x68] sm:$0xff] }
 0x1c3   :  { %v579_v8 = vpop.f32.mrf.mxu0  ;;  %v13111_v9 = vpop.f32.mrf.mxu1 }
 0x1c4   :  { %v695_v11 = vadd.f32 %v11978_v6, %v685_v7  ;;  %v580_v17 = vadd.f32 %v579_v8, %v492_v62  ;;  %v1101_v7 = vld [vmem:[%s18587_s7 + $0x38] sm:$0xff]  ;;  %v1100_v9 = vld [vmem:[%s18587_s7 + $0x30] sm:$0xff] }
 0x1c5   :  { %v13100_v12 = vpop.f32.mrf.mxu0  ;;  %v676_v13 = vpop.f32.mrf.mxu1  ;;  %v12008_v8 = vld [vmem:[%s18587_s7 + $0x58] sm:$0xff] }
 0x1c6   :  { %v686_v14 = vadd.f32 %v676_v13, %v575_v10  ;;  %v698_v16 = vmax.f32 %v695_v11, 0.0  ;;  %v12007_v10 = vld [vmem:[%s18587_s7 + $0x50] sm:$0xff]  ;;  %v1099_v11 = vld [vmem:[%s18587_s7 + $0x28] sm:$0xff]  ;;  %v1098_v13 = vld [vmem:[%s18587_s7 + $0x20] sm:$0xff] }
 0x1c7   :  { %v13114_v15 = vpop.f32.mrf.mxu1  ;;  %v12006_v12 = vld [vmem:[%s18587_s7 + $0x48] sm:$0xff] }
 0x1c8   :  { %v696_v18 = vadd.f32 %v11978_v6, %v686_v14  ;;  %v704_v23 = vrot.slane %v698_v16, 1  ;;  %v715_v27 = vrot.slane %v698_v16, 2  ;;  %v12005_v14 = vld [vmem:[%s18587_s7 + $0x40] sm:$0xff]  ;;  %v1097_v15 = vld [vmem:[%s18587_s7 + $0x18] sm:$0xff] }
 0x1c9   :  { %v681_v19 = vpop.f32.mrf.mxu1 }
 0x1ca   :  { %v699_v20 = vmax.f32 %v696_v18, 0.0  ;;  %v687_v21 = vadd.f32 %v681_v19, %v580_v17  ;;  %v1095_v17 = vld [vmem:[%s18587_s7 + $0x8] sm:$0xff]  ;;  %v1094_v18 = vld [vmem:[%s18587_s7] sm:$0xff] }
 0x1cb   :  { %v13117_v22 = vpop.f32.mrf.mxu1 }
 0x1cc   :  { %v705_v24 = vrot.slane %v699_v20, 1  ;;  %v716_v25 = vrot.slane %v699_v20, 2  ;;  %v697_v26 = vadd.f32 %v11978_v6, %v687_v21  ;;  %v12009_v6 = vld [vmem:[%s18587_s7 + $0x60] sm:$0xff] }
 0x1ce   :  { %v706_v28 = vsel %vm243_vm3, %v704_v23, %v705_v24  ;;  %v700_v29 = vmax.f32 %v697_v26, 0.0  ;;  %v717_v31 = vsel %vm374_vm4, %v715_v27, %v716_v25 }
 0x1cf   :  { %v712_v30 = vadd.f32 %v706_v28, %v698_v16  ;;  %v1096_v16 = vld [vmem:[%s18587_s7 + $0x10] sm:$0xff] }
 0x1d0   :  { %v707_v32 = vrot.slane %v700_v29, 1  ;;  %v718_v33 = vrot.slane %v700_v29, 2 }
 0x1d1   :  { %v723_v34 = vadd.f32 %v717_v31, %v712_v30 }
 0x1d2   :  { %v714_v35 = vadd.f32 %v707_v32, %v700_v29  ;;  %v708_v36 = vsel %vm243_vm3, %v705_v24, %v707_v32  ;;  %v719_v41 = vsel %vm374_vm4, %v716_v25, %v718_v33  ;;  %v12004_v32 = vld [vmem:[%s18586_s6] ss:$0 sm:$0xff] }
 0x1d3   :  { %v14774_v37 = vmul.f32 0.33333334, %v723_v34  ;;  %v713_v39 = vadd.f32 %v708_v36, %v699_v20 }
 0x1d4   :  { %v725_v40 = vadd.f32 %v718_v33, %v714_v35 }
 0x1d5   :  { %13135 = vmatmul.mubr.msk.f32.vlgmr.msra.gmra.mxu0 %vm758_vm6, %v14774_v37  ;;  %v724_v43 = vadd.f32 %v719_v41, %v713_v39  ;;  %v734_v48 = vrot.slane %v14774_v37, 7  ;;  %v932_v60 = vrot.slane %v14774_v37, 1  ;;  %v938_v0 = vrot.slane %v14774_v37, 5 }
 0x1d6   :  { %v728_v44 = vmul.f32 0.33333334, %v725_v40  ;;  %13169 = vmatpush3.msra.mxu0 %v12000_v38  ;;  %13137 = vmatprep.mubr.msk.f32.mxu0 %vm14447_vm0, %v14446_v1 }
 0x1d7   :  { %13170 = vmatprep.subr.mxu0 %v14446_v1  ;;  %v727_v45 = vmul.f32 0.33333334, %v724_v43 }
 0x1d8   :  { %13171 = vmatpush3.msra.mxu0 %v11999_v42  ;;  %v730_v47 = vrot.slane %v728_v44, 3  ;;  %v737_v55 = vrot.slane %v728_v44, 7  ;;  %v935_v62 = vrot.slane %v728_v44, 1 }
 0x1d9   :  { %13172 = vmatprep.subr.mxu0 %v14446_v1  ;;  %13138 = vmatmul.mubr.msk.f32.gmra.mxu0 %vm758_vm6, %v727_v45  ;;  %v735_v51 = vrot.slane %v727_v45, 7  ;;  %v933_v57 = vrot.slane %v727_v45, 1 }
 0x1da   :  { %13173 = vmatpush3.msra.mxu0 %v11998_v46  ;;  %v740_v50 = vsel %vm53_vm2, %v730_v47, %v734_v48  ;;  %13140 = vmatprep.mubr.msk.f32.mxu0 %vm14447_vm0, %v14446_v1  ;;  %v941_v2 = vsel %vm940_vm7, %v935_v62, %v938_v0 }
 0x1db   :  { %13174 = vmatprep.subr.mxu0 %v14446_v1  ;;  %13160 = vmatmul.mubr.msk.f32.vlgmr.msra.gmra.mxu1 %vm758_vm6, %v740_v50  ;;  %v736_v54 = vsel %vm53_vm2, %v734_v48, %v735_v51  ;;  %v738_v59 = vsel %vm53_vm2, %v735_v51, %v737_v55  ;;  %v934_v61 = vsel %vm243_vm3, %v932_v60, %v933_v57 }
 0x1dc   :  { %13175 = vmatpush3.msra.mxu0 %v11997_v49  ;;  %13162 = vmatprep.mubr.msk.f32.mxu1 %vm14447_vm0, %v14446_v1  ;;  %v936_v63 = vsel %vm243_vm3, %v933_v57, %v935_v62 }
 0x1dd   :  { %13176 = vmatprep.subr.mxu0 %v14446_v1  ;;  %13141 = vmatmul.mubr.msk.f32.gmra.mxu0 %vm758_vm6, %v728_v44 }
 0x1de   :  { %13177 = vmatpush3.msra.mxu0 %v11996_v52  ;;  %13184 = vmatprep.mubr.msk.f32.mxu0 %vm14447_vm0, %v14446_v1 }
 0x1df   :  { %13178 = vmatprep.subr.mxu0 %v14446_v1  ;;  %13163 = vmatmul.mubr.msk.f32.gmra.mxu1 %vm758_vm6, %v736_v54 }
 0x1e0   :  { %13179 = vmatpush3.msra.mxu0 %v11995_v53  ;;  %13165 = vmatprep.mubr.msk.f32.mxu1 %vm14447_vm0, %v14446_v1 }
 0x1e1   :  { %13180 = vmatprep.subr.mxu0 %v14446_v1  ;;  %13194 = vmatpush3.msra.mxu1 %v12012_v3 }
 0x1e2   :  { %13181 = vmatpush3.msra.mxu0 %v11994_v56  ;;  %13195 = vmatprep.subr.mxu1 %v14446_v1 }
 0x1e3   :  { %13182 = vmatprep.subr.mxu0 %v14446_v1  ;;  %13166 = vmatmul.mubr.msk.f32.gmra.mxu1 %vm758_vm6, %v738_v59 }
 0x1e4   :  { %13183 = vmatpush3.msra.mxu0 %v11993_v58  ;;  %13209 = vmatprep.mubr.msk.f32.mxu1 %vm14447_vm0, %v14446_v1 }
 0x1e5   :  { %13185 = vmatmul.mubr.msk.f32.vlgmr.msra.gmra.mxu0 %vm758_vm6, %v934_v61  ;;  %13218 = vmatprep.subr.mxu0 %v14446_v1 }
 0x1e6   :  { %13187 = vmatprep.mubr.msk.f32.mxu0 %vm14447_vm0, %v14446_v1  ;;  %13196 = vmatpush3.msra.mxu1 %v12011_v4  ;;  %v12025_v4 = vld [vmem:[%s18587_s7 + $0xb0] sm:$0xff] }
 0x1e7   :  { %13197 = vmatprep.subr.mxu1 %v14446_v1  ;;  %13219 = vmatpush3.msra.mxu0 %v1101_v7 }
 0x1e8   :  { %13198 = vmatpush3.msra.mxu1 %v12010_v5  ;;  %13220 = vmatprep.subr.mxu0 %v14446_v1 }
 0x1e9   :  { %13188 = vmatmul.mubr.msk.f32.gmra.mxu0 %vm758_vm6, %v936_v63  ;;  %13199 = vmatprep.subr.mxu1 %v14446_v1  ;;  %v12026_v63 = vld [vmem:[%s18587_s7 + $0xb8] sm:$0xff] }
 0x1ea   :  { %13190 = vmatprep.mubr.msk.f32.mxu0 %vm14447_vm0, %v14446_v1  ;;  %13200 = vmatpush3.msra.mxu1 %v12009_v6 }
 0x1eb   :  { %13201 = vmatprep.subr.mxu1 %v14446_v1  ;;  %13221 = vmatpush3.msra.mxu0 %v1100_v9 }
 0x1ec   :  { %13202 = vmatpush3.msra.mxu1 %v12008_v8  ;;  %13222 = vmatprep.subr.mxu0 %v14446_v1  ;;  %v12024_v8 = vld [vmem:[%s18587_s7 + $0xa8] sm:$0xff] }
 0x1ed   :  { %13191 = vmatmul.mubr.msk.f32.gmra.mxu0 %vm758_vm6, %v941_v2  ;;  %13203 = vmatprep.subr.mxu1 %v14446_v1 }
 0x1ee   :  { %13234 = vmatprep.mubr.msk.f32.mxu0 %vm14447_vm0, %v14446_v1  ;;  %13204 = vmatpush3.msra.mxu1 %v12007_v10 }
 0x1ef   :  { %13205 = vmatprep.subr.mxu1 %v14446_v1  ;;  %13223 = vmatpush3.msra.mxu0 %v1099_v11  ;;  %v12023_v11 = vld [vmem:[%s18587_s7 + $0xa0] sm:$0xff] }
 0x1f0   :  { %13206 = vmatpush3.msra.mxu1 %v12006_v12  ;;  %13224 = vmatprep.subr.mxu0 %v14446_v1 }
 0x1f1   :  { %13207 = vmatprep.subr.mxu1 %v14446_v1  ;;  %13225 = vmatpush3.msra.mxu0 %v1098_v13 }
 0x1f2   :  { %13208 = vmatpush3.msra.mxu1 %v12005_v14  ;;  %13226 = vmatprep.subr.mxu0 %v14446_v1  ;;  %v12022_v14 = vld [vmem:[%s18587_s7 + $0x98] sm:$0xff] }
 0x1f3   :  { %13227 = vmatpush3.msra.mxu0 %v1097_v15  ;;  %13243 = vmatprep.subr.mxu1 %v14446_v1  ;;  %v12021_v15 = vld [vmem:[%s18587_s7 + $0x90] sm:$0xff] }
 0x1f4   :  { %13228 = vmatprep.subr.mxu0 %v14446_v1 }
 0x1f5   :  { %13229 = vmatpush3.msra.mxu0 %v1096_v16 }
 0x1f6   :  { %13230 = vmatprep.subr.mxu0 %v14446_v1 }
 0x1f7   :  { %13231 = vmatpush3.msra.mxu0 %v1095_v17 }
 0x1f8   :  { %13232 = vmatprep.subr.mxu0 %v14446_v1 }
 0x1f9   :  { %13233 = vmatpush3.msra.mxu0 %v1094_v18  ;;  %v12020_v18 = vld [vmem:[%s18587_s7 + $0x88] sm:$0xff] }
 0x295   :  { %v831_v19 = vpop.f32.mrf.mxu0 }
 0x297   :  { %v13136_v20 = vpop.f32.mrf.mxu0 }
 0x298   :  { %v12019_v20 = vld [vmem:[%s18587_s7 + $0x80] sm:$0xff] }
 0x299   :  { %v836_v21 = vpop.f32.mrf.mxu0 }
 0x29b   :  { %v13139_v22 = vpop.f32.mrf.mxu0  ;;  %v918_v23 = vpop.f32.mrf.mxu1 }
 0x29c   :  { %v919_v30 = vadd.f32 %v918_v23, %v831_v19 }
 0x29d   :  { %v841_v24 = vpop.f32.mrf.mxu0  ;;  %v13161_v25 = vpop.f32.mrf.mxu1 }
 0x29e   :  { %v1437_v25 = vld [vmem:[%s18589_s9 + $0x80] sm:$0xff] }
 0x29f   :  { %v13142_v26 = vpop.f32.mrf.mxu0  ;;  %v923_v27 = vpop.f32.mrf.mxu1  ;;  %1468 = vmatprep.subr.mxu0 %v1437_v25  ;;  %v12049_v25 = vld [vmem:[%s18589_s9 + $0x118] sm:$0xff] }
 0x2a0   :  { %v924_v36 = vadd.f32 %v923_v27, %v836_v21  ;;  %v1439_v26 = vld [vmem:[%s18589_s9 + $0x90] sm:$0xff]  ;;  %v1436_v27 = vld [vmem:[%s18589_s9 + $0x78] sm:$0xff] }
 0x2a1   :  { %v13164_v28 = vpop.f32.mrf.mxu1 }
 0x2a2   :  { %v1438_v28 = vld [vmem:[%s18589_s9 + $0x88] sm:$0xff] }
 0x2a3   :  { %v928_v29 = vpop.f32.mrf.mxu1 }
 0x2a4   :  { %v929_v41 = vadd.f32 %v928_v29, %v841_v24  ;;  %v1432_v29 = vld [vmem:[%s18589_s9 + $0x58] sm:$0xff] }
 0x2a5   :  { %v1024_v31 = vpop.f32.mrf.mxu0  ;;  %v13167_v33 = vpop.f32.mrf.mxu1 }
 0x2a6   :  { %v1038_v34 = vadd.f32 %v1024_v31, %v919_v30  ;;  %v1434_v30 = vld [vmem:[%s18589_s9 + $0x68] sm:$0xff]  ;;  %v1431_v31 = vld [vmem:[%s18589_s9 + $0x50] sm:$0xff] }
 0x2a7   :  { %v13186_v35 = vpop.f32.mrf.mxu0  ;;  %v1427_v33 = vld [vmem:[%s18589_s9 + $0x30] sm:$0xff] }
 0x2a8   :  { %v1048_v37 = vadd.f32 %v12004_v32, %v1038_v34  ;;  %v1429_v34 = vld [vmem:[%s18589_s9 + $0x40] sm:$0xff]  ;;  %v1426_v35 = vld [vmem:[%s18589_s9 + $0x28] sm:$0xff] }
 0x2a9   :  { %v1029_v38 = vpop.f32.mrf.mxu0 }
 0x2aa   :  { %v1039_v39 = vadd.f32 %v1029_v38, %v924_v36  ;;  %v1051_v42 = vmax.f32 %v1048_v37, 0.0  ;;  %v1428_v36 = vld [vmem:[%s18589_s9 + $0x38] sm:$0xff]  ;;  %v1422_v37 = vld [vmem:[%s18589_s9 + $0x8] sm:$0xff] }
 0x2ab   :  { %v13189_v40 = vpop.f32.mrf.mxu0  ;;  %v1424_v38 = vld [vmem:[%s18589_s9 + $0x18] sm:$0xff] }
 0x2ac   :  { %v1049_v43 = vadd.f32 %v12004_v32, %v1039_v39  ;;  %v1057_v48 = vrot.slane %v1051_v42, 1  ;;  %v1068_v52 = vrot.slane %v1051_v42, 2  ;;  %v1421_v39 = vld [vmem:[%s18589_s9] sm:$0xff]  ;;  %v1423_v40 = vld [vmem:[%s18589_s9 + $0x10] sm:$0xff] }
 0x2ad   :  { %v1034_v44 = vpop.f32.mrf.mxu0 }
 0x2ae   :  { %v1052_v45 = vmax.f32 %v1049_v43, 0.0  ;;  %v1040_v46 = vadd.f32 %v1034_v44, %v929_v41  ;;  %v12050_v41 = vld [vmem:[%s18589_s9 + $0x120] sm:$0xff] }
 0x2af   :  { %v13192_v47 = vpop.f32.mrf.mxu0 }
 0x2b0   :  { %v1058_v49 = vrot.slane %v1052_v45, 1  ;;  %v1069_v50 = vrot.slane %v1052_v45, 2  ;;  %v1050_v51 = vadd.f32 %v12004_v32, %v1040_v46  ;;  %v1433_v32 = vld [vmem:[%s18589_s9 + $0x60] sm:$0xff] }
 0x2b2   :  { %v1059_v53 = vsel %vm243_vm3, %v1057_v48, %v1058_v49  ;;  %v1053_v54 = vmax.f32 %v1050_v51, 0.0  ;;  %v1070_v56 = vsel %vm374_vm4, %v1068_v52, %v1069_v50 }
 0x2b3   :  { %v1065_v55 = vadd.f32 %v1059_v53, %v1051_v42 }
 0x2b4   :  { %v1060_v57 = vrot.slane %v1053_v54, 1  ;;  %v1071_v58 = vrot.slane %v1053_v54, 2 }
 0x2b5   :  { %v1076_v59 = vadd.f32 %v1070_v56, %v1065_v55  ;;  %v12030_v56 = vld [vmem:[%s18588_s8] ss:$0 sm:$0xff] }
 0x2b6   :  { %v1067_v60 = vadd.f32 %v1060_v57, %v1053_v54  ;;  %v1061_v61 = vsel %vm243_vm3, %v1058_v49, %v1060_v57  ;;  %v1072_v3 = vsel %vm374_vm4, %v1069_v50, %v1071_v58 }
 0x2b7   :  { %v1079_v62 = vmul.f32 0.33333334, %v1076_v59  ;;  %v1066_v0 = vadd.f32 %v1061_v61, %v1052_v45 }
 0x2b8   :  { %v1078_v2 = vadd.f32 %v1071_v58, %v1067_v60 }
 0x2b9   :  { %13210 = vmatmul.mubr.msk.f32.vlgmr.msra.gmra.mxu1 %vm758_vm6, %v1079_v62  ;;  %v1077_v5 = vadd.f32 %v1072_v3, %v1066_v0  ;;  %v1087_v10 = vrot.slane %v1079_v62, 7  ;;  %v1284_v22 = vrot.slane %v1079_v62, 1 }
 0x2ba   :  { %v1081_v6 = vmul.f32 0.33333334, %v1078_v2  ;;  %13244 = vmatpush3.msra.mxu1 %v12026_v63  ;;  %13212 = vmatprep.mubr.msk.f32.mxu1 %vm14447_vm0, %v14446_v1 }
 0x2bb   :  { %13245 = vmatprep.subr.mxu1 %v14446_v1  ;;  %v1080_v7 = vmul.f32 0.33333334, %v1077_v5 }
 0x2bc   :  { %13246 = vmatpush3.msra.mxu1 %v12025_v4  ;;  %v1083_v9 = vrot.slane %v1081_v6, 1  ;;  %v1090_v17 = vrot.slane %v1081_v6, 7 }
 0x2bd   :  { %13247 = vmatprep.subr.mxu1 %v14446_v1  ;;  %13213 = vmatmul.mubr.msk.f32.gmra.mxu1 %vm758_vm6, %v1080_v7  ;;  %v1088_v13 = vrot.slane %v1080_v7, 7  ;;  %v1285_v19 = vrot.slane %v1080_v7, 1 }
 0x2be   :  { %13248 = vmatpush3.msra.mxu1 %v12024_v8  ;;  %v1093_v12 = vsel %vm53_vm2, %v1083_v9, %v1087_v10  ;;  %13215 = vmatprep.mubr.msk.f32.mxu1 %vm14447_vm0, %v14446_v1 }
 0x2bf   :  { %13249 = vmatprep.subr.mxu1 %v14446_v1  ;;  %13235 = vmatmul.mubr.msk.f32.vlgmr.msra.gmra.mxu0 %vm758_vm6, %v1093_v12  ;;  %v1089_v16 = vsel %vm53_vm2, %v1087_v10, %v1088_v13  ;;  %v1091_v21 = vsel %vm53_vm2, %v1088_v13, %v1090_v17  ;;  %v1286_v23 = vsel %vm243_vm3, %v1284_v22, %v1285_v19 }
 0x2c0   :  { %13250 = vmatpush3.msra.mxu1 %v12023_v11  ;;  %13237 = vmatprep.mubr.msk.f32.mxu0 %vm14447_vm0, %v14446_v1  ;;  %v1287_v24 = vsel %vm243_vm3, %v1285_v19, %v1083_v9 }
 0x2c1   :  { %13251 = vmatprep.subr.mxu1 %v14446_v1  ;;  %13216 = vmatmul.mubr.msk.f32.gmra.mxu1 %vm758_vm6, %v1081_v6 }
 0x2c2   :  { %13252 = vmatpush3.msra.mxu1 %v12022_v14  ;;  %13259 = vmatprep.mubr.msk.f32.mxu1 %vm14447_vm0, %v14446_v1 }
 0x2c3   :  { %13253 = vmatprep.subr.mxu1 %v14446_v1  ;;  %13238 = vmatmul.mubr.msk.f32.gmra.mxu0 %vm758_vm6, %v1089_v16 }
 0x2c4   :  { %13254 = vmatpush3.msra.mxu1 %v12021_v15  ;;  %13240 = vmatprep.mubr.msk.f32.mxu0 %vm14447_vm0, %v14446_v1 }
 0x2c5   :  { %13255 = vmatprep.subr.mxu1 %v14446_v1  ;;  %1469 = vmatpush1.msra.mxu0 %v1436_v27 }
 0x2c6   :  { %13256 = vmatpush3.msra.mxu1 %v12020_v18  ;;  %1470 = vmatprep.subr.mxu0 %v1432_v29  ;;  %v12044_v29 = vld [vmem:[%s18589_s9 + $0xf0] sm:$0xff] }
 0x2c7   :  { %13257 = vmatprep.subr.mxu1 %v14446_v1  ;;  %13241 = vmatmul.mubr.msk.f32.gmra.mxu0 %vm758_vm6, %v1091_v21 }
 0x2c8   :  { %13258 = vmatpush3.msra.mxu1 %v12019_v20  ;;  %1508 = vmatprep.mubr.f32.mxu0 %v14446_v1 }
 0x2c9   :  { %13260 = vmatmul.mubr.msk.f32.vlgmr.msra.gmra.mxu1 %vm758_vm6, %v1286_v23  ;;  %1539 = vmatprep.subr.mxu1 %v1439_v26  ;;  %v12045_v26 = vld [vmem:[%s18589_s9 + $0xf8] sm:$0xff] }
 0x2ca   :  { %13262 = vmatprep.mubr.msk.f32.mxu1 %vm14447_vm0, %v14446_v1  ;;  %1540 = vmatpush1.msra.mxu1 %v1438_v28  ;;  %v1435_v28 = vld [vmem:[%s18589_s9 + $0x70] sm:$0xff] }
 0x2cb   :  { %1541 = vmatprep.subr.mxu1 %v1434_v30  ;;  %1471 = vmatpush1.msra.mxu0 %v1431_v31  ;;  %v12040_v30 = vld [vmem:[%s18589_s9 + $0xd0] sm:$0xff]  ;;  %v1430_v31 = vld [vmem:[%s18589_s9 + $0x48] sm:$0xff] }
 0x2cc   :  { %1542 = vmatpush1.msra.mxu1 %v1433_v32  ;;  %1472 = vmatprep.subr.mxu0 %v1427_v33  ;;  %v12039_v32 = vld [vmem:[%s18589_s9 + $0xc8] sm:$0xff] }
 0x2cd   :  { %13263 = vmatmul.mubr.msk.f32.gmra.mxu1 %vm758_vm6, %v1287_v24  ;;  %1543 = vmatprep.subr.mxu1 %v1429_v34  ;;  %v1440_v24 = vld [vmem:[%s18589_s9 + $0x98] sm:$0xff]  ;;  %v12035_v33 = vld [vmem:[%s18589_s9 + $0xa8] sm:$0xff]  ;;  %v1425_v34 = vld [vmem:[%s18589_s9 + $0x20] sm:$0xff] }
 0x2ce   :  { %13265 = vmatprep.mubr.msk.f32.mxu1 %vm14447_vm0, %v14446_v1  ;;  %1473 = vmatpush1.msra.mxu0 %v1426_v35  ;;  %v12034_v35 = vld [vmem:[%s18589_s9 + $0xa0] sm:$0xff] }
 0x2cf   :  { %1544 = vmatpush1.msra.mxu1 %v1428_v36  ;;  %1474 = vmatprep.subr.mxu0 %v1422_v37  ;;  %v12052_v37 = vld [vmem:[%s18589_s9 + $0x130] sm:$0xff] }
 0x2d0   :  { %1545 = vmatprep.subr.mxu1 %v1424_v38  ;;  %1475 = vmatpush1.msra.mxu0 %v1421_v39  ;;  %v12051_v38 = vld [vmem:[%s18589_s9 + $0x128] sm:$0xff]  ;;  %v12053_v39 = vld [vmem:[%s18589_s9 + $0x138] sm:$0xff] }
 0x2d1   :  { %13266 = vmatmul.mubr.msk.f32.gmra.mxu1 %vm758_vm6, %v1093_v12  ;;  %13268 = vmatprep.subr.mxu0 %v14446_v1 }
 0x2d2   :  { %1579 = vmatprep.mubr.f32.mxu1 %v14446_v1  ;;  %1546 = vmatpush1.msra.mxu1 %v1423_v40  ;;  %v12047_v40 = vld [vmem:[%s18589_s9 + $0x108] sm:$0xff] }
 0x2d3   :  { %1750 = vmatprep.subr.mxu1 %v12050_v41  ;;  %v12046_v41 = vld [vmem:[%s18589_s9 + $0x100] sm:$0xff] }
 0x379   :  { %v1183_v42 = vpop.f32.mrf.mxu1 }
 0x37b   :  { %v13211_v43 = vpop.f32.mrf.mxu1 }
 0x37c   :  { %v12042_v43 = vld [vmem:[%s18589_s9 + $0xe0] sm:$0xff] }
 0x37d   :  { %v1188_v44 = vpop.f32.mrf.mxu1 }
 0x37f   :  { %v13214_v45 = vpop.f32.mrf.mxu1  ;;  %v1270_v46 = vpop.f32.mrf.mxu0 }
 0x380   :  { %v1271_v53 = vadd.f32 %v1270_v46, %v1183_v42  ;;  %v12048_v42 = vld [vmem:[%s18589_s9 + $0x110] sm:$0xff]  ;;  %v12043_v45 = vld [vmem:[%s18589_s9 + $0xe8] sm:$0xff]  ;;  %v12037_v46 = vld [vmem:[%s18589_s9 + $0xb8] sm:$0xff] }
 0x381   :  { %v1193_v47 = vpop.f32.mrf.mxu1  ;;  %v13236_v48 = vpop.f32.mrf.mxu0 }
 0x382   :  { %v12038_v48 = vld [vmem:[%s18589_s9 + $0xc0] sm:$0xff] }
 0x383   :  { %v13217_v49 = vpop.f32.mrf.mxu1  ;;  %v1275_v50 = vpop.f32.mrf.mxu0 }
 0x384   :  { %v1276_v60 = vadd.f32 %v1275_v50, %v1188_v44  ;;  %v12041_v44 = vld [vmem:[%s18589_s9 + $0xd8] sm:$0xff]  ;;  %v12073_v49 = vld [vmem:[%s18589_s9 + $0x1c0] sm:$0xff]  ;;  %v12075_v50 = vld [vmem:[%s18589_s9 + $0x1d0] sm:$0xff] }
 0x385   :  { %v13239_v51 = vpop.f32.mrf.mxu0 }
 0x386   :  { %v12072_v51 = vld [vmem:[%s18589_s9 + $0x1b8] sm:$0xff] }
 0x387   :  { %v1280_v52 = vpop.f32.mrf.mxu0 }
 0x388   :  { %v1281_v54 = vadd.f32 %v1280_v52, %v1193_v47  ;;  %v12036_v47 = vld [vmem:[%s18589_s9 + $0xb0] sm:$0xff]  ;;  %v12074_v52 = vld [vmem:[%s18589_s9 + $0x1c8] sm:$0xff] }
 0x389   :  { %v1367_v55 = vpop.f32.mrf.mxu1  ;;  %v13242_v57 = vpop.f32.mrf.mxu0 }
 0x38a   :  { %v1381_v58 = vadd.f32 %v1367_v55, %v1271_v53  ;;  %v12068_v53 = vld [vmem:[%s18589_s9 + $0x198] sm:$0xff]  ;;  %v12067_v55 = vld [vmem:[%s18589_s9 + $0x190] sm:$0xff] }
 0x38b   :  { %v13261_v59 = vpop.f32.mrf.mxu1  ;;  %v12063_v57 = vld [vmem:[%s18589_s9 + $0x170] sm:$0xff] }
 0x38c   :  { %v1391_v61 = vadd.f32 %v12030_v56, %v1381_v58  ;;  %v12065_v58 = vld [vmem:[%s18589_s9 + $0x180] sm:$0xff]  ;;  %v12062_v59 = vld [vmem:[%s18589_s9 + $0x168] sm:$0xff] }
 0x38d   :  { %v1372_v62 = vpop.f32.mrf.mxu1 }
 0x38e   :  { %v1382_v63 = vadd.f32 %v1372_v62, %v1276_v60  ;;  %v1394_v2 = vmax.f32 %v1391_v61, 0.0  ;;  %v12064_v60 = vld [vmem:[%s18589_s9 + $0x178] sm:$0xff]  ;;  %v12058_v61 = vld [vmem:[%s18589_s9 + $0x148] sm:$0xff] }
 0x38f   :  { %v13264_v0 = vpop.f32.mrf.mxu1  ;;  %v12060_v62 = vld [vmem:[%s18589_s9 + $0x158] sm:$0xff] }
 0x390   :  { %v1392_v3 = vadd.f32 %v12030_v56, %v1382_v63  ;;  %v1400_v8 = vrot.slane %v1394_v2, 1  ;;  %v1409_v12 = vrot.slane %v1394_v2, 2  ;;  %v12057_v63 = vld [vmem:[%s18589_s9 + $0x140] sm:$0xff]  ;;  %v12059_v0 = vld [vmem:[%s18589_s9 + $0x150] sm:$0xff] }
 0x391   :  { %v1377_v4 = vpop.f32.mrf.mxu1 }
 0x392   :  { %v1395_v5 = vmax.f32 %v1392_v3, 0.0  ;;  %v1383_v6 = vadd.f32 %v1377_v4, %v1281_v54  ;;  %v12070_v54 = vld [vmem:[%s18589_s9 + $0x1a8] sm:$0xff]  ;;  %v12096_v3 = vld [vmem:[%s18589_s9 + $0x260] sm:$0xff]  ;;  %v12076_v4 = vld [vmem:[%s18589_s9 + $0x1d8] sm:$0xff] }
 0x393   :  { %v13267_v7 = vpop.f32.mrf.mxu1 }
 0x394   :  { %v1401_v9 = vrot.slane %v1395_v5, 1  ;;  %v1410_v10 = vrot.slane %v1395_v5, 2  ;;  %v1393_v11 = vadd.f32 %v12030_v56, %v1383_v6  ;;  %v12069_v56 = vld [vmem:[%s18589_s9 + $0x1a0] sm:$0xff]  ;;  %v12091_v6 = vld [vmem:[%s18589_s9 + $0x238] sm:$0xff]  ;;  %v12071_v7 = vld [vmem:[%s18589_s9 + $0x1b0] sm:$0xff] }
 0x396   :  { %v1402_v13 = vsel %vm243_vm3, %v1400_v8, %v1401_v9  ;;  %v1396_v14 = vmax.f32 %v1393_v11, 0.0  ;;  %v1411_v16 = vsel %vm374_vm4, %v1409_v12, %v1410_v10  ;;  %v12090_v8 = vld [vmem:[%s18589_s9 + $0x230] sm:$0xff]  ;;  %v12085_v11 = vld [vmem:[%s18589_s9 + $0x208] sm:$0xff] }
 0x397   :  { %v1407_v15 = vadd.f32 %v1402_v13, %v1394_v2  ;;  %v12081_v12 = vld [vmem:[%s18589_s9 + $0x1e8] sm:$0xff]  ;;  %v12061_v13 = vld [vmem:[%s18589_s9 + $0x160] sm:$0xff] }
 0x398   :  { %v1403_v17 = vrot.slane %v1396_v14, 1  ;;  %v1412_v18 = vrot.slane %v1396_v14, 2  ;;  %v12080_v14 = vld [vmem:[%s18589_s9 + $0x1e0] sm:$0xff] }
 0x399   :  { %v1416_v19 = vadd.f32 %v1411_v16, %v1407_v15  ;;  %v12098_v16 = vld [vmem:[%s18589_s9 + $0x270] sm:$0xff] }
 0x39a   :  { %v1404_v20 = vsel %vm243_vm3, %v1401_v9, %v1403_v17  ;;  %v1413_v21 = vsel %vm374_vm4, %v1410_v10, %v1412_v18  ;;  %v12086_v9 = vld [vmem:[%s18589_s9 + $0x210] sm:$0xff]  ;;  %v12066_v10 = vld [vmem:[%s18589_s9 + $0x188] sm:$0xff]  ;;  %v12099_v18 = vld [vmem:[%s18589_s9 + $0x278] sm:$0xff] }
 0x39b   :  { %v15036_v22 = vmul.f32 0.33333334, %v1416_v19  ;;  %v1408_v23 = vadd.f32 %v1404_v20, %v1395_v5  ;;  %v12095_v5 = vld [vmem:[%s18589_s9 + $0x258] sm:$0xff]  ;;  %v12097_v17 = vld [vmem:[%s18589_s9 + $0x268] sm:$0xff]  ;;  %v12092_v20 = vld [vmem:[%s18589_s9 + $0x240] sm:$0xff] }
 0x39c   :  { %v12093_v19 = vld [vmem:[%s18589_s9 + $0x248] sm:$0xff] }
 0x39d   :  { %v15047_v27 = vadd.f32 %v1413_v21, %v1408_v23  ;;  %12031 = vmatmul.mubr.msk.f32.vlgmr.msra.gmra.mxu0 %vm69_vm1, %v15036_v22  ;;  %12032 = vmatmul.mubr.msk.f32.vlgmr.msra.gmra.mxu1 %vm69_vm1, %v15036_v22  ;;  %v1723_v36 = vrot.slane %v15036_v22, 1  ;;  %v2005_v2 = vrot.slane %v15036_v22, 2  ;;  %v2287_v15 = vrot.slane %v15036_v22, 3  ;;  %v12094_v21 = vld [vmem:[%s18589_s9 + $0x250] sm:$0xff]  ;;  %v12088_v23 = vld [vmem:[%s18589_s9 + $0x220] sm:$0xff] }
 0x39e   :  { %13269 = vmatpush3.msra.mxu0 %v1440_v24  ;;  %1751 = vmatpush1.msra.mxu1 %v12049_v25  ;;  %v12087_v24 = vld [vmem:[%s18589_s9 + $0x218] sm:$0xff]  ;;  %v12089_v25 = vld [vmem:[%s18589_s9 + $0x228] sm:$0xff] }
 0x39f   :  { %13270 = vmatprep.subr.mxu0 %v14446_v1  ;;  %1752 = vmatprep.subr.mxu1 %v12045_v26  ;;  %v12083_v26 = vld [vmem:[%s18589_s9 + $0x1f8] sm:$0xff] }
 0x3a0   :  { %13271 = vmatpush3.msra.mxu0 %v1435_v28  ;;  %1753 = vmatpush1.msra.mxu1 %v12044_v29  ;;  %v12082_v28 = vld [vmem:[%s18589_s9 + $0x1f0] sm:$0xff]  ;;  %v12084_v29 = vld [vmem:[%s18589_s9 + $0x200] sm:$0xff] }
 0x3a1   :  { %13272 = vmatprep.subr.mxu0 %v14446_v1  ;;  %1754 = vmatprep.subr.mxu1 %v12040_v30  ;;  %v12119_v30 = vld [vmem:[%s18589_s9 + $0x300] sm:$0xff] }
 0x3a2   :  { %13273 = vmatpush3.msra.mxu0 %v1430_v31  ;;  %1755 = vmatpush1.msra.mxu1 %v12039_v32  ;;  %v12121_v31 = vld [vmem:[%s18589_s9 + $0x310] sm:$0xff]  ;;  %v12118_v32 = vld [vmem:[%s18589_s9 + $0x2f8] sm:$0xff] }
 0x3a3   :  { %13274 = vmatprep.subr.mxu0 %v14446_v1  ;;  %1756 = vmatprep.subr.mxu1 %v12035_v33  ;;  %v12120_v33 = vld [vmem:[%s18589_s9 + $0x308] sm:$0xff] }
 0x3a4   :  { %13275 = vmatpush3.msra.mxu0 %v1425_v34  ;;  %13276 = vmatprep.mubr.msk.f32.mxu0 %vm14447_vm0, %v14446_v1  ;;  %v12114_v34 = vld [vmem:[%s18589_s9 + $0x2d8] sm:$0xff] }
 0x3a5   :  { %1757 = vmatpush1.msra.mxu1 %v12034_v35  ;;  %1790 = vmatprep.mubr.f32.mxu1 %v14446_v1  ;;  %v12116_v35 = vld [vmem:[%s18589_s9 + $0x2e8] sm:$0xff] }
 0x3a6   :  { %13277 = vmatmul.mubr.msk.f32.vlgmr.msra.gmra.mxu0 %vm69_vm1, %v15036_v22  ;;  %12054 = vmatmul.mubr.msk.f32.vlgmr.msra.gmra.mxu1 %vm69_vm1, %v1723_v36 }
 0x3a7   :  { %1821 = vmatprep.subr.mxu0 %v12052_v37  ;;  %13279 = vmatprep.subr.mxu1 %v14446_v1  ;;  %v12115_v37 = vld [vmem:[%s18589_s9 + $0x2e0] sm:$0xff] }
 0x3a8   :  { %1822 = vmatpush1.msra.mxu0 %v12051_v38  ;;  %13280 = vmatpush3.msra.mxu1 %v12053_v39  ;;  %v12109_v38 = vld [vmem:[%s18589_s9 + $0x2b0] sm:$0xff]  ;;  %v12111_v39 = vld [vmem:[%s18589_s9 + $0x2c0] sm:$0xff] }
 0x3a9   :  { %1823 = vmatprep.subr.mxu0 %v12047_v40  ;;  %13281 = vmatprep.subr.mxu1 %v14446_v1  ;;  %v12108_v40 = vld [vmem:[%s18589_s9 + $0x2a8] sm:$0xff] }
 0x3aa   :  { %1824 = vmatpush1.msra.mxu0 %v12046_v41  ;;  %13282 = vmatpush3.msra.mxu1 %v12048_v42  ;;  %v12110_v41 = vld [vmem:[%s18589_s9 + $0x2b8] sm:$0xff]  ;;  %v12104_v42 = vld [vmem:[%s18589_s9 + $0x288] sm:$0xff] }
 0x3ab   :  { %1825 = vmatprep.subr.mxu0 %v12042_v43  ;;  %13283 = vmatprep.subr.mxu1 %v14446_v1  ;;  %v12106_v43 = vld [vmem:[%s18589_s9 + $0x298] sm:$0xff] }
 0x3ac   :  { %1826 = vmatpush1.msra.mxu0 %v12041_v44  ;;  %13284 = vmatpush3.msra.mxu1 %v12043_v45  ;;  %v12103_v44 = vld [vmem:[%s18589_s9 + $0x280] sm:$0xff]  ;;  %v12105_v45 = vld [vmem:[%s18589_s9 + $0x290] sm:$0xff] }
 0x3ad   :  { %1827 = vmatprep.subr.mxu0 %v12037_v46  ;;  %13285 = vmatprep.subr.mxu1 %v14446_v1  ;;  %v2569_v46 = vrot.slane %v15036_v22, 4 }
 0x3ae   :  { %1828 = vmatpush1.msra.mxu0 %v12036_v47  ;;  %1861 = vmatprep.mubr.f32.mxu0 %v14446_v1  ;;  %v12142_v47 = vld [vmem:[%s18589_s9 + $0x3a0] sm:$0xff] }
 0x3af   :  { %13286 = vmatpush3.msra.mxu1 %v12038_v48  ;;  %13287 = vmatprep.mubr.msk.f32.mxu1 %vm14447_vm0, %v14446_v1  ;;  %v12122_v48 = vld [vmem:[%s18589_s9 + $0x318] sm:$0xff] }
 0x3b0   :  { %12055 = vmatmul.mubr.msk.f32.vlgmr.msra.gmra.mxu0 %vm69_vm1, %v1723_v36  ;;  %13288 = vmatmul.mubr.msk.f32.vlgmr.msra.gmra.mxu1 %vm69_vm1, %v1723_v36  ;;  %v12113_v36 = vld [vmem:[%s18589_s9 + $0x2d0] sm:$0xff] }
 0x3b1   :  { %2032 = vmatprep.subr.mxu0 %v12073_v49  ;;  %2103 = vmatprep.subr.mxu1 %v12075_v50  ;;  %v12141_v49 = vld [vmem:[%s18589_s9 + $0x398] sm:$0xff] }
 0x3b2   :  { %2033 = vmatpush1.msra.mxu0 %v12072_v51  ;;  %2104 = vmatpush1.msra.mxu1 %v12074_v52  ;;  %v12137_v50 = vld [vmem:[%s18589_s9 + $0x378] sm:$0xff]  ;;  %v12117_v51 = vld [vmem:[%s18589_s9 + $0x2f0] sm:$0xff] }
 0x3b3   :  { %2034 = vmatprep.subr.mxu0 %v12068_v53  ;;  %2105 = vmatprep.subr.mxu1 %v12070_v54  ;;  %v12136_v52 = vld [vmem:[%s18589_s9 + $0x370] sm:$0xff]  ;;  %v12112_v54 = vld [vmem:[%s18589_s9 + $0x2c8] sm:$0xff] }
 0x3b4   :  { %2035 = vmatpush1.msra.mxu0 %v12067_v55  ;;  %2106 = vmatpush1.msra.mxu1 %v12069_v56  ;;  %v12132_v53 = vld [vmem:[%s18589_s9 + $0x350] sm:$0xff]  ;;  %v12131_v55 = vld [vmem:[%s18589_s9 + $0x348] sm:$0xff] }
 0x3b5   :  { %2036 = vmatprep.subr.mxu0 %v12063_v57  ;;  %2107 = vmatprep.subr.mxu1 %v12065_v58  ;;  %v12127_v56 = vld [vmem:[%s18589_s9 + $0x328] sm:$0xff]  ;;  %v12107_v57 = vld [vmem:[%s18589_s9 + $0x2a0] sm:$0xff] }
 0x3b6   :  { %2037 = vmatpush1.msra.mxu0 %v12062_v59  ;;  %2108 = vmatpush1.msra.mxu1 %v12064_v60  ;;  %v12126_v58 = vld [vmem:[%s18589_s9 + $0x320] sm:$0xff]  ;;  %v2851_v59 = vrot.slane %v15036_v22, 5  ;;  %v12144_v60 = vld [vmem:[%s18589_s9 + $0x3b0] sm:$0xff] }
 0x3b7   :  { %2038 = vmatprep.subr.mxu0 %v12058_v61  ;;  %2109 = vmatprep.subr.mxu1 %v12060_v62  ;;  %v12143_v61 = vld [vmem:[%s18589_s9 + $0x3a8] sm:$0xff]  ;;  %v12145_v62 = vld [vmem:[%s18589_s9 + $0x3b8] sm:$0xff] }
 0x3b8   :  { %2039 = vmatpush1.msra.mxu0 %v12057_v63  ;;  %2072 = vmatprep.mubr.f32.mxu0 %v14446_v1  ;;  %v12139_v63 = vld [vmem:[%s18589_s9 + $0x388] sm:$0xff] }
 0x3b9   :  { %2110 = vmatpush1.msra.mxu1 %v12059_v0  ;;  %2143 = vmatprep.mubr.f32.mxu1 %v14446_v1  ;;  %v12138_v0 = vld [vmem:[%s18589_s9 + $0x380] sm:$0xff] }
 0x3ba   :  { %12077 = vmatmul.mubr.msk.f32.vlgmr.msra.gmra.mxu0 %vm69_vm1, %v2005_v2  ;;  %12078 = vmatmul.mubr.msk.f32.vlgmr.msra.gmra.mxu1 %vm69_vm1, %v2005_v2 }
 0x3bb   :  { %13290 = vmatprep.subr.mxu0 %v14446_v1  ;;  %2314 = vmatprep.subr.mxu1 %v12096_v3  ;;  %v12134_v3 = vld [vmem:[%s18589_s9 + $0x360] sm:$0xff] }
 0x3bc   :  { %13291 = vmatpush3.msra.mxu0 %v12076_v4  ;;  %2315 = vmatpush1.msra.mxu1 %v12095_v5  ;;  %v12133_v4 = vld [vmem:[%s18589_s9 + $0x358] sm:$0xff]  ;;  %v12135_v5 = vld [vmem:[%s18589_s9 + $0x368] sm:$0xff] }
 0x3bd   :  { %13292 = vmatprep.subr.mxu0 %v14446_v1  ;;  %2316 = vmatprep.subr.mxu1 %v12091_v6  ;;  %v12129_v6 = vld [vmem:[%s18589_s9 + $0x338] sm:$0xff] }
 0x3be   :  { %13293 = vmatpush3.msra.mxu0 %v12071_v7  ;;  %2317 = vmatpush1.msra.mxu1 %v12090_v8  ;;  %v12128_v7 = vld [vmem:[%s18589_s9 + $0x330] sm:$0xff]  ;;  %v12130_v8 = vld [vmem:[%s18589_s9 + $0x340] sm:$0xff] }
 0x3bf   :  { %13294 = vmatprep.subr.mxu0 %v14446_v1  ;;  %2318 = vmatprep.subr.mxu1 %v12086_v9  ;;  %v12165_v9 = vld [vmem:[%s18589_s9 + $0x440] sm:$0xff] }
 0x3c0   :  { %13295 = vmatpush3.msra.mxu0 %v12066_v10  ;;  %2319 = vmatpush1.msra.mxu1 %v12085_v11  ;;  %v12167_v10 = vld [vmem:[%s18589_s9 + $0x450] sm:$0xff]  ;;  %v12164_v11 = vld [vmem:[%s18589_s9 + $0x438] sm:$0xff] }
 0x3c1   :  { %13296 = vmatprep.subr.mxu0 %v14446_v1  ;;  %2320 = vmatprep.subr.mxu1 %v12081_v12  ;;  %v12166_v12 = vld [vmem:[%s18589_s9 + $0x448] sm:$0xff] }
 0x3c2   :  { %13297 = vmatpush3.msra.mxu0 %v12061_v13  ;;  %13298 = vmatprep.mubr.msk.f32.mxu0 %vm14447_vm0, %v14446_v1  ;;  %v12160_v13 = vld [vmem:[%s18589_s9 + $0x418] sm:$0xff] }
 0x3c3   :  { %2321 = vmatpush1.msra.mxu1 %v12080_v14  ;;  %2354 = vmatprep.mubr.f32.mxu1 %v14446_v1  ;;  %v12162_v14 = vld [vmem:[%s18589_s9 + $0x428] sm:$0xff] }
 0x3c4   :  { %13299 = vmatmul.mubr.msk.f32.vlgmr.msra.gmra.mxu0 %vm69_vm1, %v2005_v2  ;;  %12100 = vmatmul.mubr.msk.f32.vlgmr.msra.gmra.mxu1 %vm69_vm1, %v2287_v15  ;;  %v12140_v2 = vld [vmem:[%s18589_s9 + $0x390] sm:$0xff] }
 0x3c5   :  { %2385 = vmatprep.subr.mxu0 %v12098_v16  ;;  %13301 = vmatprep.subr.mxu1 %v14446_v1  ;;  %v12161_v16 = vld [vmem:[%s18589_s9 + $0x420] sm:$0xff] }
 0x3c6   :  { %2386 = vmatpush1.msra.mxu0 %v12097_v17  ;;  %13302 = vmatpush3.msra.mxu1 %v12099_v18  ;;  %v12155_v17 = vld [vmem:[%s18589_s9 + $0x3f0] sm:$0xff]  ;;  %v12157_v18 = vld [vmem:[%s18589_s9 + $0x400] sm:$0xff] }
 0x3c7   :  { %2387 = vmatprep.subr.mxu0 %v12093_v19  ;;  %13303 = vmatprep.subr.mxu1 %v14446_v1  ;;  %v12154_v19 = vld [vmem:[%s18589_s9 + $0x3e8] sm:$0xff] }
 0x3c8   :  { %2388 = vmatpush1.msra.mxu0 %v12092_v20  ;;  %13304 = vmatpush3.msra.mxu1 %v12094_v21  ;;  %v12156_v20 = vld [vmem:[%s18589_s9 + $0x3f8] sm:$0xff]  ;;  %v12150_v21 = vld [vmem:[%s18589_s9 + $0x3c8] sm:$0xff] }
 0x3c9   :  { %2389 = vmatprep.subr.mxu0 %v12088_v23  ;;  %13305 = vmatprep.subr.mxu1 %v14446_v1  ;;  %v12152_v23 = vld [vmem:[%s18589_s9 + $0x3d8] sm:$0xff] }
 0x3ca   :  { %2390 = vmatpush1.msra.mxu0 %v12087_v24  ;;  %13306 = vmatpush3.msra.mxu1 %v12089_v25  ;;  %v12149_v24 = vld [vmem:[%s18589_s9 + $0x3c0] sm:$0xff]  ;;  %v12151_v25 = vld [vmem:[%s18589_s9 + $0x3d0] sm:$0xff] }
 0x3cb   :  { %2391 = vmatprep.subr.mxu0 %v12083_v26  ;;  %13307 = vmatprep.subr.mxu1 %v14446_v1  ;;  %v3133_v26 = vrot.slane %v15036_v22, 6 }
 0x3cc   :  { %2392 = vmatpush1.msra.mxu0 %v12082_v28  ;;  %2425 = vmatprep.mubr.f32.mxu0 %v14446_v1  ;;  %v12188_v28 = vld [vmem:[%s18589_s9 + $0x4e0] sm:$0xff] }
 0x3cd   :  { %13308 = vmatpush3.msra.mxu1 %v12084_v29  ;;  %13309 = vmatprep.mubr.msk.f32.mxu1 %vm14447_vm0, %v14446_v1  ;;  %v12168_v29 = vld [vmem:[%s18589_s9 + $0x458] sm:$0xff] }
 0x3ce   :  { %12101 = vmatmul.mubr.msk.f32.vlgmr.msra.gmra.mxu0 %vm69_vm1, %v2287_v15  ;;  %13310 = vmatmul.mubr.msk.f32.vlgmr.msra.gmra.mxu1 %vm69_vm1, %v2287_v15  ;;  %v12159_v15 = vld [vmem:[%s18589_s9 + $0x410] sm:$0xff] }
 0x3cf   :  { %2596 = vmatprep.subr.mxu0 %v12119_v30  ;;  %2667 = vmatprep.subr.mxu1 %v12121_v31  ;;  %v12187_v30 = vld [vmem:[%s18589_s9 + $0x4d8] sm:$0xff] }
 0x3d0   :  { %2597 = vmatpush1.msra.mxu0 %v12118_v32  ;;  %2668 = vmatpush1.msra.mxu1 %v12120_v33  ;;  %v12183_v31 = vld [vmem:[%s18589_s9 + $0x4b8] sm:$0xff]  ;;  %v12163_v32 = vld [vmem:[%s18589_s9 + $0x430] sm:$0xff] }
 0x3d1   :  { %2598 = vmatprep.subr.mxu0 %v12114_v34  ;;  %2669 = vmatprep.subr.mxu1 %v12116_v35  ;;  %v12182_v33 = vld [vmem:[%s18589_s9 + $0x4b0] sm:$0xff]  ;;  %v12158_v35 = vld [vmem:[%s18589_s9 + $0x408] sm:$0xff] }
 0x3d2   :  { %2599 = vmatpush1.msra.mxu0 %v12113_v36  ;;  %2670 = vmatpush1.msra.mxu1 %v12115_v37  ;;  %v12178_v34 = vld [vmem:[%s18589_s9 + $0x490] sm:$0xff]  ;;  %v12177_v36 = vld [vmem:[%s18589_s9 + $0x488] sm:$0xff] }
 0x3d3   :  { %2600 = vmatprep.subr.mxu0 %v12109_v38  ;;  %2671 = vmatprep.subr.mxu1 %v12111_v39  ;;  %v12173_v37 = vld [vmem:[%s18589_s9 + $0x468] sm:$0xff]  ;;  %v12153_v38 = vld [vmem:[%s18589_s9 + $0x3e0] sm:$0xff] }
 0x3d4   :  { %2601 = vmatpush1.msra.mxu0 %v12108_v40  ;;  %2672 = vmatpush1.msra.mxu1 %v12110_v41  ;;  %v12172_v39 = vld [vmem:[%s18589_s9 + $0x460] sm:$0xff]  ;;  %v3415_v40 = vrot.slane %v15036_v22, 7  ;;  %v12190_v41 = vld [vmem:[%s18589_s9 + $0x4f0] sm:$0xff]  ;;  %v12185_v22 = vld [vmem:[%s18589_s9 + $0x4c8] sm:$0xff] }
 0x3d5   :  { %2602 = vmatprep.subr.mxu0 %v12104_v42  ;;  %2673 = vmatprep.subr.mxu1 %v12106_v43  ;;  %v12189_v42 = vld [vmem:[%s18589_s9 + $0x4e8] sm:$0xff]  ;;  %v12191_v43 = vld [vmem:[%s18589_s9 + $0x4f8] sm:$0xff] }
 0x3d6   :  { %2603 = vmatpush1.msra.mxu0 %v12103_v44  ;;  %2636 = vmatprep.mubr.f32.mxu0 %v14446_v1  ;;  %v12184_v44 = vld [vmem:[%s18589_s9 + $0x4c0] sm:$0xff] }
 0x3d7   :  { %2674 = vmatpush1.msra.mxu1 %v12105_v45  ;;  %2707 = vmatprep.mubr.f32.mxu1 %v14446_v1  ;;  %v12186_v45 = vld [vmem:[%s18589_s9 + $0x4d0] sm:$0xff] }
 0x3d8   :  { %12123 = vmatmul.mubr.msk.f32.vlgmr.msra.gmra.mxu0 %vm69_vm1, %v2569_v46  ;;  %12124 = vmatmul.mubr.msk.f32.vlgmr.msra.gmra.mxu1 %vm69_vm1, %v2569_v46 }
 0x3d9   :  { %13312 = vmatprep.subr.mxu0 %v14446_v1  ;;  %2878 = vmatprep.subr.mxu1 %v12142_v47  ;;  %v12179_v47 = vld [vmem:[%s18589_s9 + $0x498] sm:$0xff] }
 0x3da   :  { %13313 = vmatpush3.msra.mxu0 %v12122_v48  ;;  %2879 = vmatpush1.msra.mxu1 %v12141_v49  ;;  %v12181_v48 = vld [vmem:[%s18589_s9 + $0x4a8] sm:$0xff]  ;;  %v12175_v49 = vld [vmem:[%s18589_s9 + $0x478] sm:$0xff] }
 0x3db   :  { %13314 = vmatprep.subr.mxu0 %v14446_v1  ;;  %2880 = vmatprep.subr.mxu1 %v12137_v50  ;;  %v12174_v50 = vld [vmem:[%s18589_s9 + $0x470] sm:$0xff] }
 0x3dc   :  { %13315 = vmatpush3.msra.mxu0 %v12117_v51  ;;  %2881 = vmatpush1.msra.mxu1 %v12136_v52  ;;  %v12176_v51 = vld [vmem:[%s18589_s9 + $0x480] sm:$0xff] }
 0x3dd   :  { %13316 = vmatprep.subr.mxu0 %v14446_v1  ;;  %2882 = vmatprep.subr.mxu1 %v12132_v53  ;;  %v12211_v52 = vld [vmem:[%s18589_s9 + $0x580] sm:$0xff]  ;;  %v12213_v53 = vld [vmem:[%s18589_s9 + $0x590] sm:$0xff] }
 0x3de   :  { %13317 = vmatpush3.msra.mxu0 %v12112_v54  ;;  %2883 = vmatpush1.msra.mxu1 %v12131_v55  ;;  %v12210_v54 = vld [vmem:[%s18589_s9 + $0x578] sm:$0xff]  ;;  %v12212_v55 = vld [vmem:[%s18589_s9 + $0x588] sm:$0xff] }
 0x3df   :  { %13318 = vmatprep.subr.mxu0 %v14446_v1  ;;  %2884 = vmatprep.subr.mxu1 %v12127_v56  ;;  %v12206_v56 = vld [vmem:[%s18589_s9 + $0x558] sm:$0xff] }
 0x3e0   :  { %13319 = vmatpush3.msra.mxu0 %v12107_v57  ;;  %13320 = vmatprep.mubr.msk.f32.mxu0 %vm14447_vm0, %v14446_v1  ;;  %v12208_v57 = vld [vmem:[%s18589_s9 + $0x568] sm:$0xff] }
 0x3e1   :  { %2885 = vmatpush1.msra.mxu1 %v12126_v58  ;;  %2918 = vmatprep.mubr.f32.mxu1 %v14446_v1  ;;  %v12205_v58 = vld [vmem:[%s18589_s9 + $0x550] sm:$0xff] }
 0x3e2   :  { %13321 = vmatmul.mubr.msk.f32.vlgmr.msra.gmra.mxu0 %vm69_vm1, %v2569_v46  ;;  %12146 = vmatmul.mubr.msk.f32.vlgmr.msra.gmra.mxu1 %vm69_vm1, %v2851_v59  ;;  %v12180_v46 = vld [vmem:[%s18589_s9 + $0x4a0] sm:$0xff] }
 0x3e3   :  { %2949 = vmatprep.subr.mxu0 %v12144_v60  ;;  %13323 = vmatprep.subr.mxu1 %v14446_v1  ;;  %v12201_v60 = vld [vmem:[%s18589_s9 + $0x530] sm:$0xff] }
 0x3e4   :  { %2950 = vmatpush1.msra.mxu0 %v12143_v61  ;;  %13324 = vmatpush3.msra.mxu1 %v12145_v62  ;;  %v12203_v61 = vld [vmem:[%s18589_s9 + $0x540] sm:$0xff]  ;;  %v12200_v62 = vld [vmem:[%s18589_s9 + $0x528] sm:$0xff] }
 0x3e5   :  { %2951 = vmatprep.subr.mxu0 %v12139_v63  ;;  %13325 = vmatprep.subr.mxu1 %v14446_v1  ;;  %v12202_v63 = vld [vmem:[%s18589_s9 + $0x538] sm:$0xff] }
 0x3e6   :  { %2952 = vmatpush1.msra.mxu0 %v12138_v0  ;;  %13326 = vmatpush3.msra.mxu1 %v12140_v2  ;;  %v12196_v0 = vld [vmem:[%s18589_s9 + $0x508] sm:$0xff]  ;;  %v12198_v2 = vld [vmem:[%s18589_s9 + $0x518] sm:$0xff] }
 0x3e7   :  { %2953 = vmatprep.subr.mxu0 %v12134_v3  ;;  %13327 = vmatprep.subr.mxu1 %v14446_v1  ;;  %v12195_v3 = vld [vmem:[%s18589_s9 + $0x500] sm:$0xff] }
 0x3e8   :  { %2954 = vmatpush1.msra.mxu0 %v12133_v4  ;;  %13328 = vmatpush3.msra.mxu1 %v12135_v5  ;;  %v12197_v4 = vld [vmem:[%s18589_s9 + $0x510] sm:$0xff]  ;;  %v15613_v5 = vmul.f32 0.33333334, %v15047_v27  ;;  %v12229_v27 = vld [vmem:[%s18589_s9 + $0x5f8] sm:$0xff] }
 0x3e9   :  { %2955 = vmatprep.subr.mxu0 %v12129_v6  ;;  %13329 = vmatprep.subr.mxu1 %v14446_v1  ;;  %v12234_v6 = vld [vmem:[%s18589_s9 + $0x620] sm:$0xff] }
 0x3ea   :  { %2956 = vmatpush1.msra.mxu0 %v12128_v7  ;;  %2989 = vmatprep.mubr.f32.mxu0 %v14446_v1  ;;  %v12214_v7 = vld [vmem:[%s18589_s9 + $0x598] sm:$0xff] }
 0x3eb   :  { %13330 = vmatpush3.msra.mxu1 %v12130_v8  ;;  %13331 = vmatprep.mubr.msk.f32.mxu1 %vm14447_vm0, %v14446_v1  ;;  %v12233_v8 = vld [vmem:[%s18589_s9 + $0x618] sm:$0xff] }
 0x3ec   :  { %12147 = vmatmul.mubr.msk.f32.vlgmr.msra.gmra.mxu0 %vm69_vm1, %v2851_v59  ;;  %13332 = vmatmul.mubr.msk.f32.vlgmr.msra.gmra.mxu1 %vm69_vm1, %v2851_v59  ;;  %v12207_v59 = vld [vmem:[%s18589_s9 + $0x560] sm:$0xff] }
 0x3ed   :  { %3160 = vmatprep.subr.mxu0 %v12165_v9  ;;  %3231 = vmatprep.subr.mxu1 %v12167_v10  ;;  %v12209_v9 = vld [vmem:[%s18589_s9 + $0x570] sm:$0xff] }
 0x3ee   :  { %3161 = vmatpush1.msra.mxu0 %v12164_v11  ;;  %3232 = vmatpush1.msra.mxu1 %v12166_v12  ;;  %v12228_v10 = vld [vmem:[%s18589_s9 + $0x5f0] sm:$0xff]  ;;  %v12204_v12 = vld [vmem:[%s18589_s9 + $0x548] sm:$0xff] }
 0x3ef   :  { %3162 = vmatprep.subr.mxu0 %v12160_v13  ;;  %3233 = vmatprep.subr.mxu1 %v12162_v14  ;;  %v12224_v11 = vld [vmem:[%s18589_s9 + $0x5d0] sm:$0xff]  ;;  %v12223_v13 = vld [vmem:[%s18589_s9 + $0x5c8] sm:$0xff] }
 0x3f0   :  { %3163 = vmatpush1.msra.mxu0 %v12159_v15  ;;  %3234 = vmatpush1.msra.mxu1 %v12161_v16  ;;  %v12219_v14 = vld [vmem:[%s18589_s9 + $0x5a8] sm:$0xff]  ;;  %v12199_v15 = vld [vmem:[%s18589_s9 + $0x520] sm:$0xff] }
 0x3f1   :  { %3164 = vmatprep.subr.mxu0 %v12155_v17  ;;  %3235 = vmatprep.subr.mxu1 %v12157_v18  ;;  %v12218_v16 = vld [vmem:[%s18589_s9 + $0x5a0] sm:$0xff]  ;;  %v3979_v17 = vrot.slane %v15613_v5, 1  ;;  %v12236_v18 = vld [vmem:[%s18589_s9 + $0x630] sm:$0xff] }
 0x3f2   :  { %3165 = vmatpush1.msra.mxu0 %v12154_v19  ;;  %3236 = vmatpush1.msra.mxu1 %v12156_v20  ;;  %v12235_v19 = vld [vmem:[%s18589_s9 + $0x628] sm:$0xff]  ;;  %v12237_v20 = vld [vmem:[%s18589_s9 + $0x638] sm:$0xff] }
 0x3f3   :  { %3166 = vmatprep.subr.mxu0 %v12150_v21  ;;  %3237 = vmatprep.subr.mxu1 %v12152_v23  ;;  %v12231_v21 = vld [vmem:[%s18589_s9 + $0x608] sm:$0xff]  ;;  %v12230_v23 = vld [vmem:[%s18589_s9 + $0x600] sm:$0xff] }
 0x3f4   :  { %3167 = vmatpush1.msra.mxu0 %v12149_v24  ;;  %3200 = vmatprep.mubr.f32.mxu0 %v14446_v1  ;;  %v12232_v24 = vld [vmem:[%s18589_s9 + $0x610] sm:$0xff] }
 0x3f5   :  { %3238 = vmatpush1.msra.mxu1 %v12151_v25  ;;  %3271 = vmatprep.mubr.f32.mxu1 %v14446_v1  ;;  %v12226_v25 = vld [vmem:[%s18589_s9 + $0x5e0] sm:$0xff] }
 0x3f6   :  { %12169 = vmatmul.mubr.msk.f32.vlgmr.msra.gmra.mxu0 %vm69_vm1, %v3133_v26  ;;  %12170 = vmatmul.mubr.msk.f32.vlgmr.msra.gmra.mxu1 %vm69_vm1, %v3133_v26 }
 0x3f7   :  { %13334 = vmatprep.subr.mxu0 %v14446_v1  ;;  %3442 = vmatprep.subr.mxu1 %v12188_v28  ;;  %v12227_v28 = vld [vmem:[%s18589_s9 + $0x5e8] sm:$0xff] }
 0x3f8   :  { %13335 = vmatpush3.msra.mxu0 %v12168_v29  ;;  %3443 = vmatpush1.msra.mxu1 %v12187_v30  ;;  %v12221_v29 = vld [vmem:[%s18589_s9 + $0x5b8] sm:$0xff]  ;;  %v12220_v30 = vld [vmem:[%s18589_s9 + $0x5b0] sm:$0xff] }
 0x3f9   :  { %13336 = vmatprep.subr.mxu0 %v14446_v1  ;;  %3444 = vmatprep.subr.mxu1 %v12183_v31  ;;  %v12222_v31 = vld [vmem:[%s18589_s9 + $0x5c0] sm:$0xff] }
 0x3fa   :  { %13337 = vmatpush3.msra.mxu0 %v12163_v32  ;;  %3445 = vmatpush1.msra.mxu1 %v12182_v33  ;;  %v12257_v32 = vld [vmem:[%s18589_s9 + $0x6c0] sm:$0xff]  ;;  %v12259_v33 = vld [vmem:[%s18589_s9 + $0x6d0] sm:$0xff] }
 0x3fb   :  { %13338 = vmatprep.subr.mxu0 %v14446_v1  ;;  %3446 = vmatprep.subr.mxu1 %v12178_v34  ;;  %v12256_v34 = vld [vmem:[%s18589_s9 + $0x6b8] sm:$0xff] }
 0x3fc   :  { %13339 = vmatpush3.msra.mxu0 %v12158_v35  ;;  %3447 = vmatpush1.msra.mxu1 %v12177_v36  ;;  %v12258_v35 = vld [vmem:[%s18589_s9 + $0x6c8] sm:$0xff]  ;;  %v12252_v36 = vld [vmem:[%s18589_s9 + $0x698] sm:$0xff] }
 0x3fd   :  { %13340 = vmatprep.subr.mxu0 %v14446_v1  ;;  %3448 = vmatprep.subr.mxu1 %v12173_v37  ;;  %v12254_v37 = vld [vmem:[%s18589_s9 + $0x6a8] sm:$0xff] }
 0x3fe   :  { %13341 = vmatpush3.msra.mxu0 %v12153_v38  ;;  %13342 = vmatprep.mubr.msk.f32.mxu0 %vm14447_vm0, %v14446_v1  ;;  %v12251_v38 = vld [vmem:[%s18589_s9 + $0x690] sm:$0xff] }
 0x3ff   :  { %3449 = vmatpush1.msra.mxu1 %v12172_v39  ;;  %3482 = vmatprep.mubr.f32.mxu1 %v14446_v1  ;;  %v12253_v39 = vld [vmem:[%s18589_s9 + $0x6a0] sm:$0xff] }
 0x400   :  { %13343 = vmatmul.mubr.msk.f32.vlgmr.msra.gmra.mxu0 %vm69_vm1, %v3133_v26  ;;  %12192 = vmatmul.mubr.msk.f32.vlgmr.msra.gmra.mxu1 %vm69_vm1, %v3415_v40  ;;  %v12225_v26 = vld [vmem:[%s18589_s9 + $0x5d8] sm:$0xff] }
 0x401   :  { %3513 = vmatprep.subr.mxu0 %v12190_v41  ;;  %13345 = vmatprep.subr.mxu1 %v14446_v1  ;;  %v12249_v41 = vld [vmem:[%s18589_s9 + $0x680] sm:$0xff] }
 0x402   :  { %3514 = vmatpush1.msra.mxu0 %v12189_v42  ;;  %13346 = vmatpush3.msra.mxu1 %v12191_v43  ;;  %v12246_v42 = vld [vmem:[%s18589_s9 + $0x668] sm:$0xff]  ;;  %v12248_v43 = vld [vmem:[%s18589_s9 + $0x678] sm:$0xff] }
 0x403   :  { %3515 = vmatprep.subr.mxu0 %v12185_v22  ;;  %13347 = vmatprep.subr.mxu1 %v14446_v1  ;;  %v12242_v22 = vld [vmem:[%s18589_s9 + $0x648] sm:$0xff] }
 0x404   :  { %3516 = vmatpush1.msra.mxu0 %v12184_v44  ;;  %13348 = vmatpush3.msra.mxu1 %v12186_v45  ;;  %v12244_v44 = vld [vmem:[%s18589_s9 + $0x658] sm:$0xff]  ;;  %v12241_v45 = vld [vmem:[%s18589_s9 + $0x640] sm:$0xff] }
 0x405   :  { %3517 = vmatprep.subr.mxu0 %v12180_v46  ;;  %13349 = vmatprep.subr.mxu1 %v14446_v1  ;;  %v12243_v46 = vld [vmem:[%s18589_s9 + $0x650] sm:$0xff] }
 0x406   :  { %3518 = vmatpush1.msra.mxu0 %v12179_v47  ;;  %13350 = vmatpush3.msra.mxu1 %v12181_v48  ;;  %v4261_v47 = vrot.slane %v15613_v5, 2  ;;  %v12280_v48 = vld [vmem:[%s18589_s9 + $0x760] sm:$0xff] }
 0x407   :  { %3519 = vmatprep.subr.mxu0 %v12175_v49  ;;  %13351 = vmatprep.subr.mxu1 %v14446_v1  ;;  %v12260_v49 = vld [vmem:[%s18589_s9 + $0x6d8] sm:$0xff] }
 0x408   :  { %3520 = vmatpush1.msra.mxu0 %v12174_v50  ;;  %3553 = vmatprep.mubr.f32.mxu0 %v14446_v1  ;;  %v12279_v50 = vld [vmem:[%s18589_s9 + $0x758] sm:$0xff] }
 0x409   :  { %13352 = vmatpush3.msra.mxu1 %v12176_v51  ;;  %13353 = vmatprep.mubr.msk.f32.mxu1 %vm14447_vm0, %v14446_v1  ;;  %v12275_v51 = vld [vmem:[%s18589_s9 + $0x738] sm:$0xff] }
 0x40a   :  { %12193 = vmatmul.mubr.msk.f32.vlgmr.msra.gmra.mxu0 %vm69_vm1, %v3415_v40  ;;  %13354 = vmatmul.mubr.msk.f32.vlgmr.msra.gmra.mxu1 %vm69_vm1, %v3415_v40  ;;  %v12247_v40 = vld [vmem:[%s18589_s9 + $0x670] sm:$0xff] }
 0x40b   :  { %3724 = vmatprep.subr.mxu0 %v12211_v52  ;;  %3795 = vmatprep.subr.mxu1 %v12213_v53  ;;  %v12255_v52 = vld [vmem:[%s18589_s9 + $0x6b0] sm:$0xff] }
 0x40c   :  { %3725 = vmatpush1.msra.mxu0 %v12210_v54  ;;  %3796 = vmatpush1.msra.mxu1 %v12212_v55  ;;  %v12274_v53 = vld [vmem:[%s18589_s9 + $0x730] sm:$0xff]  ;;  %v12250_v55 = vld [vmem:[%s18589_s9 + $0x688] sm:$0xff] }
 0x40d   :  { %3726 = vmatprep.subr.mxu0 %v12206_v56  ;;  %3797 = vmatprep.subr.mxu1 %v12208_v57  ;;  %v12270_v54 = vld [vmem:[%s18589_s9 + $0x710] sm:$0xff]  ;;  %v12269_v56 = vld [vmem:[%s18589_s9 + $0x708] sm:$0xff] }
 0x40e   :  { %3727 = vmatpush1.msra.mxu0 %v12205_v58  ;;  %3798 = vmatpush1.msra.mxu1 %v12207_v59  ;;  %v12265_v57 = vld [vmem:[%s18589_s9 + $0x6e8] sm:$0xff]  ;;  %v12245_v58 = vld [vmem:[%s18589_s9 + $0x660] sm:$0xff] }
 0x40f   :  { %3728 = vmatprep.subr.mxu0 %v12201_v60  ;;  %3799 = vmatprep.subr.mxu1 %v12203_v61  ;;  %v12264_v59 = vld [vmem:[%s18589_s9 + $0x6e0] sm:$0xff]  ;;  %v4543_v60 = vrot.slane %v15613_v5, 3  ;;  %v12282_v61 = vld [vmem:[%s18589_s9 + $0x770] sm:$0xff] }
 0x410   :  { %3729 = vmatpush1.msra.mxu0 %v12200_v62  ;;  %3800 = vmatpush1.msra.mxu1 %v12202_v63  ;;  %v12281_v62 = vld [vmem:[%s18589_s9 + $0x768] sm:$0xff]  ;;  %v12283_v63 = vld [vmem:[%s18589_s9 + $0x778] sm:$0xff] }
 0x411   :  { %3730 = vmatprep.subr.mxu0 %v12196_v0  ;;  %3801 = vmatprep.subr.mxu1 %v12198_v2  ;;  %v12277_v0 = vld [vmem:[%s18589_s9 + $0x748] sm:$0xff]  ;;  %v12276_v2 = vld [vmem:[%s18589_s9 + $0x740] sm:$0xff] }
 0x412   :  { %3731 = vmatpush1.msra.mxu0 %v12195_v3  ;;  %3764 = vmatprep.mubr.f32.mxu0 %v14446_v1  ;;  %v12278_v3 = vld [vmem:[%s18589_s9 + $0x750] sm:$0xff] }
 0x413   :  { %3802 = vmatpush1.msra.mxu1 %v12197_v4  ;;  %3835 = vmatprep.mubr.f32.mxu1 %v14446_v1  ;;  %v12272_v4 = vld [vmem:[%s18589_s9 + $0x720] sm:$0xff] }
 0x414   :  { %12215 = vmatmul.mubr.msk.f32.vlgmr.msra.gmra.mxu0 %vm69_vm1, %v15613_v5  ;;  %12216 = vmatmul.mubr.msk.f32.vlgmr.msra.gmra.mxu1 %vm69_vm1, %v15613_v5 }
 0x415   :  { %13356 = vmatprep.subr.mxu0 %v14446_v1  ;;  %4006 = vmatprep.subr.mxu1 %v12234_v6  ;;  %v12271_v6 = vld [vmem:[%s18589_s9 + $0x718] sm:$0xff] }
 0x416   :  { %13357 = vmatpush3.msra.mxu0 %v12214_v7  ;;  %4007 = vmatpush1.msra.mxu1 %v12233_v8  ;;  %v12273_v7 = vld [vmem:[%s18589_s9 + $0x728] sm:$0xff]  ;;  %v12267_v8 = vld [vmem:[%s18589_s9 + $0x6f8] sm:$0xff] }
 0x417   :  { %13358 = vmatprep.subr.mxu0 %v14446_v1  ;;  %4008 = vmatprep.subr.mxu1 %v12229_v27  ;;  %v12266_v27 = vld [vmem:[%s18589_s9 + $0x6f0] sm:$0xff] }
 0x418   :  { %13359 = vmatpush3.msra.mxu0 %v12209_v9  ;;  %4009 = vmatpush1.msra.mxu1 %v12228_v10  ;;  %v12268_v9 = vld [vmem:[%s18589_s9 + $0x700] sm:$0xff] }
 0x419   :  { %13360 = vmatprep.subr.mxu0 %v14446_v1  ;;  %4010 = vmatprep.subr.mxu1 %v12224_v11  ;;  %v12303_v10 = vld [vmem:[%s18589_s9 + $0x800] sm:$0xff]  ;;  %v12305_v11 = vld [vmem:[%s18589_s9 + $0x810] sm:$0xff] }
 0x41a   :  { %13361 = vmatpush3.msra.mxu0 %v12204_v12  ;;  %4011 = vmatpush1.msra.mxu1 %v12223_v13  ;;  %v12302_v12 = vld [vmem:[%s18589_s9 + $0x7f8] sm:$0xff]  ;;  %v12304_v13 = vld [vmem:[%s18589_s9 + $0x808] sm:$0xff] }
 0x41b   :  { %13362 = vmatprep.subr.mxu0 %v14446_v1  ;;  %4012 = vmatprep.subr.mxu1 %v12219_v14  ;;  %v12298_v14 = vld [vmem:[%s18589_s9 + $0x7d8] sm:$0xff] }
 0x41c   :  { %13363 = vmatpush3.msra.mxu0 %v12199_v15  ;;  %13364 = vmatprep.mubr.msk.f32.mxu0 %vm14447_vm0, %v14446_v1  ;;  %v12300_v15 = vld [vmem:[%s18589_s9 + $0x7e8] sm:$0xff] }
 0x41d   :  { %4013 = vmatpush1.msra.mxu1 %v12218_v16  ;;  %4046 = vmatprep.mubr.f32.mxu1 %v14446_v1  ;;  %v12297_v16 = vld [vmem:[%s18589_s9 + $0x7d0] sm:$0xff] }
 0x41e   :  { %13365 = vmatmul.mubr.msk.f32.vlgmr.msra.gmra.mxu0 %vm69_vm1, %v15613_v5  ;;  %12238 = vmatmul.mubr.msk.f32.vlgmr.msra.gmra.mxu1 %vm69_vm1, %v3979_v17 }
 0x41f   :  { %4077 = vmatprep.subr.mxu0 %v12236_v18  ;;  %13367 = vmatprep.subr.mxu1 %v14446_v1  ;;  %v12293_v18 = vld [vmem:[%s18589_s9 + $0x7b0] sm:$0xff] }
 0x420   :  { %4078 = vmatpush1.msra.mxu0 %v12235_v19  ;;  %13368 = vmatpush3.msra.mxu1 %v12237_v20  ;;  %v12295_v19 = vld [vmem:[%s18589_s9 + $0x7c0] sm:$0xff]  ;;  %v12292_v20 = vld [vmem:[%s18589_s9 + $0x7a8] sm:$0xff] }
 0x421   :  { %4079 = vmatprep.subr.mxu0 %v12231_v21  ;;  %13369 = vmatprep.subr.mxu1 %v14446_v1  ;;  %v12294_v21 = vld [vmem:[%s18589_s9 + $0x7b8] sm:$0xff] }
 0x422   :  { %4080 = vmatpush1.msra.mxu0 %v12230_v23  ;;  %13370 = vmatpush3.msra.mxu1 %v12232_v24  ;;  %v12288_v23 = vld [vmem:[%s18589_s9 + $0x788] sm:$0xff]  ;;  %v12290_v24 = vld [vmem:[%s18589_s9 + $0x798] sm:$0xff] }
 0x423   :  { %4081 = vmatprep.subr.mxu0 %v12226_v25  ;;  %13371 = vmatprep.subr.mxu1 %v14446_v1  ;;  %v12287_v25 = vld [vmem:[%s18589_s9 + $0x780] sm:$0xff] }
 0x424   :  { %4082 = vmatpush1.msra.mxu0 %v12225_v26  ;;  %13372 = vmatpush3.msra.mxu1 %v12227_v28  ;;  %v12289_v26 = vld [vmem:[%s18589_s9 + $0x790] sm:$0xff]  ;;  %v4825_v28 = vrot.slane %v15613_v5, 4 }
 0x425   :  { %4083 = vmatprep.subr.mxu0 %v12221_v29  ;;  %13373 = vmatprep.subr.mxu1 %v14446_v1  ;;  %v12326_v29 = vld [vmem:[%s18589_s9 + $0x8a0] sm:$0xff] }
 0x426   :  { %4084 = vmatpush1.msra.mxu0 %v12220_v30  ;;  %4117 = vmatprep.mubr.f32.mxu0 %v14446_v1  ;;  %v12306_v30 = vld [vmem:[%s18589_s9 + $0x818] sm:$0xff] }
 0x427   :  { %13374 = vmatpush3.msra.mxu1 %v12222_v31  ;;  %13375 = vmatprep.mubr.msk.f32.mxu1 %vm14447_vm0, %v14446_v1  ;;  %v12325_v31 = vld [vmem:[%s18589_s9 + $0x898] sm:$0xff] }
 0x428   :  { %12239 = vmatmul.mubr.msk.f32.vlgmr.msra.gmra.mxu0 %vm69_vm1, %v3979_v17  ;;  %13376 = vmatmul.mubr.msk.f32.vlgmr.msra.gmra.mxu1 %vm69_vm1, %v3979_v17  ;;  %v12299_v17 = vld [vmem:[%s18589_s9 + $0x7e0] sm:$0xff] }
 0x429   :  { %4288 = vmatprep.subr.mxu0 %v12257_v32  ;;  %4359 = vmatprep.subr.mxu1 %v12259_v33  ;;  %v12321_v32 = vld [vmem:[%s18589_s9 + $0x878] sm:$0xff]  ;;  %v12301_v33 = vld [vmem:[%s18589_s9 + $0x7f0] sm:$0xff] }
 0x42a   :  { %4289 = vmatpush1.msra.mxu0 %v12256_v34  ;;  %4360 = vmatpush1.msra.mxu1 %v12258_v35  ;;  %v12320_v34 = vld [vmem:[%s18589_s9 + $0x870] sm:$0xff] }
 0x42b   :  { %4290 = vmatprep.subr.mxu0 %v12252_v36  ;;  %4361 = vmatprep.subr.mxu1 %v12254_v37  ;;  %v12316_v35 = vld [vmem:[%s18589_s9 + $0x850] sm:$0xff]  ;;  %v12296_v36 = vld [vmem:[%s18589_s9 + $0x7c8] sm:$0xff] }
 0x42c   :  { %4291 = vmatpush1.msra.mxu0 %v12251_v38  ;;  %4362 = vmatpush1.msra.mxu1 %v12253_v39  ;;  %v12315_v37 = vld [vmem:[%s18589_s9 + $0x848] sm:$0xff]  ;;  %v12291_v39 = vld [vmem:[%s18589_s9 + $0x7a0] sm:$0xff] }
 0x42d   :  { %4292 = vmatprep.subr.mxu0 %v12247_v40  ;;  %4363 = vmatprep.subr.mxu1 %v12249_v41  ;;  %v12311_v38 = vld [vmem:[%s18589_s9 + $0x828] sm:$0xff]  ;;  %v12310_v40 = vld [vmem:[%s18589_s9 + $0x820] sm:$0xff]  ;;  %v14448_v41 = vmov 1966171168  }
 0x42e   :  { %4293 = vmatpush1.msra.mxu0 %v12246_v42  ;;  %4364 = vmatpush1.msra.mxu1 %v12248_v43  ;;  %v1664_v42 = vunpack.c.l.s4 %v14448_v41  ;;  %v1666_v43 = vlaneseq  ;;  %v12342_v41 = vld [vmem:[%s18589_s9 + $0x908] sm:$0xff] }
 0x42f   :  { %4294 = vmatprep.subr.mxu0 %v12242_v22  ;;  %4365 = vmatprep.subr.mxu1 %v12244_v44  ;;  %v5107_v22 = vrot.slane %v15613_v5, 5  ;;  %v12328_v44 = vld [vmem:[%s18589_s9 + $0x8b0] sm:$0xff] }
 0x430   :  { %4295 = vmatpush1.msra.mxu0 %v12241_v45  ;;  %4328 = vmatprep.mubr.f32.mxu0 %v14446_v1  ;;  %v12327_v45 = vld [vmem:[%s18589_s9 + $0x8a8] sm:$0xff] }
 0x431   :  { %4366 = vmatpush1.msra.mxu1 %v12243_v46  ;;  %4399 = vmatprep.mubr.f32.mxu1 %v14446_v1  ;;  %v12329_v46 = vld [vmem:[%s18589_s9 + $0x8b8] sm:$0xff] }
 0x432   :  { %12261 = vmatmul.mubr.msk.f32.vlgmr.msra.gmra.mxu0 %vm69_vm1, %v4261_v47  ;;  %12262 = vmatmul.mubr.msk.f32.vlgmr.msra.gmra.mxu1 %vm69_vm1, %v4261_v47 }
 0x433   :  { %13378 = vmatprep.subr.mxu0 %v14446_v1  ;;  %4570 = vmatprep.subr.mxu1 %v12280_v48  ;;  %v1665_v48 = vunpack.c.0.s8 %v1664_v42  ;;  %v12361_v42 = vld [vmem:[%s18589_s9 + $0x988] sm:$0xff] }
 0x434   :  { %13379 = vmatpush3.msra.mxu0 %v12260_v49  ;;  %4571 = vmatpush1.msra.mxu1 %v12279_v50  ;;  %v15968_v49 = vshrl.u32 %v1666_v43, 7  ;;  %v12322_v50 = vld [vmem:[%s18589_s9 + $0x880] sm:$0xff] }
 0x435   :  { %13380 = vmatprep.subr.mxu0 %v14446_v1  ;;  %4572 = vmatprep.subr.mxu1 %v12275_v51  ;;  %v12324_v51 = vld [vmem:[%s18589_s9 + $0x890] sm:$0xff] }
 0x436   :  { %13381 = vmatpush3.msra.mxu0 %v12255_v52  ;;  %4573 = vmatpush1.msra.mxu1 %v12274_v53  ;;  %v12318_v52 = vld [vmem:[%s18589_s9 + $0x860] sm:$0xff]  ;;  %v12317_v53 = vld [vmem:[%s18589_s9 + $0x858] sm:$0xff] }
 0x437   :  { %13382 = vmatprep.subr.mxu0 %v14446_v1  ;;  %4574 = vmatprep.subr.mxu1 %v12270_v54  ;;  %v12319_v54 = vld [vmem:[%s18589_s9 + $0x868] sm:$0xff] }
 0x438   :  { %13383 = vmatpush3.msra.mxu0 %v12250_v55  ;;  %4575 = vmatpush1.msra.mxu1 %v12269_v56 }
 0x439   :  { %13384 = vmatprep.subr.mxu0 %v14446_v1  ;;  %4576 = vmatprep.subr.mxu1 %v12265_v57  ;;  %v12313_v57 = vld [vmem:[%s18589_s9 + $0x838] sm:$0xff] }
 0x43a   :  { %13385 = vmatpush3.msra.mxu0 %v12245_v58  ;;  %13386 = vmatprep.mubr.msk.f32.mxu0 %vm14447_vm0, %v14446_v1  ;;  %v15991_v58 = vsub.s32 %v1665_v48, %v15968_v49  ;;  %v12356_v48 = vld [vmem:[%s18589_s9 + $0x960] sm:$0xff] }
 0x43b   :  { %4577 = vmatpush1.msra.mxu1 %v12264_v59  ;;  %4610 = vmatprep.mubr.f32.mxu1 %v14446_v1  ;;  %v12312_v59 = vld [vmem:[%s18589_s9 + $0x830] sm:$0xff] }
 0x43c   :  { %13387 = vmatmul.mubr.msk.f32.vlgmr.msra.gmra.mxu0 %vm69_vm1, %v4261_v47  ;;  %12284 = vmatmul.mubr.msk.f32.vlgmr.msra.gmra.mxu1 %vm69_vm1, %v4543_v60  ;;  %v12323_v47 = vld [vmem:[%s18589_s9 + $0x888] sm:$0xff] }
 0x43d   :  { %4641 = vmatprep.subr.mxu0 %v12282_v61  ;;  %13389 = vmatprep.subr.mxu1 %v14446_v1 }
 0x43e   :  { %4642 = vmatpush1.msra.mxu0 %v12281_v62  ;;  %13390 = vmatpush3.msra.mxu1 %v12283_v63  ;;  %v12314_v62 = vld [vmem:[%s18589_s9 + $0x840] sm:$0xff] }
 0x43f   :  { %4643 = vmatprep.subr.mxu0 %v12277_v0  ;;  %13391 = vmatprep.subr.mxu1 %v14446_v1 }
 0x440   :  { %4644 = vmatpush1.msra.mxu0 %v12276_v2  ;;  %13392 = vmatpush3.msra.mxu1 %v12278_v3  ;;  %v12349_v2 = vld [vmem:[%s18589_s9 + $0x940] sm:$0xff]  ;;  %v12351_v3 = vld [vmem:[%s18589_s9 + $0x950] sm:$0xff] }
 0x441   :  { %4645 = vmatprep.subr.mxu0 %v12272_v4  ;;  %13393 = vmatprep.subr.mxu1 %v14446_v1 }
 0x442   :  { %4646 = vmatpush1.msra.mxu0 %v12271_v6  ;;  %13394 = vmatpush3.msra.mxu1 %v12273_v7  ;;  %v12348_v7 = vld [vmem:[%s18589_s9 + $0x938] sm:$0xff] }
 0x443   :  { %4647 = vmatprep.subr.mxu0 %v12267_v8  ;;  %13395 = vmatprep.subr.mxu1 %v14446_v1  ;;  %v12350_v8 = vld [vmem:[%s18589_s9 + $0x948] sm:$0xff] }
 0x444   :  { %4648 = vmatpush1.msra.mxu0 %v12266_v27  ;;  %4681 = vmatprep.mubr.f32.mxu0 %v14446_v1  ;;  %v12344_v27 = vld [vmem:[%s18589_s9 + $0x918] sm:$0xff] }
 0x445   :  { %13396 = vmatpush3.msra.mxu1 %v12268_v9  ;;  %13397 = vmatprep.mubr.msk.f32.mxu1 %vm14447_vm0, %v14446_v1  ;;  %v12346_v9 = vld [vmem:[%s18589_s9 + $0x928] sm:$0xff] }
 0x446   :  { %12285 = vmatmul.mubr.msk.f32.vlgmr.msra.gmra.mxu0 %vm69_vm1, %v4543_v60  ;;  %13398 = vmatmul.mubr.msk.f32.vlgmr.msra.gmra.mxu1 %vm69_vm1, %v4543_v60 }
 0x447   :  { %4852 = vmatprep.subr.mxu0 %v12303_v10  ;;  %4923 = vmatprep.subr.mxu1 %v12305_v11  ;;  %v12343_v11 = vld [vmem:[%s18589_s9 + $0x910] sm:$0xff] }
 0x448   :  { %4853 = vmatpush1.msra.mxu0 %v12302_v12  ;;  %4924 = vmatpush1.msra.mxu1 %v12304_v13  ;;  %v12345_v12 = vld [vmem:[%s18589_s9 + $0x920] sm:$0xff]  ;;  %v12339_v13 = vld [vmem:[%s18589_s9 + $0x8f0] sm:$0xff] }
 0x449   :  { %4854 = vmatprep.subr.mxu0 %v12298_v14  ;;  %4925 = vmatprep.subr.mxu1 %v12300_v15  ;;  %v12341_v14 = vld [vmem:[%s18589_s9 + $0x900] sm:$0xff] }
 0x44a   :  { %4855 = vmatpush1.msra.mxu0 %v12297_v16  ;;  %4926 = vmatpush1.msra.mxu1 %v12299_v17  ;;  %v12338_v16 = vld [vmem:[%s18589_s9 + $0x8e8] sm:$0xff]  ;;  %v12340_v17 = vld [vmem:[%s18589_s9 + $0x8f8] sm:$0xff] }
 0x44b   :  { %4856 = vmatprep.subr.mxu0 %v12293_v18  ;;  %4927 = vmatprep.subr.mxu1 %v12295_v19 }
 0x44c   :  { %4857 = vmatpush1.msra.mxu0 %v12292_v20  ;;  %4928 = vmatpush1.msra.mxu1 %v12294_v21  ;;  %v12334_v20 = vld [vmem:[%s18589_s9 + $0x8c8] sm:$0xff]  ;;  %v12336_v21 = vld [vmem:[%s18589_s9 + $0x8d8] sm:$0xff] }
 0x44d   :  { %4858 = vmatprep.subr.mxu0 %v12288_v23  ;;  %4929 = vmatprep.subr.mxu1 %v12290_v24  ;;  %v12333_v24 = vld [vmem:[%s18589_s9 + $0x8c0] sm:$0xff] }
 0x44e   :  { %4859 = vmatpush1.msra.mxu0 %v12287_v25  ;;  %4892 = vmatprep.mubr.f32.mxu0 %v14446_v1 }
 0x44f   :  { %4930 = vmatpush1.msra.mxu1 %v12289_v26  ;;  %4963 = vmatprep.mubr.f32.mxu1 %v14446_v1  ;;  %v12335_v26 = vld [vmem:[%s18589_s9 + $0x8d0] sm:$0xff] }
 0x450   :  { %12307 = vmatmul.mubr.msk.f32.vlgmr.msra.gmra.mxu0 %vm69_vm1, %v4825_v28  ;;  %12308 = vmatmul.mubr.msk.f32.vlgmr.msra.gmra.mxu1 %vm69_vm1, %v4825_v28 }
 0x451   :  { %13400 = vmatprep.subr.mxu0 %v14446_v1  ;;  %5134 = vmatprep.subr.mxu1 %v12326_v29 }
 0x452   :  { %13401 = vmatpush3.msra.mxu0 %v12306_v30  ;;  %5135 = vmatpush1.msra.mxu1 %v12325_v31  ;;  %v5389_v30 = vrot.slane %v15613_v5, 6  ;;  %v12372_v31 = vld [vmem:[%s18589_s9 + $0x9e0] sm:$0xff] }
 0x453   :  { %13402 = vmatprep.subr.mxu0 %v14446_v1  ;;  %5136 = vmatprep.subr.mxu1 %v12321_v32  ;;  %v12352_v32 = vld [vmem:[%s18589_s9 + $0x958] sm:$0xff] }
 0x454   :  { %13403 = vmatpush3.msra.mxu0 %v12301_v33  ;;  %5137 = vmatpush1.msra.mxu1 %v12320_v34  ;;  %v12371_v33 = vld [vmem:[%s18589_s9 + $0x9d8] sm:$0xff] }
 0x455   :  { %13404 = vmatprep.subr.mxu0 %v14446_v1  ;;  %5138 = vmatprep.subr.mxu1 %v12316_v35  ;;  %v12367_v34 = vld [vmem:[%s18589_s9 + $0x9b8] sm:$0xff] }
 0x456   :  { %13405 = vmatpush3.msra.mxu0 %v12296_v36  ;;  %5139 = vmatpush1.msra.mxu1 %v12315_v37  ;;  %v12347_v36 = vld [vmem:[%s18589_s9 + $0x930] sm:$0xff] }
 0x457   :  { %13406 = vmatprep.subr.mxu0 %v14446_v1  ;;  %5140 = vmatprep.subr.mxu1 %v12311_v38  ;;  %v12366_v37 = vld [vmem:[%s18589_s9 + $0x9b0] sm:$0xff] }
 0x458   :  { %13407 = vmatpush3.msra.mxu0 %v12291_v39  ;;  %13408 = vmatprep.mubr.msk.f32.mxu0 %vm14447_vm0, %v14446_v1  ;;  %v12362_v38 = vld [vmem:[%s18589_s9 + $0x990] sm:$0xff] }
 0x459   :  { %5141 = vmatpush1.msra.mxu1 %v12310_v40  ;;  %5174 = vmatprep.mubr.f32.mxu1 %v14446_v1 }
 0x45a   :  { %13409 = vmatmul.mubr.msk.f32.vlgmr.msra.gmra.mxu0 %vm69_vm1, %v4825_v28  ;;  %12330 = vmatmul.mubr.msk.f32.vlgmr.msra.gmra.mxu1 %vm69_vm1, %v5107_v22 }
 0x45b   :  { %5205 = vmatprep.subr.mxu0 %v12328_v44  ;;  %13411 = vmatprep.subr.mxu1 %v14446_v1 }
 0x45c   :  { %5206 = vmatpush1.msra.mxu0 %v12327_v45  ;;  %13412 = vmatpush3.msra.mxu1 %v12329_v46  ;;  %v12337_v46 = vld [vmem:[%s18589_s9 + $0x8e0] sm:$0xff] }
 0x45d   :  { %5207 = vmatprep.subr.mxu0 %v12323_v47  ;;  %13413 = vmatprep.subr.mxu1 %v14446_v1  ;;  %v1510_v55 = vpop.f32.mrf.mxu0  ;;  %v1581_v56 = vpop.f32.mrf.mxu1 }
 0x45e   :  { %5208 = vmatpush1.msra.mxu0 %v12322_v50  ;;  %13414 = vmatpush3.msra.mxu1 %v12324_v51 }
 0x45f   :  { %5209 = vmatprep.subr.mxu0 %v12318_v52  ;;  %13415 = vmatprep.subr.mxu1 %v14446_v1  ;;  %v1512_v60 = vpop.f32.mrf.mxu0  ;;  %v1583_v61 = vpop.f32.mrf.mxu1 }
 0x460   :  { %5210 = vmatpush1.msra.mxu0 %v12317_v53  ;;  %13416 = vmatpush3.msra.mxu1 %v12319_v54  ;;  %v1661_v63 = vcombine.low %v1510_v55, %v1512_v60  ;;  %v1662_v0 = vcombine.low %v1581_v56, %v1583_v61  ;;  %v5671_v53 = vrot.slane %v15613_v5, 7  ;;  %v12374_v54 = vld [vmem:[%s18589_s9 + $0x9f0] sm:$0xff]  ;;  %v12373_v55 = vld [vmem:[%s18589_s9 + $0x9e8] sm:$0xff]  ;;  %v12375_v56 = vld [vmem:[%s18589_s9 + $0x9f8] sm:$0xff] }
 0x461   :  { %5211 = vmatprep.subr.mxu0 %v12313_v57  ;;  %13417 = vmatprep.subr.mxu1 %v14446_v1  ;;  %v12369_v5 = vld [vmem:[%s18589_s9 + $0x9c8] sm:$0xff]  ;;  %v12368_v60 = vld [vmem:[%s18589_s9 + $0x9c0] sm:$0xff]  ;;  %v12370_v61 = vld [vmem:[%s18589_s9 + $0x9d0] sm:$0xff] }
 0x462   :  { %5212 = vmatpush1.msra.mxu0 %v12312_v59  ;;  %5245 = vmatprep.mubr.f32.mxu0 %v14446_v1  ;;  %v1669_v4 = vrot.slane %v1661_v63, %v15991_v58  ;;  %v1676_v6 = vrot.slane %v1662_v0, %v15991_v58  ;;  %v1420_v59 = vld [vmem:[%s18590_s10] sm:$0x1f] }
 0x463   :  { %13418 = vmatpush3.msra.mxu1 %v12314_v62  ;;  %13419 = vmatprep.mubr.msk.f32.mxu1 %vm14447_vm0, %v14446_v1  ;;  %v12364_v0 = vld [vmem:[%s18589_s9 + $0x9a0] sm:$0xff] }
 0x464   :  { %12331 = vmatmul.mubr.msk.f32.vlgmr.msra.gmra.mxu0 %vm69_vm1, %v5107_v22  ;;  %13420 = vmatmul.mubr.msk.f32.vlgmr.msra.gmra.mxu1 %vm69_vm1, %v5107_v22  ;;  %v1684_v10 = vcombine.low %v1669_v4, %v1676_v6  ;;  %v12357_v22 = vld [vmem:[%s18589_s9 + $0x968] sm:$0xff]  ;;  %v12363_v4 = vld [vmem:[%s18589_s9 + $0x998] sm:$0xff] }
 0x465   :  { %5416 = vmatprep.subr.mxu0 %v12349_v2  ;;  %5487 = vmatprep.subr.mxu1 %v12351_v3  ;;  %v12365_v6 = vld [vmem:[%s18589_s9 + $0x9a8] sm:$0xff] }
 0x466   :  { %5417 = vmatpush1.msra.mxu0 %v12348_v7  ;;  %5488 = vmatpush1.msra.mxu1 %v12350_v8  ;;  %v1652_v15 = vpop.f32.mrf.mxu0  ;;  %v16046_v19 = vrot.slane %v1684_v10, %v15991_v58  ;;  %v1792_v28 = vpop.f32.mrf.mxu1 }
 0x467   :  { %5418 = vmatprep.subr.mxu0 %v12344_v27  ;;  %5489 = vmatprep.subr.mxu1 %v12346_v9  ;;  %v1683_v18 = vrot.slane %v1652_v15, %v15991_v58  ;;  %v12359_v27 = vld [vmem:[%s18589_s9 + $0x978] sm:$0xff]  ;;  %v12360_v15 = vld [vmem:[%s18589_s9 + $0x980] sm:$0xff] }
 0x468   :  { %5419 = vmatpush1.msra.mxu0 %v12343_v11  ;;  %5490 = vmatpush1.msra.mxu1 %v12345_v12  ;;  %v13278_v23 = vpop.f32.mrf.mxu0  ;;  %v1794_v35 = vpop.f32.mrf.mxu1  ;;  %v12358_v11 = vld [vmem:[%s18589_s9 + $0x970] sm:$0xff] }
 0x469   :  { %5420 = vmatprep.subr.mxu0 %v12339_v13  ;;  %5491 = vmatprep.subr.mxu1 %v12341_v14  ;;  %v16058_v25 = vrot.slane %v1683_v18, %v15991_v58  ;;  %v1943_v43 = vcombine.low %v1792_v28, %v1794_v35 }
 0x46a   :  { %5421 = vmatpush1.msra.mxu0 %v12338_v16  ;;  %5492 = vmatpush1.msra.mxu1 %v12340_v17 }
 0x46b   :  { %5422 = vmatprep.subr.mxu0 %v12334_v20  ;;  %5493 = vmatprep.subr.mxu1 %v12336_v21  ;;  %v1699_v29 = vcombine.low %v16046_v19, %v16058_v25  ;;  %v1951_v50 = vrot.slane %v1943_v43, %v15991_v58 }
 0x46c   :  { %5423 = vmatpush1.msra.mxu0 %v12333_v24  ;;  %5456 = vmatprep.mubr.f32.mxu0 %v14446_v1 }
 0x46d   :  { %5494 = vmatpush1.msra.mxu1 %v12335_v26  ;;  %5527 = vmatprep.mubr.f32.mxu1 %v14446_v1  ;;  %v1701_v7 = vadd.f32 %v1699_v29, %v1420_v59 }
 0x46e   :  { %12353 = vmatmul.mubr.msk.f32.vlgmr.msra.gmra.mxu0 %vm69_vm1, %v5389_v30  ;;  %12354 = vmatmul.mubr.msk.f32.vlgmr.msra.gmra.mxu1 %vm69_vm1, %v5389_v30 }
 0x46f   :  { %13422 = vmatprep.subr.mxu0 %v14446_v1  ;;  %5698 = vmatprep.subr.mxu1 %v12372_v31 }
 0x470   :  { %13423 = vmatpush3.msra.mxu0 %v12352_v32  ;;  %5699 = vmatpush1.msra.mxu1 %v12371_v33  ;;  %v1863_v39 = vpop.f32.mrf.mxu0  ;;  %v1934_v40 = vpop.f32.mrf.mxu1 }
 0x471   :  { %13424 = vmatprep.subr.mxu0 %v14446_v1  ;;  %5700 = vmatprep.subr.mxu1 %v12367_v34  ;;  %v1965_v51 = vrot.slane %v1934_v40, %v15991_v58 }
 0x472   :  { %13425 = vmatpush3.msra.mxu0 %v12347_v36  ;;  %5701 = vmatpush1.msra.mxu1 %v12366_v37  ;;  %v1865_v44 = vpop.f32.mrf.mxu0  ;;  %v13289_v45 = vpop.f32.mrf.mxu1 }
 0x473   :  { %13426 = vmatprep.subr.mxu0 %v14446_v1  ;;  %5702 = vmatprep.subr.mxu1 %v12362_v38  ;;  %v1944_v47 = vcombine.low %v1863_v39, %v1865_v44  ;;  %v1980_v62 = vrot.slane %v1965_v51, %v15991_v58 }
 0x474   :  { %13427 = vmatpush3.msra.mxu0 %v12342_v41  ;;  %5703 = vmatpush1.msra.mxu1 %v12361_v42 }
 0x475   :  { %13428 = vmatprep.subr.mxu0 %v14446_v1  ;;  %5704 = vmatprep.subr.mxu1 %v12357_v22  ;;  %v1958_v52 = vrot.slane %v1944_v47, %v15991_v58 }
 0x476   :  { %13429 = vmatpush3.msra.mxu0 %v12337_v46  ;;  %13430 = vmatprep.mubr.msk.f32.mxu0 %vm14447_vm0, %v14446_v1 }
 0x477   :  { %5705 = vmatpush1.msra.mxu1 %v12356_v48  ;;  %5738 = vmatprep.mubr.f32.mxu1 %v14446_v1  ;;  %v1966_v57 = vcombine.low %v1951_v50, %v1958_v52 }
 0x478   :  { %13431 = vmatmul.mubr.msk.f32.vlgmr.msra.gmra.mxu0 %vm69_vm1, %v5389_v30  ;;  %12376 = vmatmul.mubr.msk.f32.vlgmr.msra.gmra.mxu1 %vm69_vm1, %v5671_v53 }
 0x479   :  { %5769 = vmatprep.subr.mxu0 %v12374_v54  ;;  %13433 = vmatprep.subr.mxu1 %v14446_v1  ;;  %v1973_v63 = vrot.slane %v1966_v57, %v15991_v58 }
 0x47a   :  { %5770 = vmatpush1.msra.mxu0 %v12373_v55  ;;  %13434 = vmatpush3.msra.mxu1 %v12375_v56  ;;  %v2074_v2 = vpop.f32.mrf.mxu0  ;;  %v2145_v3 = vpop.f32.mrf.mxu1 }
 0x47b   :  { %5771 = vmatprep.subr.mxu0 %v12369_v5  ;;  %13435 = vmatprep.subr.mxu1 %v14446_v1  ;;  %v1981_v8 = vcombine.low %v1973_v63, %v1980_v62 }
 0x47c   :  { %5772 = vmatpush1.msra.mxu0 %v12368_v60  ;;  %13436 = vmatpush3.msra.mxu1 %v12370_v61  ;;  %v2076_v9 = vpop.f32.mrf.mxu0  ;;  %v2147_v10 = vpop.f32.mrf.mxu1 }
 0x47d   :  { %5773 = vmatprep.subr.mxu0 %v12364_v0  ;;  %13437 = vmatprep.subr.mxu1 %v14446_v1  ;;  %v2225_v12 = vcombine.low %v2074_v2, %v2076_v9  ;;  %v2226_v13 = vcombine.low %v2145_v3, %v2147_v10  ;;  %v1983_v14 = vadd.f32 %v1981_v8, %v1701_v7  ;;  %v5964_v9 = vld [vmem:[%s18591_s11 + $0xf8] sm:$0xff] }
 0x47e   :  { %5774 = vmatpush1.msra.mxu0 %v12363_v4  ;;  %13438 = vmatpush3.msra.mxu1 %v12365_v6  ;;  %v5996_v10 = vld [vmem:[%s18591_s11 + $0x1f8] sm:$0xff] }
 0x47f   :  { %5775 = vmatprep.subr.mxu0 %v12359_v27  ;;  %13439 = vmatprep.subr.mxu1 %v14446_v1  ;;  %v2233_v16 = vrot.slane %v2225_v12, %v15991_v58  ;;  %v2240_v17 = vrot.slane %v2226_v13, %v15991_v58  ;;  %v5948_v13 = vld [vmem:[%s18591_s11 + $0x78] sm:$0xff] }
 0x480   :  { %5776 = vmatpush1.msra.mxu0 %v12358_v11  ;;  %5809 = vmatprep.mubr.f32.mxu0 %v14446_v1 }
 0x481   :  { %13440 = vmatpush3.msra.mxu1 %v12360_v15  ;;  %13441 = vmatprep.mubr.msk.f32.mxu1 %vm14447_vm0, %v14446_v1  ;;  %v2248_v18 = vcombine.low %v2233_v16, %v2240_v17  ;;  %v5963_v15 = vld [vmem:[%s18591_s11 + $0xf0] sm:$0xff] }
 0x482   :  { %12377 = vmatmul.mubr.msk.f32.vlgmr.msra.gmra.mxu0 %vm69_vm1, %v5671_v53  ;;  %13442 = vmatmul.mubr.msk.f32.vlgmr.msra.gmra.mxu1 %vm69_vm1, %v5671_v53 }
 0x483   :  { %v2255_v23 = vrot.slane %v2248_v18, %v15991_v58  ;;  %12654 = vmatprep.subr.mxu0 %v5964_v9  ;;  %12689 = vmatprep.subr.mxu1 %v5996_v10  ;;  %v5995_v18 = vld [vmem:[%s18591_s11 + $0x1f0] sm:$0xff]  ;;  %v5954_v10 = vld [vmem:[%s18591_s11 + $0xa8] sm:$0xff] }
 0x484   :  { %v2216_v19 = vpop.f32.mrf.mxu0  ;;  %v2356_v25 = vpop.f32.mrf.mxu1  ;;  %12655 = vmatpush3.msra.mxu0 %v5948_v13  ;;  %v5970_v13 = vld [vmem:[%s18591_s11 + $0x128] sm:$0xff] }
 0x485   :  { %v2247_v20 = vrot.slane %v2216_v19, %v15991_v58  ;;  %v5947_v19 = vld [vmem:[%s18591_s11 + $0x70] sm:$0xff]  ;;  %12656 = vmatprep.subr.mxu0 %v5963_v15 }
 0x486   :  { %v13300_v21 = vpop.f32.mrf.mxu0  ;;  %v2358_v29 = vpop.f32.mrf.mxu1  ;;  %12657 = vmatpush3.msra.mxu0 %v5947_v19  ;;  %v5937_v19 = vld [vmem:[%s18591_s11 + $0x20] sm:$0xff] }
 0x487   :  { %v2262_v24 = vrot.slane %v2247_v20, %v15991_v58  ;;  %v2507_v32 = vcombine.low %v2356_v25, %v2358_v29  ;;  %v5979_v20 = vld [vmem:[%s18591_s11 + $0x170] sm:$0xff] }
 0x489   :  { %v2263_v26 = vcombine.low %v2255_v23, %v2262_v24  ;;  %v2515_v36 = vrot.slane %v2507_v32, %v15991_v58  ;;  %v5962_v23 = vld [vmem:[%s18591_s11 + $0xe8] sm:$0xff] }
 0x48a   :  { %v5994_v24 = vld [vmem:[%s18591_s11 + $0x1e8] sm:$0xff]  ;;  %12658 = vmatprep.subr.mxu0 %v5962_v23 }
 0x48b   :  { %v2265_v28 = vadd.f32 %v2263_v26, %v1983_v14  ;;  %v5980_v14 = vld [vmem:[%s18591_s11 + $0x178] sm:$0xff]  ;;  %v5978_v32 = vld [vmem:[%s18591_s11 + $0x168] sm:$0xff] }
 0x48c   :  { %12690 = vmatpush3.msra.mxu1 %v5980_v14 }
 0x48d   :  { %12691 = vmatprep.subr.mxu1 %v5995_v18 }
 0x48e   :  { %v2427_v30 = vpop.f32.mrf.mxu0  ;;  %v2498_v31 = vpop.f32.mrf.mxu1  ;;  %12692 = vmatpush3.msra.mxu1 %v5979_v20  ;;  %v5969_v20 = vld [vmem:[%s18591_s11 + $0x120] sm:$0xff] }
 0x48f   :  { %v2529_v37 = vrot.slane %v2498_v31, %v15991_v58  ;;  %12693 = vmatprep.subr.mxu1 %v5994_v24  ;;  %v5946_v31 = vld [vmem:[%s18591_s11 + $0x68] sm:$0xff]  ;;  %v5952_v24 = vld [vmem:[%s18591_s11 + $0x98] sm:$0xff] }
 0x490   :  { %v2429_v33 = vpop.f32.mrf.mxu0  ;;  %v13311_v34 = vpop.f32.mrf.mxu1  ;;  %12659 = vmatpush3.msra.mxu0 %v5946_v31  ;;  %12694 = vmatpush3.msra.mxu1 %v5978_v32  ;;  %v5983_v31 = vld [vmem:[%s18591_s11 + $0x190] sm:$0xff] }
 0x491   :  { %v2508_v35 = vcombine.low %v2427_v30, %v2429_v33  ;;  %v2544_v40 = vrot.slane %v2529_v37, %v15991_v58  ;;  %v5961_v33 = vld [vmem:[%s18591_s11 + $0xe0] sm:$0xff] }
 0x492   :  { %v5993_v34 = vld [vmem:[%s18591_s11 + $0x1e0] sm:$0xff]  ;;  %12660 = vmatprep.subr.mxu0 %v5961_v33 }
 0x493   :  { %v2522_v38 = vrot.slane %v2508_v35, %v15991_v58  ;;  %12695 = vmatprep.subr.mxu1 %v5993_v34  ;;  %v5945_v37 = vld [vmem:[%s18591_s11 + $0x60] sm:$0xff] }
 0x494   :  { %12661 = vmatpush3.msra.mxu0 %v5945_v37  ;;  %v5950_v37 = vld [vmem:[%s18591_s11 + $0x88] sm:$0xff] }
 0x495   :  { %v2530_v39 = vcombine.low %v2515_v36, %v2522_v38  ;;  %v5977_v38 = vld [vmem:[%s18591_s11 + $0x160] sm:$0xff] }
 0x496   :  { %12696 = vmatpush3.msra.mxu1 %v5977_v38  ;;  %v5982_v38 = vld [vmem:[%s18591_s11 + $0x188] sm:$0xff] }
 0x497   :  { %v2537_v41 = vrot.slane %v2530_v39, %v15991_v58  ;;  %v5960_v39 = vld [vmem:[%s18591_s11 + $0xd8] sm:$0xff] }
 0x498   :  { %v2638_v42 = vpop.f32.mrf.mxu0  ;;  %v2709_v43 = vpop.f32.mrf.mxu1  ;;  %12662 = vmatprep.subr.mxu0 %v5960_v39 }
 0x499   :  { %v2545_v22 = vcombine.low %v2537_v41, %v2544_v40  ;;  %v5992_v40 = vld [vmem:[%s18591_s11 + $0x1d8] sm:$0xff] }
 0x49a   :  { %v2640_v44 = vpop.f32.mrf.mxu0  ;;  %v2711_v45 = vpop.f32.mrf.mxu1  ;;  %12697 = vmatprep.subr.mxu1 %v5992_v40  ;;  %v5934_v40 = vld [vmem:[%s18591_s11 + $0x8] sm:$0xff] }
 0x49b   :  { %v2789_v46 = vcombine.low %v2638_v42, %v2640_v44  ;;  %v2790_v47 = vcombine.low %v2709_v43, %v2711_v45  ;;  %v2547_v48 = vadd.f32 %v2545_v22, %v2265_v28  ;;  %v5944_v42 = vld [vmem:[%s18591_s11 + $0x58] sm:$0xff]  ;;  %v5959_v22 = vld [vmem:[%s18591_s11 + $0xd0] sm:$0xff] }
 0x49c   :  { %v5976_v43 = vld [vmem:[%s18591_s11 + $0x158] sm:$0xff]  ;;  %12663 = vmatpush3.msra.mxu0 %v5944_v42  ;;  %v5991_v44 = vld [vmem:[%s18591_s11 + $0x1d0] sm:$0xff]  ;;  %v5949_v42 = vld [vmem:[%s18591_s11 + $0x80] sm:$0xff] }
 0x49d   :  { %v2797_v50 = vrot.slane %v2789_v46, %v15991_v58  ;;  %v2804_v51 = vrot.slane %v2790_v47, %v15991_v58  ;;  %12698 = vmatpush3.msra.mxu1 %v5976_v43  ;;  %12664 = vmatprep.subr.mxu0 %v5959_v22  ;;  %v5943_v45 = vld [vmem:[%s18591_s11 + $0x50] sm:$0xff]  ;;  %v5958_v47 = vld [vmem:[%s18591_s11 + $0xc8] sm:$0xff]  ;;  %v5981_v43 = vld [vmem:[%s18591_s11 + $0x180] sm:$0xff] }
 0x49e   :  { %12699 = vmatprep.subr.mxu1 %v5991_v44  ;;  %v5975_v46 = vld [vmem:[%s18591_s11 + $0x150] sm:$0xff]  ;;  %12665 = vmatpush3.msra.mxu0 %v5943_v45  ;;  %v5933_v22 = vld [vmem:[%s18591_s11] sm:$0xff] }
 0x49f   :  { %v2812_v52 = vcombine.low %v2797_v50, %v2804_v51  ;;  %12700 = vmatpush3.msra.mxu1 %v5975_v46  ;;  %v5990_v50 = vld [vmem:[%s18591_s11 + $0x1c8] sm:$0xff]  ;;  %12666 = vmatprep.subr.mxu0 %v5958_v47  ;;  %v5965_v44 = vld [vmem:[%s18591_s11 + $0x100] sm:$0xff] }
 0x4a0   :  { %12701 = vmatprep.subr.mxu1 %v5990_v50 }
 0x4a1   :  { %v2819_v56 = vrot.slane %v2812_v52, %v15991_v58  ;;  %v5942_v52 = vld [vmem:[%s18591_s11 + $0x48] sm:$0xff] }
 0x4a2   :  { %v2780_v53 = vpop.f32.mrf.mxu0  ;;  %v2920_v5 = vpop.f32.mrf.mxu1  ;;  %12667 = vmatpush3.msra.mxu0 %v5942_v52 }
 0x4a3   :  { %v2811_v54 = vrot.slane %v2780_v53, %v15991_v58  ;;  %v5974_v53 = vld [vmem:[%s18591_s11 + $0x148] sm:$0xff] }
 0x4a4   :  { %v13322_v55 = vpop.f32.mrf.mxu0  ;;  %v2922_v61 = vpop.f32.mrf.mxu1  ;;  %12702 = vmatpush3.msra.mxu1 %v5974_v53 }
 0x4a5   :  { %v2826_v57 = vrot.slane %v2811_v54, %v15991_v58  ;;  %v3071_v0 = vcombine.low %v2920_v5, %v2922_v61  ;;  %v5957_v55 = vld [vmem:[%s18591_s11 + $0xc0] sm:$0xff] }
 0x4a6   :  { %12668 = vmatprep.subr.mxu0 %v5957_v55 }
 0x4a7   :  { %v2827_v59 = vcombine.low %v2819_v56, %v2826_v57  ;;  %v3079_v6 = vrot.slane %v3071_v0, %v15991_v58  ;;  %v5989_v56 = vld [vmem:[%s18591_s11 + $0x1c0] sm:$0xff] }
 0x4a8   :  { %12703 = vmatprep.subr.mxu1 %v5989_v56 }
 0x4a9   :  { %v2829_v60 = vadd.f32 %v2827_v59, %v2547_v48  ;;  %v5941_v59 = vld [vmem:[%s18591_s11 + $0x40] sm:$0xff] }
 0x4aa   :  { %12669 = vmatpush3.msra.mxu0 %v5941_v59 }
 0x4ac   :  { %v2991_v62 = vpop.f32.mrf.mxu0  ;;  %v3062_v63 = vpop.f32.mrf.mxu1 }
 0x4ad   :  { %v3093_v7 = vrot.slane %v3062_v63, %v15991_v58  ;;  %v5988_v63 = vld [vmem:[%s18591_s11 + $0x1b8] sm:$0xff] }
 0x4ae   :  { %v2993_v2 = vpop.f32.mrf.mxu0  ;;  %v13333_v3 = vpop.f32.mrf.mxu1 }
 0x4af   :  { %v3072_v4 = vcombine.low %v2991_v62, %v2993_v2  ;;  %v3108_v11 = vrot.slane %v3093_v7, %v15991_v58  ;;  %v5956_v62 = vld [vmem:[%s18591_s11 + $0xb8] sm:$0xff] }
 0x4b0   :  { %12670 = vmatprep.subr.mxu0 %v5956_v62  ;;  %v5940_v2 = vld [vmem:[%s18591_s11 + $0x38] sm:$0xff] }
 0x4b1   :  { %v3086_v8 = vrot.slane %v3072_v4, %v15991_v58  ;;  %v5972_v3 = vld [vmem:[%s18591_s11 + $0x138] sm:$0xff]  ;;  %12671 = vmatpush3.msra.mxu0 %v5940_v2  ;;  %v5955_v4 = vld [vmem:[%s18591_s11 + $0xb0] sm:$0xff] }
 0x4b2   :  { %12672 = vmatprep.subr.mxu0 %v5955_v4 }
 0x4b3   :  { %v3094_v27 = vcombine.low %v3079_v6, %v3086_v8  ;;  %v5987_v6 = vld [vmem:[%s18591_s11 + $0x1b0] sm:$0xff] }
 0x4b4   :  { %v5939_v8 = vld [vmem:[%s18591_s11 + $0x30] sm:$0xff] }
 0x4b5   :  { %v3101_v12 = vrot.slane %v3094_v27, %v15991_v58  ;;  %v5971_v27 = vld [vmem:[%s18591_s11 + $0x130] sm:$0xff]  ;;  %12673 = vmatpush3.msra.mxu0 %v5939_v8 }
 0x4b6   :  { %v3202_v16 = vpop.f32.mrf.mxu0  ;;  %v3273_v17 = vpop.f32.mrf.mxu1  ;;  %12674 = vmatprep.subr.mxu0 %v5954_v10 }
 0x4b7   :  { %v3109_v21 = vcombine.low %v3101_v12, %v3108_v11  ;;  %v5986_v11 = vld [vmem:[%s18591_s11 + $0x1a8] sm:$0xff] }
 0x4b8   :  { %v3204_v25 = vpop.f32.mrf.mxu0  ;;  %v3275_v26 = vpop.f32.mrf.mxu1  ;;  %v5938_v12 = vld [vmem:[%s18591_s11 + $0x28] sm:$0xff] }
 0x4b9   :  { %v3353_v28 = vcombine.low %v3202_v16, %v3204_v25  ;;  %v3354_v29 = vcombine.low %v3273_v17, %v3275_v26  ;;  %v16222_v30 = vadd.f32 %v3109_v21, %v2829_v60  ;;  %v5973_v60 = vld [vmem:[%s18591_s11 + $0x140] sm:$0xff]  ;;  %12675 = vmatpush3.msra.mxu0 %v5938_v12  ;;  %v5984_v25 = vld [vmem:[%s18591_s11 + $0x198] sm:$0xff] }
 0x4ba   :  { %12704 = vmatpush3.msra.mxu1 %v5973_v60  ;;  %v5953_v16 = vld [vmem:[%s18591_s11 + $0xa0] sm:$0xff] }
 0x4bb   :  { %v3361_v35 = vrot.slane %v3353_v28, %v15991_v58  ;;  %v3368_v36 = vrot.slane %v3354_v29, %v15991_v58  ;;  %12705 = vmatprep.subr.mxu1 %v5988_v63  ;;  %v5985_v17 = vld [vmem:[%s18591_s11 + $0x1a0] sm:$0xff]  ;;  %12676 = vmatprep.subr.mxu0 %v5953_v16  ;;  %v5936_v28 = vld [vmem:[%s18591_s11 + $0x18] sm:$0xff] }
 0x4bc   :  { %12706 = vmatpush3.msra.mxu1 %v5972_v3  ;;  %12677 = vmatpush3.msra.mxu0 %v5937_v19  ;;  %v5968_v29 = vld [vmem:[%s18591_s11 + $0x118] sm:$0xff] }
 0x4bd   :  { %v3376_v41 = vcombine.low %v3361_v35, %v3368_v36  ;;  %12707 = vmatprep.subr.mxu1 %v5987_v6  ;;  %12678 = vmatprep.subr.mxu0 %v5952_v24  ;;  %v5935_v35 = vld [vmem:[%s18591_s11 + $0x10] sm:$0xff] }
 0x4be   :  { %12708 = vmatpush3.msra.mxu1 %v5971_v27  ;;  %12679 = vmatpush3.msra.mxu0 %v5936_v28  ;;  %v5967_v36 = vld [vmem:[%s18591_s11 + $0x110] sm:$0xff] }
 0x4bf   :  { %v3383_v57 = vrot.slane %v3376_v41, %v15991_v58  ;;  %12709 = vmatprep.subr.mxu1 %v5986_v11  ;;  %v5966_v41 = vld [vmem:[%s18591_s11 + $0x108] sm:$0xff] }
 0x4c0   :  { %v3344_v48 = vpop.f32.mrf.mxu0  ;;  %v3484_v61 = vpop.f32.mrf.mxu1  ;;  %12710 = vmatpush3.msra.mxu1 %v5970_v13 }
 0x4c1   :  { %v3375_v51 = vrot.slane %v3344_v48, %v15991_v58  ;;  %12711 = vmatprep.subr.mxu1 %v5985_v17 }
 0x4c2   :  { %v13344_v54 = vpop.f32.mrf.mxu0  ;;  %v3486_v9 = vpop.f32.mrf.mxu1  ;;  %12712 = vmatpush3.msra.mxu1 %v5969_v20 }
 0x4c3   :  { %v3390_v5 = vrot.slane %v3375_v51, %v15991_v58  ;;  %v3635_v18 = vcombine.low %v3484_v61, %v3486_v9  ;;  %12713 = vmatprep.subr.mxu1 %v5984_v25 }
 0x4c4   :  { %12714 = vmatpush3.msra.mxu1 %v5968_v29 }
 0x4c5   :  { %v3391_v0 = vcombine.low %v3383_v57, %v3390_v5  ;;  %v3643_v32 = vrot.slane %v3635_v18, %v15991_v58  ;;  %12715 = vmatprep.subr.mxu1 %v5983_v31 }
 0x4c6   :  { %12716 = vmatpush3.msra.mxu1 %v5967_v36 }
 0x4c7   :  { %v16314_v7 = vadd.f32 %v3391_v0, %v16222_v30  ;;  %v5951_v30 = vld [vmem:[%s18591_s11 + $0x90] sm:$0xff]  ;;  %12717 = vmatprep.subr.mxu1 %v5982_v38 }
 0x4c8   :  { %12680 = vmatprep.subr.mxu0 %v5951_v30  ;;  %12718 = vmatpush3.msra.mxu1 %v5966_v41 }
 0x4c9   :  { %12681 = vmatpush3.msra.mxu0 %v5935_v35  ;;  %12719 = vmatprep.subr.mxu1 %v5981_v43 }
 0x4ca   :  { %v3555_v14 = vpop.f32.mrf.mxu0  ;;  %v3626_v15 = vpop.f32.mrf.mxu1  ;;  %12682 = vmatprep.subr.mxu0 %v5950_v37  ;;  %12720 = vmatpush3.msra.mxu1 %v5965_v44 }
 0x4cb   :  { %v3657_v33 = vrot.slane %v3626_v15, %v15991_v58  ;;  %12683 = vmatpush3.msra.mxu0 %v5934_v40  ;;  %13479 = vmatprep.subr.mxu1 %v14446_v1 }
 0x4cc   :  { %v3557_v21 = vpop.f32.mrf.mxu0  ;;  %v13355_v23 = vpop.f32.mrf.mxu1  ;;  %12684 = vmatprep.subr.mxu0 %v5949_v42 }
 0x4cd   :  { %v3636_v26 = vcombine.low %v3555_v14, %v3557_v21  ;;  %v3672_v45 = vrot.slane %v3657_v33, %v15991_v58  ;;  %12685 = vmatpush3.msra.mxu0 %v5933_v22 }
 0x4ce   :  { %13444 = vmatprep.subr.mxu0 %v14446_v1 }
 0x4cf   :  { %v3650_v34 = vrot.slane %v3636_v26, %v15991_v58 }
 0x4d1   :  { %v3658_v39 = vcombine.low %v3643_v32, %v3650_v34 }
 0x4d3   :  { %v3665_v46 = vrot.slane %v3658_v39, %v15991_v58 }
 0x4d4   :  { %v3766_v47 = vpop.f32.mrf.mxu0  ;;  %v3837_v48 = vpop.f32.mrf.mxu1 }
 0x4d5   :  { %v3673_v50 = vcombine.low %v3665_v46, %v3672_v45 }
 0x4d6   :  { %v3768_v51 = vpop.f32.mrf.mxu0  ;;  %v3839_v52 = vpop.f32.mrf.mxu1 }
 0x4d7   :  { %v3917_v53 = vcombine.low %v3766_v47, %v3768_v51  ;;  %v3918_v54 = vcombine.low %v3837_v48, %v3839_v52  ;;  %v3675_v55 = vadd.f32 %v3673_v50, %v16314_v7 }
 0x4d9   :  { %v3925_v56 = vrot.slane %v3917_v53, %v15991_v58  ;;  %v3932_v57 = vrot.slane %v3918_v54, %v15991_v58 }
 0x4db   :  { %v3940_v5 = vcombine.low %v3925_v56, %v3932_v57 }
 0x4dd   :  { %v3947_v62 = vrot.slane %v3940_v5, %v15991_v58 }
 0x4de   :  { %v3908_v59 = vpop.f32.mrf.mxu0  ;;  %v4048_v0 = vpop.f32.mrf.mxu1 }
 0x4df   :  { %v3939_v60 = vrot.slane %v3908_v59, %v15991_v58 }
 0x4e0   :  { %v13366_v61 = vpop.f32.mrf.mxu0  ;;  %v4050_v4 = vpop.f32.mrf.mxu1 }
 0x4e1   :  { %v3954_v63 = vrot.slane %v3939_v60, %v15991_v58  ;;  %v4199_v7 = vcombine.low %v4048_v0, %v4050_v4 }
 0x4e3   :  { %v3955_v2 = vcombine.low %v3947_v62, %v3954_v63  ;;  %v4207_v11 = vrot.slane %v4199_v7, %v15991_v58 }
 0x4e5   :  { %v3957_v3 = vadd.f32 %v3955_v2, %v3675_v55 }
 0x4e8   :  { %v4119_v6 = vpop.f32.mrf.mxu0  ;;  %v4190_v8 = vpop.f32.mrf.mxu1 }
 0x4e9   :  { %v4221_v12 = vrot.slane %v4190_v8, %v15991_v58 }
 0x4ea   :  { %v4121_v27 = vpop.f32.mrf.mxu0  ;;  %v13377_v9 = vpop.f32.mrf.mxu1 }
 0x4eb   :  { %v4200_v10 = vcombine.low %v4119_v6, %v4121_v27  ;;  %v4236_v15 = vrot.slane %v4221_v12, %v15991_v58 }
 0x4ed   :  { %v4214_v13 = vrot.slane %v4200_v10, %v15991_v58 }
 0x4ef   :  { %v4222_v14 = vcombine.low %v4207_v11, %v4214_v13 }
 0x4f1   :  { %v4229_v16 = vrot.slane %v4222_v14, %v15991_v58 }
 0x4f2   :  { %v4330_v17 = vpop.f32.mrf.mxu0  ;;  %v4401_v18 = vpop.f32.mrf.mxu1 }
 0x4f3   :  { %v4237_v19 = vcombine.low %v4229_v16, %v4236_v15 }
 0x4f4   :  { %v4332_v20 = vpop.f32.mrf.mxu0  ;;  %v4403_v21 = vpop.f32.mrf.mxu1 }
 0x4f5   :  { %v4481_v23 = vcombine.low %v4330_v17, %v4332_v20  ;;  %v4482_v24 = vcombine.low %v4401_v18, %v4403_v21  ;;  %v4239_v25 = vadd.f32 %v4237_v19, %v3957_v3 }
 0x4f7   :  { %v4489_v26 = vrot.slane %v4481_v23, %v15991_v58  ;;  %v4496_v28 = vrot.slane %v4482_v24, %v15991_v58 }
 0x4f9   :  { %v4504_v29 = vcombine.low %v4489_v26, %v4496_v28 }
 0x4fb   :  { %v4511_v33 = vrot.slane %v4504_v29, %v15991_v58 }
 0x4fc   :  { %v4472_v30 = vpop.f32.mrf.mxu0  ;;  %v4612_v35 = vpop.f32.mrf.mxu1 }
 0x4fd   :  { %v4503_v31 = vrot.slane %v4472_v30, %v15991_v58 }
 0x4fe   :  { %v13388_v32 = vpop.f32.mrf.mxu0  ;;  %v4614_v38 = vpop.f32.mrf.mxu1 }
 0x4ff   :  { %v4518_v34 = vrot.slane %v4503_v31, %v15991_v58  ;;  %v4763_v57 = vcombine.low %v4612_v35, %v4614_v38 }
 0x501   :  { %v4519_v36 = vcombine.low %v4511_v33, %v4518_v34  ;;  %v4771_v0 = vrot.slane %v4763_v57, %v15991_v58  ;;  %v6029_v57 = vsub.s32 3, %v15968_v49 }
 0x503   :  { %v16417_v37 = vadd.f32 %v4519_v36, %v4239_v25 }
 0x506   :  { %v4754_v39 = vpop.f32.mrf.mxu1  ;;  %v4683_v41 = vpop.f32.mrf.mxu0 }
 0x507   :  { %v4785_v12 = vrot.slane %v4754_v39, %v15991_v58 }
 0x508   :  { %v13399_v40 = vpop.f32.mrf.mxu1  ;;  %v4685_v42 = vpop.f32.mrf.mxu0 }
 0x509   :  { %v4764_v55 = vcombine.low %v4683_v41, %v4685_v42  ;;  %v4800_v21 = vrot.slane %v4785_v12, %v15991_v58  ;;  %v6007_v12 = vld [vmem:[%s18591_s11 + $0x250] sm:$0xff] }
 0x50b   :  { %v4778_v59 = vrot.slane %v4764_v55, %v15991_v58 }
 0x50d   :  { %v4786_v6 = vcombine.low %v4771_v0, %v4778_v59  ;;  %v6025_v59 = vsub.s32 2, %v15968_v49 }
 0x50f   :  { %v4793_v16 = vrot.slane %v4786_v6, %v15991_v58  ;;  %v6010_v6 = vld [vmem:[%s18591_s11 + $0x268] sm:$0xff] }
 0x510   :  { %v4894_v43 = vpop.f32.mrf.mxu0  ;;  %v4965_v22 = vpop.f32.mrf.mxu1 }
 0x511   :  { %v4801_v28 = vcombine.low %v4793_v16, %v4800_v21  ;;  %v16528_v16 = vld [vmem:[%s18580_s0 + $0x28] sm:$0xff]  ;;  %v6004_v21 = vld [vmem:[%s18591_s11 + $0x238] sm:$0xff] }
 0x512   :  { %v4896_v44 = vpop.f32.mrf.mxu0  ;;  %v4967_v46 = vpop.f32.mrf.mxu1 }
 0x513   :  { %v5045_v62 = vcombine.low %v4894_v43, %v4896_v44  ;;  %v5046_v63 = vcombine.low %v4965_v22, %v4967_v46  ;;  %v4803_v42 = vadd.f32 %v4801_v28, %v16417_v37  ;;  %v6021_v37 = vsub.s32 1, %v15968_v49  ;;  %v13953_v28 = vld [vmem:[%s18581_s1] sm:$0xff] }
 0x515   :  { %v5053_v27 = vrot.slane %v5045_v62, %v15991_v58  ;;  %v5060_v9 = vrot.slane %v5046_v63, %v15991_v58 }
 0x517   :  { %v5068_v18 = vcombine.low %v5053_v27, %v5060_v9  ;;  %v13948_v27 = vld [vmem:[%s18581_s1 + $0x28] sm:$0xff]  ;;  %v16493_v9 = vld [vmem:[%s18580_s0 + $0x18] sm:$0xff] }
 0x519   :  { %v5075_v32 = vrot.slane %v5068_v18, %v15991_v58  ;;  %v13951_v18 = vld [vmem:[%s18581_s1 + $0x10] sm:$0xff] }
 0x51a   :  { %v5036_v45 = vpop.f32.mrf.mxu0  ;;  %v5176_v48 = vpop.f32.mrf.mxu1 }
 0x51b   :  { %v5067_v15 = vrot.slane %v5036_v45, %v15991_v58 }
 0x51c   :  { %v13410_v47 = vpop.f32.mrf.mxu0  ;;  %v5178_v50 = vpop.f32.mrf.mxu1 }
 0x51d   :  { %v5327_v2 = vcombine.low %v5176_v48, %v5178_v50  ;;  %v5082_v25 = vrot.slane %v5067_v15, %v15991_v58  ;;  %v6006_v15 = vld [vmem:[%s18591_s11 + $0x248] sm:$0xff] }
 0x51f   :  { %v5335_v13 = vrot.slane %v5327_v2, %v15991_v58  ;;  %v5083_v39 = vcombine.low %v5075_v32, %v5082_v25  ;;  %v6012_v2 = vld [vmem:[%s18591_s11 + $0x278] sm:$0xff] }
 0x521   :  { %v5085_v47 = vadd.f32 %v5083_v39, %v4803_v42  ;;  %v13956_v42 = vld [vmem:[%s18581_s1 + $0x48] sm:$0xff] }
 0x524   :  { %v5318_v51 = vpop.f32.mrf.mxu1  ;;  %v5247_v53 = vpop.f32.mrf.mxu0 }
 0x525   :  { %v5349_v23 = vrot.slane %v5318_v51, %v15991_v58 }
 0x526   :  { %v13421_v52 = vpop.f32.mrf.mxu1  ;;  %v5249_v54 = vpop.f32.mrf.mxu0 }
 0x527   :  { %v5328_v60 = vcombine.low %v5247_v53, %v5249_v54  ;;  %v5364_v35 = vrot.slane %v5349_v23, %v15991_v58  ;;  %v13952_v23 = vld [vmem:[%s18581_s1 + $0x8] sm:$0xff] }
 0x529   :  { %v5342_v8 = vrot.slane %v5328_v60, %v15991_v58 }
 0x52b   :  { %v5350_v17 = vcombine.low %v5335_v13, %v5342_v8  ;;  %v13947_v8 = vld [vmem:[%s18581_s1 + $0x30] sm:$0xff]  ;;  %v13950_v13 = vld [vmem:[%s18581_s1 + $0x18] sm:$0xff] }
 0x52d   :  { %v5357_v29 = vrot.slane %v5350_v17, %v15991_v58  ;;  %v6005_v17 = vld [vmem:[%s18591_s11 + $0x240] sm:$0xff] }
 0x52e   :  { %v5458_v56 = vpop.f32.mrf.mxu0  ;;  %v5529_v5 = vpop.f32.mrf.mxu1 }
 0x52f   :  { %v5365_v43 = vcombine.low %v5357_v29, %v5364_v35  ;;  %v6002_v29 = vld [vmem:[%s18591_s11 + $0x228] sm:$0xff]  ;;  %v13955_v35 = vld [vmem:[%s18581_s1 + $0x50] sm:$0xff] }
 0x530   :  { %v5460_v61 = vpop.f32.mrf.mxu0  ;;  %v5531_v3 = vpop.f32.mrf.mxu1 }
 0x531   :  { %v5609_v10 = vcombine.low %v5458_v56, %v5460_v61  ;;  %v5610_v11 = vcombine.low %v5529_v5, %v5531_v3  ;;  %v5367_v51 = vadd.f32 %v5365_v43, %v5085_v47  ;;  %v6017_v5 = vsub.s32 0, %v15968_v49  ;;  %v6011_v3 = vld [vmem:[%s18591_s11 + $0x270] sm:$0xff]  ;;  %v5997_v43 = vld [vmem:[%s18591_s11 + $0x200] sm:$0xff] }
 0x533   :  { %v5617_v19 = vrot.slane %v5609_v10, %v15991_v58  ;;  %v5624_v20 = vrot.slane %v5610_v11, %v15991_v58  ;;  %v13949_v10 = vld [vmem:[%s18581_s1 + $0x20] sm:$0xff]  ;;  %v6008_v11 = vld [vmem:[%s18591_s11 + $0x258] sm:$0xff] }
 0x535   :  { %v5632_v33 = vcombine.low %v5617_v19, %v5624_v20  ;;  %v6259_v19 = vrot.slane %v16493_v9, 7  ;;  %v6255_v20 = vrot.slane %v16528_v16, 7 }
 0x537   :  { %v5639_v22 = vrot.slane %v5632_v33, %v15991_v58  ;;  %v6000_v33 = vld [vmem:[%s18591_s11 + $0x218] sm:$0xff] }
 0x538   :  { %v5600_v4 = vpop.f32.mrf.mxu0  ;;  %v5740_v14 = vpop.f32.mrf.mxu1 }
 0x539   :  { %v5631_v26 = vrot.slane %v5600_v4, %v15991_v58  ;;  %v13946_v4 = vld [vmem:[%s18581_s1 + $0x38] sm:$0xff] }
 0x53a   :  { %v13432_v7 = vpop.f32.mrf.mxu0  ;;  %v5742_v24 = vpop.f32.mrf.mxu1 }
 0x53b   :  { %v5891_v34 = vcombine.low %v5740_v14, %v5742_v24  ;;  %v5646_v40 = vrot.slane %v5631_v26, %v15991_v58  ;;  %v6009_v7 = vld [vmem:[%s18591_s11 + $0x260] sm:$0xff]  ;;  %v6003_v24 = vld [vmem:[%s18591_s11 + $0x230] sm:$0xff]  ;;  %v6264_v26 = vsel %vm53_vm2, %v6255_v20, %v6259_v19 }
 0x53c   :  { %v16516_v14 = vld [vmem:[%s18580_s0 + $0x20] sm:$0xff] }
 0x53d   :  { %v5899_v44 = vrot.slane %v5891_v34, %v15991_v58  ;;  %v5647_v48 = vcombine.low %v5639_v22, %v5646_v40  ;;  %v6260_v25 = vrot.slane %v16516_v14, 7  ;;  %v5999_v34 = vld [vmem:[%s18591_s11 + $0x210] sm:$0xff]  ;;  %v5998_v40 = vld [vmem:[%s18591_s11 + $0x208] sm:$0xff]  ;;  %v6441_v22 = vrot.slane %v16528_v16, 1 }
 0x53f   :  { %v5649_v54 = vadd.f32 %v5647_v48, %v5367_v51  ;;  %v6261_v32 = vsel %vm53_vm2, %v6259_v19, %v6260_v25  ;;  %v6262_v39 = vsel %vm53_vm2, %v6260_v25, %v6255_v20  ;;  %v13958_v48 = vld [vmem:[%s18583_s3 + $0x38] sm:$0xff] }
 0x542   :  { %v5811_v30 = vpop.f32.mrf.mxu0  ;;  %v5882_v31 = vpop.f32.mrf.mxu1 }
 0x543   :  { %v5913_v45 = vrot.slane %v5882_v31, %v15991_v58  ;;  %v13954_v31 = vld [vmem:[%s18581_s1 + $0x58] sm:$0xff] }
 0x544   :  { %v5813_v36 = vpop.f32.mrf.mxu0  ;;  %v13443_v38 = vpop.f32.mrf.mxu1 }
 0x545   :  { %v5892_v41 = vcombine.low %v5811_v30, %v5813_v36  ;;  %v5928_v52 = vrot.slane %v5913_v45, %v15991_v58  ;;  %v6001_v30 = vld [vmem:[%s18591_s11 + $0x220] sm:$0xff]  ;;  %v6438_v36 = vrot.slane %v16493_v9, 1  ;;  %v6439_v38 = vrot.slane %v16516_v14, 1 }
 0x546   :  { %v13957_v45 = vld [vmem:[%s18581_s1 + $0x40] sm:$0xff] }
 0x547   :  { %v5906_v46 = vrot.slane %v5892_v41, %v15991_v58  ;;  %v6033_v41 = vsub.s32 4, %v15968_v49  ;;  %v6442_v47 = vsel %vm243_vm3, %v6439_v38, %v6441_v22  ;;  %v6445_v51 = vsel %vm243_vm3, %v6441_v22, %v6438_v36 }
 0x549   :  { %v5914_v50 = vcombine.low %v5899_v44, %v5906_v46  ;;  %v6440_v44 = vsel %vm243_vm3, %v6438_v36, %v6439_v38 }
 0x54b   :  { %v5921_v53 = vrot.slane %v5914_v50, %v15991_v58  ;;  %v13959_v50 = vld [vmem:[%s18583_s3 + $0x30] sm:$0xff] }
 0x54d   :  { %v5929_v55 = vcombine.low %v5921_v53, %v5928_v52  ;;  %v13960_v52 = vld [vmem:[%s18583_s3 + $0x28] sm:$0xff]  ;;  %v13961_v53 = vld [vmem:[%s18583_s3 + $0x18] sm:$0xff] }
 0x54f   :  { %v5931_v56 = vadd.f32 %v5929_v55, %v5649_v54  ;;  %v13962_v54 = vld [vmem:[%s18583_s3 + $0x20] sm:$0xff]  ;;  %v13963_v55 = vld [vmem:[%s18583_s3 + $0x10] sm:$0xff] }
 0x551   :  { %v16449_v60 = vmax.f32 %v5931_v56, 0.0  ;;  %v13964_v56 = vld [vmem:[%s18583_s3 + $0x8] sm:$0xff] }
 0x553   :  { %v6022_v61 = vrot.slane %v16449_v60, %v6021_v37  ;;  %v6030_v62 = vrot.slane %v16449_v60, %v6029_v57  ;;  %v6018_v63 = vrot.slane %v16449_v60, %v6017_v5  ;;  %v6026_v0 = vrot.slane %v16449_v60, %v6025_v59 }
 0x554   :  { %v6034_v46 = vrot.slane %v16449_v60, %v6033_v41  ;;  %v13965_v60 = vld [vmem:[%s18583_s3] sm:$0xff] }
 0x555   :  { %6104 = vmatprep.mubr.f32.mxu0 %v6022_v61  ;;  %6174 = vmatprep.mubr.f32.mxu1 %v6030_v62 }
 0x556   :  { %6105 = vmatmul.mubr.f32.vlgmr.msra.gmra.mxu0 %v6018_v63  ;;  %6175 = vmatmul.mubr.f32.vlgmr.msra.gmra.mxu1 %v6026_v0  ;;  %v6013_v63 = vld [vmem:[%s18592_s12] sm:$0x1] }
 0x557   :  { %13445 = vmatpush3.msra.mxu0 %v6012_v2  ;;  %13480 = vmatpush3.msra.mxu1 %v13946_v4 }
 0x558   :  { %13446 = vmatprep.subr.mxu0 %v14446_v1  ;;  %13481 = vmatprep.subr.mxu1 %v14446_v1 }
 0x559   :  { %13447 = vmatpush3.msra.mxu0 %v6011_v3  ;;  %13482 = vmatpush3.msra.mxu1 %v13947_v8 }
 0x55a   :  { %13448 = vmatprep.subr.mxu0 %v14446_v1  ;;  %13483 = vmatprep.subr.mxu1 %v14446_v1 }
 0x55b   :  { %13449 = vmatpush3.msra.mxu0 %v6010_v6  ;;  %13484 = vmatpush3.msra.mxu1 %v13948_v27 }
 0x55c   :  { %13450 = vmatprep.subr.mxu0 %v14446_v1  ;;  %13485 = vmatprep.subr.mxu1 %v14446_v1 }
 0x55d   :  { %13451 = vmatpush3.msra.mxu0 %v6009_v7  ;;  %13486 = vmatpush3.msra.mxu1 %v13949_v10 }
 0x55e   :  { %13487 = vmatprep.mubr.msk.f32.mxu1 %vm14447_vm0, %v14446_v1  ;;  %13452 = vmatprep.subr.mxu0 %v14446_v1 }
 0x55f   :  { %13488 = vmatmul.mubr.msk.f32.vlgmr.msra.gmra.mxu1 %vm69_vm1, %v16493_v9  ;;  %13496 = vmatprep.subr.mxu1 %v14446_v1 }
 0x560   :  { %13453 = vmatpush3.msra.mxu0 %v6008_v11  ;;  %13497 = vmatpush3.msra.mxu1 %v13950_v13 }
 0x561   :  { %13454 = vmatprep.subr.mxu0 %v14446_v1  ;;  %13490 = vmatprep.mubr.msk.f32.mxu1 %vm14447_vm0, %v14446_v1 }
 0x562   :  { %13455 = vmatpush3.msra.mxu0 %v6007_v12  ;;  %13498 = vmatprep.subr.mxu1 %v14446_v1 }
 0x563   :  { %13456 = vmatprep.subr.mxu0 %v14446_v1  ;;  %13491 = vmatmul.mubr.msk.f32.gmra.mxu1 %vm69_vm1, %v16516_v14 }
 0x564   :  { %13499 = vmatpush3.msra.mxu1 %v13951_v18  ;;  %13457 = vmatpush3.msra.mxu0 %v6006_v15 }
 0x565   :  { %13458 = vmatprep.subr.mxu0 %v14446_v1  ;;  %13500 = vmatprep.subr.mxu1 %v14446_v1 }
 0x566   :  { %13459 = vmatpush3.msra.mxu0 %v6005_v17  ;;  %13493 = vmatprep.mubr.msk.f32.mxu1 %vm14447_vm0, %v14446_v1 }
 0x567   :  { %13501 = vmatpush3.msra.mxu1 %v13952_v23  ;;  %13460 = vmatprep.subr.mxu0 %v14446_v1 }
 0x568   :  { %13494 = vmatmul.mubr.msk.f32.gmra.mxu1 %vm69_vm1, %v16528_v16  ;;  %13461 = vmatpush3.msra.mxu0 %v6004_v21 }
 0x569   :  { %13502 = vmatprep.subr.mxu1 %v14446_v1  ;;  %13462 = vmatprep.subr.mxu0 %v14446_v1 }
 0x56a   :  { %13503 = vmatpush3.msra.mxu1 %v13953_v28  ;;  %13463 = vmatpush3.msra.mxu0 %v6003_v24 }
 0x56b   :  { %13504 = vmatprep.mubr.msk.f32.mxu1 %vm14447_vm0, %v14446_v1  ;;  %13464 = vmatprep.subr.mxu0 %v14446_v1 }
 0x56c   :  { %13505 = vmatmul.mubr.msk.f32.vlgmr.msra.gmra.mxu1 %vm69_vm1, %v6264_v26  ;;  %13513 = vmatprep.subr.mxu1 %v14446_v1 }
 0x56d   :  { %13465 = vmatpush3.msra.mxu0 %v6002_v29  ;;  %13514 = vmatpush3.msra.mxu1 %v13954_v31  ;;  %v13966_v29 = vld [vmem:[%s18582_s2] ss:$0 sm:$0xff] }
 0x56e   :  { %13466 = vmatprep.subr.mxu0 %v14446_v1  ;;  %13507 = vmatprep.mubr.msk.f32.mxu1 %vm14447_vm0, %v14446_v1 }
 0x56f   :  { %13467 = vmatpush3.msra.mxu0 %v6001_v30  ;;  %13515 = vmatprep.subr.mxu1 %v14446_v1 }
 0x570   :  { %13468 = vmatprep.subr.mxu0 %v14446_v1  ;;  %13508 = vmatmul.mubr.msk.f32.gmra.mxu1 %vm69_vm1, %v6261_v32 }
 0x571   :  { %13516 = vmatpush3.msra.mxu1 %v13955_v35  ;;  %13469 = vmatpush3.msra.mxu0 %v6000_v33 }
 0x572   :  { %13470 = vmatprep.subr.mxu0 %v14446_v1  ;;  %13517 = vmatprep.subr.mxu1 %v14446_v1 }
 0x573   :  { %13471 = vmatpush3.msra.mxu0 %v5999_v34  ;;  %13510 = vmatprep.mubr.msk.f32.mxu1 %vm14447_vm0, %v14446_v1 }
 0x574   :  { %13518 = vmatpush3.msra.mxu1 %v13956_v42  ;;  %13472 = vmatprep.subr.mxu0 %v14446_v1 }
 0x575   :  { %13511 = vmatmul.mubr.msk.f32.gmra.mxu1 %vm69_vm1, %v6262_v39  ;;  %13473 = vmatpush3.msra.mxu0 %v5998_v40 }
 0x576   :  { %13519 = vmatprep.subr.mxu1 %v14446_v1  ;;  %13474 = vmatprep.subr.mxu0 %v14446_v1 }
 0x577   :  { %13520 = vmatpush3.msra.mxu1 %v13957_v45  ;;  %13475 = vmatpush3.msra.mxu0 %v5997_v43 }
 0x578   :  { %13476 = vmatprep.mubr.msk.f32.mxu0 %vm14447_vm0, %v14446_v1  ;;  %13521 = vmatprep.mubr.msk.f32.mxu1 %vm14447_vm0, %v14446_v1 }
 0x579   :  { %13477 = vmatmul.mubr.f32.vlgmr.msra.gmra.mxu0 %v6034_v46  ;;  %13522 = vmatmul.mubr.msk.f32.vlgmr.msra.gmra.mxu1 %vm69_vm1, %v6440_v44 }
 0x57a   :  { %13524 = vmatprep.mubr.msk.f32.mxu1 %vm14447_vm0, %v14446_v1  ;;  %13530 = vmatprep.subr.mxu0 %v14446_v1 }
 0x57b   :  { %13531 = vmatpush3.msra.mxu0 %v13958_v48  ;;  %13547 = vmatprep.subr.mxu1 %v14446_v1 }
 0x57c   :  { %13532 = vmatprep.subr.mxu0 %v14446_v1  ;;  %13538 = vmatprep.mubr.msk.f32.mxu0 %vm14447_vm0, %v14446_v1 }
 0x57d   :  { %13525 = vmatmul.mubr.msk.f32.gmra.mxu1 %vm69_vm1, %v6442_v47  ;;  %13533 = vmatpush3.msra.mxu0 %v13959_v50 }
 0x57e   :  { %13527 = vmatprep.mubr.msk.f32.mxu1 %vm14447_vm0, %v14446_v1  ;;  %13534 = vmatprep.subr.mxu0 %v14446_v1 }
 0x57f   :  { %13535 = vmatpush3.msra.mxu0 %v13960_v52  ;;  %13548 = vmatpush3.msra.mxu1 %v13961_v53 }
 0x580   :  { %13536 = vmatprep.subr.mxu0 %v14446_v1  ;;  %13549 = vmatprep.subr.mxu1 %v14446_v1 }
 0x581   :  { %13528 = vmatmul.mubr.msk.f32.gmra.mxu1 %vm69_vm1, %v6445_v51  ;;  %13537 = vmatpush3.msra.mxu0 %v13962_v54 }
 0x582   :  { %13564 = vmatprep.subr.mxu0 %v14446_v1  ;;  %13550 = vmatpush3.msra.mxu1 %v13963_v55 }
 0x583   :  { %13551 = vmatprep.subr.mxu1 %v14446_v1  ;;  %13555 = vmatprep.mubr.msk.f32.mxu1 %vm14447_vm0, %v14446_v1 }
 0x584   :  { %13552 = vmatpush3.msra.mxu1 %v13964_v56 }
 0x585   :  { %13553 = vmatprep.subr.mxu1 %v14446_v1 }
 0x586   :  { %13554 = vmatpush3.msra.mxu1 %v13965_v60 }
 0x587   :  { %13581 = vmatprep.subr.mxu1 %v14446_v1 }
 0x616   :  { %v12686_v61 = vpop.f32.mrf.mxu0  ;;  %v12721_v62 = vpop.f32.mrf.mxu1 }
 0x618   :  { %v12687_v0 = vpop.f32.mrf.mxu0  ;;  %v12722_v2 = vpop.f32.mrf.mxu1 }
 0x619   :  { %v12688_v3 = vadd.f32 %v12687_v0, %v12686_v61  ;;  %v12723_v4 = vadd.f32 %v12722_v2, %v12721_v62 }
 0x61b   :  { %v6107_v6 = vadd.f32 %v12688_v3, %v6013_v63  ;;  %v13967_v3 = vld [vmem:[%s18583_s3 + $0x58] sm:$0xff] }
 0x61d   :  { %v6177_v8 = vadd.f32 %v12723_v4, %v6107_v6  ;;  %v13968_v6 = vld [vmem:[%s18583_s3 + $0x50] sm:$0xff] }
 0x61f   :  { %v6337_v7 = vpop.f32.mrf.mxu1 }
 0x621   :  { %v13489_v27 = vpop.f32.mrf.mxu1 }
 0x623   :  { %v6342_v9 = vpop.f32.mrf.mxu1 }
 0x625   :  { %v13492_v10 = vpop.f32.mrf.mxu1 }
 0x628   :  { %v6347_v11 = vpop.f32.mrf.mxu1 }
 0x62a   :  { %v13495_v12 = vpop.f32.mrf.mxu1 }
 0x62b   :  { %v13970_v12 = vld [vmem:[%s18583_s3 + $0x40] sm:$0xff] }
 0x62c   :  { %v6424_v13 = vpop.f32.mrf.mxu1 }
 0x62d   :  { %v6425_v19 = vadd.f32 %v6424_v13, %v6337_v7  ;;  %v13971_v13 = vld [vmem:[%s18585_s5 + $0x78] sm:$0xff] }
 0x62e   :  { %v13506_v14 = vpop.f32.mrf.mxu1 }
 0x630   :  { %v6429_v15 = vpop.f32.mrf.mxu1 }
 0x631   :  { %v6430_v28 = vadd.f32 %v6429_v15, %v6342_v9  ;;  %v13969_v9 = vld [vmem:[%s18583_s3 + $0x48] sm:$0xff] }
 0x632   :  { %v13509_v16 = vpop.f32.mrf.mxu1 }
 0x635   :  { %v6434_v17 = vpop.f32.mrf.mxu1 }
 0x636   :  { %v6435_v34 = vadd.f32 %v6434_v17, %v6347_v11 }
 0x637   :  { %v13512_v18 = vpop.f32.mrf.mxu1 }
 0x639   :  { %v6246_v20 = vpop.f32.mrf.mxu0  ;;  %v6519_v21 = vpop.f32.mrf.mxu1 }
 0x63a   :  { %v16677_v23 = vadd.f32 %v6246_v20, %v6177_v8  ;;  %v6533_v24 = vadd.f32 %v6519_v21, %v6425_v19  ;;  %v13972_v19 = vld [vmem:[%s18585_s5 + $0x70] sm:$0xff]  ;;  %v13973_v21 = vld [vmem:[%s18585_s5 + $0x68] sm:$0xff] }
 0x63b   :  { %v13478_v25 = vpop.f32.mrf.mxu0  ;;  %v13523_v26 = vpop.f32.mrf.mxu1 }
 0x63c   :  { %v6536_v30 = vadd.f32 %v13966_v29, %v6533_v24  ;;  %v13974_v25 = vld [vmem:[%s18585_s5 + $0x60] sm:$0xff]  ;;  %v13975_v26 = vld [vmem:[%s18585_s5 + $0x38] sm:$0xff] }
 0x63d   :  { %v6524_v31 = vpop.f32.mrf.mxu1 }
 0x63e   :  { %v6534_v32 = vadd.f32 %v6524_v31, %v6430_v28  ;;  %v6539_v35 = vmax.f32 %v6536_v30, 0.0  ;;  %v13977_v31 = vld [vmem:[%s18585_s5 + $0x30] sm:$0xff] }
 0x63f   :  { %v13526_v33 = vpop.f32.mrf.mxu1 }
 0x640   :  { %v6537_v36 = vadd.f32 %v13966_v29, %v6534_v32  ;;  %v6545_v43 = vrot.slane %v6539_v35, 1  ;;  %v6556_v46 = vrot.slane %v6539_v35, 2  ;;  %v13978_v32 = vld [vmem:[%s18585_s5 + $0x50] sm:$0xff]  ;;  %v13979_v33 = vld [vmem:[%s18585_s5 + $0x28] sm:$0xff] }
 0x641   :  { %v6529_v38 = vpop.f32.mrf.mxu1 }
 0x642   :  { %v6540_v39 = vmax.f32 %v6537_v36, 0.0  ;;  %v6535_v40 = vadd.f32 %v6529_v38, %v6435_v34  ;;  %v13980_v34 = vld [vmem:[%s18585_s5 + $0x48] sm:$0xff]  ;;  %v13982_v36 = vld [vmem:[%s18585_s5 + $0x40] sm:$0xff]  ;;  %v13983_v38 = vld [vmem:[%s18585_s5 + $0x18] sm:$0xff] }
 0x643   :  { %v13529_v42 = vpop.f32.mrf.mxu1 }
 0x644   :  { %v6546_v22 = vrot.slane %v6540_v39, 1  ;;  %v6557_v44 = vrot.slane %v6540_v39, 2  ;;  %v6538_v45 = vadd.f32 %v13966_v29, %v6535_v40  ;;  %v13976_v29 = vld [vmem:[%s18585_s5 + $0x58] sm:$0xff]  ;;  %v13985_v40 = vld [vmem:[%s18585_s5 + $0x8] sm:$0xff]  ;;  %v13986_v42 = vld [vmem:[%s18585_s5] sm:$0xff] }
 0x646   :  { %v6547_v47 = vsel %vm243_vm3, %v6545_v43, %v6546_v22  ;;  %v6541_v48 = vmax.f32 %v6538_v45, 0.0  ;;  %v6558_v51 = vsel %vm374_vm4, %v6556_v46, %v6557_v44 }
 0x647   :  { %v6553_v50 = vadd.f32 %v6547_v47, %v6539_v35  ;;  %v13981_v35 = vld [vmem:[%s18585_s5 + $0x20] sm:$0xff] }
 0x648   :  { %v6548_v52 = vrot.slane %v6541_v48, 1  ;;  %v6559_v53 = vrot.slane %v6541_v48, 2 }
 0x649   :  { %v6564_v54 = vadd.f32 %v6558_v51, %v6553_v50 }
 0x64a   :  { %v6555_v55 = vadd.f32 %v6548_v52, %v6541_v48  ;;  %v6549_v56 = vsel %vm243_vm3, %v6546_v22, %v6548_v52  ;;  %v6560_v63 = vsel %vm374_vm4, %v6557_v44, %v6559_v53 }
 0x64b   :  { %v16685_v60 = vmul.f32 0.33333334, %v6564_v54  ;;  %v6554_v61 = vadd.f32 %v6549_v56, %v6540_v39  ;;  %v13984_v39 = vld [vmem:[%s18585_s5 + $0x10] sm:$0xff] }
 0x64c   :  { %v6566_v62 = vadd.f32 %v6559_v53, %v6555_v55 }
 0x64d   :  { %13539 = vmatmul.mubr.msk.f32.vlgmr.msra.gmra.mxu0 %vm69_vm1, %v16685_v60  ;;  %v6565_v0 = vadd.f32 %v6560_v63, %v6554_v61  ;;  %v6575_v7 = vrot.slane %v16685_v60, 7  ;;  %v6755_v15 = vrot.slane %v16685_v60, 1  ;;  %v6761_v28 = vrot.slane %v16685_v60, 3 }
 0x64e   :  { %v6569_v2 = vmul.f32 0.33333334, %v6566_v62  ;;  %13565 = vmatpush3.msra.mxu0 %v13967_v3  ;;  %13541 = vmatprep.mubr.msk.f32.mxu0 %vm14447_vm0, %v14446_v1  ;;  %v13987_v62 = vld [vmem:[%s18584_s4] ss:$0 sm:$0xff] }
 0x64f   :  { %13566 = vmatprep.subr.mxu0 %v14446_v1  ;;  %v6568_v4 = vmul.f32 0.33333334, %v6565_v0 }
 0x650   :  { %13567 = vmatpush3.msra.mxu0 %v13968_v6  ;;  %v6571_v8 = vrot.slane %v6569_v2, 5  ;;  %v6578_v16 = vrot.slane %v6569_v2, 7  ;;  %v6758_v18 = vrot.slane %v6569_v2, 1 }
 0x651   :  { %13542 = vmatmul.mubr.msk.f32.gmra.mxu0 %vm69_vm1, %v6568_v4  ;;  %13568 = vmatprep.subr.mxu0 %v14446_v1  ;;  %v6576_v10 = vrot.slane %v6568_v4, 7  ;;  %v6756_v11 = vrot.slane %v6568_v4, 1 }
 0x652   :  { %v6581_v27 = vsel %vm53_vm2, %v6571_v8, %v6575_v7  ;;  %13544 = vmatprep.mubr.msk.f32.mxu0 %vm14447_vm0, %v14446_v1  ;;  %13569 = vmatpush3.msra.mxu0 %v13969_v9  ;;  %v6763_v30 = vsel %vm591_vm5, %v6758_v18, %v6761_v28 }
 0x653   :  { %13556 = vmatmul.mubr.msk.f32.vlgmr.msra.gmra.mxu1 %vm69_vm1, %v6581_v27  ;;  %13570 = vmatprep.subr.mxu0 %v14446_v1  ;;  %v6577_v14 = vsel %vm53_vm2, %v6575_v7, %v6576_v10  ;;  %v6757_v17 = vsel %vm243_vm3, %v6755_v15, %v6756_v11  ;;  %v6579_v20 = vsel %vm53_vm2, %v6576_v10, %v6578_v16 }
 0x654   :  { %13558 = vmatprep.mubr.msk.f32.mxu1 %vm14447_vm0, %v14446_v1  ;;  %13571 = vmatpush3.msra.mxu0 %v13970_v12  ;;  %v6759_v24 = vsel %vm243_vm3, %v6756_v11, %v6758_v18 }
 0x655   :  { %13545 = vmatmul.mubr.msk.f32.gmra.mxu0 %vm69_vm1, %v6569_v2  ;;  %13582 = vmatpush3.msra.mxu1 %v13971_v13 }
 0x656   :  { %13572 = vmatprep.mubr.msk.f32.mxu0 %vm14447_vm0, %v14446_v1  ;;  %13583 = vmatprep.subr.mxu1 %v14446_v1 }
 0x657   :  { %13559 = vmatmul.mubr.msk.f32.gmra.mxu1 %vm69_vm1, %v6577_v14  ;;  %13606 = vmatprep.subr.mxu0 %v14446_v1 }
 0x658   :  { %13561 = vmatprep.mubr.msk.f32.mxu1 %vm14447_vm0, %v14446_v1  ;;  %13584 = vmatpush3.msra.mxu1 %v13972_v19 }
 0x659   :  { %13573 = vmatmul.mubr.msk.f32.vlgmr.msra.gmra.mxu0 %vm69_vm1, %v6757_v17  ;;  %13585 = vmatprep.subr.mxu1 %v14446_v1 }
 0x65a   :  { %13575 = vmatprep.mubr.msk.f32.mxu0 %vm14447_vm0, %v14446_v1  ;;  %13586 = vmatpush3.msra.mxu1 %v13973_v21 }
 0x65b   :  { %13562 = vmatmul.mubr.msk.f32.gmra.mxu1 %vm69_vm1, %v6579_v20  ;;  %13587 = vmatprep.subr.mxu1 %v14446_v1 }
 0x65c   :  { %13588 = vmatpush3.msra.mxu1 %v13974_v25  ;;  %13607 = vmatpush3.msra.mxu0 %v13975_v26 }
 0x65d   :  { %13576 = vmatmul.mubr.msk.f32.gmra.mxu0 %vm69_vm1, %v6759_v24  ;;  %13589 = vmatprep.subr.mxu1 %v14446_v1 }
 0x65e   :  { %13578 = vmatprep.mubr.msk.f32.mxu0 %vm14447_vm0, %v14446_v1  ;;  %13590 = vmatpush3.msra.mxu1 %v13976_v29 }
 0x65f   :  { %13608 = vmatprep.subr.mxu0 %v14446_v1  ;;  %13591 = vmatprep.subr.mxu1 %v14446_v1 }
 0x660   :  { %13609 = vmatpush3.msra.mxu0 %v13977_v31  ;;  %13592 = vmatpush3.msra.mxu1 %v13978_v32 }
 0x661   :  { %13579 = vmatmul.mubr.msk.f32.gmra.mxu0 %vm69_vm1, %v6763_v30  ;;  %13610 = vmatprep.subr.mxu0 %v14446_v1 }
 0x662   :  { %13593 = vmatprep.subr.mxu1 %v14446_v1  ;;  %13611 = vmatpush3.msra.mxu0 %v13979_v33 }
 0x663   :  { %13594 = vmatpush3.msra.mxu1 %v13980_v34  ;;  %13612 = vmatprep.subr.mxu0 %v14446_v1 }
 0x664   :  { %13595 = vmatprep.subr.mxu1 %v14446_v1  ;;  %13613 = vmatpush3.msra.mxu0 %v13981_v35  ;;  %v13988_v35 = vld [vmem:[%s18585_s5 + $0xb8] sm:$0xff] }
 0x665   :  { %13596 = vmatpush3.msra.mxu1 %v13982_v36  ;;  %13614 = vmatprep.subr.mxu0 %v14446_v1 }
 0x666   :  { %13597 = vmatprep.mubr.msk.f32.mxu1 %vm14447_vm0, %v14446_v1  ;;  %13615 = vmatpush3.msra.mxu0 %v13983_v38  ;;  %v13989_v38 = vld [vmem:[%s18585_s5 + $0xb0] sm:$0xff] }
 0x667   :  { %13631 = vmatprep.subr.mxu1 %v14446_v1  ;;  %13616 = vmatprep.subr.mxu0 %v14446_v1 }
 0x668   :  { %13617 = vmatpush3.msra.mxu0 %v13984_v39  ;;  %13622 = vmatprep.mubr.msk.f32.mxu0 %vm14447_vm0, %v14446_v1 }
 0x669   :  { %13618 = vmatprep.subr.mxu0 %v14446_v1 }
 0x66a   :  { %13619 = vmatpush3.msra.mxu0 %v13985_v40 }
 0x66b   :  { %13620 = vmatprep.subr.mxu0 %v14446_v1 }
 0x66c   :  { %13621 = vmatpush3.msra.mxu0 %v13986_v42  ;;  %v13990_v42 = vld [vmem:[%s18585_s5 + $0xa8] sm:$0xff] }
 0x66d   :  { %13656 = vmatprep.subr.mxu0 %v14446_v1 }
 0x70d   :  { %v6654_v43 = vpop.f32.mrf.mxu0 }
 0x70f   :  { %v13540_v22 = vpop.f32.mrf.mxu0 }
 0x711   :  { %v6659_v44 = vpop.f32.mrf.mxu0 }
 0x713   :  { %v13543_v45 = vpop.f32.mrf.mxu0  ;;  %v6741_v46 = vpop.f32.mrf.mxu1 }
 0x714   :  { %v6742_v52 = vadd.f32 %v6741_v46, %v6654_v43  ;;  %v13992_v45 = vld [vmem:[%s18585_s5 + $0x98] sm:$0xff] }
 0x715   :  { %v6664_v47 = vpop.f32.mrf.mxu0  ;;  %v13557_v48 = vpop.f32.mrf.mxu1 }
 0x717   :  { %v13546_v50 = vpop.f32.mrf.mxu0  ;;  %v6746_v51 = vpop.f32.mrf.mxu1 }
 0x718   :  { %v6747_v61 = vadd.f32 %v6746_v51, %v6659_v44  ;;  %v13991_v44 = vld [vmem:[%s18585_s5 + $0xa0] sm:$0xff]  ;;  %v13993_v50 = vld [vmem:[%s18585_s5 + $0x90] sm:$0xff]  ;;  %v13994_v51 = vld [vmem:[%s18587_s7 + $0x78] sm:$0xff] }
 0x719   :  { %v13560_v53 = vpop.f32.mrf.mxu1  ;;  %v6837_v54 = vpop.f32.mrf.mxu0 }
 0x71a   :  { %v6851_v55 = vadd.f32 %v6837_v54, %v6742_v52  ;;  %v13995_v52 = vld [vmem:[%s18585_s5 + $0x88] sm:$0xff] }
 0x71b   :  { %v6751_v56 = vpop.f32.mrf.mxu1  ;;  %v13574_v60 = vpop.f32.mrf.mxu0 }
 0x71c   :  { %v6854_v63 = vadd.f32 %v13987_v62, %v6851_v55  ;;  %v6752_v8 = vadd.f32 %v6751_v56, %v6664_v47  ;;  %v13996_v55 = vld [vmem:[%s18585_s5 + $0x80] sm:$0xff] }
 0x71d   :  { %v13563_v0 = vpop.f32.mrf.mxu1  ;;  %v6842_v2 = vpop.f32.mrf.mxu0 }
 0x71e   :  { %v6852_v3 = vadd.f32 %v6842_v2, %v6747_v61  ;;  %v6857_v6 = vmax.f32 %v6854_v63, 0.0  ;;  %v13997_v61 = vld [vmem:[%s18587_s7 + $0x70] sm:$0xff]  ;;  %v13999_v0 = vld [vmem:[%s18587_s7 + $0x60] sm:$0xff]  ;;  %v14000_v2 = vld [vmem:[%s18587_s7 + $0x38] sm:$0xff] }
 0x71f   :  { %v13577_v4 = vpop.f32.mrf.mxu0 }
 0x720   :  { %v6855_v7 = vadd.f32 %v13987_v62, %v6852_v3  ;;  %v6863_v12 = vrot.slane %v6857_v6, 1  ;;  %v6874_v16 = vrot.slane %v6857_v6, 2  ;;  %v14001_v4 = vld [vmem:[%s18587_s7 + $0x58] sm:$0xff] }
 0x721   :  { %v6847_v27 = vpop.f32.mrf.mxu0 }
 0x722   :  { %v6858_v9 = vmax.f32 %v6855_v7, 0.0  ;;  %v6853_v10 = vadd.f32 %v6847_v27, %v6752_v8  ;;  %v14002_v8 = vld [vmem:[%s18587_s7 + $0x30] sm:$0xff]  ;;  %v14004_v27 = vld [vmem:[%s18587_s7 + $0x28] sm:$0xff] }
 0x723   :  { %v13580_v11 = vpop.f32.mrf.mxu0  ;;  %v14003_v7 = vld [vmem:[%s18587_s7 + $0x50] sm:$0xff] }
 0x724   :  { %v6864_v13 = vrot.slane %v6858_v9, 1  ;;  %v6875_v14 = vrot.slane %v6858_v9, 2  ;;  %v6856_v15 = vadd.f32 %v13987_v62, %v6853_v10  ;;  %v13998_v62 = vld [vmem:[%s18587_s7 + $0x68] sm:$0xff]  ;;  %v14006_v10 = vld [vmem:[%s18587_s7 + $0x20] sm:$0xff] }
 0x725   :  { %v14007_v11 = vld [vmem:[%s18587_s7 + $0x40] sm:$0xff] }
 0x726   :  { %v6865_v17 = vsel %vm243_vm3, %v6863_v12, %v6864_v13  ;;  %v6859_v18 = vmax.f32 %v6856_v15, 0.0  ;;  %v6876_v20 = vsel %vm374_vm4, %v6874_v16, %v6875_v14  ;;  %v14008_v12 = vld [vmem:[%s18587_s7 + $0x18] sm:$0xff]  ;;  %v14011_v15 = vld [vmem:[%s18587_s7] sm:$0xff] }
 0x727   :  { %v6871_v19 = vadd.f32 %v6865_v17, %v6857_v6  ;;  %v14012_v16 = vld [vmem:[%s18589_s9 + $0x80] sm:$0xff] }
 0x728   :  { %v6866_v21 = vrot.slane %v6859_v18, 1  ;;  %v6877_v24 = vrot.slane %v6859_v18, 2 }
 0x729   :  { %v6882_v25 = vadd.f32 %v6876_v20, %v6871_v19 }
 0x72a   :  { %v6873_v26 = vadd.f32 %v6866_v21, %v6859_v18  ;;  %v6867_v28 = vsel %vm243_vm3, %v6864_v13, %v6866_v21  ;;  %v6878_v32 = vsel %vm374_vm4, %v6875_v14, %v6877_v24  ;;  %v14009_v13 = vld [vmem:[%s18587_s7 + $0x10] sm:$0xff]  ;;  %v14010_v14 = vld [vmem:[%s18587_s7 + $0x8] sm:$0xff] }
 0x72b   :  { %v16811_v29 = vmul.f32 0.33333334, %v6882_v25  ;;  %v6872_v30 = vadd.f32 %v6867_v28, %v6858_v9  ;;  %v14005_v9 = vld [vmem:[%s18587_s7 + $0x48] sm:$0xff] }
 0x72c   :  { %v6884_v31 = vadd.f32 %v6877_v24, %v6873_v26 }
 0x72d   :  { %13598 = vmatmul.mubr.msk.f32.vlgmr.msra.gmra.mxu1 %vm758_vm6, %v16811_v29  ;;  %v6883_v33 = vadd.f32 %v6878_v32, %v6872_v30  ;;  %v6893_v40 = vrot.slane %v16811_v29, 7  ;;  %v7073_v54 = vrot.slane %v16811_v29, 1  ;;  %v7079_v3 = vrot.slane %v16811_v29, 5 }
 0x72e   :  { %v16816_v34 = vmul.f32 0.33333334, %v6884_v31  ;;  %13632 = vmatpush3.msra.mxu1 %v13988_v35  ;;  %13600 = vmatprep.mubr.msk.f32.mxu1 %vm14447_vm0, %v14446_v1 }
 0x72f   :  { %13633 = vmatprep.subr.mxu1 %v14446_v1  ;;  %v6886_v36 = vmul.f32 0.33333334, %v6883_v33 }
 0x730   :  { %13634 = vmatpush3.msra.mxu1 %v13989_v38  ;;  %v6889_v39 = vrot.slane %v16816_v34, 3  ;;  %v6896_v47 = vrot.slane %v16816_v34, 7  ;;  %v7076_v60 = vrot.slane %v16816_v34, 1  ;;  %v14013_v38 = vld [vmem:[%s18586_s6] ss:$0 sm:$0xff] }
 0x731   :  { %13635 = vmatprep.subr.mxu1 %v14446_v1  ;;  %13601 = vmatmul.mubr.msk.f32.gmra.mxu1 %vm758_vm6, %v6886_v36  ;;  %v6894_v22 = vrot.slane %v6886_v36, 7  ;;  %v7074_v48 = vrot.slane %v6886_v36, 1 }
 0x732   :  { %13636 = vmatpush3.msra.mxu1 %v13990_v42  ;;  %v6899_v43 = vsel %vm53_vm2, %v6889_v39, %v6893_v40  ;;  %13603 = vmatprep.mubr.msk.f32.mxu1 %vm14447_vm0, %v14446_v1  ;;  %v7081_v6 = vsel %vm940_vm7, %v7076_v60, %v7079_v3 }
 0x733   :  { %13637 = vmatprep.subr.mxu1 %v14446_v1  ;;  %13623 = vmatmul.mubr.msk.f32.vlgmr.msra.gmra.mxu0 %vm758_vm6, %v6899_v43  ;;  %v6895_v46 = vsel %vm53_vm2, %v6893_v40, %v6894_v22  ;;  %v6897_v53 = vsel %vm53_vm2, %v6894_v22, %v6896_v47  ;;  %v7075_v56 = vsel %vm243_vm3, %v7073_v54, %v7074_v48 }
 0x734   :  { %13638 = vmatpush3.msra.mxu1 %v13991_v44  ;;  %13625 = vmatprep.mubr.msk.f32.mxu0 %vm14447_vm0, %v14446_v1  ;;  %v7077_v63 = vsel %vm243_vm3, %v7074_v48, %v7076_v60 }
 0x735   :  { %13639 = vmatprep.subr.mxu1 %v14446_v1  ;;  %13604 = vmatmul.mubr.msk.f32.gmra.mxu1 %vm758_vm6, %v16816_v34 }
 0x736   :  { %13640 = vmatpush3.msra.mxu1 %v13992_v45  ;;  %13647 = vmatprep.mubr.msk.f32.mxu1 %vm14447_vm0, %v14446_v1 }
 0x737   :  { %13641 = vmatprep.subr.mxu1 %v14446_v1  ;;  %13626 = vmatmul.mubr.msk.f32.gmra.mxu0 %vm758_vm6, %v6895_v46 }
 0x738   :  { %13642 = vmatpush3.msra.mxu1 %v13993_v50  ;;  %13628 = vmatprep.mubr.msk.f32.mxu0 %vm14447_vm0, %v14446_v1 }
 0x739   :  { %13643 = vmatprep.subr.mxu1 %v14446_v1  ;;  %13657 = vmatpush3.msra.mxu0 %v13994_v51 }
 0x73a   :  { %13644 = vmatpush3.msra.mxu1 %v13995_v52  ;;  %13658 = vmatprep.subr.mxu0 %v14446_v1 }
 0x73b   :  { %13645 = vmatprep.subr.mxu1 %v14446_v1  ;;  %13629 = vmatmul.mubr.msk.f32.gmra.mxu0 %vm758_vm6, %v6897_v53 }
 0x73c   :  { %13646 = vmatpush3.msra.mxu1 %v13996_v55  ;;  %13659 = vmatpush3.msra.mxu0 %v13997_v61 }
 0x73d   :  { %13648 = vmatmul.mubr.msk.f32.vlgmr.msra.gmra.mxu1 %vm758_vm6, %v7075_v56  ;;  %13660 = vmatprep.subr.mxu0 %v14446_v1 }
 0x73e   :  { %13650 = vmatprep.mubr.msk.f32.mxu1 %vm14447_vm0, %v14446_v1  ;;  %13661 = vmatpush3.msra.mxu0 %v13998_v62 }
 0x73f   :  { %13662 = vmatprep.subr.mxu0 %v14446_v1  ;;  %13681 = vmatprep.subr.mxu1 %v14446_v1 }
 0x740   :  { %13663 = vmatpush3.msra.mxu0 %v13999_v0  ;;  %13682 = vmatpush3.msra.mxu1 %v14000_v2 }
 0x741   :  { %13651 = vmatmul.mubr.msk.f32.gmra.mxu1 %vm758_vm6, %v7077_v63  ;;  %13664 = vmatprep.subr.mxu0 %v14446_v1 }
 0x742   :  { %13653 = vmatprep.mubr.msk.f32.mxu1 %vm14447_vm0, %v14446_v1  ;;  %13665 = vmatpush3.msra.mxu0 %v14001_v4 }
 0x743   :  { %13683 = vmatprep.subr.mxu1 %v14446_v1  ;;  %13666 = vmatprep.subr.mxu0 %v14446_v1 }
 0x744   :  { %13684 = vmatpush3.msra.mxu1 %v14002_v8  ;;  %13667 = vmatpush3.msra.mxu0 %v14003_v7 }
 0x745   :  { %13654 = vmatmul.mubr.msk.f32.gmra.mxu1 %vm758_vm6, %v7081_v6  ;;  %13685 = vmatprep.subr.mxu1 %v14446_v1 }
 0x746   :  { %13668 = vmatprep.subr.mxu0 %v14446_v1  ;;  %13686 = vmatpush3.msra.mxu1 %v14004_v27 }
 0x747   :  { %13669 = vmatpush3.msra.mxu0 %v14005_v9  ;;  %13687 = vmatprep.subr.mxu1 %v14446_v1 }
 0x748   :  { %13670 = vmatprep.subr.mxu0 %v14446_v1  ;;  %13688 = vmatpush3.msra.mxu1 %v14006_v10 }
 0x749   :  { %13671 = vmatpush3.msra.mxu0 %v14007_v11  ;;  %13689 = vmatprep.subr.mxu1 %v14446_v1  ;;  %v14014_v11 = vld [vmem:[%s18587_s7 + $0xb8] sm:$0xff] }
 0x74a   :  { %13672 = vmatprep.mubr.msk.f32.mxu0 %vm14447_vm0, %v14446_v1  ;;  %13690 = vmatpush3.msra.mxu1 %v14008_v12 }
 0x74b   :  { %13706 = vmatprep.subr.mxu0 %v14446_v1  ;;  %13691 = vmatprep.subr.mxu1 %v14446_v1 }
 0x74c   :  { %13692 = vmatpush3.msra.mxu1 %v14009_v13  ;;  %13697 = vmatprep.mubr.msk.f32.mxu1 %vm14447_vm0, %v14446_v1 }
 0x74d   :  { %13693 = vmatprep.subr.mxu1 %v14446_v1 }
 0x74e   :  { %13694 = vmatpush3.msra.mxu1 %v14010_v14  ;;  %v14015_v14 = vld [vmem:[%s18587_s7 + $0xb0] sm:$0xff] }
 0x74f   :  { %13695 = vmatprep.subr.mxu1 %v14446_v1 }
 0x750   :  { %13696 = vmatpush3.msra.mxu1 %v14011_v15 }
 0x751   :  { %7538 = vmatprep.subr.mxu1 %v14012_v16  ;;  %v14016_v16 = vld [vmem:[%s18587_s7 + $0xa8] sm:$0xff] }
 0x7ed   :  { %v6972_v17 = vpop.f32.mrf.mxu1 }
 0x7ef   :  { %v13599_v18 = vpop.f32.mrf.mxu1 }
 0x7f1   :  { %v6977_v19 = vpop.f32.mrf.mxu1 }
 0x7f3   :  { %v13602_v20 = vpop.f32.mrf.mxu1  ;;  %v7059_v21 = vpop.f32.mrf.mxu0 }
 0x7f4   :  { %v7060_v31 = vadd.f32 %v7059_v21, %v6972_v17  ;;  %v14018_v20 = vld [vmem:[%s18587_s7 + $0x98] sm:$0xff] }
 0x7f5   :  { %v6982_v24 = vpop.f32.mrf.mxu1  ;;  %v13624_v25 = vpop.f32.mrf.mxu0 }
 0x7f6   :  { %v14019_v25 = vld [vmem:[%s18587_s7 + $0x90] sm:$0xff] }
 0x7f7   :  { %v13605_v26 = vpop.f32.mrf.mxu1  ;;  %v7064_v28 = vpop.f32.mrf.mxu0 }
 0x7f8   :  { %v7065_v36 = vadd.f32 %v7064_v28, %v6977_v19  ;;  %v14017_v19 = vld [vmem:[%s18587_s7 + $0xa0] sm:$0xff]  ;;  %v14020_v28 = vld [vmem:[%s18589_s9 + $0x78] sm:$0xff] }
 0x7f9   :  { %v13627_v29 = vpop.f32.mrf.mxu0 }
 0x7fa   :  { %v14021_v29 = vld [vmem:[%s18587_s7 + $0x88] sm:$0xff] }
 0x7fb   :  { %v7069_v30 = vpop.f32.mrf.mxu0 }
 0x7fc   :  { %v7070_v22 = vadd.f32 %v7069_v30, %v6982_v24 }
 0x7fd   :  { %v7155_v32 = vpop.f32.mrf.mxu1  ;;  %v13630_v33 = vpop.f32.mrf.mxu0 }
 0x7fe   :  { %v7169_v34 = vadd.f32 %v7155_v32, %v7060_v31  ;;  %v14022_v32 = vld [vmem:[%s18589_s9 + $0x58] sm:$0xff]  ;;  %v14023_v33 = vld [vmem:[%s18587_s7 + $0x80] sm:$0xff] }
 0x7ff   :  { %v13649_v35 = vpop.f32.mrf.mxu1 }
 0x800   :  { %v7172_v39 = vadd.f32 %v14013_v38, %v7169_v34  ;;  %v14024_v35 = vld [vmem:[%s18589_s9 + $0x50] sm:$0xff] }
 0x801   :  { %v7160_v40 = vpop.f32.mrf.mxu1 }
 0x802   :  { %v7170_v42 = vadd.f32 %v7160_v40, %v7065_v36  ;;  %v7175_v44 = vmax.f32 %v7172_v39, 0.0  ;;  %v14025_v36 = vld [vmem:[%s18589_s9 + $0x90] sm:$0xff]  ;;  %v14027_v39 = vld [vmem:[%s18589_s9 + $0x68] sm:$0xff] }
 0x803   :  { %v13652_v43 = vpop.f32.mrf.mxu1  ;;  %v14028_v40 = vld [vmem:[%s18589_s9 + $0x30] sm:$0xff] }
 0x804   :  { %v7173_v45 = vadd.f32 %v14013_v38, %v7170_v42  ;;  %v7181_v51 = vrot.slane %v7175_v44, 1  ;;  %v7192_v55 = vrot.slane %v7175_v44, 2  ;;  %v14029_v43 = vld [vmem:[%s18589_s9 + $0x60] sm:$0xff] }
 0x805   :  { %v7165_v46 = vpop.f32.mrf.mxu1 }
 0x806   :  { %v7176_v47 = vmax.f32 %v7173_v45, 0.0  ;;  %v7171_v48 = vadd.f32 %v7165_v46, %v7070_v22  ;;  %v14030_v22 = vld [vmem:[%s18589_s9 + $0x28] sm:$0xff]  ;;  %v14032_v45 = vld [vmem:[%s18589_s9 + $0x38] sm:$0xff] }
 0x807   :  { %v13655_v50 = vpop.f32.mrf.mxu1  ;;  %v14033_v46 = vld [vmem:[%s18589_s9 + $0x8] sm:$0xff] }
 0x808   :  { %v7182_v52 = vrot.slane %v7176_v47, 1  ;;  %v7193_v53 = vrot.slane %v7176_v47, 2  ;;  %v7174_v54 = vadd.f32 %v14013_v38, %v7171_v48  ;;  %v14026_v38 = vld [vmem:[%s18589_s9 + $0x88] sm:$0xff]  ;;  %v14035_v48 = vld [vmem:[%s18589_s9] sm:$0xff]  ;;  %v14036_v50 = vld [vmem:[%s18589_s9 + $0x10] sm:$0xff] }
 0x80a   :  { %v7183_v56 = vsel %vm243_vm3, %v7181_v51, %v7182_v52  ;;  %v7177_v60 = vmax.f32 %v7174_v54, 0.0  ;;  %v7194_v62 = vsel %vm374_vm4, %v7192_v55, %v7193_v53  ;;  %v14037_v51 = vld [vmem:[%s18589_s9 + $0x120] sm:$0xff] }
 0x80b   :  { %v7189_v61 = vadd.f32 %v7183_v56, %v7175_v44  ;;  %v14031_v44 = vld [vmem:[%s18589_s9 + $0x40] sm:$0xff] }
 0x80c   :  { %v7184_v63 = vrot.slane %v7177_v60, 1  ;;  %v7195_v0 = vrot.slane %v7177_v60, 2 }
 0x80d   :  { %v7200_v2 = vadd.f32 %v7194_v62, %v7189_v61 }
 0x80e   :  { %v7185_v3 = vsel %vm243_vm3, %v7182_v52, %v7184_v63  ;;  %v7191_v4 = vadd.f32 %v7184_v63, %v7177_v60  ;;  %v7196_v7 = vsel %vm374_vm4, %v7193_v53, %v7195_v0 }
 0x80f   :  { %v7203_v6 = vmul.f32 0.33333334, %v7200_v2  ;;  %v7190_v8 = vadd.f32 %v7185_v3, %v7176_v47  ;;  %v14034_v47 = vld [vmem:[%s18589_s9 + $0x18] sm:$0xff] }
 0x810   :  { %v7202_v27 = vadd.f32 %v7195_v0, %v7191_v4 }
 0x811   :  { %13673 = vmatmul.mubr.msk.f32.vlgmr.msra.gmra.mxu0 %vm758_vm6, %v7203_v6  ;;  %v7201_v9 = vadd.f32 %v7196_v7, %v7190_v8  ;;  %v7211_v15 = vrot.slane %v7203_v6, 7  ;;  %v7391_v31 = vrot.slane %v7203_v6, 1 }
 0x812   :  { %v16963_v10 = vmul.f32 0.33333334, %v7202_v27  ;;  %13707 = vmatpush3.msra.mxu0 %v14014_v11  ;;  %13675 = vmatprep.mubr.msk.f32.mxu0 %vm14447_vm0, %v14446_v1 }
 0x813   :  { %13708 = vmatprep.subr.mxu0 %v14446_v1  ;;  %v7204_v12 = vmul.f32 0.33333334, %v7201_v9 }
 0x814   :  { %v7207_v13 = vrot.slane %v16963_v10, 1  ;;  %13709 = vmatpush3.msra.mxu0 %v14015_v14  ;;  %v7214_v24 = vrot.slane %v16963_v10, 7 }
 0x815   :  { %13710 = vmatprep.subr.mxu0 %v14446_v1  ;;  %13676 = vmatmul.mubr.msk.f32.gmra.mxu0 %vm758_vm6, %v7204_v12  ;;  %v7212_v18 = vrot.slane %v7204_v12, 7  ;;  %v7392_v26 = vrot.slane %v7204_v12, 1 }
 0x816   :  { %13711 = vmatpush3.msra.mxu0 %v14016_v16  ;;  %v16981_v17 = vsel %vm53_vm2, %v7207_v13, %v7211_v15  ;;  %13678 = vmatprep.mubr.msk.f32.mxu0 %vm14447_vm0, %v14446_v1 }
 0x817   :  { %13712 = vmatprep.subr.mxu0 %v14446_v1  ;;  %13698 = vmatmul.mubr.msk.f32.vlgmr.msra.gmra.mxu1 %vm758_vm6, %v16981_v17  ;;  %v7213_v21 = vsel %vm53_vm2, %v7211_v15, %v7212_v18  ;;  %v7215_v30 = vsel %vm53_vm2, %v7212_v18, %v7214_v24  ;;  %v7393_v34 = vsel %vm243_vm3, %v7391_v31, %v7392_v26 }
 0x818   :  { %13713 = vmatpush3.msra.mxu0 %v14017_v19  ;;  %13700 = vmatprep.mubr.msk.f32.mxu1 %vm14447_vm0, %v14446_v1  ;;  %v7394_v42 = vsel %vm243_vm3, %v7392_v26, %v7207_v13 }
 0x819   :  { %13714 = vmatprep.subr.mxu0 %v14446_v1  ;;  %13679 = vmatmul.mubr.msk.f32.gmra.mxu0 %vm758_vm6, %v16963_v10  ;;  %v14038_v10 = vld [vmem:[%s18588_s8] ss:$0 sm:$0xff] }
 0x81a   :  { %13715 = vmatpush3.msra.mxu0 %v14018_v20  ;;  %13722 = vmatprep.mubr.msk.f32.mxu0 %vm14447_vm0, %v14446_v1 }
 0x81b   :  { %13716 = vmatprep.subr.mxu0 %v14446_v1  ;;  %13701 = vmatmul.mubr.msk.f32.gmra.mxu1 %vm758_vm6, %v7213_v21 }
 0x81c   :  { %13717 = vmatpush3.msra.mxu0 %v14019_v25  ;;  %13703 = vmatprep.mubr.msk.f32.mxu1 %vm14447_vm0, %v14446_v1 }
 0x81d   :  { %13718 = vmatprep.subr.mxu0 %v14446_v1  ;;  %7539 = vmatpush1.msra.mxu1 %v14020_v28 }
 0x81e   :  { %13719 = vmatpush3.msra.mxu0 %v14021_v29  ;;  %7540 = vmatprep.subr.mxu1 %v14022_v32 }
 0x81f   :  { %13720 = vmatprep.subr.mxu0 %v14446_v1  ;;  %13704 = vmatmul.mubr.msk.f32.gmra.mxu1 %vm758_vm6, %v7215_v30 }
 0x820   :  { %13721 = vmatpush3.msra.mxu0 %v14023_v33  ;;  %7541 = vmatpush1.msra.mxu1 %v14024_v35 }
 0x821   :  { %13723 = vmatmul.mubr.msk.f32.vlgmr.msra.gmra.mxu0 %vm758_vm6, %v7393_v34  ;;  %7609 = vmatprep.subr.mxu0 %v14025_v36 }
 0x822   :  { %13725 = vmatprep.mubr.msk.f32.mxu0 %vm14447_vm0, %v14446_v1  ;;  %7610 = vmatpush1.msra.mxu0 %v14026_v38 }
 0x823   :  { %7611 = vmatprep.subr.mxu0 %v14027_v39  ;;  %7542 = vmatprep.subr.mxu1 %v14028_v40 }
 0x824   :  { %7612 = vmatpush1.msra.mxu0 %v14029_v43  ;;  %7543 = vmatpush1.msra.mxu1 %v14030_v22  ;;  %v14039_v43 = vld [vmem:[%s18589_s9 + $0x98] sm:$0xff] }
 0x825   :  { %13726 = vmatmul.mubr.msk.f32.gmra.mxu0 %vm758_vm6, %v7394_v42  ;;  %7613 = vmatprep.subr.mxu0 %v14031_v44  ;;  %v14040_v22 = vld [vmem:[%s18589_s9 + $0x118] sm:$0xff] }
 0x826   :  { %13728 = vmatprep.mubr.msk.f32.mxu0 %vm14447_vm0, %v14446_v1  ;;  %7614 = vmatpush1.msra.mxu0 %v14032_v45  ;;  %v14041_v44 = vld [vmem:[%s18589_s9 + $0xf8] sm:$0xff]  ;;  %v14042_v45 = vld [vmem:[%s18589_s9 + $0x70] sm:$0xff] }
 0x827   :  { %7544 = vmatprep.subr.mxu1 %v14033_v46  ;;  %7615 = vmatprep.subr.mxu0 %v14034_v47  ;;  %v14043_v46 = vld [vmem:[%s18589_s9 + $0xf0] sm:$0xff] }
 0x828   :  { %7545 = vmatpush1.msra.mxu1 %v14035_v48  ;;  %7616 = vmatpush1.msra.mxu0 %v14036_v50  ;;  %v14044_v47 = vld [vmem:[%s18589_s9 + $0xd0] sm:$0xff]  ;;  %v14045_v48 = vld [vmem:[%s18589_s9 + $0x48] sm:$0xff] }
 0x829   :  { %13729 = vmatmul.mubr.msk.f32.gmra.mxu0 %vm758_vm6, %v16981_v17  ;;  %7578 = vmatprep.mubr.f32.mxu1 %v14446_v1  ;;  %v14046_v50 = vld [vmem:[%s18589_s9 + $0xc8] sm:$0xff] }
 0x82a   :  { %7649 = vmatprep.mubr.f32.mxu0 %v14446_v1  ;;  %13731 = vmatprep.subr.mxu1 %v14446_v1 }
 0x82b   :  { %7799 = vmatprep.subr.mxu0 %v14037_v51  ;;  %v14047_v51 = vld [vmem:[%s18589_s9 + $0xa8] sm:$0xff] }
 0x8d1   :  { %v7290_v52 = vpop.f32.mrf.mxu0 }
 0x8d3   :  { %v13674_v53 = vpop.f32.mrf.mxu0 }
 0x8d5   :  { %v7295_v54 = vpop.f32.mrf.mxu0 }
 0x8d7   :  { %v13677_v55 = vpop.f32.mrf.mxu0  ;;  %v7377_v56 = vpop.f32.mrf.mxu1 }
 0x8d8   :  { %v7378_v3 = vadd.f32 %v7377_v56, %v7290_v52  ;;  %v14048_v52 = vld [vmem:[%s18589_s9 + $0x20] sm:$0xff]  ;;  %v14050_v55 = vld [vmem:[%s18589_s9 + $0x130] sm:$0xff]  ;;  %v14051_v56 = vld [vmem:[%s18589_s9 + $0x128] sm:$0xff] }
 0x8d9   :  { %v7300_v60 = vpop.f32.mrf.mxu0  ;;  %v13699_v61 = vpop.f32.mrf.mxu1 }
 0x8da   :  { %v14053_v61 = vld [vmem:[%s18589_s9 + $0x108] sm:$0xff] }
 0x8db   :  { %v13680_v62 = vpop.f32.mrf.mxu0  ;;  %v7382_v63 = vpop.f32.mrf.mxu1 }
 0x8dc   :  { %v7383_v9 = vadd.f32 %v7382_v63, %v7295_v54  ;;  %v14049_v54 = vld [vmem:[%s18589_s9 + $0xa0] sm:$0xff]  ;;  %v14055_v63 = vld [vmem:[%s18589_s9 + $0x110] sm:$0xff] }
 0x8dd   :  { %v13702_v0 = vpop.f32.mrf.mxu1  ;;  %v14054_v62 = vld [vmem:[%s18589_s9 + $0x100] sm:$0xff] }
 0x8de   :  { %v14056_v0 = vld [vmem:[%s18589_s9 + $0xe0] sm:$0xff] }
 0x8df   :  { %v7387_v2 = vpop.f32.mrf.mxu1 }
 0x8e0   :  { %v7388_v4 = vadd.f32 %v7387_v2, %v7300_v60  ;;  %v14052_v60 = vld [vmem:[%s18589_s9 + $0x138] sm:$0xff] }
 0x8e1   :  { %v7465_v6 = vpop.f32.mrf.mxu0  ;;  %v13705_v8 = vpop.f32.mrf.mxu1  ;;  %v14057_v2 = vld [vmem:[%s18589_s9 + $0xd8] sm:$0xff] }
 0x8e2   :  { %v7479_v7 = vadd.f32 %v7465_v6, %v7378_v3  ;;  %v14058_v3 = vld [vmem:[%s18589_s9 + $0xe8] sm:$0xff]  ;;  %v14060_v6 = vld [vmem:[%s18589_s9 + $0xb0] sm:$0xff]  ;;  %v14061_v8 = vld [vmem:[%s18589_s9 + $0xc0] sm:$0xff] }
 0x8e3   :  { %v13724_v27 = vpop.f32.mrf.mxu0 }
 0x8e4   :  { %v7482_v11 = vadd.f32 %v14038_v10, %v7479_v7  ;;  %v14062_v7 = vld [vmem:[%s18589_s9 + $0x1c0] sm:$0xff]  ;;  %v14063_v27 = vld [vmem:[%s18589_s9 + $0x1d0] sm:$0xff] }
 0x8e5   :  { %v7470_v12 = vpop.f32.mrf.mxu0 }
 0x8e6   :  { %v7480_v13 = vadd.f32 %v7470_v12, %v7383_v9  ;;  %v7485_v15 = vmax.f32 %v7482_v11, 0.0  ;;  %v14064_v9 = vld [vmem:[%s18589_s9 + $0x1b8] sm:$0xff]  ;;  %v14067_v12 = vld [vmem:[%s18589_s9 + $0x1a8] sm:$0xff] }
 0x8e7   :  { %v13727_v14 = vpop.f32.mrf.mxu0  ;;  %v14066_v11 = vld [vmem:[%s18589_s9 + $0x198] sm:$0xff] }
 0x8e8   :  { %v7483_v16 = vadd.f32 %v14038_v10, %v7480_v13  ;;  %v7491_v21 = vrot.slane %v7485_v15, 1  ;;  %v7500_v28 = vrot.slane %v7485_v15, 2  ;;  %v14068_v13 = vld [vmem:[%s18589_s9 + $0x190] sm:$0xff]  ;;  %v14069_v14 = vld [vmem:[%s18589_s9 + $0x1a0] sm:$0xff] }
 0x8e9   :  { %v7475_v17 = vpop.f32.mrf.mxu0 }
 0x8ea   :  { %v7486_v18 = vmax.f32 %v7483_v16, 0.0  ;;  %v7481_v19 = vadd.f32 %v7475_v17, %v7388_v4  ;;  %v14059_v4 = vld [vmem:[%s18589_s9 + $0xb8] sm:$0xff]  ;;  %v14071_v16 = vld [vmem:[%s18589_s9 + $0x180] sm:$0xff]  ;;  %v14072_v17 = vld [vmem:[%s18589_s9 + $0x168] sm:$0xff] }
 0x8eb   :  { %v13730_v20 = vpop.f32.mrf.mxu0 }
 0x8ec   :  { %v7492_v24 = vrot.slane %v7486_v18, 1  ;;  %v7501_v25 = vrot.slane %v7486_v18, 2  ;;  %v7484_v26 = vadd.f32 %v14038_v10, %v7481_v19  ;;  %v14065_v10 = vld [vmem:[%s18589_s9 + $0x1c8] sm:$0xff]  ;;  %v14075_v20 = vld [vmem:[%s18589_s9 + $0x158] sm:$0xff] }
 0x8ed   :  { %v14074_v19 = vld [vmem:[%s18589_s9 + $0x148] sm:$0xff] }
 0x8ee   :  { %v7493_v29 = vsel %vm243_vm3, %v7491_v21, %v7492_v24  ;;  %v7487_v30 = vmax.f32 %v7484_v26, 0.0  ;;  %v7502_v32 = vsel %vm374_vm4, %v7500_v28, %v7501_v25  ;;  %v14076_v21 = vld [vmem:[%s18589_s9 + $0x140] sm:$0xff]  ;;  %v14079_v28 = vld [vmem:[%s18589_s9 + $0x1d8] sm:$0xff] }
 0x8ef   :  { %v7498_v31 = vadd.f32 %v7493_v29, %v7485_v15  ;;  %v14070_v15 = vld [vmem:[%s18589_s9 + $0x170] sm:$0xff]  ;;  %v14078_v26 = vld [vmem:[%s18589_s9 + $0x260] sm:$0xff]  ;;  %v14080_v29 = vld [vmem:[%s18589_s9 + $0x258] sm:$0xff] }
 0x8f0   :  { %v7494_v33 = vrot.slane %v7487_v30, 1  ;;  %v7503_v34 = vrot.slane %v7487_v30, 2  ;;  %v14081_v30 = vld [vmem:[%s18589_s9 + $0x238] sm:$0xff] }
 0x8f1   :  { %v7507_v35 = vadd.f32 %v7502_v32, %v7498_v31  ;;  %v14082_v31 = vld [vmem:[%s18589_s9 + $0x1b0] sm:$0xff] }
 0x8f2   :  { %v7495_v36 = vsel %vm243_vm3, %v7492_v24, %v7494_v33  ;;  %v7504_v38 = vsel %vm374_vm4, %v7501_v25, %v7503_v34  ;;  %v14077_v25 = vld [vmem:[%s18589_s9 + $0x150] sm:$0xff]  ;;  %v14085_v34 = vld [vmem:[%s18589_s9 + $0x188] sm:$0xff] }
 0x8f3   :  { %v17088_v39 = vmul.f32 0.33333334, %v7507_v35  ;;  %v7499_v40 = vadd.f32 %v7495_v36, %v7486_v18  ;;  %v14073_v18 = vld [vmem:[%s18589_s9 + $0x178] sm:$0xff]  ;;  %v14083_v32 = vld [vmem:[%s18589_s9 + $0x230] sm:$0xff]  ;;  %v14086_v35 = vld [vmem:[%s18589_s9 + $0x208] sm:$0xff] }
 0x8f4   :  { %v14084_v33 = vld [vmem:[%s18589_s9 + $0x210] sm:$0xff]  ;;  %v14087_v36 = vld [vmem:[%s18589_s9 + $0x1e8] sm:$0xff] }
 0x8f5   :  { %v17090_v42 = vadd.f32 %v7504_v38, %v7499_v40  ;;  %12418 = vmatmul.mubr.msk.f32.vlgmr.msra.gmra.mxu1 %vm69_vm1, %v17088_v39  ;;  %12419 = vmatmul.mubr.msk.f32.vlgmr.msra.gmra.mxu0 %vm69_vm1, %v17088_v39  ;;  %v7772_v53 = vrot.slane %v17088_v39, 1  ;;  %v8033_v24 = vrot.slane %v17088_v39, 2  ;;  %v14088_v38 = vld [vmem:[%s18589_s9 + $0x160] sm:$0xff]  ;;  %v8294_v40 = vrot.slane %v17088_v39, 3 }
 0x8f6   :  { %13732 = vmatpush3.msra.mxu1 %v14039_v43  ;;  %7800 = vmatpush1.msra.mxu0 %v14040_v22  ;;  %v14089_v43 = vld [vmem:[%s18589_s9 + $0x1e0] sm:$0xff]  ;;  %v14090_v22 = vld [vmem:[%s18589_s9 + $0x270] sm:$0xff] }
 0x8f7   :  { %13733 = vmatprep.subr.mxu1 %v14446_v1  ;;  %7801 = vmatprep.subr.mxu0 %v14041_v44  ;;  %v14091_v44 = vld [vmem:[%s18589_s9 + $0x268] sm:$0xff] }
 0x8f8   :  { %13734 = vmatpush3.msra.mxu1 %v14042_v45  ;;  %7802 = vmatpush1.msra.mxu0 %v14043_v46  ;;  %v14092_v45 = vld [vmem:[%s18589_s9 + $0x278] sm:$0xff]  ;;  %v14093_v46 = vld [vmem:[%s18589_s9 + $0x248] sm:$0xff] }
 0x8f9   :  { %13735 = vmatprep.subr.mxu1 %v14446_v1  ;;  %7803 = vmatprep.subr.mxu0 %v14044_v47  ;;  %v14094_v47 = vld [vmem:[%s18589_s9 + $0x240] sm:$0xff] }
 0x8fa   :  { %13736 = vmatpush3.msra.mxu1 %v14045_v48  ;;  %7804 = vmatpush1.msra.mxu0 %v14046_v50  ;;  %v14095_v48 = vld [vmem:[%s18589_s9 + $0x250] sm:$0xff]  ;;  %v14096_v50 = vld [vmem:[%s18589_s9 + $0x220] sm:$0xff] }
 0x8fb   :  { %13737 = vmatprep.subr.mxu1 %v14446_v1  ;;  %7805 = vmatprep.subr.mxu0 %v14047_v51  ;;  %v14097_v51 = vld [vmem:[%s18589_s9 + $0x218] sm:$0xff] }
 0x8fc   :  { %13738 = vmatpush3.msra.mxu1 %v14048_v52  ;;  %13739 = vmatprep.mubr.msk.f32.mxu1 %vm14447_vm0, %v14446_v1  ;;  %v14098_v52 = vld [vmem:[%s18589_s9 + $0x228] sm:$0xff] }
 0x8fd   :  { %7806 = vmatpush1.msra.mxu0 %v14049_v54  ;;  %7839 = vmatprep.mubr.f32.mxu0 %v14446_v1  ;;  %v14100_v54 = vld [vmem:[%s18589_s9 + $0x1f0] sm:$0xff] }
 0x8fe   :  { %13740 = vmatmul.mubr.msk.f32.vlgmr.msra.gmra.mxu1 %vm69_vm1, %v17088_v39  ;;  %12421 = vmatmul.mubr.msk.f32.vlgmr.msra.gmra.mxu0 %vm69_vm1, %v7772_v53 }
 0x8ff   :  { %7870 = vmatprep.subr.mxu1 %v14050_v55  ;;  %13742 = vmatprep.subr.mxu0 %v14446_v1  ;;  %v14101_v55 = vld [vmem:[%s18589_s9 + $0x200] sm:$0xff] }
 0x900   :  { %7871 = vmatpush1.msra.mxu1 %v14051_v56  ;;  %13743 = vmatpush3.msra.mxu0 %v14052_v60  ;;  %v14102_v56 = vld [vmem:[%s18589_s9 + $0x300] sm:$0xff]  ;;  %v14103_v60 = vld [vmem:[%s18589_s9 + $0x310] sm:$0xff] }
 0x901   :  { %7872 = vmatprep.subr.mxu1 %v14053_v61  ;;  %13744 = vmatprep.subr.mxu0 %v14446_v1  ;;  %v14104_v61 = vld [vmem:[%s18589_s9 + $0x2f8] sm:$0xff] }
 0x902   :  { %7873 = vmatpush1.msra.mxu1 %v14054_v62  ;;  %13745 = vmatpush3.msra.mxu0 %v14055_v63  ;;  %v14105_v62 = vld [vmem:[%s18589_s9 + $0x308] sm:$0xff]  ;;  %v14106_v63 = vld [vmem:[%s18589_s9 + $0x2d8] sm:$0xff] }
 0x903   :  { %7874 = vmatprep.subr.mxu1 %v14056_v0  ;;  %13746 = vmatprep.subr.mxu0 %v14446_v1  ;;  %v14107_v0 = vld [vmem:[%s18589_s9 + $0x2e8] sm:$0xff] }
 0x904   :  { %7875 = vmatpush1.msra.mxu1 %v14057_v2  ;;  %13747 = vmatpush3.msra.mxu0 %v14058_v3  ;;  %v14108_v2 = vld [vmem:[%s18589_s9 + $0x2d0] sm:$0xff]  ;;  %v14109_v3 = vld [vmem:[%s18589_s9 + $0x2e0] sm:$0xff] }
 0x905   :  { %7876 = vmatprep.subr.mxu1 %v14059_v4  ;;  %13748 = vmatprep.subr.mxu0 %v14446_v1  ;;  %v14110_v4 = vld [vmem:[%s18589_s9 + $0x2b0] sm:$0xff] }
 0x906   :  { %7877 = vmatpush1.msra.mxu1 %v14060_v6  ;;  %7910 = vmatprep.mubr.f32.mxu1 %v14446_v1  ;;  %v14111_v6 = vld [vmem:[%s18589_s9 + $0x2c0] sm:$0xff] }
 0x907   :  { %13749 = vmatpush3.msra.mxu0 %v14061_v8  ;;  %13750 = vmatprep.mubr.msk.f32.mxu0 %vm14447_vm0, %v14446_v1  ;;  %v14112_v8 = vld [vmem:[%s18589_s9 + $0x2a8] sm:$0xff] }
 0x908   :  { %12422 = vmatmul.mubr.msk.f32.vlgmr.msra.gmra.mxu1 %vm69_vm1, %v7772_v53  ;;  %13751 = vmatmul.mubr.msk.f32.vlgmr.msra.gmra.mxu0 %vm69_vm1, %v7772_v53  ;;  %v14099_v53 = vld [vmem:[%s18589_s9 + $0x1f8] sm:$0xff] }
 0x909   :  { %8060 = vmatprep.subr.mxu1 %v14062_v7  ;;  %8131 = vmatprep.subr.mxu0 %v14063_v27  ;;  %v14113_v7 = vld [vmem:[%s18589_s9 + $0x2b8] sm:$0xff]  ;;  %v14114_v27 = vld [vmem:[%s18589_s9 + $0x288] sm:$0xff] }
 0x90a   :  { %8061 = vmatpush1.msra.mxu1 %v14064_v9  ;;  %8132 = vmatpush1.msra.mxu0 %v14065_v10  ;;  %v14115_v9 = vld [vmem:[%s18589_s9 + $0x298] sm:$0xff]  ;;  %v14116_v10 = vld [vmem:[%s18589_s9 + $0x280] sm:$0xff] }
 0x90b   :  { %8062 = vmatprep.subr.mxu1 %v14066_v11  ;;  %8133 = vmatprep.subr.mxu0 %v14067_v12  ;;  %v8555_v11 = vrot.slane %v17088_v39, 4  ;;  %v14117_v12 = vld [vmem:[%s18589_s9 + $0x290] sm:$0xff] }
 0x90c   :  { %8063 = vmatpush1.msra.mxu1 %v14068_v13  ;;  %8134 = vmatpush1.msra.mxu0 %v14069_v14  ;;  %v14118_v13 = vld [vmem:[%s18589_s9 + $0x3a0] sm:$0xff]  ;;  %v14119_v14 = vld [vmem:[%s18589_s9 + $0x318] sm:$0xff] }
 0x90d   :  { %8064 = vmatprep.subr.mxu1 %v14070_v15  ;;  %8135 = vmatprep.subr.mxu0 %v14071_v16  ;;  %v14120_v15 = vld [vmem:[%s18589_s9 + $0x398] sm:$0xff] }
 0x90e   :  { %8065 = vmatpush1.msra.mxu1 %v14072_v17  ;;  %8136 = vmatpush1.msra.mxu0 %v14073_v18  ;;  %v14121_v16 = vld [vmem:[%s18589_s9 + $0x378] sm:$0xff]  ;;  %v14122_v17 = vld [vmem:[%s18589_s9 + $0x2f0] sm:$0xff] }
 0x90f   :  { %8066 = vmatprep.subr.mxu1 %v14074_v19  ;;  %8137 = vmatprep.subr.mxu0 %v14075_v20  ;;  %v14123_v18 = vld [vmem:[%s18589_s9 + $0x370] sm:$0xff]  ;;  %v14125_v20 = vld [vmem:[%s18589_s9 + $0x2c8] sm:$0xff] }
 0x910   :  { %8067 = vmatpush1.msra.mxu1 %v14076_v21  ;;  %8100 = vmatprep.mubr.f32.mxu1 %v14446_v1  ;;  %v14124_v19 = vld [vmem:[%s18589_s9 + $0x350] sm:$0xff]  ;;  %v14126_v21 = vld [vmem:[%s18589_s9 + $0x348] sm:$0xff] }
 0x911   :  { %8138 = vmatpush1.msra.mxu0 %v14077_v25  ;;  %8171 = vmatprep.mubr.f32.mxu0 %v14446_v1  ;;  %v14128_v25 = vld [vmem:[%s18589_s9 + $0x2a0] sm:$0xff] }
 0x912   :  { %12424 = vmatmul.mubr.msk.f32.vlgmr.msra.gmra.mxu1 %vm69_vm1, %v8033_v24  ;;  %12425 = vmatmul.mubr.msk.f32.vlgmr.msra.gmra.mxu0 %vm69_vm1, %v8033_v24 }
 0x913   :  { %13753 = vmatprep.subr.mxu1 %v14446_v1  ;;  %8321 = vmatprep.subr.mxu0 %v14078_v26  ;;  %v8816_v26 = vrot.slane %v17088_v39, 5 }
 0x914   :  { %13754 = vmatpush3.msra.mxu1 %v14079_v28  ;;  %8322 = vmatpush1.msra.mxu0 %v14080_v29  ;;  %v14129_v28 = vld [vmem:[%s18589_s9 + $0x320] sm:$0xff]  ;;  %v14130_v29 = vld [vmem:[%s18589_s9 + $0x3b0] sm:$0xff] }
 0x915   :  { %13755 = vmatprep.subr.mxu1 %v14446_v1  ;;  %8323 = vmatprep.subr.mxu0 %v14081_v30  ;;  %v14131_v30 = vld [vmem:[%s18589_s9 + $0x3a8] sm:$0xff] }
 0x916   :  { %13756 = vmatpush3.msra.mxu1 %v14082_v31  ;;  %8324 = vmatpush1.msra.mxu0 %v14083_v32  ;;  %v14132_v31 = vld [vmem:[%s18589_s9 + $0x3b8] sm:$0xff]  ;;  %v14133_v32 = vld [vmem:[%s18589_s9 + $0x388] sm:$0xff] }
 0x917   :  { %13757 = vmatprep.subr.mxu1 %v14446_v1  ;;  %8325 = vmatprep.subr.mxu0 %v14084_v33  ;;  %v14134_v33 = vld [vmem:[%s18589_s9 + $0x380] sm:$0xff] }
 0x918   :  { %13758 = vmatpush3.msra.mxu1 %v14085_v34  ;;  %8326 = vmatpush1.msra.mxu0 %v14086_v35  ;;  %v14135_v34 = vld [vmem:[%s18589_s9 + $0x390] sm:$0xff]  ;;  %v14136_v35 = vld [vmem:[%s18589_s9 + $0x360] sm:$0xff] }
 0x919   :  { %13759 = vmatprep.subr.mxu1 %v14446_v1  ;;  %8327 = vmatprep.subr.mxu0 %v14087_v36  ;;  %v14137_v36 = vld [vmem:[%s18589_s9 + $0x358] sm:$0xff] }
 0x91a   :  { %13760 = vmatpush3.msra.mxu1 %v14088_v38  ;;  %13761 = vmatprep.mubr.msk.f32.mxu1 %vm14447_vm0, %v14446_v1  ;;  %v14138_v38 = vld [vmem:[%s18589_s9 + $0x368] sm:$0xff] }
 0x91b   :  { %8328 = vmatpush1.msra.mxu0 %v14089_v43  ;;  %8361 = vmatprep.mubr.f32.mxu0 %v14446_v1  ;;  %v14140_v43 = vld [vmem:[%s18589_s9 + $0x330] sm:$0xff] }
 0x91c   :  { %13762 = vmatmul.mubr.msk.f32.vlgmr.msra.gmra.mxu1 %vm69_vm1, %v8033_v24  ;;  %12427 = vmatmul.mubr.msk.f32.vlgmr.msra.gmra.mxu0 %vm69_vm1, %v8294_v40  ;;  %v14127_v24 = vld [vmem:[%s18589_s9 + $0x328] sm:$0xff] }
 0x91d   :  { %8392 = vmatprep.subr.mxu1 %v14090_v22  ;;  %13764 = vmatprep.subr.mxu0 %v14446_v1  ;;  %v14141_v22 = vld [vmem:[%s18589_s9 + $0x340] sm:$0xff] }
 0x91e   :  { %8393 = vmatpush1.msra.mxu1 %v14091_v44  ;;  %13765 = vmatpush3.msra.mxu0 %v14092_v45  ;;  %v14142_v44 = vld [vmem:[%s18589_s9 + $0x440] sm:$0xff]  ;;  %v14143_v45 = vld [vmem:[%s18589_s9 + $0x450] sm:$0xff] }
 0x91f   :  { %8394 = vmatprep.subr.mxu1 %v14093_v46  ;;  %13766 = vmatprep.subr.mxu0 %v14446_v1  ;;  %v14144_v46 = vld [vmem:[%s18589_s9 + $0x438] sm:$0xff] }
 0x920   :  { %8395 = vmatpush1.msra.mxu1 %v14094_v47  ;;  %13767 = vmatpush3.msra.mxu0 %v14095_v48  ;;  %v14145_v47 = vld [vmem:[%s18589_s9 + $0x448] sm:$0xff]  ;;  %v14146_v48 = vld [vmem:[%s18589_s9 + $0x418] sm:$0xff] }
 0x921   :  { %8396 = vmatprep.subr.mxu1 %v14096_v50  ;;  %13768 = vmatprep.subr.mxu0 %v14446_v1  ;;  %v14147_v50 = vld [vmem:[%s18589_s9 + $0x428] sm:$0xff] }
 0x922   :  { %8397 = vmatpush1.msra.mxu1 %v14097_v51  ;;  %13769 = vmatpush3.msra.mxu0 %v14098_v52  ;;  %v14148_v51 = vld [vmem:[%s18589_s9 + $0x410] sm:$0xff]  ;;  %v14149_v52 = vld [vmem:[%s18589_s9 + $0x420] sm:$0xff] }
 0x923   :  { %8398 = vmatprep.subr.mxu1 %v14099_v53  ;;  %13770 = vmatprep.subr.mxu0 %v14446_v1  ;;  %v14150_v53 = vld [vmem:[%s18589_s9 + $0x3f0] sm:$0xff] }
 0x924   :  { %8399 = vmatpush1.msra.mxu1 %v14100_v54  ;;  %8432 = vmatprep.mubr.f32.mxu1 %v14446_v1  ;;  %v14151_v54 = vld [vmem:[%s18589_s9 + $0x400] sm:$0xff] }
 0x925   :  { %13771 = vmatpush3.msra.mxu0 %v14101_v55  ;;  %13772 = vmatprep.mubr.msk.f32.mxu0 %vm14447_vm0, %v14446_v1  ;;  %v14152_v55 = vld [vmem:[%s18589_s9 + $0x3e8] sm:$0xff] }
 0x926   :  { %12428 = vmatmul.mubr.msk.f32.vlgmr.msra.gmra.mxu1 %vm69_vm1, %v8294_v40  ;;  %13773 = vmatmul.mubr.msk.f32.vlgmr.msra.gmra.mxu0 %vm69_vm1, %v8294_v40  ;;  %v14139_v40 = vld [vmem:[%s18589_s9 + $0x338] sm:$0xff] }
 0x927   :  { %8582 = vmatprep.subr.mxu1 %v14102_v56  ;;  %8653 = vmatprep.subr.mxu0 %v14103_v60  ;;  %v14153_v56 = vld [vmem:[%s18589_s9 + $0x3f8] sm:$0xff]  ;;  %v14154_v60 = vld [vmem:[%s18589_s9 + $0x3c8] sm:$0xff] }
 0x928   :  { %8583 = vmatpush1.msra.mxu1 %v14104_v61  ;;  %8654 = vmatpush1.msra.mxu0 %v14105_v62  ;;  %v14155_v61 = vld [vmem:[%s18589_s9 + $0x3d8] sm:$0xff]  ;;  %v14156_v62 = vld [vmem:[%s18589_s9 + $0x3c0] sm:$0xff] }
 0x929   :  { %8584 = vmatprep.subr.mxu1 %v14106_v63  ;;  %8655 = vmatprep.subr.mxu0 %v14107_v0  ;;  %v9077_v63 = vrot.slane %v17088_v39, 6  ;;  %v14157_v0 = vld [vmem:[%s18589_s9 + $0x3d0] sm:$0xff] }
 0x92a   :  { %8585 = vmatpush1.msra.mxu1 %v14108_v2  ;;  %8656 = vmatpush1.msra.mxu0 %v14109_v3  ;;  %v14158_v2 = vld [vmem:[%s18589_s9 + $0x4e0] sm:$0xff]  ;;  %v14159_v3 = vld [vmem:[%s18589_s9 + $0x458] sm:$0xff] }
 0x92b   :  { %8586 = vmatprep.subr.mxu1 %v14110_v4  ;;  %8657 = vmatprep.subr.mxu0 %v14111_v6  ;;  %v14160_v4 = vld [vmem:[%s18589_s9 + $0x4d8] sm:$0xff] }
 0x92c   :  { %8587 = vmatpush1.msra.mxu1 %v14112_v8  ;;  %8658 = vmatpush1.msra.mxu0 %v14113_v7  ;;  %v14161_v6 = vld [vmem:[%s18589_s9 + $0x4b8] sm:$0xff]  ;;  %v14162_v8 = vld [vmem:[%s18589_s9 + $0x430] sm:$0xff] }
 0x92d   :  { %8588 = vmatprep.subr.mxu1 %v14114_v27  ;;  %8659 = vmatprep.subr.mxu0 %v14115_v9  ;;  %v14163_v7 = vld [vmem:[%s18589_s9 + $0x4b0] sm:$0xff]  ;;  %v14165_v9 = vld [vmem:[%s18589_s9 + $0x408] sm:$0xff] }
 0x92e   :  { %8589 = vmatpush1.msra.mxu1 %v14116_v10  ;;  %8622 = vmatprep.mubr.f32.mxu1 %v14446_v1  ;;  %v14164_v27 = vld [vmem:[%s18589_s9 + $0x490] sm:$0xff]  ;;  %v14166_v10 = vld [vmem:[%s18589_s9 + $0x488] sm:$0xff] }
 0x92f   :  { %8660 = vmatpush1.msra.mxu0 %v14117_v12  ;;  %8693 = vmatprep.mubr.f32.mxu0 %v14446_v1  ;;  %v14168_v12 = vld [vmem:[%s18589_s9 + $0x3e0] sm:$0xff] }
 0x930   :  { %12430 = vmatmul.mubr.msk.f32.vlgmr.msra.gmra.mxu1 %vm69_vm1, %v8555_v11  ;;  %12431 = vmatmul.mubr.msk.f32.vlgmr.msra.gmra.mxu0 %vm69_vm1, %v8555_v11 }
 0x931   :  { %13775 = vmatprep.subr.mxu1 %v14446_v1  ;;  %8843 = vmatprep.subr.mxu0 %v14118_v13  ;;  %v9338_v13 = vrot.slane %v17088_v39, 7  ;;  %v14171_v39 = vld [vmem:[%s18589_s9 + $0x4e8] sm:$0xff] }
 0x932   :  { %13776 = vmatpush3.msra.mxu1 %v14119_v14  ;;  %8844 = vmatpush1.msra.mxu0 %v14120_v15  ;;  %v14169_v14 = vld [vmem:[%s18589_s9 + $0x460] sm:$0xff]  ;;  %v14170_v15 = vld [vmem:[%s18589_s9 + $0x4f0] sm:$0xff] }
 0x933   :  { %13777 = vmatprep.subr.mxu1 %v14446_v1  ;;  %8845 = vmatprep.subr.mxu0 %v14121_v16  ;;  %v14172_v16 = vld [vmem:[%s18589_s9 + $0x4f8] sm:$0xff] }
 0x934   :  { %13778 = vmatpush3.msra.mxu1 %v14122_v17  ;;  %8846 = vmatpush1.msra.mxu0 %v14123_v18  ;;  %v14173_v17 = vld [vmem:[%s18589_s9 + $0x4c8] sm:$0xff]  ;;  %v14174_v18 = vld [vmem:[%s18589_s9 + $0x4c0] sm:$0xff] }
 0x935   :  { %13779 = vmatprep.subr.mxu1 %v14446_v1  ;;  %8847 = vmatprep.subr.mxu0 %v14124_v19  ;;  %v14175_v19 = vld [vmem:[%s18589_s9 + $0x4d0] sm:$0xff] }
 0x936   :  { %13780 = vmatpush3.msra.mxu1 %v14125_v20  ;;  %8848 = vmatpush1.msra.mxu0 %v14126_v21  ;;  %v14176_v20 = vld [vmem:[%s18589_s9 + $0x4a0] sm:$0xff]  ;;  %v14177_v21 = vld [vmem:[%s18589_s9 + $0x498] sm:$0xff] }
 0x937   :  { %13781 = vmatprep.subr.mxu1 %v14446_v1  ;;  %8849 = vmatprep.subr.mxu0 %v14127_v24  ;;  %v14178_v24 = vld [vmem:[%s18589_s9 + $0x4a8] sm:$0xff] }
 0x938   :  { %13782 = vmatpush3.msra.mxu1 %v14128_v25  ;;  %13783 = vmatprep.mubr.msk.f32.mxu1 %vm14447_vm0, %v14446_v1  ;;  %v14179_v25 = vld [vmem:[%s18589_s9 + $0x478] sm:$0xff] }
 0x939   :  { %8850 = vmatpush1.msra.mxu0 %v14129_v28  ;;  %8883 = vmatprep.mubr.f32.mxu0 %v14446_v1  ;;  %v14181_v28 = vld [vmem:[%s18589_s9 + $0x480] sm:$0xff] }
 0x93a   :  { %13784 = vmatmul.mubr.msk.f32.vlgmr.msra.gmra.mxu1 %vm69_vm1, %v8555_v11  ;;  %12433 = vmatmul.mubr.msk.f32.vlgmr.msra.gmra.mxu0 %vm69_vm1, %v8816_v26  ;;  %v14167_v11 = vld [vmem:[%s18589_s9 + $0x468] sm:$0xff] }
 0x93b   :  { %8914 = vmatprep.subr.mxu1 %v14130_v29  ;;  %13786 = vmatprep.subr.mxu0 %v14446_v1  ;;  %v14182_v29 = vld [vmem:[%s18589_s9 + $0x580] sm:$0xff] }
 0x93c   :  { %8915 = vmatpush1.msra.mxu1 %v14131_v30  ;;  %13787 = vmatpush3.msra.mxu0 %v14132_v31  ;;  %v14183_v30 = vld [vmem:[%s18589_s9 + $0x590] sm:$0xff]  ;;  %v14184_v31 = vld [vmem:[%s18589_s9 + $0x578] sm:$0xff] }
 0x93d   :  { %8916 = vmatprep.subr.mxu1 %v14133_v32  ;;  %13788 = vmatprep.subr.mxu0 %v14446_v1  ;;  %v14185_v32 = vld [vmem:[%s18589_s9 + $0x588] sm:$0xff] }
 0x93e   :  { %8917 = vmatpush1.msra.mxu1 %v14134_v33  ;;  %13789 = vmatpush3.msra.mxu0 %v14135_v34  ;;  %v14186_v33 = vld [vmem:[%s18589_s9 + $0x558] sm:$0xff]  ;;  %v14187_v34 = vld [vmem:[%s18589_s9 + $0x568] sm:$0xff] }
 0x93f   :  { %8918 = vmatprep.subr.mxu1 %v14136_v35  ;;  %13790 = vmatprep.subr.mxu0 %v14446_v1  ;;  %v14188_v35 = vld [vmem:[%s18589_s9 + $0x550] sm:$0xff] }
 0x940   :  { %8919 = vmatpush1.msra.mxu1 %v14137_v36  ;;  %13791 = vmatpush3.msra.mxu0 %v14138_v38  ;;  %v14189_v36 = vld [vmem:[%s18589_s9 + $0x560] sm:$0xff]  ;;  %v14190_v38 = vld [vmem:[%s18589_s9 + $0x530] sm:$0xff] }
 0x941   :  { %8920 = vmatprep.subr.mxu1 %v14139_v40  ;;  %13792 = vmatprep.subr.mxu0 %v14446_v1  ;;  %v14191_v40 = vld [vmem:[%s18589_s9 + $0x540] sm:$0xff] }
 0x942   :  { %8921 = vmatpush1.msra.mxu1 %v14140_v43  ;;  %8954 = vmatprep.mubr.f32.mxu1 %v14446_v1  ;;  %v14192_v43 = vld [vmem:[%s18589_s9 + $0x528] sm:$0xff] }
 0x943   :  { %13793 = vmatpush3.msra.mxu0 %v14141_v22  ;;  %13794 = vmatprep.mubr.msk.f32.mxu0 %vm14447_vm0, %v14446_v1  ;;  %v14193_v22 = vld [vmem:[%s18589_s9 + $0x538] sm:$0xff] }
 0x944   :  { %12434 = vmatmul.mubr.msk.f32.vlgmr.msra.gmra.mxu1 %vm69_vm1, %v8816_v26  ;;  %13795 = vmatmul.mubr.msk.f32.vlgmr.msra.gmra.mxu0 %vm69_vm1, %v8816_v26  ;;  %v14180_v26 = vld [vmem:[%s18589_s9 + $0x470] sm:$0xff] }
 0x945   :  { %9104 = vmatprep.subr.mxu1 %v14142_v44  ;;  %9175 = vmatprep.subr.mxu0 %v14143_v45  ;;  %v14194_v44 = vld [vmem:[%s18589_s9 + $0x508] sm:$0xff]  ;;  %v14195_v45 = vld [vmem:[%s18589_s9 + $0x518] sm:$0xff] }
 0x946   :  { %9105 = vmatpush1.msra.mxu1 %v14144_v46  ;;  %9176 = vmatpush1.msra.mxu0 %v14145_v47  ;;  %v17659_v46 = vmul.f32 0.33333334, %v17090_v42  ;;  %v14196_v47 = vld [vmem:[%s18589_s9 + $0x500] sm:$0xff] }
 0x947   :  { %9106 = vmatprep.subr.mxu1 %v14146_v48  ;;  %9177 = vmatprep.subr.mxu0 %v14147_v50  ;;  %v14197_v48 = vld [vmem:[%s18589_s9 + $0x510] sm:$0xff]  ;;  %v14198_v42 = vld [vmem:[%s18589_s9 + $0x620] sm:$0xff]  ;;  %v14199_v50 = vld [vmem:[%s18589_s9 + $0x598] sm:$0xff] }
 0x948   :  { %9107 = vmatpush1.msra.mxu1 %v14148_v51  ;;  %9178 = vmatpush1.msra.mxu0 %v14149_v52  ;;  %v14200_v51 = vld [vmem:[%s18589_s9 + $0x618] sm:$0xff] }
 0x949   :  { %9108 = vmatprep.subr.mxu1 %v14150_v53  ;;  %9179 = vmatprep.subr.mxu0 %v14151_v54  ;;  %v14201_v52 = vld [vmem:[%s18589_s9 + $0x5f8] sm:$0xff]  ;;  %v14202_v53 = vld [vmem:[%s18589_s9 + $0x570] sm:$0xff] }
 0x94a   :  { %9109 = vmatpush1.msra.mxu1 %v14152_v55  ;;  %9180 = vmatpush1.msra.mxu0 %v14153_v56  ;;  %v14203_v54 = vld [vmem:[%s18589_s9 + $0x5f0] sm:$0xff]  ;;  %v14205_v56 = vld [vmem:[%s18589_s9 + $0x548] sm:$0xff] }
 0x94b   :  { %9110 = vmatprep.subr.mxu1 %v14154_v60  ;;  %9181 = vmatprep.subr.mxu0 %v14155_v61  ;;  %v14204_v55 = vld [vmem:[%s18589_s9 + $0x5d0] sm:$0xff]  ;;  %v14206_v60 = vld [vmem:[%s18589_s9 + $0x5c8] sm:$0xff] }
 0x94c   :  { %9111 = vmatpush1.msra.mxu1 %v14156_v62  ;;  %9144 = vmatprep.mubr.f32.mxu1 %v14446_v1  ;;  %v14207_v61 = vld [vmem:[%s18589_s9 + $0x5a8] sm:$0xff]  ;;  %v14208_v62 = vld [vmem:[%s18589_s9 + $0x520] sm:$0xff] }
 0x94d   :  { %9182 = vmatpush1.msra.mxu0 %v14157_v0  ;;  %9215 = vmatprep.mubr.f32.mxu0 %v14446_v1  ;;  %v14209_v0 = vld [vmem:[%s18589_s9 + $0x5a0] sm:$0xff] }
 0x94e   :  { %12436 = vmatmul.mubr.msk.f32.vlgmr.msra.gmra.mxu1 %vm69_vm1, %v9077_v63  ;;  %12437 = vmatmul.mubr.msk.f32.vlgmr.msra.gmra.mxu0 %vm69_vm1, %v9077_v63 }
 0x94f   :  { %13797 = vmatprep.subr.mxu1 %v14446_v1  ;;  %9365 = vmatprep.subr.mxu0 %v14158_v2  ;;  %v14210_v2 = vld [vmem:[%s18589_s9 + $0x630] sm:$0xff] }
 0x950   :  { %13798 = vmatpush3.msra.mxu1 %v14159_v3  ;;  %9366 = vmatpush1.msra.mxu0 %v14160_v4  ;;  %v14211_v3 = vld [vmem:[%s18589_s9 + $0x628] sm:$0xff]  ;;  %v14212_v4 = vld [vmem:[%s18589_s9 + $0x638] sm:$0xff] }
 0x951   :  { %13799 = vmatprep.subr.mxu1 %v14446_v1  ;;  %9367 = vmatprep.subr.mxu0 %v14161_v6  ;;  %v14213_v6 = vld [vmem:[%s18589_s9 + $0x608] sm:$0xff] }
 0x952   :  { %13800 = vmatpush3.msra.mxu1 %v14162_v8  ;;  %9368 = vmatpush1.msra.mxu0 %v14163_v7  ;;  %v14214_v8 = vld [vmem:[%s18589_s9 + $0x600] sm:$0xff]  ;;  %v14215_v7 = vld [vmem:[%s18589_s9 + $0x610] sm:$0xff] }
 0x953   :  { %13801 = vmatprep.subr.mxu1 %v14446_v1  ;;  %9369 = vmatprep.subr.mxu0 %v14164_v27  ;;  %v14216_v27 = vld [vmem:[%s18589_s9 + $0x5e0] sm:$0xff] }
 0x954   :  { %13802 = vmatpush3.msra.mxu1 %v14165_v9  ;;  %9370 = vmatpush1.msra.mxu0 %v14166_v10  ;;  %v14217_v9 = vld [vmem:[%s18589_s9 + $0x5d8] sm:$0xff]  ;;  %v14218_v10 = vld [vmem:[%s18589_s9 + $0x5e8] sm:$0xff] }
 0x955   :  { %13803 = vmatprep.subr.mxu1 %v14446_v1  ;;  %9371 = vmatprep.subr.mxu0 %v14167_v11  ;;  %v14219_v11 = vld [vmem:[%s18589_s9 + $0x5b8] sm:$0xff] }
 0x956   :  { %13804 = vmatpush3.msra.mxu1 %v14168_v12  ;;  %13805 = vmatprep.mubr.msk.f32.mxu1 %vm14447_vm0, %v14446_v1  ;;  %v14220_v12 = vld [vmem:[%s18589_s9 + $0x5b0] sm:$0xff] }
 0x957   :  { %9372 = vmatpush1.msra.mxu0 %v14169_v14  ;;  %9405 = vmatprep.mubr.f32.mxu0 %v14446_v1  ;;  %v14222_v14 = vld [vmem:[%s18589_s9 + $0x6c0] sm:$0xff] }
 0x958   :  { %13806 = vmatmul.mubr.msk.f32.vlgmr.msra.gmra.mxu1 %vm69_vm1, %v9077_v63  ;;  %12439 = vmatmul.mubr.msk.f32.vlgmr.msra.gmra.mxu0 %vm69_vm1, %v9338_v13  ;;  %v9860_v63 = vrot.slane %v17659_v46, 1 }
 0x959   :  { %9436 = vmatprep.subr.mxu1 %v14170_v15  ;;  %13808 = vmatprep.subr.mxu0 %v14446_v1  ;;  %v14223_v15 = vld [vmem:[%s18589_s9 + $0x6d0] sm:$0xff] }
 0x95a   :  { %9437 = vmatpush1.msra.mxu1 %v14171_v39  ;;  %13809 = vmatpush3.msra.mxu0 %v14172_v16  ;;  %v14224_v39 = vld [vmem:[%s18589_s9 + $0x6b8] sm:$0xff]  ;;  %v14225_v16 = vld [vmem:[%s18589_s9 + $0x6c8] sm:$0xff] }
 0x95b   :  { %9438 = vmatprep.subr.mxu1 %v14173_v17  ;;  %13810 = vmatprep.subr.mxu0 %v14446_v1  ;;  %v14226_v17 = vld [vmem:[%s18589_s9 + $0x698] sm:$0xff] }
 0x95c   :  { %9439 = vmatpush1.msra.mxu1 %v14174_v18  ;;  %13811 = vmatpush3.msra.mxu0 %v14175_v19  ;;  %v14227_v18 = vld [vmem:[%s18589_s9 + $0x6a8] sm:$0xff]  ;;  %v14228_v19 = vld [vmem:[%s18589_s9 + $0x690] sm:$0xff] }
 0x95d   :  { %9440 = vmatprep.subr.mxu1 %v14176_v20  ;;  %13812 = vmatprep.subr.mxu0 %v14446_v1  ;;  %v14229_v20 = vld [vmem:[%s18589_s9 + $0x6a0] sm:$0xff] }
 0x95e   :  { %9441 = vmatpush1.msra.mxu1 %v14177_v21  ;;  %13813 = vmatpush3.msra.mxu0 %v14178_v24  ;;  %v14230_v21 = vld [vmem:[%s18589_s9 + $0x670] sm:$0xff]  ;;  %v14231_v24 = vld [vmem:[%s18589_s9 + $0x680] sm:$0xff] }
 0x95f   :  { %9442 = vmatprep.subr.mxu1 %v14179_v25  ;;  %13814 = vmatprep.subr.mxu0 %v14446_v1  ;;  %v14232_v25 = vld [vmem:[%s18589_s9 + $0x668] sm:$0xff] }
 0x960   :  { %9443 = vmatpush1.msra.mxu1 %v14180_v26  ;;  %9476 = vmatprep.mubr.f32.mxu1 %v14446_v1  ;;  %v14233_v26 = vld [vmem:[%s18589_s9 + $0x678] sm:$0xff] }
 0x961   :  { %13815 = vmatpush3.msra.mxu0 %v14181_v28  ;;  %13816 = vmatprep.mubr.msk.f32.mxu0 %vm14447_vm0, %v14446_v1  ;;  %v14234_v28 = vld [vmem:[%s18589_s9 + $0x648] sm:$0xff] }
 0x962   :  { %12440 = vmatmul.mubr.msk.f32.vlgmr.msra.gmra.mxu1 %vm69_vm1, %v9338_v13  ;;  %13817 = vmatmul.mubr.msk.f32.vlgmr.msra.gmra.mxu0 %vm69_vm1, %v9338_v13  ;;  %v14221_v13 = vld [vmem:[%s18589_s9 + $0x5c0] sm:$0xff] }
 0x963   :  { %9626 = vmatprep.subr.mxu1 %v14182_v29  ;;  %9697 = vmatprep.subr.mxu0 %v14183_v30  ;;  %v14235_v29 = vld [vmem:[%s18589_s9 + $0x658] sm:$0xff]  ;;  %v14236_v30 = vld [vmem:[%s18589_s9 + $0x640] sm:$0xff] }
 0x964   :  { %9627 = vmatpush1.msra.mxu1 %v14184_v31  ;;  %9698 = vmatpush1.msra.mxu0 %v14185_v32  ;;  %v10121_v31 = vrot.slane %v17659_v46, 2  ;;  %v14237_v32 = vld [vmem:[%s18589_s9 + $0x650] sm:$0xff] }
 0x965   :  { %9628 = vmatprep.subr.mxu1 %v14186_v33  ;;  %9699 = vmatprep.subr.mxu0 %v14187_v34  ;;  %v14238_v33 = vld [vmem:[%s18589_s9 + $0x760] sm:$0xff]  ;;  %v14239_v34 = vld [vmem:[%s18589_s9 + $0x6d8] sm:$0xff] }
 0x966   :  { %9629 = vmatpush1.msra.mxu1 %v14188_v35  ;;  %9700 = vmatpush1.msra.mxu0 %v14189_v36  ;;  %v14240_v35 = vld [vmem:[%s18589_s9 + $0x758] sm:$0xff] }
 0x967   :  { %9630 = vmatprep.subr.mxu1 %v14190_v38  ;;  %9701 = vmatprep.subr.mxu0 %v14191_v40  ;;  %v14241_v36 = vld [vmem:[%s18589_s9 + $0x738] sm:$0xff]  ;;  %v14242_v38 = vld [vmem:[%s18589_s9 + $0x6b0] sm:$0xff] }
 0x968   :  { %9631 = vmatpush1.msra.mxu1 %v14192_v43  ;;  %9702 = vmatpush1.msra.mxu0 %v14193_v22  ;;  %v14243_v40 = vld [vmem:[%s18589_s9 + $0x730] sm:$0xff]  ;;  %v14245_v22 = vld [vmem:[%s18589_s9 + $0x688] sm:$0xff] }
 0x969   :  { %9632 = vmatprep.subr.mxu1 %v14194_v44  ;;  %9703 = vmatprep.subr.mxu0 %v14195_v45  ;;  %v14244_v43 = vld [vmem:[%s18589_s9 + $0x710] sm:$0xff]  ;;  %v14246_v44 = vld [vmem:[%s18589_s9 + $0x708] sm:$0xff] }
 0x96a   :  { %9633 = vmatpush1.msra.mxu1 %v14196_v47  ;;  %9666 = vmatprep.mubr.f32.mxu1 %v14446_v1  ;;  %v14247_v45 = vld [vmem:[%s18589_s9 + $0x6e8] sm:$0xff]  ;;  %v14248_v47 = vld [vmem:[%s18589_s9 + $0x660] sm:$0xff] }
 0x96b   :  { %9704 = vmatpush1.msra.mxu0 %v14197_v48  ;;  %9737 = vmatprep.mubr.f32.mxu0 %v14446_v1  ;;  %v10382_v48 = vrot.slane %v17659_v46, 3 }
 0x96c   :  { %12442 = vmatmul.mubr.msk.f32.vlgmr.msra.gmra.mxu1 %vm69_vm1, %v17659_v46  ;;  %12443 = vmatmul.mubr.msk.f32.vlgmr.msra.gmra.mxu0 %vm69_vm1, %v17659_v46 }
 0x96d   :  { %13819 = vmatprep.subr.mxu1 %v14446_v1  ;;  %9887 = vmatprep.subr.mxu0 %v14198_v42  ;;  %v14249_v42 = vld [vmem:[%s18589_s9 + $0x6e0] sm:$0xff] }
 0x96e   :  { %13820 = vmatpush3.msra.mxu1 %v14199_v50  ;;  %9888 = vmatpush1.msra.mxu0 %v14200_v51  ;;  %v14250_v50 = vld [vmem:[%s18589_s9 + $0x770] sm:$0xff]  ;;  %v14251_v51 = vld [vmem:[%s18589_s9 + $0x768] sm:$0xff] }
 0x96f   :  { %13821 = vmatprep.subr.mxu1 %v14446_v1  ;;  %9889 = vmatprep.subr.mxu0 %v14201_v52  ;;  %v14252_v52 = vld [vmem:[%s18589_s9 + $0x778] sm:$0xff] }
 0x970   :  { %13822 = vmatpush3.msra.mxu1 %v14202_v53  ;;  %9890 = vmatpush1.msra.mxu0 %v14203_v54  ;;  %v14253_v53 = vld [vmem:[%s18589_s9 + $0x748] sm:$0xff]  ;;  %v14254_v54 = vld [vmem:[%s18589_s9 + $0x740] sm:$0xff] }
 0x971   :  { %13823 = vmatprep.subr.mxu1 %v14446_v1  ;;  %9891 = vmatprep.subr.mxu0 %v14204_v55  ;;  %v14255_v55 = vld [vmem:[%s18589_s9 + $0x750] sm:$0xff] }
 0x972   :  { %13824 = vmatpush3.msra.mxu1 %v14205_v56  ;;  %9892 = vmatpush1.msra.mxu0 %v14206_v60  ;;  %v14256_v56 = vld [vmem:[%s18589_s9 + $0x720] sm:$0xff]  ;;  %v14257_v60 = vld [vmem:[%s18589_s9 + $0x718] sm:$0xff] }
 0x973   :  { %13825 = vmatprep.subr.mxu1 %v14446_v1  ;;  %9893 = vmatprep.subr.mxu0 %v14207_v61  ;;  %v14258_v61 = vld [vmem:[%s18589_s9 + $0x728] sm:$0xff] }
 0x974   :  { %13826 = vmatpush3.msra.mxu1 %v14208_v62  ;;  %13827 = vmatprep.mubr.msk.f32.mxu1 %vm14447_vm0, %v14446_v1  ;;  %v14259_v62 = vld [vmem:[%s18589_s9 + $0x6f8] sm:$0xff] }
 0x975   :  { %9894 = vmatpush1.msra.mxu0 %v14209_v0  ;;  %9927 = vmatprep.mubr.f32.mxu0 %v14446_v1  ;;  %v14261_v0 = vld [vmem:[%s18589_s9 + $0x700] sm:$0xff] }
 0x976   :  { %13828 = vmatmul.mubr.msk.f32.vlgmr.msra.gmra.mxu1 %vm69_vm1, %v17659_v46  ;;  %12445 = vmatmul.mubr.msk.f32.vlgmr.msra.gmra.mxu0 %vm69_vm1, %v9860_v63 }
 0x977   :  { %9958 = vmatprep.subr.mxu1 %v14210_v2  ;;  %13830 = vmatprep.subr.mxu0 %v14446_v1  ;;  %v14262_v2 = vld [vmem:[%s18589_s9 + $0x800] sm:$0xff] }
 0x978   :  { %9959 = vmatpush1.msra.mxu1 %v14211_v3  ;;  %13831 = vmatpush3.msra.mxu0 %v14212_v4  ;;  %v14263_v3 = vld [vmem:[%s18589_s9 + $0x810] sm:$0xff]  ;;  %v14264_v4 = vld [vmem:[%s18589_s9 + $0x7f8] sm:$0xff] }
 0x979   :  { %9960 = vmatprep.subr.mxu1 %v14213_v6  ;;  %13832 = vmatprep.subr.mxu0 %v14446_v1  ;;  %v14265_v6 = vld [vmem:[%s18589_s9 + $0x808] sm:$0xff] }
 0x97a   :  { %9961 = vmatpush1.msra.mxu1 %v14214_v8  ;;  %13833 = vmatpush3.msra.mxu0 %v14215_v7  ;;  %v14266_v8 = vld [vmem:[%s18589_s9 + $0x7d8] sm:$0xff]  ;;  %v14267_v7 = vld [vmem:[%s18589_s9 + $0x7e8] sm:$0xff] }
 0x97b   :  { %9962 = vmatprep.subr.mxu1 %v14216_v27  ;;  %13834 = vmatprep.subr.mxu0 %v14446_v1  ;;  %v14268_v27 = vld [vmem:[%s18589_s9 + $0x7d0] sm:$0xff] }
 0x97c   :  { %9963 = vmatpush1.msra.mxu1 %v14217_v9  ;;  %13835 = vmatpush3.msra.mxu0 %v14218_v10  ;;  %v14269_v9 = vld [vmem:[%s18589_s9 + $0x7e0] sm:$0xff]  ;;  %v14270_v10 = vld [vmem:[%s18589_s9 + $0x7b0] sm:$0xff] }
 0x97d   :  { %9964 = vmatprep.subr.mxu1 %v14219_v11  ;;  %13836 = vmatprep.subr.mxu0 %v14446_v1  ;;  %v14271_v11 = vld [vmem:[%s18589_s9 + $0x7c0] sm:$0xff] }
 0x97e   :  { %9965 = vmatpush1.msra.mxu1 %v14220_v12  ;;  %9998 = vmatprep.mubr.f32.mxu1 %v14446_v1  ;;  %v14272_v12 = vld [vmem:[%s18589_s9 + $0x7a8] sm:$0xff] }
 0x97f   :  { %13837 = vmatpush3.msra.mxu0 %v14221_v13  ;;  %13838 = vmatprep.mubr.msk.f32.mxu0 %vm14447_vm0, %v14446_v1  ;;  %v14273_v13 = vld [vmem:[%s18589_s9 + $0x7b8] sm:$0xff] }
 0x980   :  { %12446 = vmatmul.mubr.msk.f32.vlgmr.msra.gmra.mxu1 %vm69_vm1, %v9860_v63  ;;  %13839 = vmatmul.mubr.msk.f32.vlgmr.msra.gmra.mxu0 %vm69_vm1, %v9860_v63  ;;  %v14260_v63 = vld [vmem:[%s18589_s9 + $0x6f0] sm:$0xff] }
 0x981   :  { %10148 = vmatprep.subr.mxu1 %v14222_v14  ;;  %10219 = vmatprep.subr.mxu0 %v14223_v15  ;;  %v14274_v14 = vld [vmem:[%s18589_s9 + $0x788] sm:$0xff]  ;;  %v14275_v15 = vld [vmem:[%s18589_s9 + $0x798] sm:$0xff] }
 0x982   :  { %10149 = vmatpush1.msra.mxu1 %v14224_v39  ;;  %10220 = vmatpush1.msra.mxu0 %v14225_v16  ;;  %v14276_v39 = vld [vmem:[%s18589_s9 + $0x780] sm:$0xff]  ;;  %v10643_v16 = vrot.slane %v17659_v46, 4 }
 0x983   :  { %10150 = vmatprep.subr.mxu1 %v14226_v17  ;;  %10221 = vmatprep.subr.mxu0 %v14227_v18  ;;  %v14277_v17 = vld [vmem:[%s18589_s9 + $0x790] sm:$0xff]  ;;  %v14278_v18 = vld [vmem:[%s18589_s9 + $0x8a0] sm:$0xff] }
 0x984   :  { %10151 = vmatpush1.msra.mxu1 %v14228_v19  ;;  %10222 = vmatpush1.msra.mxu0 %v14229_v20  ;;  %v14279_v19 = vld [vmem:[%s18589_s9 + $0x818] sm:$0xff] }
 0x985   :  { %10152 = vmatprep.subr.mxu1 %v14230_v21  ;;  %10223 = vmatprep.subr.mxu0 %v14231_v24  ;;  %v14280_v20 = vld [vmem:[%s18589_s9 + $0x898] sm:$0xff]  ;;  %v14282_v24 = vld [vmem:[%s18589_s9 + $0x7f0] sm:$0xff] }
 0x986   :  { %10153 = vmatpush1.msra.mxu1 %v14232_v25  ;;  %10224 = vmatpush1.msra.mxu0 %v14233_v26  ;;  %v14281_v21 = vld [vmem:[%s18589_s9 + $0x878] sm:$0xff]  ;;  %v14283_v25 = vld [vmem:[%s18589_s9 + $0x870] sm:$0xff] }
 0x987   :  { %10154 = vmatprep.subr.mxu1 %v14234_v28  ;;  %10225 = vmatprep.subr.mxu0 %v14235_v29  ;;  %v14284_v26 = vld [vmem:[%s18589_s9 + $0x850] sm:$0xff]  ;;  %v14285_v28 = vld [vmem:[%s18589_s9 + $0x7c8] sm:$0xff] }
 0x988   :  { %10155 = vmatpush1.msra.mxu1 %v14236_v30  ;;  %10188 = vmatprep.mubr.f32.mxu1 %v14446_v1  ;;  %v14286_v29 = vld [vmem:[%s18589_s9 + $0x848] sm:$0xff] }
 0x989   :  { %10226 = vmatpush1.msra.mxu0 %v14237_v32  ;;  %10259 = vmatprep.mubr.f32.mxu0 %v14446_v1  ;;  %v14287_v30 = vld [vmem:[%s18589_s9 + $0x828] sm:$0xff]  ;;  %v10904_v32 = vrot.slane %v17659_v46, 5 }
 0x98a   :  { %12448 = vmatmul.mubr.msk.f32.vlgmr.msra.gmra.mxu1 %vm69_vm1, %v10121_v31  ;;  %12449 = vmatmul.mubr.msk.f32.vlgmr.msra.gmra.mxu0 %vm69_vm1, %v10121_v31 }
 0x98b   :  { %13841 = vmatprep.subr.mxu1 %v14446_v1  ;;  %10409 = vmatprep.subr.mxu0 %v14238_v33  ;;  %v14289_v33 = vld [vmem:[%s18589_s9 + $0x820] sm:$0xff] }
 0x98c   :  { %13842 = vmatpush3.msra.mxu1 %v14239_v34  ;;  %10410 = vmatpush1.msra.mxu0 %v14240_v35  ;;  %v14290_v34 = vld [vmem:[%s18589_s9 + $0x8b0] sm:$0xff]  ;;  %v14291_v35 = vld [vmem:[%s18589_s9 + $0x8a8] sm:$0xff] }
 0x98d   :  { %13843 = vmatprep.subr.mxu1 %v14446_v1  ;;  %10411 = vmatprep.subr.mxu0 %v14241_v36  ;;  %v14292_v36 = vld [vmem:[%s18589_s9 + $0x8b8] sm:$0xff] }
 0x98e   :  { %13844 = vmatpush3.msra.mxu1 %v14242_v38  ;;  %10412 = vmatpush1.msra.mxu0 %v14243_v40  ;;  %v14293_v38 = vld [vmem:[%s18589_s9 + $0x888] sm:$0xff] }
 0x98f   :  { %13845 = vmatprep.subr.mxu1 %v14446_v1  ;;  %10413 = vmatprep.subr.mxu0 %v14244_v43 }
 0x990   :  { %13846 = vmatpush3.msra.mxu1 %v14245_v22  ;;  %10414 = vmatpush1.msra.mxu0 %v14246_v44  ;;  %v14294_v22 = vld [vmem:[%s18589_s9 + $0x880] sm:$0xff]  ;;  %v14295_v44 = vld [vmem:[%s18589_s9 + $0x890] sm:$0xff] }
 0x991   :  { %13847 = vmatprep.subr.mxu1 %v14446_v1  ;;  %10415 = vmatprep.subr.mxu0 %v14247_v45  ;;  %v14296_v45 = vld [vmem:[%s18589_s9 + $0x860] sm:$0xff] }
 0x992   :  { %13848 = vmatpush3.msra.mxu1 %v14248_v47  ;;  %13849 = vmatprep.mubr.msk.f32.mxu1 %vm14447_vm0, %v14446_v1 }
 0x993   :  { %10416 = vmatpush1.msra.mxu0 %v14249_v42  ;;  %10449 = vmatprep.mubr.f32.mxu0 %v14446_v1  ;;  %v14297_v42 = vld [vmem:[%s18589_s9 + $0x858] sm:$0xff] }
 0x994   :  { %13850 = vmatmul.mubr.msk.f32.vlgmr.msra.gmra.mxu1 %vm69_vm1, %v10121_v31  ;;  %12451 = vmatmul.mubr.msk.f32.vlgmr.msra.gmra.mxu0 %vm69_vm1, %v10382_v48  ;;  %v14288_v31 = vld [vmem:[%s18589_s9 + $0x7a0] sm:$0xff] }
 0x995   :  { %10480 = vmatprep.subr.mxu1 %v14250_v50  ;;  %13852 = vmatprep.subr.mxu0 %v14446_v1  ;;  %v14298_v50 = vld [vmem:[%s18589_s9 + $0x868] sm:$0xff] }
 0x996   :  { %10481 = vmatpush1.msra.mxu1 %v14251_v51  ;;  %13853 = vmatpush3.msra.mxu0 %v14252_v52 }
 0x997   :  { %10482 = vmatprep.subr.mxu1 %v14253_v53  ;;  %13854 = vmatprep.subr.mxu0 %v14446_v1  ;;  %v14299_v53 = vld [vmem:[%s18589_s9 + $0x838] sm:$0xff] }
 0x998   :  { %10483 = vmatpush1.msra.mxu1 %v14254_v54  ;;  %13855 = vmatpush3.msra.mxu0 %v14255_v55  ;;  %v14300_v54 = vld [vmem:[%s18589_s9 + $0x830] sm:$0xff] }
 0x999   :  { %10484 = vmatprep.subr.mxu1 %v14256_v56  ;;  %13856 = vmatprep.subr.mxu0 %v14446_v1 }
 0x99a   :  { %10485 = vmatpush1.msra.mxu1 %v14257_v60  ;;  %13857 = vmatpush3.msra.mxu0 %v14258_v61  ;;  %v14301_v60 = vld [vmem:[%s18589_s9 + $0x840] sm:$0xff] }
 0x99b   :  { %10486 = vmatprep.subr.mxu1 %v14259_v62  ;;  %13858 = vmatprep.subr.mxu0 %v14446_v1  ;;  %v14302_v62 = vld [vmem:[%s18589_s9 + $0x940] sm:$0xff] }
 0x99c   :  { %10487 = vmatpush1.msra.mxu1 %v14260_v63  ;;  %10520 = vmatprep.mubr.f32.mxu1 %v14446_v1  ;;  %v14303_v63 = vld [vmem:[%s18589_s9 + $0x950] sm:$0xff] }
 0x99d   :  { %13859 = vmatpush3.msra.mxu0 %v14261_v0  ;;  %13860 = vmatprep.mubr.msk.f32.mxu0 %vm14447_vm0, %v14446_v1  ;;  %v14304_v0 = vld [vmem:[%s18589_s9 + $0x938] sm:$0xff] }
 0x99e   :  { %12452 = vmatmul.mubr.msk.f32.vlgmr.msra.gmra.mxu1 %vm69_vm1, %v10382_v48  ;;  %13861 = vmatmul.mubr.msk.f32.vlgmr.msra.gmra.mxu0 %vm69_vm1, %v10382_v48 }
 0x99f   :  { %10670 = vmatprep.subr.mxu1 %v14262_v2  ;;  %10741 = vmatprep.subr.mxu0 %v14263_v3  ;;  %v14305_v2 = vld [vmem:[%s18589_s9 + $0x948] sm:$0xff] }
 0x9a0   :  { %10671 = vmatpush1.msra.mxu1 %v14264_v4  ;;  %10742 = vmatpush1.msra.mxu0 %v14265_v6  ;;  %v14306_v6 = vld [vmem:[%s18589_s9 + $0x918] sm:$0xff] }
 0x9a1   :  { %10672 = vmatprep.subr.mxu1 %v14266_v8  ;;  %10743 = vmatprep.subr.mxu0 %v14267_v7  ;;  %v14307_v8 = vld [vmem:[%s18589_s9 + $0x928] sm:$0xff] }
 0x9a2   :  { %10673 = vmatpush1.msra.mxu1 %v14268_v27  ;;  %10744 = vmatpush1.msra.mxu0 %v14269_v9  ;;  %v14308_v9 = vld [vmem:[%s18589_s9 + $0x910] sm:$0xff] }
 0x9a3   :  { %10674 = vmatprep.subr.mxu1 %v14270_v10  ;;  %10745 = vmatprep.subr.mxu0 %v14271_v11  ;;  %v14309_v10 = vld [vmem:[%s18589_s9 + $0x920] sm:$0xff] }
 0x9a4   :  { %10675 = vmatpush1.msra.mxu1 %v14272_v12  ;;  %10746 = vmatpush1.msra.mxu0 %v14273_v13  ;;  %v14310_v13 = vld [vmem:[%s18589_s9 + $0x8f0] sm:$0xff] }
 0x9a5   :  { %10676 = vmatprep.subr.mxu1 %v14274_v14  ;;  %10747 = vmatprep.subr.mxu0 %v14275_v15  ;;  %v14311_v14 = vld [vmem:[%s18589_s9 + $0x900] sm:$0xff] }
 0x9a6   :  { %10677 = vmatpush1.msra.mxu1 %v14276_v39  ;;  %10710 = vmatprep.mubr.f32.mxu1 %v14446_v1 }
 0x9a7   :  { %10748 = vmatpush1.msra.mxu0 %v14277_v17  ;;  %10781 = vmatprep.mubr.f32.mxu0 %v14446_v1  ;;  %v14313_v17 = vld [vmem:[%s18589_s9 + $0x8f8] sm:$0xff] }
 0x9a8   :  { %12454 = vmatmul.mubr.msk.f32.vlgmr.msra.gmra.mxu1 %vm69_vm1, %v10643_v16  ;;  %12455 = vmatmul.mubr.msk.f32.vlgmr.msra.gmra.mxu0 %vm69_vm1, %v10643_v16 }
 0x9a9   :  { %13863 = vmatprep.subr.mxu1 %v14446_v1  ;;  %10931 = vmatprep.subr.mxu0 %v14278_v18  ;;  %v14314_v18 = vld [vmem:[%s18589_s9 + $0x8c8] sm:$0xff] }
 0x9aa   :  { %13864 = vmatpush3.msra.mxu1 %v14279_v19  ;;  %10932 = vmatpush1.msra.mxu0 %v14280_v20  ;;  %v14315_v19 = vld [vmem:[%s18589_s9 + $0x8d8] sm:$0xff] }
 0x9ab   :  { %13865 = vmatprep.subr.mxu1 %v14446_v1  ;;  %10933 = vmatprep.subr.mxu0 %v14281_v21  ;;  %v14316_v21 = vld [vmem:[%s18589_s9 + $0x8c0] sm:$0xff] }
 0x9ac   :  { %13866 = vmatpush3.msra.mxu1 %v14282_v24  ;;  %10934 = vmatpush1.msra.mxu0 %v14283_v25  ;;  %v11165_v24 = vrot.slane %v17659_v46, 6  ;;  %v14317_v25 = vld [vmem:[%s18589_s9 + $0x8d0] sm:$0xff] }
 0x9ad   :  { %13867 = vmatprep.subr.mxu1 %v14446_v1  ;;  %10935 = vmatprep.subr.mxu0 %v14284_v26  ;;  %v14318_v26 = vld [vmem:[%s18589_s9 + $0x9e0] sm:$0xff] }
 0x9ae   :  { %13868 = vmatpush3.msra.mxu1 %v14285_v28  ;;  %10936 = vmatpush1.msra.mxu0 %v14286_v29  ;;  %v14319_v28 = vld [vmem:[%s18589_s9 + $0x958] sm:$0xff] }
 0x9af   :  { %13869 = vmatprep.subr.mxu1 %v14446_v1  ;;  %10937 = vmatprep.subr.mxu0 %v14287_v30  ;;  %v14320_v29 = vld [vmem:[%s18589_s9 + $0x9d8] sm:$0xff] }
 0x9b0   :  { %13870 = vmatpush3.msra.mxu1 %v14288_v31  ;;  %13871 = vmatprep.mubr.msk.f32.mxu1 %vm14447_vm0, %v14446_v1 }
 0x9b1   :  { %10938 = vmatpush1.msra.mxu0 %v14289_v33  ;;  %10971 = vmatprep.mubr.f32.mxu0 %v14446_v1  ;;  %v14322_v33 = vld [vmem:[%s18589_s9 + $0x930] sm:$0xff] }
 0x9b2   :  { %13872 = vmatmul.mubr.msk.f32.vlgmr.msra.gmra.mxu1 %vm69_vm1, %v10643_v16  ;;  %12457 = vmatmul.mubr.msk.f32.vlgmr.msra.gmra.mxu0 %vm69_vm1, %v10904_v32  ;;  %v14312_v16 = vld [vmem:[%s18589_s9 + $0x8e8] sm:$0xff] }
 0x9b3   :  { %11002 = vmatprep.subr.mxu1 %v14290_v34  ;;  %13874 = vmatprep.subr.mxu0 %v14446_v1  ;;  %v14323_v34 = vld [vmem:[%s18589_s9 + $0x9b0] sm:$0xff] }
 0x9b4   :  { %11003 = vmatpush1.msra.mxu1 %v14291_v35  ;;  %13875 = vmatpush3.msra.mxu0 %v14292_v36 }
 0x9b5   :  { %11004 = vmatprep.subr.mxu1 %v14293_v38  ;;  %13876 = vmatprep.subr.mxu0 %v14446_v1  ;;  %v7580_v40 = vpop.f32.mrf.mxu1  ;;  %v7651_v43 = vpop.f32.mrf.mxu0  ;;  %v14324_v38 = vld [vmem:[%s18589_s9 + $0x990] sm:$0xff] }
 0x9b6   :  { %11005 = vmatpush1.msra.mxu1 %v14294_v22  ;;  %13877 = vmatpush3.msra.mxu0 %v14295_v44  ;;  %v14326_v22 = vld [vmem:[%s18589_s9 + $0x988] sm:$0xff] }
 0x9b7   :  { %11006 = vmatprep.subr.mxu1 %v14296_v45  ;;  %13878 = vmatprep.subr.mxu0 %v14446_v1  ;;  %v7582_v47 = vpop.f32.mrf.mxu1  ;;  %v7653_v48 = vpop.f32.mrf.mxu0  ;;  %v14327_v44 = vld [vmem:[%s18589_s9 + $0x968] sm:$0xff] }
 0x9b8   :  { %11007 = vmatpush1.msra.mxu1 %v14297_v42  ;;  %13879 = vmatpush3.msra.mxu0 %v14298_v50  ;;  %v7731_v51 = vcombine.low %v7580_v40, %v7582_v47  ;;  %v7732_v52 = vcombine.low %v7651_v43, %v7653_v48  ;;  %v14325_v43 = vld [vmem:[%s18589_s9 + $0x908] sm:$0xff]  ;;  %v14328_v42 = vld [vmem:[%s18589_s9 + $0x8e0] sm:$0xff]  ;;  %v11426_v50 = vrot.slane %v17659_v46, 7 }
 0x9b9   :  { %11008 = vmatprep.subr.mxu1 %v14299_v53  ;;  %13880 = vmatprep.subr.mxu0 %v14446_v1  ;;  %v14330_v53 = vld [vmem:[%s18589_s9 + $0x9f0] sm:$0xff] }
 0x9ba   :  { %11009 = vmatpush1.msra.mxu1 %v14300_v54  ;;  %11042 = vmatprep.mubr.f32.mxu1 %v14446_v1  ;;  %v7739_v55 = vrot.slane %v7731_v51, %v15991_v58  ;;  %v7746_v56 = vrot.slane %v7732_v52, %v15991_v58  ;;  %v14329_v51 = vld [vmem:[%s18589_s9 + $0x960] sm:$0xff] }
 0x9bb   :  { %13881 = vmatpush3.msra.mxu0 %v14301_v60  ;;  %13882 = vmatprep.mubr.msk.f32.mxu0 %vm14447_vm0, %v14446_v1 }
 0x9bc   :  { %12458 = vmatmul.mubr.msk.f32.vlgmr.msra.gmra.mxu1 %vm69_vm1, %v10904_v32  ;;  %13883 = vmatmul.mubr.msk.f32.vlgmr.msra.gmra.mxu0 %vm69_vm1, %v10904_v32  ;;  %v7754_v61 = vcombine.low %v7739_v55, %v7746_v56  ;;  %v14321_v32 = vld [vmem:[%s18589_s9 + $0x9b8] sm:$0xff]  ;;  %v14331_v55 = vld [vmem:[%s18589_s9 + $0x9e8] sm:$0xff] }
 0x9bd   :  { %11192 = vmatprep.subr.mxu1 %v14302_v62  ;;  %11263 = vmatprep.subr.mxu0 %v14303_v63  ;;  %v14332_v56 = vld [vmem:[%s18589_s9 + $0x9f8] sm:$0xff]  ;;  %v14333_v62 = vld [vmem:[%s18589_s9 + $0x9c8] sm:$0xff]  ;;  %v14334_v63 = vld [vmem:[%s18590_s10] sm:$0x1f] }
 0x9be   :  { %11193 = vmatpush1.msra.mxu1 %v14304_v0  ;;  %11264 = vmatpush1.msra.mxu0 %v14305_v2  ;;  %v7722_v3 = vpop.f32.mrf.mxu1  ;;  %v18067_v4 = vpop.f32.mrf.mxu0  ;;  %v18077_v27 = vrot.slane %v7754_v61, %v15991_v58 }
 0x9bf   :  { %11194 = vmatprep.subr.mxu1 %v14306_v6  ;;  %11265 = vmatprep.subr.mxu0 %v14307_v8  ;;  %v7753_v7 = vrot.slane %v7722_v3, %v15991_v58  ;;  %v14335_v3 = vld [vmem:[%s18589_s9 + $0x9c0] sm:$0xff] }
 0x9c0   :  { %11195 = vmatpush1.msra.mxu1 %v14308_v9  ;;  %11266 = vmatpush1.msra.mxu0 %v14309_v10  ;;  %v13741_v11 = vpop.f32.mrf.mxu1  ;;  %v7843_v12 = vpop.f32.mrf.mxu0 }
 0x9c1   :  { %11196 = vmatprep.subr.mxu1 %v14310_v13  ;;  %11267 = vmatprep.subr.mxu0 %v14311_v14  ;;  %v18092_v15 = vrot.slane %v7753_v7, %v15991_v58  ;;  %v7992_v39 = vcombine.low %v18067_v4, %v7843_v12  ;;  %v14336_v4 = vld [vmem:[%s18589_s9 + $0x9d0] sm:$0xff]  ;;  %v14337_v7 = vld [vmem:[%s18589_s9 + $0x9a0] sm:$0xff]  ;;  %v14338_v11 = vld [vmem:[%s18589_s9 + $0x998] sm:$0xff] }
 0x9c2   :  { %11197 = vmatpush1.msra.mxu1 %v14312_v16  ;;  %11268 = vmatpush1.msra.mxu0 %v14313_v17  ;;  %v14339_v12 = vld [vmem:[%s18589_s9 + $0x9a8] sm:$0xff]  ;;  %v14340_v13 = vld [vmem:[%s18589_s9 + $0x978] sm:$0xff]  ;;  %v14342_v16 = vld [vmem:[%s18589_s9 + $0x980] sm:$0xff] }
 0x9c3   :  { %11198 = vmatprep.subr.mxu1 %v14314_v18  ;;  %11269 = vmatprep.subr.mxu0 %v14315_v19  ;;  %v7769_v20 = vcombine.low %v18077_v27, %v18092_v15  ;;  %v8000_v45 = vrot.slane %v7992_v39, %v15991_v58  ;;  %v14341_v39 = vld [vmem:[%s18589_s9 + $0x970] sm:$0xff]  ;;  %v14343_v18 = vld [vmem:[%s18591_s11 + $0xf8] sm:$0xff] }
 0x9c4   :  { %11199 = vmatpush1.msra.mxu1 %v14316_v21  ;;  %11232 = vmatprep.mubr.f32.mxu1 %v14446_v1  ;;  %v14344_v19 = vld [vmem:[%s18591_s11 + $0x1f8] sm:$0xff] }
 0x9c5   :  { %11270 = vmatpush1.msra.mxu0 %v14317_v25  ;;  %11303 = vmatprep.mubr.f32.mxu0 %v14446_v1  ;;  %v7771_v0 = vadd.f32 %v14334_v63, %v7769_v20  ;;  %v14346_v25 = vld [vmem:[%s18591_s11 + $0x178] sm:$0xff]  ;;  %v14367_v63 = vld [vmem:[%s18591_s11 + $0xc8] sm:$0xff] }
 0x9c6   :  { %12460 = vmatmul.mubr.msk.f32.vlgmr.msra.gmra.mxu1 %vm69_vm1, %v11165_v24  ;;  %12461 = vmatmul.mubr.msk.f32.vlgmr.msra.gmra.mxu0 %vm69_vm1, %v11165_v24 }
 0x9c7   :  { %13885 = vmatprep.subr.mxu1 %v14446_v1  ;;  %11453 = vmatprep.subr.mxu0 %v14318_v26 }
 0x9c8   :  { %13886 = vmatpush3.msra.mxu1 %v14319_v28  ;;  %11454 = vmatpush1.msra.mxu0 %v14320_v29  ;;  %v7912_v30 = vpop.f32.mrf.mxu1  ;;  %v7983_v31 = vpop.f32.mrf.mxu0  ;;  %v14347_v28 = vld [vmem:[%s18591_s11 + $0xf0] sm:$0xff] }
 0x9c9   :  { %13887 = vmatprep.subr.mxu1 %v14446_v1  ;;  %11455 = vmatprep.subr.mxu0 %v14321_v32  ;;  %v8014_v47 = vrot.slane %v7983_v31, %v15991_v58  ;;  %v14348_v29 = vld [vmem:[%s18591_s11 + $0x1f0] sm:$0xff] }
 0x9ca   :  { %13888 = vmatpush3.msra.mxu1 %v14322_v33  ;;  %11456 = vmatpush1.msra.mxu0 %v14323_v34  ;;  %v7914_v35 = vpop.f32.mrf.mxu1  ;;  %v13752_v36 = vpop.f32.mrf.mxu0  ;;  %v14349_v32 = vld [vmem:[%s18591_s11 + $0x70] sm:$0xff] }
 0x9cb   :  { %13889 = vmatprep.subr.mxu1 %v14446_v1  ;;  %11457 = vmatprep.subr.mxu0 %v14324_v38  ;;  %v7993_v40 = vcombine.low %v7912_v30, %v7914_v35  ;;  %v8029_v46 = vrot.slane %v8014_v47, %v15991_v58  ;;  %v14350_v33 = vld [vmem:[%s18591_s11 + $0x170] sm:$0xff]  ;;  %v14351_v38 = vld [vmem:[%s18591_s11 + $0xe8] sm:$0xff]  ;;  %v14356_v47 = vld [vmem:[%s18591_s11 + $0x1e0] sm:$0xff] }
 0x9cc   :  { %13890 = vmatpush3.msra.mxu1 %v14325_v43  ;;  %11458 = vmatpush1.msra.mxu0 %v14326_v22  ;;  %v14353_v43 = vld [vmem:[%s18591_s11 + $0x68] sm:$0xff] }
 0x9cd   :  { %13891 = vmatprep.subr.mxu1 %v14446_v1  ;;  %11459 = vmatprep.subr.mxu0 %v14327_v44  ;;  %v8007_v48 = vrot.slane %v7993_v40, %v15991_v58  ;;  %v14352_v40 = vld [vmem:[%s18591_s11 + $0x1e8] sm:$0xff] }
 0x9ce   :  { %13892 = vmatpush3.msra.mxu1 %v14328_v42  ;;  %13893 = vmatprep.mubr.msk.f32.mxu1 %vm14447_vm0, %v14446_v1  ;;  %v14354_v22 = vld [vmem:[%s18591_s11 + $0x168] sm:$0xff]  ;;  %v14358_v42 = vld [vmem:[%s18591_s11 + $0x160] sm:$0xff] }
 0x9cf   :  { %11460 = vmatpush1.msra.mxu0 %v14329_v51  ;;  %11493 = vmatprep.mubr.f32.mxu0 %v14446_v1  ;;  %v8015_v52 = vcombine.low %v8000_v45, %v8007_v48  ;;  %v14355_v45 = vld [vmem:[%s18591_s11 + $0xe0] sm:$0xff]  ;;  %v14359_v51 = vld [vmem:[%s18591_s11 + $0xd8] sm:$0xff] }
 0x9d0   :  { %13894 = vmatmul.mubr.msk.f32.vlgmr.msra.gmra.mxu1 %vm69_vm1, %v11165_v24  ;;  %12463 = vmatmul.mubr.msk.f32.vlgmr.msra.gmra.mxu0 %vm69_vm1, %v11426_v50  ;;  %v14345_v24 = vld [vmem:[%s18591_s11 + $0x78] sm:$0xff]  ;;  %v14357_v48 = vld [vmem:[%s18591_s11 + $0x60] sm:$0xff] }
 0x9d1   :  { %11524 = vmatprep.subr.mxu1 %v14330_v53  ;;  %13896 = vmatprep.subr.mxu0 %v14446_v1  ;;  %v8022_v54 = vrot.slane %v8015_v52, %v15991_v58  ;;  %v14360_v52 = vld [vmem:[%s18591_s11 + $0x1d8] sm:$0xff] }
 0x9d2   :  { %11525 = vmatpush1.msra.mxu1 %v14331_v55  ;;  %13897 = vmatpush3.msra.mxu0 %v14332_v56  ;;  %v8102_v60 = vpop.f32.mrf.mxu1  ;;  %v8173_v61 = vpop.f32.mrf.mxu0  ;;  %v14361_v53 = vld [vmem:[%s18591_s11 + $0x58] sm:$0xff]  ;;  %v14364_v55 = vld [vmem:[%s18591_s11 + $0x1d0] sm:$0xff] }
 0x9d3   :  { %11526 = vmatprep.subr.mxu1 %v14333_v62  ;;  %13898 = vmatprep.subr.mxu0 %v14446_v1  ;;  %v8030_v2 = vcombine.low %v8022_v54, %v8029_v46  ;;  %v14362_v46 = vld [vmem:[%s18591_s11 + $0x158] sm:$0xff]  ;;  %v14363_v54 = vld [vmem:[%s18591_s11 + $0xd0] sm:$0xff] }
 0x9d4   :  { %11527 = vmatpush1.msra.mxu1 %v14335_v3  ;;  %13899 = vmatpush3.msra.mxu0 %v14336_v4  ;;  %v8104_v6 = vpop.f32.mrf.mxu1  ;;  %v8175_v8 = vpop.f32.mrf.mxu0  ;;  %v14366_v62 = vld [vmem:[%s18591_s11 + $0x150] sm:$0xff]  ;;  %v14369_v4 = vld [vmem:[%s18591_s11 + $0x48] sm:$0xff] }
 0x9d5   :  { %11528 = vmatprep.subr.mxu1 %v14337_v7  ;;  %13900 = vmatprep.subr.mxu0 %v14446_v1  ;;  %v8253_v27 = vcombine.low %v8102_v60, %v8104_v6  ;;  %v8254_v9 = vcombine.low %v8173_v61, %v8175_v8  ;;  %v8032_v10 = vadd.f32 %v8030_v2, %v7771_v0  ;;  %v14365_v61 = vld [vmem:[%s18591_s11 + $0x50] sm:$0xff]  ;;  %v14368_v0 = vld [vmem:[%s18591_s11 + $0x1c8] sm:$0xff]  ;;  %v14371_v7 = vld [vmem:[%s18591_s11 + $0xc0] sm:$0xff] }
 0x9d6   :  { %11529 = vmatpush1.msra.mxu1 %v14338_v11  ;;  %13901 = vmatpush3.msra.mxu0 %v14339_v12  ;;  %v14370_v6 = vld [vmem:[%s18591_s11 + $0x148] sm:$0xff] }
 0x9d7   :  { %11530 = vmatprep.subr.mxu1 %v14340_v13  ;;  %13902 = vmatprep.subr.mxu0 %v14446_v1  ;;  %v8261_v14 = vrot.slane %v8253_v27, %v15991_v58  ;;  %v8268_v15 = vrot.slane %v8254_v9, %v15991_v58  ;;  %v14372_v27 = vld [vmem:[%s18591_s11 + $0x1c0] sm:$0xff] }
 0x9d8   :  { %11531 = vmatpush1.msra.mxu1 %v14341_v39  ;;  %11564 = vmatprep.mubr.f32.mxu1 %v14446_v1  ;;  %v14373_v9 = vld [vmem:[%s18591_s11 + $0x40] sm:$0xff]  ;;  %v14377_v39 = vld [vmem:[%s18591_s11 + $0x38] sm:$0xff] }
 0x9d9   :  { %13903 = vmatpush3.msra.mxu0 %v14342_v16  ;;  %13904 = vmatprep.mubr.msk.f32.mxu0 %vm14447_vm0, %v14446_v1  ;;  %v8276_v17 = vcombine.low %v8261_v14, %v8268_v15  ;;  %v14375_v14 = vld [vmem:[%s18591_s11 + $0xb8] sm:$0xff] }
 0x9da   :  { %12464 = vmatmul.mubr.msk.f32.vlgmr.msra.gmra.mxu1 %vm69_vm1, %v11426_v50  ;;  %13905 = vmatmul.mubr.msk.f32.vlgmr.msra.gmra.mxu0 %vm69_vm1, %v11426_v50  ;;  %v14376_v15 = vld [vmem:[%s18591_s11 + $0x1b8] sm:$0xff] }
 0x9db   :  { %12929 = vmatprep.subr.mxu1 %v14343_v18  ;;  %12964 = vmatprep.subr.mxu0 %v14344_v19  ;;  %v8283_v34 = vrot.slane %v8276_v17, %v15991_v58  ;;  %v14378_v16 = vld [vmem:[%s18591_s11 + $0x138] sm:$0xff]  ;;  %v14379_v18 = vld [vmem:[%s18591_s11 + $0xb0] sm:$0xff] }
 0x9dc   :  { %v8244_v20 = vpop.f32.mrf.mxu1  ;;  %v18230_v21 = vpop.f32.mrf.mxu0  ;;  %12930 = vmatpush3.msra.mxu1 %v14345_v24  ;;  %12965 = vmatpush3.msra.mxu0 %v14346_v25  ;;  %v14380_v19 = vld [vmem:[%s18591_s11 + $0x1b0] sm:$0xff] }
 0x9dd   :  { %v8275_v26 = vrot.slane %v8244_v20, %v15991_v58  ;;  %12931 = vmatprep.subr.mxu1 %v14347_v28  ;;  %12966 = vmatprep.subr.mxu0 %v14348_v29  ;;  %v14381_v20 = vld [vmem:[%s18591_s11 + $0x30] sm:$0xff]  ;;  %v14384_v28 = vld [vmem:[%s18591_s11 + $0x1a8] sm:$0xff] }
 0x9de   :  { %v13763_v30 = vpop.f32.mrf.mxu1  ;;  %v18245_v31 = vpop.f32.mrf.mxu0  ;;  %12932 = vmatpush3.msra.mxu1 %v14349_v32  ;;  %12967 = vmatpush3.msra.mxu0 %v14350_v33  ;;  %v14386_v32 = vld [vmem:[%s18591_s11 + $0x128] sm:$0xff] }
 0x9df   :  { %v8290_v35 = vrot.slane %v8275_v26, %v15991_v58  ;;  %v8514_v36 = vcombine.low %v18230_v21, %v18245_v31  ;;  %12933 = vmatprep.subr.mxu1 %v14351_v38  ;;  %12968 = vmatprep.subr.mxu0 %v14352_v40  ;;  %v14382_v21 = vld [vmem:[%s18591_s11 + $0x130] sm:$0xff]  ;;  %v14383_v26 = vld [vmem:[%s18591_s11 + $0xa8] sm:$0xff]  ;;  %v14389_v40 = vld [vmem:[%s18591_s11 + $0x20] sm:$0xff] }
 0x9e0   :  { %12934 = vmatpush3.msra.mxu1 %v14353_v43  ;;  %12969 = vmatpush3.msra.mxu0 %v14354_v22  ;;  %v14385_v31 = vld [vmem:[%s18591_s11 + $0x28] sm:$0xff]  ;;  %v14390_v43 = vld [vmem:[%s18591_s11 + $0x120] sm:$0xff] }
 0x9e1   :  { %v8291_v44 = vcombine.low %v8283_v34, %v8290_v35  ;;  %12935 = vmatprep.subr.mxu1 %v14355_v45  ;;  %12970 = vmatprep.subr.mxu0 %v14356_v47  ;;  %v8522_v11 = vrot.slane %v8514_v36, %v15991_v58  ;;  %v14387_v34 = vld [vmem:[%s18591_s11 + $0xa0] sm:$0xff]  ;;  %v14391_v47 = vld [vmem:[%s18591_s11 + $0x98] sm:$0xff] }
 0x9e2   :  { %12936 = vmatpush3.msra.mxu1 %v14357_v48  ;;  %12971 = vmatpush3.msra.mxu0 %v14358_v42  ;;  %v14388_v35 = vld [vmem:[%s18591_s11 + $0x1a0] sm:$0xff]  ;;  %v14392_v48 = vld [vmem:[%s18591_s11 + $0x198] sm:$0xff] }
 0x9e3   :  { %v18281_v50 = vadd.f32 %v8291_v44, %v8032_v10  ;;  %12937 = vmatprep.subr.mxu1 %v14359_v51  ;;  %12972 = vmatprep.subr.mxu0 %v14360_v52  ;;  %v14374_v10 = vld [vmem:[%s18591_s11 + $0x140] sm:$0xff]  ;;  %v14393_v42 = vld [vmem:[%s18591_s11 + $0x18] sm:$0xff] }
 0x9e4   :  { %12938 = vmatpush3.msra.mxu1 %v14361_v53  ;;  %12973 = vmatpush3.msra.mxu0 %v14362_v46  ;;  %v14394_v51 = vld [vmem:[%s18591_s11 + $0x118] sm:$0xff]  ;;  %v14395_v53 = vld [vmem:[%s18591_s11 + $0x90] sm:$0xff] }
 0x9e5   :  { %12939 = vmatprep.subr.mxu1 %v14363_v54  ;;  %12974 = vmatprep.subr.mxu0 %v14364_v55  ;;  %v14396_v46 = vld [vmem:[%s18591_s11 + $0x190] sm:$0xff] }
 0x9e6   :  { %v8434_v56 = vpop.f32.mrf.mxu1  ;;  %v8505_v60 = vpop.f32.mrf.mxu0  ;;  %12940 = vmatpush3.msra.mxu1 %v14365_v61  ;;  %12975 = vmatpush3.msra.mxu0 %v14366_v62  ;;  %v14397_v54 = vld [vmem:[%s18591_s11 + $0x10] sm:$0xff]  ;;  %v14400_v61 = vld [vmem:[%s18591_s11 + $0x188] sm:$0xff] }
 0x9e7   :  { %12941 = vmatprep.subr.mxu1 %v14367_v63  ;;  %12976 = vmatprep.subr.mxu0 %v14368_v0  ;;  %v8536_v12 = vrot.slane %v8505_v60, %v15991_v58  ;;  %v14398_v55 = vld [vmem:[%s18591_s11 + $0x110] sm:$0xff]  ;;  %v14399_v60 = vld [vmem:[%s18591_s11 + $0x88] sm:$0xff]  ;;  %v14403_v0 = vld [vmem:[%s18591_s11 + $0x80] sm:$0xff] }
 0x9e8   :  { %v8436_v2 = vpop.f32.mrf.mxu1  ;;  %v13774_v3 = vpop.f32.mrf.mxu0  ;;  %12942 = vmatpush3.msra.mxu1 %v14369_v4  ;;  %12977 = vmatpush3.msra.mxu0 %v14370_v6  ;;  %v14401_v62 = vld [vmem:[%s18591_s11 + $0x8] sm:$0xff]  ;;  %v14405_v6 = vld [vmem:[%s18591_s11] sm:$0xff] }
 0x9e9   :  { %v8515_v8 = vcombine.low %v8434_v56, %v8436_v2  ;;  %12943 = vmatprep.subr.mxu1 %v14371_v7  ;;  %12978 = vmatprep.subr.mxu0 %v14372_v27  ;;  %v8551_v24 = vrot.slane %v8536_v12, %v15991_v58  ;;  %v14402_v63 = vld [vmem:[%s18591_s11 + $0x108] sm:$0xff]  ;;  %v14404_v2 = vld [vmem:[%s18591_s11 + $0x180] sm:$0xff] }
 0x9ea   :  { %12944 = vmatpush3.msra.mxu1 %v14373_v9  ;;  %12979 = vmatpush3.msra.mxu0 %v14374_v10 }
 0x9eb   :  { %v8529_v13 = vrot.slane %v8515_v8, %v15991_v58  ;;  %12945 = vmatprep.subr.mxu1 %v14375_v14  ;;  %12980 = vmatprep.subr.mxu0 %v14376_v15  ;;  %v14406_v8 = vld [vmem:[%s18591_s11 + $0x100] sm:$0xff] }
 0x9ec   :  { %12946 = vmatpush3.msra.mxu1 %v14377_v39  ;;  %12981 = vmatpush3.msra.mxu0 %v14378_v16 }
 0x9ed   :  { %v8537_v17 = vcombine.low %v8522_v11, %v8529_v13  ;;  %12947 = vmatprep.subr.mxu1 %v14379_v18  ;;  %12982 = vmatprep.subr.mxu0 %v14380_v19 }
 0x9ee   :  { %12948 = vmatpush3.msra.mxu1 %v14381_v20  ;;  %12983 = vmatpush3.msra.mxu0 %v14382_v21 }
 0x9ef   :  { %v8544_v25 = vrot.slane %v8537_v17, %v15991_v58  ;;  %12949 = vmatprep.subr.mxu1 %v14383_v26  ;;  %12984 = vmatprep.subr.mxu0 %v14384_v28 }
 0x9f0   :  { %v8624_v29 = vpop.f32.mrf.mxu1  ;;  %v8695_v30 = vpop.f32.mrf.mxu0  ;;  %12950 = vmatpush3.msra.mxu1 %v14385_v31  ;;  %12985 = vmatpush3.msra.mxu0 %v14386_v32 }
 0x9f1   :  { %v8552_v33 = vcombine.low %v8544_v25, %v8551_v24  ;;  %12951 = vmatprep.subr.mxu1 %v14387_v34  ;;  %12986 = vmatprep.subr.mxu0 %v14388_v35 }
 0x9f2   :  { %v8626_v36 = vpop.f32.mrf.mxu1  ;;  %v8697_v38 = vpop.f32.mrf.mxu0  ;;  %12952 = vmatpush3.msra.mxu1 %v14389_v40  ;;  %12987 = vmatpush3.msra.mxu0 %v14390_v43 }
 0x9f3   :  { %v8775_v22 = vcombine.low %v8624_v29, %v8626_v36  ;;  %v8776_v44 = vcombine.low %v8695_v30, %v8697_v38  ;;  %v8554_v45 = vadd.f32 %v8552_v33, %v18281_v50  ;;  %12953 = vmatprep.subr.mxu1 %v14391_v47  ;;  %12988 = vmatprep.subr.mxu0 %v14392_v48 }
 0x9f4   :  { %12954 = vmatpush3.msra.mxu1 %v14393_v42  ;;  %12989 = vmatpush3.msra.mxu0 %v14394_v51 }
 0x9f5   :  { %v8783_v50 = vrot.slane %v8775_v22, %v15991_v58  ;;  %v8790_v52 = vrot.slane %v8776_v44, %v15991_v58  ;;  %12955 = vmatprep.subr.mxu1 %v14395_v53  ;;  %12990 = vmatprep.subr.mxu0 %v14396_v46 }
 0x9f6   :  { %12956 = vmatpush3.msra.mxu1 %v14397_v54  ;;  %12991 = vmatpush3.msra.mxu0 %v14398_v55 }
 0x9f7   :  { %v8798_v56 = vcombine.low %v8783_v50, %v8790_v52  ;;  %12957 = vmatprep.subr.mxu1 %v14399_v60  ;;  %12992 = vmatprep.subr.mxu0 %v14400_v61 }
 0x9f8   :  { %12958 = vmatpush3.msra.mxu1 %v14401_v62  ;;  %12993 = vmatpush3.msra.mxu0 %v14402_v63 }
 0x9f9   :  { %12959 = vmatprep.subr.mxu1 %v14403_v0  ;;  %12994 = vmatprep.subr.mxu0 %v14404_v2  ;;  %v8805_v10 = vrot.slane %v8798_v56, %v15991_v58 }
 0x9fa   :  { %v8766_v3 = vpop.f32.mrf.mxu1  ;;  %v8885_v4 = vpop.f32.mrf.mxu0  ;;  %12960 = vmatpush3.msra.mxu1 %v14405_v6  ;;  %12995 = vmatpush3.msra.mxu0 %v14406_v8 }
 0x9fb   :  { %v8797_v7 = vrot.slane %v8766_v3, %v15991_v58  ;;  %13907 = vmatprep.subr.mxu1 %v14446_v1 }
 0x9fc   :  { %v13785_v27 = vpop.f32.mrf.mxu1  ;;  %v8887_v9 = vpop.f32.mrf.mxu0 }
 0x9fd   :  { %v8812_v11 = vrot.slane %v8797_v7, %v15991_v58  ;;  %v9036_v12 = vcombine.low %v8885_v4, %v8887_v9 }
 0x9ff   :  { %v8813_v13 = vcombine.low %v8805_v10, %v8812_v11  ;;  %v9044_v19 = vrot.slane %v9036_v12, %v15991_v58 }
 0xa01   :  { %v8815_v14 = vadd.f32 %v8813_v13, %v8554_v45 }
 0xa04   :  { %v8956_v15 = vpop.f32.mrf.mxu1  ;;  %v9027_v39 = vpop.f32.mrf.mxu0 }
 0xa05   :  { %v9058_v20 = vrot.slane %v9027_v39, %v15991_v58 }
 0xa06   :  { %v8958_v16 = vpop.f32.mrf.mxu1  ;;  %v13796_v17 = vpop.f32.mrf.mxu0 }
 0xa07   :  { %v9037_v18 = vcombine.low %v8956_v15, %v8958_v16  ;;  %v9073_v25 = vrot.slane %v9058_v20, %v15991_v58 }
 0xa09   :  { %v9051_v21 = vrot.slane %v9037_v18, %v15991_v58 }
 0xa0b   :  { %v9059_v24 = vcombine.low %v9044_v19, %v9051_v21 }
 0xa0d   :  { %v9066_v26 = vrot.slane %v9059_v24, %v15991_v58 }
 0xa0e   :  { %v9146_v28 = vpop.f32.mrf.mxu1  ;;  %v9217_v29 = vpop.f32.mrf.mxu0 }
 0xa0f   :  { %v9074_v30 = vcombine.low %v9066_v26, %v9073_v25 }
 0xa10   :  { %v9148_v31 = vpop.f32.mrf.mxu1  ;;  %v9219_v32 = vpop.f32.mrf.mxu0 }
 0xa11   :  { %v9297_v33 = vcombine.low %v9146_v28, %v9148_v31  ;;  %v9298_v34 = vcombine.low %v9217_v29, %v9219_v32  ;;  %v9076_v35 = vadd.f32 %v9074_v30, %v8815_v14 }
 0xa13   :  { %v9305_v36 = vrot.slane %v9297_v33, %v15991_v58  ;;  %v9312_v38 = vrot.slane %v9298_v34, %v15991_v58 }
 0xa15   :  { %v9320_v40 = vcombine.low %v9305_v36, %v9312_v38 }
 0xa17   :  { %v9327_v48 = vrot.slane %v9320_v40, %v15991_v58 }
 0xa18   :  { %v9288_v43 = vpop.f32.mrf.mxu1  ;;  %v9407_v22 = vpop.f32.mrf.mxu0 }
 0xa19   :  { %v9319_v44 = vrot.slane %v9288_v43, %v15991_v58 }
 0xa1a   :  { %v13807_v45 = vpop.f32.mrf.mxu1  ;;  %v9409_v47 = vpop.f32.mrf.mxu0 }
 0xa1b   :  { %v9334_v42 = vrot.slane %v9319_v44, %v15991_v58  ;;  %v9558_v51 = vcombine.low %v9407_v22, %v9409_v47 }
 0xa1d   :  { %v9335_v50 = vcombine.low %v9327_v48, %v9334_v42  ;;  %v9566_v60 = vrot.slane %v9558_v51, %v15991_v58 }
 0xa1f   :  { %v9337_v52 = vadd.f32 %v9335_v50, %v9076_v35 }
 0xa22   :  { %v9478_v53 = vpop.f32.mrf.mxu1  ;;  %v9549_v46 = vpop.f32.mrf.mxu0 }
 0xa23   :  { %v9580_v61 = vrot.slane %v9549_v46, %v15991_v58 }
 0xa24   :  { %v9480_v54 = vpop.f32.mrf.mxu1  ;;  %v13818_v55 = vpop.f32.mrf.mxu0 }
 0xa25   :  { %v9559_v56 = vcombine.low %v9478_v53, %v9480_v54  ;;  %v9595_v0 = vrot.slane %v9580_v61, %v15991_v58 }
 0xa27   :  { %v9573_v62 = vrot.slane %v9559_v56, %v15991_v58 }
 0xa29   :  { %v9581_v63 = vcombine.low %v9566_v60, %v9573_v62 }
 0xa2b   :  { %v9588_v2 = vrot.slane %v9581_v63, %v15991_v58 }
 0xa2c   :  { %v9668_v3 = vpop.f32.mrf.mxu1  ;;  %v9739_v4 = vpop.f32.mrf.mxu0 }
 0xa2d   :  { %v9596_v6 = vcombine.low %v9588_v2, %v9595_v0 }
 0xa2e   :  { %v9670_v8 = vpop.f32.mrf.mxu1  ;;  %v9741_v7 = vpop.f32.mrf.mxu0 }
 0xa2f   :  { %v9819_v27 = vcombine.low %v9668_v3, %v9670_v8  ;;  %v9820_v9 = vcombine.low %v9739_v4, %v9741_v7  ;;  %v9598_v10 = vadd.f32 %v9596_v6, %v9337_v52 }
 0xa31   :  { %v9827_v11 = vrot.slane %v9819_v27, %v15991_v58  ;;  %v9834_v12 = vrot.slane %v9820_v9, %v15991_v58 }
 0xa33   :  { %v9842_v13 = vcombine.low %v9827_v11, %v9834_v12 }
 0xa35   :  { %v9849_v18 = vrot.slane %v9842_v13, %v15991_v58 }
 0xa36   :  { %v9810_v14 = vpop.f32.mrf.mxu1  ;;  %v9929_v15 = vpop.f32.mrf.mxu0 }
 0xa37   :  { %v9841_v39 = vrot.slane %v9810_v14, %v15991_v58 }
 0xa38   :  { %v13829_v16 = vpop.f32.mrf.mxu1  ;;  %v9931_v17 = vpop.f32.mrf.mxu0 }
 0xa39   :  { %v9856_v19 = vrot.slane %v9841_v39, %v15991_v58  ;;  %v10080_v20 = vcombine.low %v9929_v15, %v9931_v17 }
 0xa3b   :  { %v9857_v21 = vcombine.low %v9849_v18, %v9856_v19  ;;  %v10088_v31 = vrot.slane %v10080_v20, %v15991_v58 }
 0xa3d   :  { %v9859_v24 = vadd.f32 %v9857_v21, %v9598_v10 }
 0xa40   :  { %v10000_v25 = vpop.f32.mrf.mxu1  ;;  %v10071_v26 = vpop.f32.mrf.mxu0 }
 0xa41   :  { %v10102_v32 = vrot.slane %v10071_v26, %v15991_v58 }
 0xa42   :  { %v10002_v28 = vpop.f32.mrf.mxu1  ;;  %v13840_v29 = vpop.f32.mrf.mxu0 }
 0xa43   :  { %v10081_v30 = vcombine.low %v10000_v25, %v10002_v28  ;;  %v10117_v35 = vrot.slane %v10102_v32, %v15991_v58 }
 0xa45   :  { %v10095_v33 = vrot.slane %v10081_v30, %v15991_v58 }
 0xa47   :  { %v10103_v34 = vcombine.low %v10088_v31, %v10095_v33 }
 0xa49   :  { %v10110_v36 = vrot.slane %v10103_v34, %v15991_v58 }
 0xa4a   :  { %v10190_v38 = vpop.f32.mrf.mxu1  ;;  %v10261_v40 = vpop.f32.mrf.mxu0 }
 0xa4b   :  { %v10118_v43 = vcombine.low %v10110_v36, %v10117_v35 }
 0xa4c   :  { %v10192_v22 = vpop.f32.mrf.mxu1  ;;  %v10263_v44 = vpop.f32.mrf.mxu0 }
 0xa4d   :  { %v10341_v45 = vcombine.low %v10190_v38, %v10192_v22  ;;  %v10342_v47 = vcombine.low %v10261_v40, %v10263_v44  ;;  %v10120_v48 = vadd.f32 %v10118_v43, %v9859_v24 }
 0xa4f   :  { %v10349_v42 = vrot.slane %v10341_v45, %v15991_v58  ;;  %v10356_v51 = vrot.slane %v10342_v47, %v15991_v58 }
 0xa51   :  { %v10364_v50 = vcombine.low %v10349_v42, %v10356_v51 }
 0xa53   :  { %v10371_v54 = vrot.slane %v10364_v50, %v15991_v58 }
 0xa54   :  { %v10332_v52 = vpop.f32.mrf.mxu1  ;;  %v10451_v56 = vpop.f32.mrf.mxu0 }
 0xa55   :  { %v10363_v53 = vrot.slane %v10332_v52, %v15991_v58 }
 0xa56   :  { %v13851_v46 = vpop.f32.mrf.mxu1  ;;  %v10453_v62 = vpop.f32.mrf.mxu0 }
 0xa57   :  { %v10378_v55 = vrot.slane %v10363_v53, %v15991_v58  ;;  %v10602_v17 = vcombine.low %v10451_v56, %v10453_v62 }
 0xa59   :  { %v10379_v60 = vcombine.low %v10371_v54, %v10378_v55  ;;  %v10610_v26 = vrot.slane %v10602_v17, %v15991_v58 }
 0xa5b   :  { %v18469_v61 = vadd.f32 %v10379_v60, %v10120_v48 }
 0xa5e   :  { %v10593_v63 = vpop.f32.mrf.mxu0  ;;  %v10522_v2 = vpop.f32.mrf.mxu1 }
 0xa5f   :  { %v10624_v40 = vrot.slane %v10593_v63, %v15991_v58 }
 0xa60   :  { %v13862_v0 = vpop.f32.mrf.mxu0  ;;  %v10524_v3 = vpop.f32.mrf.mxu1 }
 0xa61   :  { %v10603_v39 = vcombine.low %v10522_v2, %v10524_v3  ;;  %v10639_v50 = vrot.slane %v10624_v40, %v15991_v58  ;;  %v14420_v40 = vld [vmem:[%s18591_s11 + $0x210] sm:$0xff] }
 0xa63   :  { %v10617_v19 = vrot.slane %v10603_v39, %v15991_v58 }
 0xa65   :  { %v10625_v31 = vcombine.low %v10610_v26, %v10617_v19 }
 0xa67   :  { %v10632_v45 = vrot.slane %v10625_v31, %v15991_v58  ;;  %v14413_v31 = vld [vmem:[%s18591_s11 + $0x248] sm:$0xff] }
 0xa68   :  { %v10712_v4 = vpop.f32.mrf.mxu1  ;;  %v10783_v6 = vpop.f32.mrf.mxu0 }
 0xa69   :  { %v10640_v55 = vcombine.low %v10632_v45, %v10639_v50  ;;  %v14423_v50 = vld [vmem:[%s18592_s12] sm:$0x1] }
 0xa6a   :  { %v10714_v8 = vpop.f32.mrf.mxu1  ;;  %v10785_v27 = vpop.f32.mrf.mxu0 }
 0xa6b   :  { %v10863_v24 = vcombine.low %v10712_v4, %v10714_v8  ;;  %v10864_v25 = vcombine.low %v10783_v6, %v10785_v27 }
 0xa6d   :  { %v10871_v34 = vrot.slane %v10863_v24, %v15991_v58  ;;  %v10878_v35 = vrot.slane %v10864_v25, %v15991_v58 }
 0xa6f   :  { %v10886_v48 = vcombine.low %v10871_v34, %v10878_v35  ;;  %v14416_v34 = vld [vmem:[%s18591_s11 + $0x230] sm:$0xff]  ;;  %v14417_v35 = vld [vmem:[%s18591_s11 + $0x228] sm:$0xff] }
 0xa71   :  { %v10893_v63 = vrot.slane %v10886_v48, %v15991_v58 }
 0xa72   :  { %v10854_v7 = vpop.f32.mrf.mxu1  ;;  %v10973_v10 = vpop.f32.mrf.mxu0 }
 0xa73   :  { %v10885_v44 = vrot.slane %v10854_v7, %v15991_v58 }
 0xa74   :  { %v13873_v9 = vpop.f32.mrf.mxu1  ;;  %v10975_v11 = vpop.f32.mrf.mxu0 }
 0xa75   :  { %v11124_v28 = vcombine.low %v10973_v10, %v10975_v11  ;;  %v10900_v46 = vrot.slane %v10885_v44, %v15991_v58  ;;  %v10642_v9 = vadd.f32 %v10640_v55, %v18469_v61  ;;  %v14422_v44 = vld [vmem:[%s18591_s11 + $0x200] sm:$0xff] }
 0xa77   :  { %v11132_v43 = vrot.slane %v11124_v28, %v15991_v58  ;;  %v10901_v8 = vcombine.low %v10893_v63, %v10900_v46 }
 0xa7c   :  { %v11115_v12 = vpop.f32.mrf.mxu0  ;;  %v11044_v14 = vpop.f32.mrf.mxu1 }
 0xa7d   :  { %v11146_v52 = vrot.slane %v11115_v12, %v15991_v58 }
 0xa7e   :  { %v13884_v13 = vpop.f32.mrf.mxu0  ;;  %v11046_v15 = vpop.f32.mrf.mxu1 }
 0xa7f   :  { %v11125_v20 = vcombine.low %v11044_v14, %v11046_v15  ;;  %v11161_v3 = vrot.slane %v11146_v52, %v15991_v58  ;;  %v10903_v15 = vadd.f32 %v10901_v8, %v10642_v9 }
 0xa81   :  { %v11139_v32 = vrot.slane %v11125_v20, %v15991_v58 }
 0xa83   :  { %v11147_v47 = vcombine.low %v11132_v43, %v11139_v32  ;;  %v14414_v32 = vld [vmem:[%s18591_s11 + $0x240] sm:$0xff]  ;;  %v14421_v43 = vld [vmem:[%s18591_s11 + $0x208] sm:$0xff] }
 0xa85   :  { %v11154_v56 = vrot.slane %v11147_v47, %v15991_v58 }
 0xa86   :  { %v11234_v16 = vpop.f32.mrf.mxu1  ;;  %v11305_v18 = vpop.f32.mrf.mxu0 }
 0xa87   :  { %v11162_v10 = vcombine.low %v11154_v56, %v11161_v3 }
 0xa88   :  { %v11236_v21 = vpop.f32.mrf.mxu1  ;;  %v11307_v29 = vpop.f32.mrf.mxu0 }
 0xa89   :  { %v11385_v36 = vcombine.low %v11234_v16, %v11236_v21  ;;  %v11386_v38 = vcombine.low %v11305_v18, %v11307_v29  ;;  %v11164_v17 = vadd.f32 %v11162_v10, %v10903_v15 }
 0xa8b   :  { %v11393_v42 = vrot.slane %v11385_v36, %v15991_v58  ;;  %v11400_v51 = vrot.slane %v11386_v38, %v15991_v58  ;;  %v14418_v36 = vld [vmem:[%s18591_s11 + $0x220] sm:$0xff]  ;;  %v14419_v38 = vld [vmem:[%s18591_s11 + $0x218] sm:$0xff] }
 0xa8d   :  { %v11408_v0 = vcombine.low %v11393_v42, %v11400_v51 }
 0xa8f   :  { %v11415_v11 = vrot.slane %v11408_v0, %v15991_v58 }
 0xa90   :  { %v11376_v30 = vpop.f32.mrf.mxu1  ;;  %v11495_v22 = vpop.f32.mrf.mxu0 }
 0xa91   :  { %v11407_v54 = vrot.slane %v11376_v30, %v15991_v58  ;;  %v14412_v30 = vld [vmem:[%s18591_s11 + $0x250] sm:$0xff] }
 0xa92   :  { %v13895_v33 = vpop.f32.mrf.mxu1  ;;  %v11497_v53 = vpop.f32.mrf.mxu0 }
 0xa93   :  { %v11646_v2 = vcombine.low %v11495_v22, %v11497_v53  ;;  %v11422_v7 = vrot.slane %v11407_v54, %v15991_v58  ;;  %v14415_v33 = vld [vmem:[%s18591_s11 + $0x238] sm:$0xff] }
 0xa95   :  { %v11654_v12 = vrot.slane %v11646_v2, %v15991_v58  ;;  %v11423_v39 = vcombine.low %v11415_v11, %v11422_v7 }
 0xa97   :  { %v11425_v20 = vadd.f32 %v11423_v39, %v11164_v17 }
 0xa9a   :  { %v11566_v60 = vpop.f32.mrf.mxu1  ;;  %v11637_v62 = vpop.f32.mrf.mxu0 }
 0xa9b   :  { %v11668_v13 = vrot.slane %v11637_v62, %v15991_v58 }
 0xa9c   :  { %v11568_v4 = vpop.f32.mrf.mxu1  ;;  %v13906_v6 = vpop.f32.mrf.mxu0 }
 0xa9d   :  { %v11647_v27 = vcombine.low %v11566_v60, %v11568_v4  ;;  %v11683_v18 = vrot.slane %v11668_v13, %v15991_v58 }
 0xa9f   :  { %v11661_v14 = vrot.slane %v11647_v27, %v15991_v58 }
 0xaa1   :  { %v11669_v16 = vcombine.low %v11654_v12, %v11661_v14 }
 0xaa3   :  { %v11676_v19 = vrot.slane %v11669_v16, %v15991_v58  ;;  %v14407_v58 = vld [vmem:[%s18591_s11 + $0x278] sm:$0xff] }
 0xaa5   :  { %v11684_v21 = vcombine.low %v11676_v19, %v11683_v18 }
 0xaa7   :  { %v11686_v61 = vadd.f32 %v11684_v21, %v11425_v20 }
 0xaa9   :  { %v11687_v24 = vmax.f32 %v11686_v61, 0.0 }
 0xaab   :  { %v11696_v25 = vrot.slane %v11687_v24, %v6021_v37  ;;  %v11704_v26 = vrot.slane %v11687_v24, %v6029_v57  ;;  %v11692_v28 = vrot.slane %v11687_v24, %v6017_v5  ;;  %v11700_v29 = vrot.slane %v11687_v24, %v6025_v59  ;;  %v14408_v37 = vld [vmem:[%s18591_s11 + $0x270] sm:$0xff]  ;;  %v14409_v57 = vld [vmem:[%s18591_s11 + $0x268] sm:$0xff]  ;;  %v14410_v5 = vld [vmem:[%s18591_s11 + $0x260] sm:$0xff] }
 0xaac   :  { %v14411_v59 = vld [vmem:[%s18591_s11 + $0x258] sm:$0xff]  ;;  %v11708_v22 = vrot.slane %v11687_v24, %v6033_v41  ;;  %s14424_s11 = scalar_lea.vmem %s11936_s16, 32 }
 0xaad   :  { %11778 = vmatprep.mubr.f32.mxu1 %v11696_v25  ;;  %11848 = vmatprep.mubr.f32.mxu0 %v11704_v26  ;;  %p14425_p0 = scmp.ne.s32.totalorder %s11936_s16, %s14424_s11  ;;  %p14430_p2 = scmp.lt.s32.totalorder %s14424_s11, %s14424_s11 }
 0xaae   :  { %11779 = vmatmul.mubr.f32.vlgmr.msra.gmra.mxu1 %v11692_v28  ;;  %11849 = vmatmul.mubr.f32.vlgmr.msra.gmra.mxu0 %v11700_v29 }
 0xaaf   :  { %13908 = vmatpush3.msra.mxu1 %v14407_v58  ;;  %13939 = vmatprep.mubr.msk.f32.mxu1 %vm14447_vm0, %v14446_v1  ;;  %p14431_p3 = por %p14430_p2, %p14429_p1 }
 0xab0   :  { %13909 = vmatprep.subr.mxu1 %v14446_v1 }
 0xab1   :  { %13910 = vmatpush3.msra.mxu1 %v14408_v37  ;;  %p14432_p4 = pnand %p14431_p3, %p14425_p0 }
 0xab2   :  { %13911 = vmatprep.subr.mxu1 %v14446_v1 }
 0xab3   :  { %13912 = vmatpush3.msra.mxu1 %v14409_v57 }
 0xab4   :  { %13913 = vmatprep.subr.mxu1 %v14446_v1 }
 0xab5   :  { %13914 = vmatpush3.msra.mxu1 %v14410_v5 }
 0xab6   :  { %13915 = vmatprep.subr.mxu1 %v14446_v1 }
 0xab7   :  { %13916 = vmatpush3.msra.mxu1 %v14411_v59 }
 0xab8   :  { %13917 = vmatprep.subr.mxu1 %v14446_v1 }
 0xab9   :  { %13918 = vmatpush3.msra.mxu1 %v14412_v30 }
 0xaba   :  { %13919 = vmatprep.subr.mxu1 %v14446_v1 }
 0xabb   :  { %13920 = vmatpush3.msra.mxu1 %v14413_v31 }
 0xabc   :  { %13921 = vmatprep.subr.mxu1 %v14446_v1 }
 0xabd   :  { %13922 = vmatpush3.msra.mxu1 %v14414_v32 }
 0xabe   :  { %13923 = vmatprep.subr.mxu1 %v14446_v1 }
 0xabf   :  { %13924 = vmatpush3.msra.mxu1 %v14415_v33 }
 0xac0   :  { %13925 = vmatprep.subr.mxu1 %v14446_v1 }
 0xac1   :  { %13926 = vmatpush3.msra.mxu1 %v14416_v34 }
 0xac2   :  { %13927 = vmatprep.subr.mxu1 %v14446_v1 }
 0xac3   :  { %13928 = vmatpush3.msra.mxu1 %v14417_v35 }
 0xac4   :  { %13929 = vmatprep.subr.mxu1 %v14446_v1 }
 0xac5   :  { %13930 = vmatpush3.msra.mxu1 %v14418_v36 }
 0xac6   :  { %13931 = vmatprep.subr.mxu1 %v14446_v1 }
 0xac7   :  { %13932 = vmatpush3.msra.mxu1 %v14419_v38 }
 0xac8   :  { %13933 = vmatprep.subr.mxu1 %v14446_v1 }
 0xac9   :  { %13934 = vmatpush3.msra.mxu1 %v14420_v40 }
 0xaca   :  { %13935 = vmatprep.subr.mxu1 %v14446_v1 }
 0xacb   :  { %13936 = vmatpush3.msra.mxu1 %v14421_v43 }
 0xacc   :  { %13937 = vmatprep.subr.mxu1 %v14446_v1 }
 0xacd   :  { %13938 = vmatpush3.msra.mxu1 %v14422_v44 }
 0xace   :  { %13940 = vmatmul.mubr.f32.vlgmr.msra.gmra.mxu1 %v11708_v22 }
 0xb6e   :  { %v12961_v45 = vpop.f32.mrf.mxu1  ;;  %v12996_v48 = vpop.f32.mrf.mxu0 }
 0xb70   :  { %v12962_v47 = vpop.f32.mrf.mxu1  ;;  %v12997_v51 = vpop.f32.mrf.mxu0 }
 0xb71   :  { %v12963_v42 = vadd.f32 %v12962_v47, %v12961_v45  ;;  %v12998_v1 = vadd.f32 %v12997_v51, %v12996_v48 }
 0xb73   :  { %v11781_v52 = vadd.f32 %v14423_v50, %v12963_v42 }
 0xb75   :  { %v11851_v53 = vadd.f32 %v12998_v1, %v11781_v52 }
 0xb8e   :  { %v11920_v49 = vpop.f32.mrf.mxu1 }
 0xb8f   :  { %v11921_v41 = vadd.f32 %v11920_v49, %v11851_v53 }
 0xb90   :  { %v13941_v46 = vpop.f32.mrf.mxu1 }
 0xb91   :  { %v11925_v54 = vrot.slane %v11921_v41, 7 }
 0xb93   :  { %v11927_v55 = vsel %vm53_vm2, %v16677_v23, %v11925_v54 }
 0xb94   :  { %11928 = vst [vmem:[#allocation2] sm:$0x3] %v11927_v55 }
 0xb95   :  { %14435 = shalt.err (!%p14432_p4)
}
 0xb96   :  { %11938 = dma.vmem_to_hbm [thread:$0]  %s11936_s16, 32, %s18593_s13, [#allocation3]  }
 0xb97   :  { %14444 = dma.done.wait [#allocation3], 32  }
 0xb98   :  { %14445 = vsyncadd [#allocation3], 4294967264 }
 0xb99   :  { %11942 = vsyncpa [#allocation3], 1 }

</bundles_post_ra>
